<compile_context>
chip_gen: v7x
topology: tpu7x:2x2x1
jax: 0.10.0
libtpu: 0.0.40
codegen_flags: <defaults>
</compile_context>

<pallas_src>
import math

import jax
import jax.numpy as jnp
from jax import lax
from jax.experimental import pallas as pl
from jax.experimental.pallas import tpu as pltpu

NUM_LAYERS = 3  # layers per coder (encoder and decoder), 2 directions each


# ----------------------------- Fused Pallas kernel --------------------------

def _make_kernel(S, B, H):
    f32 = jnp.float32

    def kernel(x_ref, wif0_ref, wib0_ref, wif_ref, wib_ref, bil_ref, whh_ref,
               fcw1_ref, fcb1_ref, fcw2_ref, fcb2_ref, out_ref, act_a, act_b):
        num_layers = whh_ref.shape[0] // 2  # layers per coder

        def bilstm_layer(x, w_if_il, w_ib_il, b_il, w_hh_il, h0, c0, out_scr):
            # x: (S*B, Din) time-major layer input (row = t*B + b).
            # Gate columns: [i_f i_b | f_f f_b | g_f g_b | o_f o_b] (H wide each);
            # h/c carried as (B, 2H) = [fwd | bwd] values (vreg resident).
            gin_f = jnp.dot(x, w_if_il, preferred_element_type=f32) + b_il  # fwd cols + biases
            gin_b = jnp.dot(x, w_ib_il, preferred_element_type=f32)         # bwd cols only
            h_cat, c_cat = h0, c0
            for s in range(S):                       # static unroll (S is small & fixed)
                rec = jnp.dot(h_cat, w_hh_il, preferred_element_type=f32)   # (B, 8H)
                gates = (gin_f[s * B:(s + 1) * B, :]
                         + gin_b[(S - 1 - s) * B:(S - s) * B, :]            # bwd dir: reversed time
                         + rec)
                i = jax.nn.sigmoid(gates[:, 0:2 * H])
                f = jax.nn.sigmoid(gates[:, 2 * H:4 * H])
                g = jnp.tanh(gates[:, 4 * H:6 * H])
                o = jax.nn.sigmoid(gates[:, 6 * H:8 * H])
                c_cat = f * c_cat + i * g
                h_cat = o * jnp.tanh(c_cat)
                # layer output (time-major, [h_fwd(t) | h_bwd(t)])
                out_scr[s * B:(s + 1) * B, 0:H] = h_cat[:, 0:H]
                out_scr[(S - 1 - s) * B:(S - s) * B, H:2 * H] = h_cat[:, H:2 * H]
            return h_cat, c_cat                       # final states [fwd | bwd]

        zeros = jnp.zeros((B, 2 * H), f32)
        scr = (act_a, act_b)

        # ------------------------------ Encoder ------------------------------
        cur = x_ref[...]                              # (S*B, Din0)
        enc_states = []
        for l in range(num_layers):
            w_if = wif0_ref[...] if l == 0 else wif_ref[l - 1]
            w_ib = wib0_ref[...] if l == 0 else wib_ref[l - 1]
            hT, cT = bilstm_layer(cur, w_if, w_ib, bil_ref[l], whh_ref[l],
                                  zeros, zeros, scr[l % 2])
            enc_states.append((hT, cT))
            cur = scr[l % 2][...]                     # (S*B, 2H)

        # -------------- Decoder (init from encoder final states) -------------
        for l in range(num_layers):
            h0, c0 = enc_states[l]
            idx = num_layers + l
            hT, cT = bilstm_layer(cur, wif_ref[idx - 1], wib_ref[idx - 1],
                                  bil_ref[idx], whh_ref[idx], h0, c0, scr[idx % 2])
            cur = scr[idx % 2][...]

        # ------------------------------ FC head -------------------------------
        feats = cur                                   # (S*B, 2H); BN stats are row-order invariant
        mean = jnp.mean(feats, axis=0, keepdims=True)
        var = jnp.mean((feats - mean) ** 2, axis=0, keepdims=True)   # biased var, like PyTorch BN
        xn = (feats - mean) * lax.rsqrt(var + 1e-5)                  # gamma=1, beta=0
        h1 = jnp.tanh(jnp.dot(xn, fcw1_ref[...], preferred_element_type=f32) + fcb1_ref[...])
        h2 = jnp.tanh(jnp.dot(h1, fcw2_ref[...], preferred_element_type=f32) + fcb2_ref[...])
        m = jnp.max(h2, axis=-1, keepdims=True)
        e = jnp.exp(h2 - m)
        probs = e / jnp.sum(e, axis=-1, keepdims=True)               # (S*B, out_dim)

        # rows are time-major (t*B + b); PyTorch flattens batch-major (b*S + t)
        for t in range(S):
            for b in range(B):
                out_ref[b * S + t: b * S + t + 1, :] = probs[t * B + b: t * B + b + 1, :]

    return kernel


# ----------------------------- Model forward --------------------------------

def slot_filling_forward(batch_data, params):
    (wif0, wib0, wif_rest, wib_rest, bil_all, whh_all,
     fc_w1, fc_b1, fc_w2, fc_b2) = params
    B, S, in_dim = batch_data.shape
    H = whh_all.shape[1] // 2
    out_dim = fc_w2.shape[-1]

    # batch-first -> time-major flat rows (row = t*B + b); tiny, absorbed into the same jit
    x_flat = jnp.transpose(batch_data, (1, 0, 2)).reshape(S * B, in_dim)

    vmem = pl.BlockSpec(memory_space=pltpu.MemorySpace.VMEM)
    probs = pl.pallas_call(
        _make_kernel(S, B, H),
        out_shape=jax.ShapeDtypeStruct((B * S, out_dim), jnp.float32),
        in_specs=[vmem] * 11,
        out_specs=vmem,
        scratch_shapes=[pltpu.VMEM((S * B, 2 * H), jnp.float32),
                        pltpu.VMEM((S * B, 2 * H), jnp.float32)],
    )(x_flat, wif0, wib0, wif_rest, wib_rest, bil_all, whh_all,
      fc_w1, fc_b1, fc_w2, fc_b2)

    output = probs.reshape(B, S, 1, out_dim)
    # TODO(synk): packed padded sequences not modeled; lengths is the full sequence length.
    lengths = jnp.full((B,), S, dtype=jnp.int32)
    return output, lengths


# ----------------------------- Parameter init -------------------------------

def _init_params(key, enc_input_dim, enc_hidden, dec_hidden, out_dim, num_layers=NUM_LAYERS):
    assert enc_hidden == dec_hidden, "decoder initial-state reuse requires matching hidden dims"
    H = enc_hidden

    def interleave(m_f, m_b):
        # per-gate column interleave of the two directions: [i_f i_b | f_f f_b | g_f g_b | o_f o_b]
        parts = []
        for g in range(4):
            parts.append(m_f[:, g * H:(g + 1) * H])
            parts.append(m_b[:, g * H:(g + 1) * H])
        return jnp.concatenate(parts, axis=1)

    def lstm_dir(key, din):
        bound = 1.0 / math.sqrt(H)
        key, k1, k2, k3, k4 = jax.random.split(key, 5)
        w_ih = jax.random.uniform(k1, (din, 4 * H), jnp.float32, -bound, bound)
        w_hh = jax.random.uniform(k2, (H, 4 * H), jnp.float32, -bound, bound)
        b = (jax.random.uniform(k3, (1, 4 * H), jnp.float32, -bound, bound)
             + jax.random.uniform(k4, (1, 4 * H), jnp.float32, -bound, bound))  # b_ih + b_hh
        return key, w_ih, w_hh, b

    # layer input dims: enc0, enc1, enc2, dec0, dec1, dec2
    in_dims = [enc_input_dim] + [2 * H] * (2 * num_layers - 1)
    wif_il, wib_il, bil, whh_il = [], [], [], []
    for din in in_dims:
        key, wi_f, wh_f, b_f = lstm_dir(key, din)
        key, wi_b, wh_b, b_b = lstm_dir(key, din)
        wif_il.append(interleave(wi_f, jnp.zeros_like(wi_f)))           # (din, 8H), fwd cols
        wib_il.append(interleave(jnp.zeros_like(wi_b), wi_b))           # (din, 8H), bwd cols
        bil.append(interleave(b_f, b_b))                                # (1, 8H)
        whh_il.append(jnp.concatenate(
            [interleave(wh_f, jnp.zeros_like(wh_f)),                    # rows 0:H   -> fwd h
             interleave(jnp.zeros_like(wh_b), wh_b)], axis=0))          # rows H:2H  -> bwd h

    bound = 1.0 / math.sqrt(2 * H)
    key, a, b2, c, d = jax.random.split(key, 5)
    fc_w1 = jax.random.uniform(a, (2 * H, 2 * H), jnp.float32, -bound, bound)
    fc_b1 = jax.random.uniform(b2, (1, 2 * H), jnp.float32, -bound, bound)
    fc_w2 = jax.random.uniform(c, (2 * H, out_dim), jnp.float32, -bound, bound)
    fc_b2 = jax.random.uniform(d, (1, out_dim), jnp.float32, -bound, bound)

    params = (wif_il[0], wib_il[0],
              jnp.stack(wif_il[1:]), jnp.stack(wib_il[1:]),
              jnp.stack(bil), jnp.stack(whh_il),
              fc_w1, fc_b1, fc_w2, fc_b2)
    return key, params


# ----------------------------- Main ------------------------------------------

if __name__ == "__main__":
    B, S = 2, 8
    encoder_input_dim = 8
    encoder_hidden_dim = 32
    decoder_output_dim = 32
    output_dim = 16

    key = jax.random.PRNGKey(0)
    key, params = _init_params(key, encoder_input_dim, encoder_hidden_dim,
                               decoder_output_dim, output_dim)
    key, kx = jax.random.split(key)
    batch_data = jax.random.normal(kx, (B, S, encoder_input_dim), jnp.float32)

    fwd = jax.jit(slot_filling_forward)
    output, lengths = fwd(batch_data, params)
    output = jax.block_until_ready(output)
    lengths = jax.block_until_ready(lengths)

    assert output.shape == (B, S, 1, output_dim)
    assert lengths.shape == (B,)
    # softmax rows must sum to 1
    assert bool(jnp.allclose(jnp.sum(output, axis=-1), 1.0, atol=1e-5))
    print("KERNEL_OK")
</pallas_src>

<mosaic_0001>
module attributes {stable_mosaic.version = 11 : i64} {
  func.func @kernel(%arg0: memref<16x8xf32, #tpu.memory_space<vmem>>, %arg1: memref<8x256xf32, #tpu.memory_space<vmem>>, %arg2: memref<8x256xf32, #tpu.memory_space<vmem>>, %arg3: memref<5x64x256xf32, #tpu.memory_space<vmem>>, %arg4: memref<5x64x256xf32, #tpu.memory_space<vmem>>, %arg5: memref<6x1x256xf32, #tpu.memory_space<vmem>>, %arg6: memref<6x64x256xf32, #tpu.memory_space<vmem>>, %arg7: memref<64x64xf32, #tpu.memory_space<vmem>>, %arg8: memref<1x64xf32, #tpu.memory_space<vmem>>, %arg9: memref<64x16xf32, #tpu.memory_space<vmem>>, %arg10: memref<1x16xf32, #tpu.memory_space<vmem>>, %arg11: memref<16x16xf32, #tpu.memory_space<vmem>>, %arg12: memref<16x64xf32, #tpu.memory_space<vmem>>, %arg13: memref<16x64xf32, #tpu.memory_space<vmem>>) attributes {dimension_semantics = [], scalar_prefetch = 0 : i64, scratch_operands = 2 : i64, tpu.core_type = #tpu.core_type<tc>} {
    %cst = arith.constant 0.000000e+00 : f32
    %0 = vector.broadcast %cst : f32 to vector<2x64xf32>
    %c0 = arith.constant 0 : index
    %c0_0 = arith.constant 0 : index
    %1 = vector.load %arg0[%c0, %c0_0] : memref<16x8xf32, #tpu.memory_space<vmem>>, vector<16x8xf32>
    %c0_1 = arith.constant 0 : index
    %c0_2 = arith.constant 0 : index
    %2 = vector.load %arg1[%c0_1, %c0_2] : memref<8x256xf32, #tpu.memory_space<vmem>>, vector<8x256xf32>
    %c0_3 = arith.constant 0 : index
    %c0_4 = arith.constant 0 : index
    %3 = vector.load %arg2[%c0_3, %c0_4] : memref<8x256xf32, #tpu.memory_space<vmem>>, vector<8x256xf32>
    %c0_5 = arith.constant 0 : index
    %c0_6 = arith.constant 0 : index
    %c0_7 = arith.constant 0 : index
    %4 = vector.load %arg5[%c0_5, %c0_6, %c0_7] : memref<6x1x256xf32, #tpu.memory_space<vmem>>, vector<1x1x256xf32>
    %5 = vector.shape_cast %4 : vector<1x1x256xf32> to vector<1x256xf32>
    %c0_8 = arith.constant 0 : index
    %c0_9 = arith.constant 0 : index
    %c0_10 = arith.constant 0 : index
    %6 = vector.load %arg6[%c0_8, %c0_9, %c0_10] : memref<6x64x256xf32, #tpu.memory_space<vmem>>, vector<1x64x256xf32>
    %7 = vector.shape_cast %6 : vector<1x64x256xf32> to vector<64x256xf32>
    %cst_11 = arith.constant dense<0.000000e+00> : vector<16x256xf32>
    %8 = tpu.matmul %1, %2, %cst_11 {dimension_numbers = #tpu.dot_dimension_numbers<[1], [0], [0], [1], [0, 0, 1, 1], [], []>} : vector<16x8xf32>, vector<8x256xf32>, vector<16x256xf32> -> vector<16x256xf32>
    %9 = vector.broadcast %5 : vector<1x256xf32> to vector<16x256xf32>
    %10 = arith.addf %8, %9 : vector<16x256xf32>
    %cst_12 = arith.constant dense<0.000000e+00> : vector<16x256xf32>
    %11 = tpu.matmul %1, %3, %cst_12 {dimension_numbers = #tpu.dot_dimension_numbers<[1], [0], [0], [1], [0, 0, 1, 1], [], []>} : vector<16x8xf32>, vector<8x256xf32>, vector<16x256xf32> -> vector<16x256xf32>
    %cst_13 = arith.constant dense<0.000000e+00> : vector<2x256xf32>
    %12 = tpu.matmul %0, %7, %cst_13 {dimension_numbers = #tpu.dot_dimension_numbers<[1], [0], [0], [1], [0, 0, 1, 1], [], []>} : vector<2x64xf32>, vector<64x256xf32>, vector<2x256xf32> -> vector<2x256xf32>
    %13 = vector.extract_strided_slice %10 {offsets = [0, 0], sizes = [2, 256], strides = [1, 1]} : vector<16x256xf32> to vector<2x256xf32>
    %14 = vector.extract_strided_slice %11 {offsets = [14, 0], sizes = [2, 256], strides = [1, 1]} : vector<16x256xf32> to vector<2x256xf32>
    %15 = arith.addf %13, %14 : vector<2x256xf32>
    %16 = arith.addf %15, %12 : vector<2x256xf32>
    %17 = vector.extract_strided_slice %16 {offsets = [0, 0], sizes = [2, 64], strides = [1, 1]} : vector<2x256xf32> to vector<2x64xf32>
    %18 = arith.negf %17 : vector<2x64xf32>
    %19 = math.exp %18 : vector<2x64xf32>
    %cst_14 = arith.constant 1.000000e+00 : f32
    %20 = vector.broadcast %cst_14 : f32 to vector<2x64xf32>
    %21 = arith.addf %20, %19 : vector<2x64xf32>
    %22 = arith.divf %20, %21 : vector<2x64xf32>
    %23 = vector.extract_strided_slice %16 {offsets = [0, 64], sizes = [2, 64], strides = [1, 1]} : vector<2x256xf32> to vector<2x64xf32>
    %24 = arith.negf %23 : vector<2x64xf32>
    %25 = math.exp %24 : vector<2x64xf32>
    %cst_15 = arith.constant 1.000000e+00 : f32
    %26 = vector.broadcast %cst_15 : f32 to vector<2x64xf32>
    %27 = arith.addf %26, %25 : vector<2x64xf32>
    %28 = arith.divf %26, %27 : vector<2x64xf32>
    %29 = vector.extract_strided_slice %16 {offsets = [0, 128], sizes = [2, 64], strides = [1, 1]} : vector<2x256xf32> to vector<2x64xf32>
    %30 = math.tanh %29 : vector<2x64xf32>
    %31 = vector.extract_strided_slice %16 {offsets = [0, 192], sizes = [2, 64], strides = [1, 1]} : vector<2x256xf32> to vector<2x64xf32>
    %32 = arith.negf %31 : vector<2x64xf32>
    %33 = math.exp %32 : vector<2x64xf32>
    %cst_16 = arith.constant 1.000000e+00 : f32
    %34 = vector.broadcast %cst_16 : f32 to vector<2x64xf32>
    %35 = arith.addf %34, %33 : vector<2x64xf32>
    %36 = arith.divf %34, %35 : vector<2x64xf32>
    %37 = arith.mulf %28, %0 : vector<2x64xf32>
    %38 = arith.mulf %22, %30 : vector<2x64xf32>
    %39 = arith.addf %37, %38 : vector<2x64xf32>
    %40 = math.tanh %39 : vector<2x64xf32>
    %41 = arith.mulf %36, %40 : vector<2x64xf32>
    %42 = vector.extract_strided_slice %41 {offsets = [0, 0], sizes = [2, 32], strides = [1, 1]} : vector<2x64xf32> to vector<2x32xf32>
    %c0_17 = arith.constant 0 : index
    %c0_18 = arith.constant 0 : index
    %43 = vector.load %arg12[%c0_17, %c0_18] : memref<16x64xf32, #tpu.memory_space<vmem>>, vector<2x32xf32>
    tpu.vector_store %arg12[%c0_17, %c0_18], %42 {strides = array<i32>} : memref<16x64xf32, #tpu.memory_space<vmem>>, vector<2x32xf32>,
    %44 = vector.extract_strided_slice %41 {offsets = [0, 32], sizes = [2, 32], strides = [1, 1]} : vector<2x64xf32> to vector<2x32xf32>
    %c14 = arith.constant 14 : index
    %c32 = arith.constant 32 : index
    %45 = vector.load %arg12[%c14, %c32] : memref<16x64xf32, #tpu.memory_space<vmem>>, vector<2x32xf32>
    tpu.vector_store %arg12[%c14, %c32], %44 {strides = array<i32>} : memref<16x64xf32, #tpu.memory_space<vmem>>, vector<2x32xf32>,
    %cst_19 = arith.constant dense<0.000000e+00> : vector<2x256xf32>
    %46 = tpu.matmul %41, %7, %cst_19 {dimension_numbers = #tpu.dot_dimension_numbers<[1], [0], [0], [1], [0, 0, 1, 1], [], []>} : vector<2x64xf32>, vector<64x256xf32>, vector<2x256xf32> -> vector<2x256xf32>
    %47 = vector.extract_strided_slice %10 {offsets = [2, 0], sizes = [2, 256], strides = [1, 1]} : vector<16x256xf32> to vector<2x256xf32>
    %48 = vector.extract_strided_slice %11 {offsets = [12, 0], sizes = [2, 256], strides = [1, 1]} : vector<16x256xf32> to vector<2x256xf32>
    %49 = arith.addf %47, %48 : vector<2x256xf32>
    %50 = arith.addf %49, %46 : vector<2x256xf32>
    %51 = vector.extract_strided_slice %50 {offsets = [0, 0], sizes = [2, 64], strides = [1, 1]} : vector<2x256xf32> to vector<2x64xf32>
    %52 = arith.negf %51 : vector<2x64xf32>
    %53 = math.exp %52 : vector<2x64xf32>
    %cst_20 = arith.constant 1.000000e+00 : f32
    %54 = vector.broadcast %cst_20 : f32 to vector<2x64xf32>
    %55 = arith.addf %54, %53 : vector<2x64xf32>
    %56 = arith.divf %54, %55 : vector<2x64xf32>
    %57 = vector.extract_strided_slice %50 {offsets = [0, 64], sizes = [2, 64], strides = [1, 1]} : vector<2x256xf32> to vector<2x64xf32>
    %58 = arith.negf %57 : vector<2x64xf32>
    %59 = math.exp %58 : vector<2x64xf32>
    %cst_21 = arith.constant 1.000000e+00 : f32
    %60 = vector.broadcast %cst_21 : f32 to vector<2x64xf32>
    %61 = arith.addf %60, %59 : vector<2x64xf32>
    %62 = arith.divf %60, %61 : vector<2x64xf32>
    %63 = vector.extract_strided_slice %50 {offsets = [0, 128], sizes = [2, 64], strides = [1, 1]} : vector<2x256xf32> to vector<2x64xf32>
    %64 = math.tanh %63 : vector<2x64xf32>
    %65 = vector.extract_strided_slice %50 {offsets = [0, 192], sizes = [2, 64], strides = [1, 1]} : vector<2x256xf32> to vector<2x64xf32>
    %66 = arith.negf %65 : vector<2x64xf32>
    %67 = math.exp %66 : vector<2x64xf32>
    %cst_22 = arith.constant 1.000000e+00 : f32
    %68 = vector.broadcast %cst_22 : f32 to vector<2x64xf32>
    %69 = arith.addf %68, %67 : vector<2x64xf32>
    %70 = arith.divf %68, %69 : vector<2x64xf32>
    %71 = arith.mulf %62, %39 : vector<2x64xf32>
    %72 = arith.mulf %56, %64 : vector<2x64xf32>
    %73 = arith.addf %71, %72 : vector<2x64xf32>
    %74 = math.tanh %73 : vector<2x64xf32>
    %75 = arith.mulf %70, %74 : vector<2x64xf32>
    %76 = vector.extract_strided_slice %75 {offsets = [0, 0], sizes = [2, 32], strides = [1, 1]} : vector<2x64xf32> to vector<2x32xf32>
    %c2 = arith.constant 2 : index
    %c0_23 = arith.constant 0 : index
    %77 = vector.load %arg12[%c2, %c0_23] : memref<16x64xf32, #tpu.memory_space<vmem>>, vector<2x32xf32>
    tpu.vector_store %arg12[%c2, %c0_23], %76 {strides = array<i32>} : memref<16x64xf32, #tpu.memory_space<vmem>>, vector<2x32xf32>,
    %78 = vector.extract_strided_slice %75 {offsets = [0, 32], sizes = [2, 32], strides = [1, 1]} : vector<2x64xf32> to vector<2x32xf32>
    %c12 = arith.constant 12 : index
    %c32_24 = arith.constant 32 : index
    %79 = vector.load %arg12[%c12, %c32_24] : memref<16x64xf32, #tpu.memory_space<vmem>>, vector<2x32xf32>
    tpu.vector_store %arg12[%c12, %c32_24], %78 {strides = array<i32>} : memref<16x64xf32, #tpu.memory_space<vmem>>, vector<2x32xf32>,
    %cst_25 = arith.constant dense<0.000000e+00> : vector<2x256xf32>
    %80 = tpu.matmul %75, %7, %cst_25 {dimension_numbers = #tpu.dot_dimension_numbers<[1], [0], [0], [1], [0, 0, 1, 1], [], []>} : vector<2x64xf32>, vector<64x256xf32>, vector<2x256xf32> -> vector<2x256xf32>
    %81 = vector.extract_strided_slice %10 {offsets = [4, 0], sizes = [2, 256], strides = [1, 1]} : vector<16x256xf32> to vector<2x256xf32>
    %82 = vector.extract_strided_slice %11 {offsets = [10, 0], sizes = [2, 256], strides = [1, 1]} : vector<16x256xf32> to vector<2x256xf32>
    %83 = arith.addf %81, %82 : vector<2x256xf32>
    %84 = arith.addf %83, %80 : vector<2x256xf32>
    %85 = vector.extract_strided_slice %84 {offsets = [0, 0], sizes = [2, 64], strides = [1, 1]} : vector<2x256xf32> to vector<2x64xf32>
    %86 = arith.negf %85 : vector<2x64xf32>
    %87 = math.exp %86 : vector<2x64xf32>
    %cst_26 = arith.constant 1.000000e+00 : f32
    %88 = vector.broadcast %cst_26 : f32 to vector<2x64xf32>
    %89 = arith.addf %88, %87 : vector<2x64xf32>
    %90 = arith.divf %88, %89 : vector<2x64xf32>
    %91 = vector.extract_strided_slice %84 {offsets = [0, 64], sizes = [2, 64], strides = [1, 1]} : vector<2x256xf32> to vector<2x64xf32>
    %92 = arith.negf %91 : vector<2x64xf32>
    %93 = math.exp %92 : vector<2x64xf32>
    %cst_27 = arith.constant 1.000000e+00 : f32
    %94 = vector.broadcast %cst_27 : f32 to vector<2x64xf32>
    %95 = arith.addf %94, %93 : vector<2x64xf32>
    %96 = arith.divf %94, %95 : vector<2x64xf32>
    %97 = vector.extract_strided_slice %84 {offsets = [0, 128], sizes = [2, 64], strides = [1, 1]} : vector<2x256xf32> to vector<2x64xf32>
    %98 = math.tanh %97 : vector<2x64xf32>
    %99 = vector.extract_strided_slice %84 {offsets = [0, 192], sizes = [2, 64], strides = [1, 1]} : vector<2x256xf32> to vector<2x64xf32>
    %100 = arith.negf %99 : vector<2x64xf32>
    %101 = math.exp %100 : vector<2x64xf32>
    %cst_28 = arith.constant 1.000000e+00 : f32
    %102 = vector.broadcast %cst_28 : f32 to vector<2x64xf32>
    %103 = arith.addf %102, %101 : vector<2x64xf32>
    %104 = arith.divf %102, %103 : vector<2x64xf32>
    %105 = arith.mulf %96, %73 : vector<2x64xf32>
    %106 = arith.mulf %90, %98 : vector<2x64xf32>
    %107 = arith.addf %105, %106 : vector<2x64xf32>
    %108 = math.tanh %107 : vector<2x64xf32>
    %109 = arith.mulf %104, %108 : vector<2x64xf32>
    %110 = vector.extract_strided_slice %109 {offsets = [0, 0], sizes = [2, 32], strides = [1, 1]} : vector<2x64xf32> to vector<2x32xf32>
    %c4 = arith.constant 4 : index
    %c0_29 = arith.constant 0 : index
    %111 = vector.load %arg12[%c4, %c0_29] : memref<16x64xf32, #tpu.memory_space<vmem>>, vector<2x32xf32>
    tpu.vector_store %arg12[%c4, %c0_29], %110 {strides = array<i32>} : memref<16x64xf32, #tpu.memory_space<vmem>>, vector<2x32xf32>,
    %112 = vector.extract_strided_slice %109 {offsets = [0, 32], sizes = [2, 32], strides = [1, 1]} : vector<2x64xf32> to vector<2x32xf32>
    %c10 = arith.constant 10 : index
    %c32_30 = arith.constant 32 : index
    %113 = vector.load %arg12[%c10, %c32_30] : memref<16x64xf32, #tpu.memory_space<vmem>>, vector<2x32xf32>
    tpu.vector_store %arg12[%c10, %c32_30], %112 {strides = array<i32>} : memref<16x64xf32, #tpu.memory_space<vmem>>, vector<2x32xf32>,
    %cst_31 = arith.constant dense<0.000000e+00> : vector<2x256xf32>
    %114 = tpu.matmul %109, %7, %cst_31 {dimension_numbers = #tpu.dot_dimension_numbers<[1], [0], [0], [1], [0, 0, 1, 1], [], []>} : vector<2x64xf32>, vector<64x256xf32>, vector<2x256xf32> -> vector<2x256xf32>
    %115 = vector.extract_strided_slice %10 {offsets = [6, 0], sizes = [2, 256], strides = [1, 1]} : vector<16x256xf32> to vector<2x256xf32>
    %116 = vector.extract_strided_slice %11 {offsets = [8, 0], sizes = [2, 256], strides = [1, 1]} : vector<16x256xf32> to vector<2x256xf32>
    %117 = arith.addf %115, %116 : vector<2x256xf32>
    %118 = arith.addf %117, %114 : vector<2x256xf32>
    %119 = vector.extract_strided_slice %118 {offsets = [0, 0], sizes = [2, 64], strides = [1, 1]} : vector<2x256xf32> to vector<2x64xf32>
    %120 = arith.negf %119 : vector<2x64xf32>
    %121 = math.exp %120 : vector<2x64xf32>
    %cst_32 = arith.constant 1.000000e+00 : f32
    %122 = vector.broadcast %cst_32 : f32 to vector<2x64xf32>
    %123 = arith.addf %122, %121 : vector<2x64xf32>
    %124 = arith.divf %122, %123 : vector<2x64xf32>
    %125 = vector.extract_strided_slice %118 {offsets = [0, 64], sizes = [2, 64], strides = [1, 1]} : vector<2x256xf32> to vector<2x64xf32>
    %126 = arith.negf %125 : vector<2x64xf32>
    %127 = math.exp %126 : vector<2x64xf32>
    %cst_33 = arith.constant 1.000000e+00 : f32
    %128 = vector.broadcast %cst_33 : f32 to vector<2x64xf32>
    %129 = arith.addf %128, %127 : vector<2x64xf32>
    %130 = arith.divf %128, %129 : vector<2x64xf32>
    %131 = vector.extract_strided_slice %118 {offsets = [0, 128], sizes = [2, 64], strides = [1, 1]} : vector<2x256xf32> to vector<2x64xf32>
    %132 = math.tanh %131 : vector<2x64xf32>
    %133 = vector.extract_strided_slice %118 {offsets = [0, 192], sizes = [2, 64], strides = [1, 1]} : vector<2x256xf32> to vector<2x64xf32>
    %134 = arith.negf %133 : vector<2x64xf32>
    %135 = math.exp %134 : vector<2x64xf32>
    %cst_34 = arith.constant 1.000000e+00 : f32
    %136 = vector.broadcast %cst_34 : f32 to vector<2x64xf32>
    %137 = arith.addf %136, %135 : vector<2x64xf32>
    %138 = arith.divf %136, %137 : vector<2x64xf32>
    %139 = arith.mulf %130, %107 : vector<2x64xf32>
    %140 = arith.mulf %124, %132 : vector<2x64xf32>
    %141 = arith.addf %139, %140 : vector<2x64xf32>
    %142 = math.tanh %141 : vector<2x64xf32>
    %143 = arith.mulf %138, %142 : vector<2x64xf32>
    %144 = vector.extract_strided_slice %143 {offsets = [0, 0], sizes = [2, 32], strides = [1, 1]} : vector<2x64xf32> to vector<2x32xf32>
    %c6 = arith.constant 6 : index
    %c0_35 = arith.constant 0 : index
    %145 = vector.load %arg12[%c6, %c0_35] : memref<16x64xf32, #tpu.memory_space<vmem>>, vector<2x32xf32>
    tpu.vector_store %arg12[%c6, %c0_35], %144 {strides = array<i32>} : memref<16x64xf32, #tpu.memory_space<vmem>>, vector<2x32xf32>,
    %146 = vector.extract_strided_slice %143 {offsets = [0, 32], sizes = [2, 32], strides = [1, 1]} : vector<2x64xf32> to vector<2x32xf32>
    %c8 = arith.constant 8 : index
    %c32_36 = arith.constant 32 : index
    %147 = vector.load %arg12[%c8, %c32_36] : memref<16x64xf32, #tpu.memory_space<vmem>>, vector<2x32xf32>
    tpu.vector_store %arg12[%c8, %c32_36], %146 {strides = array<i32>} : memref<16x64xf32, #tpu.memory_space<vmem>>, vector<2x32xf32>,
    %cst_37 = arith.constant dense<0.000000e+00> : vector<2x256xf32>
    %148 = tpu.matmul %143, %7, %cst_37 {dimension_numbers = #tpu.dot_dimension_numbers<[1], [0], [0], [1], [0, 0, 1, 1], [], []>} : vector<2x64xf32>, vector<64x256xf32>, vector<2x256xf32> -> vector<2x256xf32>
    %149 = vector.extract_strided_slice %10 {offsets = [8, 0], sizes = [2, 256], strides = [1, 1]} : vector<16x256xf32> to vector<2x256xf32>
    %150 = vector.extract_strided_slice %11 {offsets = [6, 0], sizes = [2, 256], strides = [1, 1]} : vector<16x256xf32> to vector<2x256xf32>
    %151 = arith.addf %149, %150 : vector<2x256xf32>
    %152 = arith.addf %151, %148 : vector<2x256xf32>
    %153 = vector.extract_strided_slice %152 {offsets = [0, 0], sizes = [2, 64], strides = [1, 1]} : vector<2x256xf32> to vector<2x64xf32>
    %154 = arith.negf %153 : vector<2x64xf32>
    %155 = math.exp %154 : vector<2x64xf32>
    %cst_38 = arith.constant 1.000000e+00 : f32
    %156 = vector.broadcast %cst_38 : f32 to vector<2x64xf32>
    %157 = arith.addf %156, %155 : vector<2x64xf32>
    %158 = arith.divf %156, %157 : vector<2x64xf32>
    %159 = vector.extract_strided_slice %152 {offsets = [0, 64], sizes = [2, 64], strides = [1, 1]} : vector<2x256xf32> to vector<2x64xf32>
    %160 = arith.negf %159 : vector<2x64xf32>
    %161 = math.exp %160 : vector<2x64xf32>
    %cst_39 = arith.constant 1.000000e+00 : f32
    %162 = vector.broadcast %cst_39 : f32 to vector<2x64xf32>
    %163 = arith.addf %162, %161 : vector<2x64xf32>
    %164 = arith.divf %162, %163 : vector<2x64xf32>
    %165 = vector.extract_strided_slice %152 {offsets = [0, 128], sizes = [2, 64], strides = [1, 1]} : vector<2x256xf32> to vector<2x64xf32>
    %166 = math.tanh %165 : vector<2x64xf32>
    %167 = vector.extract_strided_slice %152 {offsets = [0, 192], sizes = [2, 64], strides = [1, 1]} : vector<2x256xf32> to vector<2x64xf32>
    %168 = arith.negf %167 : vector<2x64xf32>
    %169 = math.exp %168 : vector<2x64xf32>
    %cst_40 = arith.constant 1.000000e+00 : f32
    %170 = vector.broadcast %cst_40 : f32 to vector<2x64xf32>
    %171 = arith.addf %170, %169 : vector<2x64xf32>
    %172 = arith.divf %170, %171 : vector<2x64xf32>
    %173 = arith.mulf %164, %141 : vector<2x64xf32>
    %174 = arith.mulf %158, %166 : vector<2x64xf32>
    %175 = arith.addf %173, %174 : vector<2x64xf32>
    %176 = math.tanh %175 : vector<2x64xf32>
    %177 = arith.mulf %172, %176 : vector<2x64xf32>
    %178 = vector.extract_strided_slice %177 {offsets = [0, 0], sizes = [2, 32], strides = [1, 1]} : vector<2x64xf32> to vector<2x32xf32>
    %c8_41 = arith.constant 8 : index
    %c0_42 = arith.constant 0 : index
    %179 = vector.load %arg12[%c8_41, %c0_42] : memref<16x64xf32, #tpu.memory_space<vmem>>, vector<2x32xf32>
    tpu.vector_store %arg12[%c8_41, %c0_42], %178 {strides = array<i32>} : memref<16x64xf32, #tpu.memory_space<vmem>>, vector<2x32xf32>,
    %180 = vector.extract_strided_slice %177 {offsets = [0, 32], sizes = [2, 32], strides = [1, 1]} : vector<2x64xf32> to vector<2x32xf32>
    %c6_43 = arith.constant 6 : index
    %c32_44 = arith.constant 32 : index
    %181 = vector.load %arg12[%c6_43, %c32_44] : memref<16x64xf32, #tpu.memory_space<vmem>>, vector<2x32xf32>
    tpu.vector_store %arg12[%c6_43, %c32_44], %180 {strides = array<i32>} : memref<16x64xf32, #tpu.memory_space<vmem>>, vector<2x32xf32>,
    %cst_45 = arith.constant dense<0.000000e+00> : vector<2x256xf32>
    %182 = tpu.matmul %177, %7, %cst_45 {dimension_numbers = #tpu.dot_dimension_numbers<[1], [0], [0], [1], [0, 0, 1, 1], [], []>} : vector<2x64xf32>, vector<64x256xf32>, vector<2x256xf32> -> vector<2x256xf32>
    %183 = vector.extract_strided_slice %10 {offsets = [10, 0], sizes = [2, 256], strides = [1, 1]} : vector<16x256xf32> to vector<2x256xf32>
    %184 = vector.extract_strided_slice %11 {offsets = [4, 0], sizes = [2, 256], strides = [1, 1]} : vector<16x256xf32> to vector<2x256xf32>
    %185 = arith.addf %183, %184 : vector<2x256xf32>
    %186 = arith.addf %185, %182 : vector<2x256xf32>
    %187 = vector.extract_strided_slice %186 {offsets = [0, 0], sizes = [2, 64], strides = [1, 1]} : vector<2x256xf32> to vector<2x64xf32>
    %188 = arith.negf %187 : vector<2x64xf32>
    %189 = math.exp %188 : vector<2x64xf32>
    %cst_46 = arith.constant 1.000000e+00 : f32
    %190 = vector.broadcast %cst_46 : f32 to vector<2x64xf32>
    %191 = arith.addf %190, %189 : vector<2x64xf32>
    %192 = arith.divf %190, %191 : vector<2x64xf32>
    %193 = vector.extract_strided_slice %186 {offsets = [0, 64], sizes = [2, 64], strides = [1, 1]} : vector<2x256xf32> to vector<2x64xf32>
    %194 = arith.negf %193 : vector<2x64xf32>
    %195 = math.exp %194 : vector<2x64xf32>
    %cst_47 = arith.constant 1.000000e+00 : f32
    %196 = vector.broadcast %cst_47 : f32 to vector<2x64xf32>
    %197 = arith.addf %196, %195 : vector<2x64xf32>
    %198 = arith.divf %196, %197 : vector<2x64xf32>
    %199 = vector.extract_strided_slice %186 {offsets = [0, 128], sizes = [2, 64], strides = [1, 1]} : vector<2x256xf32> to vector<2x64xf32>
    %200 = math.tanh %199 : vector<2x64xf32>
    %201 = vector.extract_strided_slice %186 {offsets = [0, 192], sizes = [2, 64], strides = [1, 1]} : vector<2x256xf32> to vector<2x64xf32>
    %202 = arith.negf %201 : vector<2x64xf32>
    %203 = math.exp %202 : vector<2x64xf32>
    %cst_48 = arith.constant 1.000000e+00 : f32
    %204 = vector.broadcast %cst_48 : f32 to vector<2x64xf32>
    %205 = arith.addf %204, %203 : vector<2x64xf32>
    %206 = arith.divf %204, %205 : vector<2x64xf32>
    %207 = arith.mulf %198, %175 : vector<2x64xf32>
    %208 = arith.mulf %192, %200 : vector<2x64xf32>
    %209 = arith.addf %207, %208 : vector<2x64xf32>
    %210 = math.tanh %209 : vector<2x64xf32>
    %211 = arith.mulf %206, %210 : vector<2x64xf32>
    %212 = vector.extract_strided_slice %211 {offsets = [0, 0], sizes = [2, 32], strides = [1, 1]} : vector<2x64xf32> to vector<2x32xf32>
    %c10_49 = arith.constant 10 : index
    %c0_50 = arith.constant 0 : index
    %213 = vector.load %arg12[%c10_49, %c0_50] : memref<16x64xf32, #tpu.memory_space<vmem>>, vector<2x32xf32>
    tpu.vector_store %arg12[%c10_49, %c0_50], %212 {strides = array<i32>} : memref<16x64xf32, #tpu.memory_space<vmem>>, vector<2x32xf32>,
    %214 = vector.extract_strided_slice %211 {offsets = [0, 32], sizes = [2, 32], strides = [1, 1]} : vector<2x64xf32> to vector<2x32xf32>
    %c4_51 = arith.constant 4 : index
    %c32_52 = arith.constant 32 : index
    %215 = vector.load %arg12[%c4_51, %c32_52] : memref<16x64xf32, #tpu.memory_space<vmem>>, vector<2x32xf32>
    tpu.vector_store %arg12[%c4_51, %c32_52], %214 {strides = array<i32>} : memref<16x64xf32, #tpu.memory_space<vmem>>, vector<2x32xf32>,
    %cst_53 = arith.constant dense<0.000000e+00> : vector<2x256xf32>
    %216 = tpu.matmul %211, %7, %cst_53 {dimension_numbers = #tpu.dot_dimension_numbers<[1], [0], [0], [1], [0, 0, 1, 1], [], []>} : vector<2x64xf32>, vector<64x256xf32>, vector<2x256xf32> -> vector<2x256xf32>
    %217 = vector.extract_strided_slice %10 {offsets = [12, 0], sizes = [2, 256], strides = [1, 1]} : vector<16x256xf32> to vector<2x256xf32>
    %218 = vector.extract_strided_slice %11 {offsets = [2, 0], sizes = [2, 256], strides = [1, 1]} : vector<16x256xf32> to vector<2x256xf32>
    %219 = arith.addf %217, %218 : vector<2x256xf32>
    %220 = arith.addf %219, %216 : vector<2x256xf32>
    %221 = vector.extract_strided_slice %220 {offsets = [0, 0], sizes = [2, 64], strides = [1, 1]} : vector<2x256xf32> to vector<2x64xf32>
    %222 = arith.negf %221 : vector<2x64xf32>
    %223 = math.exp %222 : vector<2x64xf32>
    %cst_54 = arith.constant 1.000000e+00 : f32
    %224 = vector.broadcast %cst_54 : f32 to vector<2x64xf32>
    %225 = arith.addf %224, %223 : vector<2x64xf32>
    %226 = arith.divf %224, %225 : vector<2x64xf32>
    %227 = vector.extract_strided_slice %220 {offsets = [0, 64], sizes = [2, 64], strides = [1, 1]} : vector<2x256xf32> to vector<2x64xf32>
    %228 = arith.negf %227 : vector<2x64xf32>
    %229 = math.exp %228 : vector<2x64xf32>
    %cst_55 = arith.constant 1.000000e+00 : f32
    %230 = vector.broadcast %cst_55 : f32 to vector<2x64xf32>
    %231 = arith.addf %230, %229 : vector<2x64xf32>
    %232 = arith.divf %230, %231 : vector<2x64xf32>
    %233 = vector.extract_strided_slice %220 {offsets = [0, 128], sizes = [2, 64], strides = [1, 1]} : vector<2x256xf32> to vector<2x64xf32>
    %234 = math.tanh %233 : vector<2x64xf32>
    %235 = vector.extract_strided_slice %220 {offsets = [0, 192], sizes = [2, 64], strides = [1, 1]} : vector<2x256xf32> to vector<2x64xf32>
    %236 = arith.negf %235 : vector<2x64xf32>
    %237 = math.exp %236 : vector<2x64xf32>
    %cst_56 = arith.constant 1.000000e+00 : f32
    %238 = vector.broadcast %cst_56 : f32 to vector<2x64xf32>
    %239 = arith.addf %238, %237 : vector<2x64xf32>
    %240 = arith.divf %238, %239 : vector<2x64xf32>
    %241 = arith.mulf %232, %209 : vector<2x64xf32>
    %242 = arith.mulf %226, %234 : vector<2x64xf32>
    %243 = arith.addf %241, %242 : vector<2x64xf32>
    %244 = math.tanh %243 : vector<2x64xf32>
    %245 = arith.mulf %240, %244 : vector<2x64xf32>
    %246 = vector.extract_strided_slice %245 {offsets = [0, 0], sizes = [2, 32], strides = [1, 1]} : vector<2x64xf32> to vector<2x32xf32>
    %c12_57 = arith.constant 12 : index
    %c0_58 = arith.constant 0 : index
    %247 = vector.load %arg12[%c12_57, %c0_58] : memref<16x64xf32, #tpu.memory_space<vmem>>, vector<2x32xf32>
    tpu.vector_store %arg12[%c12_57, %c0_58], %246 {strides = array<i32>} : memref<16x64xf32, #tpu.memory_space<vmem>>, vector<2x32xf32>,
    %248 = vector.extract_strided_slice %245 {offsets = [0, 32], sizes = [2, 32], strides = [1, 1]} : vector<2x64xf32> to vector<2x32xf32>
    %c2_59 = arith.constant 2 : index
    %c32_60 = arith.constant 32 : index
    %249 = vector.load %arg12[%c2_59, %c32_60] : memref<16x64xf32, #tpu.memory_space<vmem>>, vector<2x32xf32>
    tpu.vector_store %arg12[%c2_59, %c32_60], %248 {strides = array<i32>} : memref<16x64xf32, #tpu.memory_space<vmem>>, vector<2x32xf32>,
    %cst_61 = arith.constant dense<0.000000e+00> : vector<2x256xf32>
    %250 = tpu.matmul %245, %7, %cst_61 {dimension_numbers = #tpu.dot_dimension_numbers<[1], [0], [0], [1], [0, 0, 1, 1], [], []>} : vector<2x64xf32>, vector<64x256xf32>, vector<2x256xf32> -> vector<2x256xf32>
    %251 = vector.extract_strided_slice %10 {offsets = [14, 0], sizes = [2, 256], strides = [1, 1]} : vector<16x256xf32> to vector<2x256xf32>
    %252 = vector.extract_strided_slice %11 {offsets = [0, 0], sizes = [2, 256], strides = [1, 1]} : vector<16x256xf32> to vector<2x256xf32>
    %253 = arith.addf %251, %252 : vector<2x256xf32>
    %254 = arith.addf %253, %250 : vector<2x256xf32>
    %255 = vector.extract_strided_slice %254 {offsets = [0, 0], sizes = [2, 64], strides = [1, 1]} : vector<2x256xf32> to vector<2x64xf32>
    %256 = arith.negf %255 : vector<2x64xf32>
    %257 = math.exp %256 : vector<2x64xf32>
    %cst_62 = arith.constant 1.000000e+00 : f32
    %258 = vector.broadcast %cst_62 : f32 to vector<2x64xf32>
    %259 = arith.addf %258, %257 : vector<2x64xf32>
    %260 = arith.divf %258, %259 : vector<2x64xf32>
    %261 = vector.extract_strided_slice %254 {offsets = [0, 64], sizes = [2, 64], strides = [1, 1]} : vector<2x256xf32> to vector<2x64xf32>
    %262 = arith.negf %261 : vector<2x64xf32>
    %263 = math.exp %262 : vector<2x64xf32>
    %cst_63 = arith.constant 1.000000e+00 : f32
    %264 = vector.broadcast %cst_63 : f32 to vector<2x64xf32>
    %265 = arith.addf %264, %263 : vector<2x64xf32>
    %266 = arith.divf %264, %265 : vector<2x64xf32>
    %267 = vector.extract_strided_slice %254 {offsets = [0, 128], sizes = [2, 64], strides = [1, 1]} : vector<2x256xf32> to vector<2x64xf32>
    %268 = math.tanh %267 : vector<2x64xf32>
    %269 = vector.extract_strided_slice %254 {offsets = [0, 192], sizes = [2, 64], strides = [1, 1]} : vector<2x256xf32> to vector<2x64xf32>
    %270 = arith.negf %269 : vector<2x64xf32>
    %271 = math.exp %270 : vector<2x64xf32>
    %cst_64 = arith.constant 1.000000e+00 : f32
    %272 = vector.broadcast %cst_64 : f32 to vector<2x64xf32>
    %273 = arith.addf %272, %271 : vector<2x64xf32>
    %274 = arith.divf %272, %273 : vector<2x64xf32>
    %275 = arith.mulf %266, %243 : vector<2x64xf32>
    %276 = arith.mulf %260, %268 : vector<2x64xf32>
    %277 = arith.addf %275, %276 : vector<2x64xf32>
    %278 = math.tanh %277 : vector<2x64xf32>
    %279 = arith.mulf %274, %278 : vector<2x64xf32>
    %280 = vector.extract_strided_slice %279 {offsets = [0, 0], sizes = [2, 32], strides = [1, 1]} : vector<2x64xf32> to vector<2x32xf32>
    %c14_65 = arith.constant 14 : index
    %c0_66 = arith.constant 0 : index
    %281 = vector.load %arg12[%c14_65, %c0_66] : memref<16x64xf32, #tpu.memory_space<vmem>>, vector<2x32xf32>
    tpu.vector_store %arg12[%c14_65, %c0_66], %280 {strides = array<i32>} : memref<16x64xf32, #tpu.memory_space<vmem>>, vector<2x32xf32>,
    %282 = vector.extract_strided_slice %279 {offsets = [0, 32], sizes = [2, 32], strides = [1, 1]} : vector<2x64xf32> to vector<2x32xf32>
    %c0_67 = arith.constant 0 : index
    %c32_68 = arith.constant 32 : index
    %283 = vector.load %arg12[%c0_67, %c32_68] : memref<16x64xf32, #tpu.memory_space<vmem>>, vector<2x32xf32>
    tpu.vector_store %arg12[%c0_67, %c32_68], %282 {strides = array<i32>} : memref<16x64xf32, #tpu.memory_space<vmem>>, vector<2x32xf32>,
    %c0_69 = arith.constant 0 : index
    %c0_70 = arith.constant 0 : index
    %284 = vector.load %arg12[%c0_69, %c0_70] : memref<16x64xf32, #tpu.memory_space<vmem>>, vector<16x64xf32>
    %c0_71 = arith.constant 0 : index
    %c0_72 = arith.constant 0 : index
    %c0_73 = arith.constant 0 : index
    %285 = vector.load %arg3[%c0_71, %c0_72, %c0_73] : memref<5x64x256xf32, #tpu.memory_space<vmem>>, vector<1x64x256xf32>
    %286 = vector.shape_cast %285 : vector<1x64x256xf32> to vector<64x256xf32>
    %c0_74 = arith.constant 0 : index
    %c0_75 = arith.constant 0 : index
    %c0_76 = arith.constant 0 : index
    %287 = vector.load %arg4[%c0_74, %c0_75, %c0_76] : memref<5x64x256xf32, #tpu.memory_space<vmem>>, vector<1x64x256xf32>
    %288 = vector.shape_cast %287 : vector<1x64x256xf32> to vector<64x256xf32>
    %c1 = arith.constant 1 : index
    %c0_77 = arith.constant 0 : index
    %c0_78 = arith.constant 0 : index
    %289 = vector.load %arg5[%c1, %c0_77, %c0_78] : memref<6x1x256xf32, #tpu.memory_space<vmem>>, vector<1x1x256xf32>
    %290 = vector.shape_cast %289 : vector<1x1x256xf32> to vector<1x256xf32>
    %c1_79 = arith.constant 1 : index
    %c0_80 = arith.constant 0 : index
    %c0_81 = arith.constant 0 : index
    %291 = vector.load %arg6[%c1_79, %c0_80, %c0_81] : memref<6x64x256xf32, #tpu.memory_space<vmem>>, vector<1x64x256xf32>
    %292 = vector.shape_cast %291 : vector<1x64x256xf32> to vector<64x256xf32>
    %cst_82 = arith.constant dense<0.000000e+00> : vector<16x256xf32>
    %293 = tpu.matmul %284, %286, %cst_82 {dimension_numbers = #tpu.dot_dimension_numbers<[1], [0], [0], [1], [0, 0, 1, 1], [], []>} : vector<16x64xf32>, vector<64x256xf32>, vector<16x256xf32> -> vector<16x256xf32>
    %294 = vector.broadcast %290 : vector<1x256xf32> to vector<16x256xf32>
    %295 = arith.addf %293, %294 : vector<16x256xf32>
    %cst_83 = arith.constant dense<0.000000e+00> : vector<16x256xf32>
    %296 = tpu.matmul %284, %288, %cst_83 {dimension_numbers = #tpu.dot_dimension_numbers<[1], [0], [0], [1], [0, 0, 1, 1], [], []>} : vector<16x64xf32>, vector<64x256xf32>, vector<16x256xf32> -> vector<16x256xf32>
    %cst_84 = arith.constant dense<0.000000e+00> : vector<2x256xf32>
    %297 = tpu.matmul %0, %292, %cst_84 {dimension_numbers = #tpu.dot_dimension_numbers<[1], [0], [0], [1], [0, 0, 1, 1], [], []>} : vector<2x64xf32>, vector<64x256xf32>, vector<2x256xf32> -> vector<2x256xf32>
    %298 = vector.extract_strided_slice %295 {offsets = [0, 0], sizes = [2, 256], strides = [1, 1]} : vector<16x256xf32> to vector<2x256xf32>
    %299 = vector.extract_strided_slice %296 {offsets = [14, 0], sizes = [2, 256], strides = [1, 1]} : vector<16x256xf32> to vector<2x256xf32>
    %300 = arith.addf %298, %299 : vector<2x256xf32>
    %301 = arith.addf %300, %297 : vector<2x256xf32>
    %302 = vector.extract_strided_slice %301 {offsets = [0, 0], sizes = [2, 64], strides = [1, 1]} : vector<2x256xf32> to vector<2x64xf32>
    %303 = arith.negf %302 : vector<2x64xf32>
    %304 = math.exp %303 : vector<2x64xf32>
    %cst_85 = arith.constant 1.000000e+00 : f32
    %305 = vector.broadcast %cst_85 : f32 to vector<2x64xf32>
    %306 = arith.addf %305, %304 : vector<2x64xf32>
    %307 = arith.divf %305, %306 : vector<2x64xf32>
    %308 = vector.extract_strided_slice %301 {offsets = [0, 64], sizes = [2, 64], strides = [1, 1]} : vector<2x256xf32> to vector<2x64xf32>
    %309 = arith.negf %308 : vector<2x64xf32>
    %310 = math.exp %309 : vector<2x64xf32>
    %cst_86 = arith.constant 1.000000e+00 : f32
    %311 = vector.broadcast %cst_86 : f32 to vector<2x64xf32>
    %312 = arith.addf %311, %310 : vector<2x64xf32>
    %313 = arith.divf %311, %312 : vector<2x64xf32>
    %314 = vector.extract_strided_slice %301 {offsets = [0, 128], sizes = [2, 64], strides = [1, 1]} : vector<2x256xf32> to vector<2x64xf32>
    %315 = math.tanh %314 : vector<2x64xf32>
    %316 = vector.extract_strided_slice %301 {offsets = [0, 192], sizes = [2, 64], strides = [1, 1]} : vector<2x256xf32> to vector<2x64xf32>
    %317 = arith.negf %316 : vector<2x64xf32>
    %318 = math.exp %317 : vector<2x64xf32>
    %cst_87 = arith.constant 1.000000e+00 : f32
    %319 = vector.broadcast %cst_87 : f32 to vector<2x64xf32>
    %320 = arith.addf %319, %318 : vector<2x64xf32>
    %321 = arith.divf %319, %320 : vector<2x64xf32>
    %322 = arith.mulf %313, %0 : vector<2x64xf32>
    %323 = arith.mulf %307, %315 : vector<2x64xf32>
    %324 = arith.addf %322, %323 : vector<2x64xf32>
    %325 = math.tanh %324 : vector<2x64xf32>
    %326 = arith.mulf %321, %325 : vector<2x64xf32>
    %327 = vector.extract_strided_slice %326 {offsets = [0, 0], sizes = [2, 32], strides = [1, 1]} : vector<2x64xf32> to vector<2x32xf32>
    %c0_88 = arith.constant 0 : index
    %c0_89 = arith.constant 0 : index
    %328 = vector.load %arg13[%c0_88, %c0_89] : memref<16x64xf32, #tpu.memory_space<vmem>>, vector<2x32xf32>
    tpu.vector_store %arg13[%c0_88, %c0_89], %327 {strides = array<i32>} : memref<16x64xf32, #tpu.memory_space<vmem>>, vector<2x32xf32>,
    %329 = vector.extract_strided_slice %326 {offsets = [0, 32], sizes = [2, 32], strides = [1, 1]} : vector<2x64xf32> to vector<2x32xf32>
    %c14_90 = arith.constant 14 : index
    %c32_91 = arith.constant 32 : index
    %330 = vector.load %arg13[%c14_90, %c32_91] : memref<16x64xf32, #tpu.memory_space<vmem>>, vector<2x32xf32>
    tpu.vector_store %arg13[%c14_90, %c32_91], %329 {strides = array<i32>} : memref<16x64xf32, #tpu.memory_space<vmem>>, vector<2x32xf32>,
    %cst_92 = arith.constant dense<0.000000e+00> : vector<2x256xf32>
    %331 = tpu.matmul %326, %292, %cst_92 {dimension_numbers = #tpu.dot_dimension_numbers<[1], [0], [0], [1], [0, 0, 1, 1], [], []>} : vector<2x64xf32>, vector<64x256xf32>, vector<2x256xf32> -> vector<2x256xf32>
    %332 = vector.extract_strided_slice %295 {offsets = [2, 0], sizes = [2, 256], strides = [1, 1]} : vector<16x256xf32> to vector<2x256xf32>
    %333 = vector.extract_strided_slice %296 {offsets = [12, 0], sizes = [2, 256], strides = [1, 1]} : vector<16x256xf32> to vector<2x256xf32>
    %334 = arith.addf %332, %333 : vector<2x256xf32>
    %335 = arith.addf %334, %331 : vector<2x256xf32>
    %336 = vector.extract_strided_slice %335 {offsets = [0, 0], sizes = [2, 64], strides = [1, 1]} : vector<2x256xf32> to vector<2x64xf32>
    %337 = arith.negf %336 : vector<2x64xf32>
    %338 = math.exp %337 : vector<2x64xf32>
    %cst_93 = arith.constant 1.000000e+00 : f32
    %339 = vector.broadcast %cst_93 : f32 to vector<2x64xf32>
    %340 = arith.addf %339, %338 : vector<2x64xf32>
    %341 = arith.divf %339, %340 : vector<2x64xf32>
    %342 = vector.extract_strided_slice %335 {offsets = [0, 64], sizes = [2, 64], strides = [1, 1]} : vector<2x256xf32> to vector<2x64xf32>
    %343 = arith.negf %342 : vector<2x64xf32>
    %344 = math.exp %343 : vector<2x64xf32>
    %cst_94 = arith.constant 1.000000e+00 : f32
    %345 = vector.broadcast %cst_94 : f32 to vector<2x64xf32>
    %346 = arith.addf %345, %344 : vector<2x64xf32>
    %347 = arith.divf %345, %346 : vector<2x64xf32>
    %348 = vector.extract_strided_slice %335 {offsets = [0, 128], sizes = [2, 64], strides = [1, 1]} : vector<2x256xf32> to vector<2x64xf32>
    %349 = math.tanh %348 : vector<2x64xf32>
    %350 = vector.extract_strided_slice %335 {offsets = [0, 192], sizes = [2, 64], strides = [1, 1]} : vector<2x256xf32> to vector<2x64xf32>
    %351 = arith.negf %350 : vector<2x64xf32>
    %352 = math.exp %351 : vector<2x64xf32>
    %cst_95 = arith.constant 1.000000e+00 : f32
    %353 = vector.broadcast %cst_95 : f32 to vector<2x64xf32>
    %354 = arith.addf %353, %352 : vector<2x64xf32>
    %355 = arith.divf %353, %354 : vector<2x64xf32>
    %356 = arith.mulf %347, %324 : vector<2x64xf32>
    %357 = arith.mulf %341, %349 : vector<2x64xf32>
    %358 = arith.addf %356, %357 : vector<2x64xf32>
    %359 = math.tanh %358 : vector<2x64xf32>
    %360 = arith.mulf %355, %359 : vector<2x64xf32>
    %361 = vector.extract_strided_slice %360 {offsets = [0, 0], sizes = [2, 32], strides = [1, 1]} : vector<2x64xf32> to vector<2x32xf32>
    %c2_96 = arith.constant 2 : index
    %c0_97 = arith.constant 0 : index
    %362 = vector.load %arg13[%c2_96, %c0_97] : memref<16x64xf32, #tpu.memory_space<vmem>>, vector<2x32xf32>
    tpu.vector_store %arg13[%c2_96, %c0_97], %361 {strides = array<i32>} : memref<16x64xf32, #tpu.memory_space<vmem>>, vector<2x32xf32>,
    %363 = vector.extract_strided_slice %360 {offsets = [0, 32], sizes = [2, 32], strides = [1, 1]} : vector<2x64xf32> to vector<2x32xf32>
    %c12_98 = arith.constant 12 : index
    %c32_99 = arith.constant 32 : index
    %364 = vector.load %arg13[%c12_98, %c32_99] : memref<16x64xf32, #tpu.memory_space<vmem>>, vector<2x32xf32>
    tpu.vector_store %arg13[%c12_98, %c32_99], %363 {strides = array<i32>} : memref<16x64xf32, #tpu.memory_space<vmem>>, vector<2x32xf32>,
    %cst_100 = arith.constant dense<0.000000e+00> : vector<2x256xf32>
    %365 = tpu.matmul %360, %292, %cst_100 {dimension_numbers = #tpu.dot_dimension_numbers<[1], [0], [0], [1], [0, 0, 1, 1], [], []>} : vector<2x64xf32>, vector<64x256xf32>, vector<2x256xf32> -> vector<2x256xf32>
    %366 = vector.extract_strided_slice %295 {offsets = [4, 0], sizes = [2, 256], strides = [1, 1]} : vector<16x256xf32> to vector<2x256xf32>
    %367 = vector.extract_strided_slice %296 {offsets = [10, 0], sizes = [2, 256], strides = [1, 1]} : vector<16x256xf32> to vector<2x256xf32>
    %368 = arith.addf %366, %367 : vector<2x256xf32>
    %369 = arith.addf %368, %365 : vector<2x256xf32>
    %370 = vector.extract_strided_slice %369 {offsets = [0, 0], sizes = [2, 64], strides = [1, 1]} : vector<2x256xf32> to vector<2x64xf32>
    %371 = arith.negf %370 : vector<2x64xf32>
    %372 = math.exp %371 : vector<2x64xf32>
    %cst_101 = arith.constant 1.000000e+00 : f32
    %373 = vector.broadcast %cst_101 : f32 to vector<2x64xf32>
    %374 = arith.addf %373, %372 : vector<2x64xf32>
    %375 = arith.divf %373, %374 : vector<2x64xf32>
    %376 = vector.extract_strided_slice %369 {offsets = [0, 64], sizes = [2, 64], strides = [1, 1]} : vector<2x256xf32> to vector<2x64xf32>
    %377 = arith.negf %376 : vector<2x64xf32>
    %378 = math.exp %377 : vector<2x64xf32>
    %cst_102 = arith.constant 1.000000e+00 : f32
    %379 = vector.broadcast %cst_102 : f32 to vector<2x64xf32>
    %380 = arith.addf %379, %378 : vector<2x64xf32>
    %381 = arith.divf %379, %380 : vector<2x64xf32>
    %382 = vector.extract_strided_slice %369 {offsets = [0, 128], sizes = [2, 64], strides = [1, 1]} : vector<2x256xf32> to vector<2x64xf32>
    %383 = math.tanh %382 : vector<2x64xf32>
    %384 = vector.extract_strided_slice %369 {offsets = [0, 192], sizes = [2, 64], strides = [1, 1]} : vector<2x256xf32> to vector<2x64xf32>
    %385 = arith.negf %384 : vector<2x64xf32>
    %386 = math.exp %385 : vector<2x64xf32>
    %cst_103 = arith.constant 1.000000e+00 : f32
    %387 = vector.broadcast %cst_103 : f32 to vector<2x64xf32>
    %388 = arith.addf %387, %386 : vector<2x64xf32>
    %389 = arith.divf %387, %388 : vector<2x64xf32>
    %390 = arith.mulf %381, %358 : vector<2x64xf32>
    %391 = arith.mulf %375, %383 : vector<2x64xf32>
    %392 = arith.addf %390, %391 : vector<2x64xf32>
    %393 = math.tanh %392 : vector<2x64xf32>
    %394 = arith.mulf %389, %393 : vector<2x64xf32>
    %395 = vector.extract_strided_slice %394 {offsets = [0, 0], sizes = [2, 32], strides = [1, 1]} : vector<2x64xf32> to vector<2x32xf32>
    %c4_104 = arith.constant 4 : index
    %c0_105 = arith.constant 0 : index
    %396 = vector.load %arg13[%c4_104, %c0_105] : memref<16x64xf32, #tpu.memory_space<vmem>>, vector<2x32xf32>
    tpu.vector_store %arg13[%c4_104, %c0_105], %395 {strides = array<i32>} : memref<16x64xf32, #tpu.memory_space<vmem>>, vector<2x32xf32>,
    %397 = vector.extract_strided_slice %394 {offsets = [0, 32], sizes = [2, 32], strides = [1, 1]} : vector<2x64xf32> to vector<2x32xf32>
    %c10_106 = arith.constant 10 : index
    %c32_107 = arith.constant 32 : index
    %398 = vector.load %arg13[%c10_106, %c32_107] : memref<16x64xf32, #tpu.memory_space<vmem>>, vector<2x32xf32>
    tpu.vector_store %arg13[%c10_106, %c32_107], %397 {strides = array<i32>} : memref<16x64xf32, #tpu.memory_space<vmem>>, vector<2x32xf32>,
    %cst_108 = arith.constant dense<0.000000e+00> : vector<2x256xf32>
    %399 = tpu.matmul %394, %292, %cst_108 {dimension_numbers = #tpu.dot_dimension_numbers<[1], [0], [0], [1], [0, 0, 1, 1], [], []>} : vector<2x64xf32>, vector<64x256xf32>, vector<2x256xf32> -> vector<2x256xf32>
    %400 = vector.extract_strided_slice %295 {offsets = [6, 0], sizes = [2, 256], strides = [1, 1]} : vector<16x256xf32> to vector<2x256xf32>
    %401 = vector.extract_strided_slice %296 {offsets = [8, 0], sizes = [2, 256], strides = [1, 1]} : vector<16x256xf32> to vector<2x256xf32>
    %402 = arith.addf %400, %401 : vector<2x256xf32>
    %403 = arith.addf %402, %399 : vector<2x256xf32>
    %404 = vector.extract_strided_slice %403 {offsets = [0, 0], sizes = [2, 64], strides = [1, 1]} : vector<2x256xf32> to vector<2x64xf32>
    %405 = arith.negf %404 : vector<2x64xf32>
    %406 = math.exp %405 : vector<2x64xf32>
    %cst_109 = arith.constant 1.000000e+00 : f32
    %407 = vector.broadcast %cst_109 : f32 to vector<2x64xf32>
    %408 = arith.addf %407, %406 : vector<2x64xf32>
    %409 = arith.divf %407, %408 : vector<2x64xf32>
    %410 = vector.extract_strided_slice %403 {offsets = [0, 64], sizes = [2, 64], strides = [1, 1]} : vector<2x256xf32> to vector<2x64xf32>
    %411 = arith.negf %410 : vector<2x64xf32>
    %412 = math.exp %411 : vector<2x64xf32>
    %cst_110 = arith.constant 1.000000e+00 : f32
    %413 = vector.broadcast %cst_110 : f32 to vector<2x64xf32>
    %414 = arith.addf %413, %412 : vector<2x64xf32>
    %415 = arith.divf %413, %414 : vector<2x64xf32>
    %416 = vector.extract_strided_slice %403 {offsets = [0, 128], sizes = [2, 64], strides = [1, 1]} : vector<2x256xf32> to vector<2x64xf32>
    %417 = math.tanh %416 : vector<2x64xf32>
    %418 = vector.extract_strided_slice %403 {offsets = [0, 192], sizes = [2, 64], strides = [1, 1]} : vector<2x256xf32> to vector<2x64xf32>
    %419 = arith.negf %418 : vector<2x64xf32>
    %420 = math.exp %419 : vector<2x64xf32>
    %cst_111 = arith.constant 1.000000e+00 : f32
    %421 = vector.broadcast %cst_111 : f32 to vector<2x64xf32>
    %422 = arith.addf %421, %420 : vector<2x64xf32>
    %423 = arith.divf %421, %422 : vector<2x64xf32>
    %424 = arith.mulf %415, %392 : vector<2x64xf32>
    %425 = arith.mulf %409, %417 : vector<2x64xf32>
    %426 = arith.addf %424, %425 : vector<2x64xf32>
    %427 = math.tanh %426 : vector<2x64xf32>
    %428 = arith.mulf %423, %427 : vector<2x64xf32>
    %429 = vector.extract_strided_slice %428 {offsets = [0, 0], sizes = [2, 32], strides = [1, 1]} : vector<2x64xf32> to vector<2x32xf32>
    %c6_112 = arith.constant 6 : index
    %c0_113 = arith.constant 0 : index
    %430 = vector.load %arg13[%c6_112, %c0_113] : memref<16x64xf32, #tpu.memory_space<vmem>>, vector<2x32xf32>
    tpu.vector_store %arg13[%c6_112, %c0_113], %429 {strides = array<i32>} : memref<16x64xf32, #tpu.memory_space<vmem>>, vector<2x32xf32>,
    %431 = vector.extract_strided_slice %428 {offsets = [0, 32], sizes = [2, 32], strides = [1, 1]} : vector<2x64xf32> to vector<2x32xf32>
    %c8_114 = arith.constant 8 : index
    %c32_115 = arith.constant 32 : index
    %432 = vector.load %arg13[%c8_114, %c32_115] : memref<16x64xf32, #tpu.memory_space<vmem>>, vector<2x32xf32>
    tpu.vector_store %arg13[%c8_114, %c32_115], %431 {strides = array<i32>} : memref<16x64xf32, #tpu.memory_space<vmem>>, vector<2x32xf32>,
    %cst_116 = arith.constant dense<0.000000e+00> : vector<2x256xf32>
    %433 = tpu.matmul %428, %292, %cst_116 {dimension_numbers = #tpu.dot_dimension_numbers<[1], [0], [0], [1], [0, 0, 1, 1], [], []>} : vector<2x64xf32>, vector<64x256xf32>, vector<2x256xf32> -> vector<2x256xf32>
    %434 = vector.extract_strided_slice %295 {offsets = [8, 0], sizes = [2, 256], strides = [1, 1]} : vector<16x256xf32> to vector<2x256xf32>
    %435 = vector.extract_strided_slice %296 {offsets = [6, 0], sizes = [2, 256], strides = [1, 1]} : vector<16x256xf32> to vector<2x256xf32>
    %436 = arith.addf %434, %435 : vector<2x256xf32>
    %437 = arith.addf %436, %433 : vector<2x256xf32>
    %438 = vector.extract_strided_slice %437 {offsets = [0, 0], sizes = [2, 64], strides = [1, 1]} : vector<2x256xf32> to vector<2x64xf32>
    %439 = arith.negf %438 : vector<2x64xf32>
    %440 = math.exp %439 : vector<2x64xf32>
    %cst_117 = arith.constant 1.000000e+00 : f32
    %441 = vector.broadcast %cst_117 : f32 to vector<2x64xf32>
    %442 = arith.addf %441, %440 : vector<2x64xf32>
    %443 = arith.divf %441, %442 : vector<2x64xf32>
    %444 = vector.extract_strided_slice %437 {offsets = [0, 64], sizes = [2, 64], strides = [1, 1]} : vector<2x256xf32> to vector<2x64xf32>
    %445 = arith.negf %444 : vector<2x64xf32>
    %446 = math.exp %445 : vector<2x64xf32>
    %cst_118 = arith.constant 1.000000e+00 : f32
    %447 = vector.broadcast %cst_118 : f32 to vector<2x64xf32>
    %448 = arith.addf %447, %446 : vector<2x64xf32>
    %449 = arith.divf %447, %448 : vector<2x64xf32>
    %450 = vector.extract_strided_slice %437 {offsets = [0, 128], sizes = [2, 64], strides = [1, 1]} : vector<2x256xf32> to vector<2x64xf32>
    %451 = math.tanh %450 : vector<2x64xf32>
    %452 = vector.extract_strided_slice %437 {offsets = [0, 192], sizes = [2, 64], strides = [1, 1]} : vector<2x256xf32> to vector<2x64xf32>
    %453 = arith.negf %452 : vector<2x64xf32>
    %454 = math.exp %453 : vector<2x64xf32>
    %cst_119 = arith.constant 1.000000e+00 : f32
    %455 = vector.broadcast %cst_119 : f32 to vector<2x64xf32>
    %456 = arith.addf %455, %454 : vector<2x64xf32>
    %457 = arith.divf %455, %456 : vector<2x64xf32>
    %458 = arith.mulf %449, %426 : vector<2x64xf32>
    %459 = arith.mulf %443, %451 : vector<2x64xf32>
    %460 = arith.addf %458, %459 : vector<2x64xf32>
    %461 = math.tanh %460 : vector<2x64xf32>
    %462 = arith.mulf %457, %461 : vector<2x64xf32>
    %463 = vector.extract_strided_slice %462 {offsets = [0, 0], sizes = [2, 32], strides = [1, 1]} : vector<2x64xf32> to vector<2x32xf32>
    %c8_120 = arith.constant 8 : index
    %c0_121 = arith.constant 0 : index
    %464 = vector.load %arg13[%c8_120, %c0_121] : memref<16x64xf32, #tpu.memory_space<vmem>>, vector<2x32xf32>
    tpu.vector_store %arg13[%c8_120, %c0_121], %463 {strides = array<i32>} : memref<16x64xf32, #tpu.memory_space<vmem>>, vector<2x32xf32>,
    %465 = vector.extract_strided_slice %462 {offsets = [0, 32], sizes = [2, 32], strides = [1, 1]} : vector<2x64xf32> to vector<2x32xf32>
    %c6_122 = arith.constant 6 : index
    %c32_123 = arith.constant 32 : index
    %466 = vector.load %arg13[%c6_122, %c32_123] : memref<16x64xf32, #tpu.memory_space<vmem>>, vector<2x32xf32>
    tpu.vector_store %arg13[%c6_122, %c32_123], %465 {strides = array<i32>} : memref<16x64xf32, #tpu.memory_space<vmem>>, vector<2x32xf32>,
    %cst_124 = arith.constant dense<0.000000e+00> : vector<2x256xf32>
    %467 = tpu.matmul %462, %292, %cst_124 {dimension_numbers = #tpu.dot_dimension_numbers<[1], [0], [0], [1], [0, 0, 1, 1], [], []>} : vector<2x64xf32>, vector<64x256xf32>, vector<2x256xf32> -> vector<2x256xf32>
    %468 = vector.extract_strided_slice %295 {offsets = [10, 0], sizes = [2, 256], strides = [1, 1]} : vector<16x256xf32> to vector<2x256xf32>
    %469 = vector.extract_strided_slice %296 {offsets = [4, 0], sizes = [2, 256], strides = [1, 1]} : vector<16x256xf32> to vector<2x256xf32>
    %470 = arith.addf %468, %469 : vector<2x256xf32>
    %471 = arith.addf %470, %467 : vector<2x256xf32>
    %472 = vector.extract_strided_slice %471 {offsets = [0, 0], sizes = [2, 64], strides = [1, 1]} : vector<2x256xf32> to vector<2x64xf32>
    %473 = arith.negf %472 : vector<2x64xf32>
    %474 = math.exp %473 : vector<2x64xf32>
    %cst_125 = arith.constant 1.000000e+00 : f32
    %475 = vector.broadcast %cst_125 : f32 to vector<2x64xf32>
    %476 = arith.addf %475, %474 : vector<2x64xf32>
    %477 = arith.divf %475, %476 : vector<2x64xf32>
    %478 = vector.extract_strided_slice %471 {offsets = [0, 64], sizes = [2, 64], strides = [1, 1]} : vector<2x256xf32> to vector<2x64xf32>
    %479 = arith.negf %478 : vector<2x64xf32>
    %480 = math.exp %479 : vector<2x64xf32>
    %cst_126 = arith.constant 1.000000e+00 : f32
    %481 = vector.broadcast %cst_126 : f32 to vector<2x64xf32>
    %482 = arith.addf %481, %480 : vector<2x64xf32>
    %483 = arith.divf %481, %482 : vector<2x64xf32>
    %484 = vector.extract_strided_slice %471 {offsets = [0, 128], sizes = [2, 64], strides = [1, 1]} : vector<2x256xf32> to vector<2x64xf32>
    %485 = math.tanh %484 : vector<2x64xf32>
    %486 = vector.extract_strided_slice %471 {offsets = [0, 192], sizes = [2, 64], strides = [1, 1]} : vector<2x256xf32> to vector<2x64xf32>
    %487 = arith.negf %486 : vector<2x64xf32>
    %488 = math.exp %487 : vector<2x64xf32>
    %cst_127 = arith.constant 1.000000e+00 : f32
    %489 = vector.broadcast %cst_127 : f32 to vector<2x64xf32>
    %490 = arith.addf %489, %488 : vector<2x64xf32>
    %491 = arith.divf %489, %490 : vector<2x64xf32>
    %492 = arith.mulf %483, %460 : vector<2x64xf32>
    %493 = arith.mulf %477, %485 : vector<2x64xf32>
    %494 = arith.addf %492, %493 : vector<2x64xf32>
    %495 = math.tanh %494 : vector<2x64xf32>
    %496 = arith.mulf %491, %495 : vector<2x64xf32>
    %497 = vector.extract_strided_slice %496 {offsets = [0, 0], sizes = [2, 32], strides = [1, 1]} : vector<2x64xf32> to vector<2x32xf32>
    %c10_128 = arith.constant 10 : index
    %c0_129 = arith.constant 0 : index
    %498 = vector.load %arg13[%c10_128, %c0_129] : memref<16x64xf32, #tpu.memory_space<vmem>>, vector<2x32xf32>
    tpu.vector_store %arg13[%c10_128, %c0_129], %497 {strides = array<i32>} : memref<16x64xf32, #tpu.memory_space<vmem>>, vector<2x32xf32>,
    %499 = vector.extract_strided_slice %496 {offsets = [0, 32], sizes = [2, 32], strides = [1, 1]} : vector<2x64xf32> to vector<2x32xf32>
    %c4_130 = arith.constant 4 : index
    %c32_131 = arith.constant 32 : index
    %500 = vector.load %arg13[%c4_130, %c32_131] : memref<16x64xf32, #tpu.memory_space<vmem>>, vector<2x32xf32>
    tpu.vector_store %arg13[%c4_130, %c32_131], %499 {strides = array<i32>} : memref<16x64xf32, #tpu.memory_space<vmem>>, vector<2x32xf32>,
    %cst_132 = arith.constant dense<0.000000e+00> : vector<2x256xf32>
    %501 = tpu.matmul %496, %292, %cst_132 {dimension_numbers = #tpu.dot_dimension_numbers<[1], [0], [0], [1], [0, 0, 1, 1], [], []>} : vector<2x64xf32>, vector<64x256xf32>, vector<2x256xf32> -> vector<2x256xf32>
    %502 = vector.extract_strided_slice %295 {offsets = [12, 0], sizes = [2, 256], strides = [1, 1]} : vector<16x256xf32> to vector<2x256xf32>
    %503 = vector.extract_strided_slice %296 {offsets = [2, 0], sizes = [2, 256], strides = [1, 1]} : vector<16x256xf32> to vector<2x256xf32>
    %504 = arith.addf %502, %503 : vector<2x256xf32>
    %505 = arith.addf %504, %501 : vector<2x256xf32>
    %506 = vector.extract_strided_slice %505 {offsets = [0, 0], sizes = [2, 64], strides = [1, 1]} : vector<2x256xf32> to vector<2x64xf32>
    %507 = arith.negf %506 : vector<2x64xf32>
    %508 = math.exp %507 : vector<2x64xf32>
    %cst_133 = arith.constant 1.000000e+00 : f32
    %509 = vector.broadcast %cst_133 : f32 to vector<2x64xf32>
    %510 = arith.addf %509, %508 : vector<2x64xf32>
    %511 = arith.divf %509, %510 : vector<2x64xf32>
    %512 = vector.extract_strided_slice %505 {offsets = [0, 64], sizes = [2, 64], strides = [1, 1]} : vector<2x256xf32> to vector<2x64xf32>
    %513 = arith.negf %512 : vector<2x64xf32>
    %514 = math.exp %513 : vector<2x64xf32>
    %cst_134 = arith.constant 1.000000e+00 : f32
    %515 = vector.broadcast %cst_134 : f32 to vector<2x64xf32>
    %516 = arith.addf %515, %514 : vector<2x64xf32>
    %517 = arith.divf %515, %516 : vector<2x64xf32>
    %518 = vector.extract_strided_slice %505 {offsets = [0, 128], sizes = [2, 64], strides = [1, 1]} : vector<2x256xf32> to vector<2x64xf32>
    %519 = math.tanh %518 : vector<2x64xf32>
    %520 = vector.extract_strided_slice %505 {offsets = [0, 192], sizes = [2, 64], strides = [1, 1]} : vector<2x256xf32> to vector<2x64xf32>
    %521 = arith.negf %520 : vector<2x64xf32>
    %522 = math.exp %521 : vector<2x64xf32>
    %cst_135 = arith.constant 1.000000e+00 : f32
    %523 = vector.broadcast %cst_135 : f32 to vector<2x64xf32>
    %524 = arith.addf %523, %522 : vector<2x64xf32>
    %525 = arith.divf %523, %524 : vector<2x64xf32>
    %526 = arith.mulf %517, %494 : vector<2x64xf32>
    %527 = arith.mulf %511, %519 : vector<2x64xf32>
    %528 = arith.addf %526, %527 : vector<2x64xf32>
    %529 = math.tanh %528 : vector<2x64xf32>
    %530 = arith.mulf %525, %529 : vector<2x64xf32>
    %531 = vector.extract_strided_slice %530 {offsets = [0, 0], sizes = [2, 32], strides = [1, 1]} : vector<2x64xf32> to vector<2x32xf32>
    %c12_136 = arith.constant 12 : index
    %c0_137 = arith.constant 0 : index
    %532 = vector.load %arg13[%c12_136, %c0_137] : memref<16x64xf32, #tpu.memory_space<vmem>>, vector<2x32xf32>
    tpu.vector_store %arg13[%c12_136, %c0_137], %531 {strides = array<i32>} : memref<16x64xf32, #tpu.memory_space<vmem>>, vector<2x32xf32>,
    %533 = vector.extract_strided_slice %530 {offsets = [0, 32], sizes = [2, 32], strides = [1, 1]} : vector<2x64xf32> to vector<2x32xf32>
    %c2_138 = arith.constant 2 : index
    %c32_139 = arith.constant 32 : index
    %534 = vector.load %arg13[%c2_138, %c32_139] : memref<16x64xf32, #tpu.memory_space<vmem>>, vector<2x32xf32>
    tpu.vector_store %arg13[%c2_138, %c32_139], %533 {strides = array<i32>} : memref<16x64xf32, #tpu.memory_space<vmem>>, vector<2x32xf32>,
    %cst_140 = arith.constant dense<0.000000e+00> : vector<2x256xf32>
    %535 = tpu.matmul %530, %292, %cst_140 {dimension_numbers = #tpu.dot_dimension_numbers<[1], [0], [0], [1], [0, 0, 1, 1], [], []>} : vector<2x64xf32>, vector<64x256xf32>, vector<2x256xf32> -> vector<2x256xf32>
    %536 = vector.extract_strided_slice %295 {offsets = [14, 0], sizes = [2, 256], strides = [1, 1]} : vector<16x256xf32> to vector<2x256xf32>
    %537 = vector.extract_strided_slice %296 {offsets = [0, 0], sizes = [2, 256], strides = [1, 1]} : vector<16x256xf32> to vector<2x256xf32>
    %538 = arith.addf %536, %537 : vector<2x256xf32>
    %539 = arith.addf %538, %535 : vector<2x256xf32>
    %540 = vector.extract_strided_slice %539 {offsets = [0, 0], sizes = [2, 64], strides = [1, 1]} : vector<2x256xf32> to vector<2x64xf32>
    %541 = arith.negf %540 : vector<2x64xf32>
    %542 = math.exp %541 : vector<2x64xf32>
    %cst_141 = arith.constant 1.000000e+00 : f32
    %543 = vector.broadcast %cst_141 : f32 to vector<2x64xf32>
    %544 = arith.addf %543, %542 : vector<2x64xf32>
    %545 = arith.divf %543, %544 : vector<2x64xf32>
    %546 = vector.extract_strided_slice %539 {offsets = [0, 64], sizes = [2, 64], strides = [1, 1]} : vector<2x256xf32> to vector<2x64xf32>
    %547 = arith.negf %546 : vector<2x64xf32>
    %548 = math.exp %547 : vector<2x64xf32>
    %cst_142 = arith.constant 1.000000e+00 : f32
    %549 = vector.broadcast %cst_142 : f32 to vector<2x64xf32>
    %550 = arith.addf %549, %548 : vector<2x64xf32>
    %551 = arith.divf %549, %550 : vector<2x64xf32>
    %552 = vector.extract_strided_slice %539 {offsets = [0, 128], sizes = [2, 64], strides = [1, 1]} : vector<2x256xf32> to vector<2x64xf32>
    %553 = math.tanh %552 : vector<2x64xf32>
    %554 = vector.extract_strided_slice %539 {offsets = [0, 192], sizes = [2, 64], strides = [1, 1]} : vector<2x256xf32> to vector<2x64xf32>
    %555 = arith.negf %554 : vector<2x64xf32>
    %556 = math.exp %555 : vector<2x64xf32>
    %cst_143 = arith.constant 1.000000e+00 : f32
    %557 = vector.broadcast %cst_143 : f32 to vector<2x64xf32>
    %558 = arith.addf %557, %556 : vector<2x64xf32>
    %559 = arith.divf %557, %558 : vector<2x64xf32>
    %560 = arith.mulf %551, %528 : vector<2x64xf32>
    %561 = arith.mulf %545, %553 : vector<2x64xf32>
    %562 = arith.addf %560, %561 : vector<2x64xf32>
    %563 = math.tanh %562 : vector<2x64xf32>
    %564 = arith.mulf %559, %563 : vector<2x64xf32>
    %565 = vector.extract_strided_slice %564 {offsets = [0, 0], sizes = [2, 32], strides = [1, 1]} : vector<2x64xf32> to vector<2x32xf32>
    %c14_144 = arith.constant 14 : index
    %c0_145 = arith.constant 0 : index
    %566 = vector.load %arg13[%c14_144, %c0_145] : memref<16x64xf32, #tpu.memory_space<vmem>>, vector<2x32xf32>
    tpu.vector_store %arg13[%c14_144, %c0_145], %565 {strides = array<i32>} : memref<16x64xf32, #tpu.memory_space<vmem>>, vector<2x32xf32>,
    %567 = vector.extract_strided_slice %564 {offsets = [0, 32], sizes = [2, 32], strides = [1, 1]} : vector<2x64xf32> to vector<2x32xf32>
    %c0_146 = arith.constant 0 : index
    %c32_147 = arith.constant 32 : index
    %568 = vector.load %arg13[%c0_146, %c32_147] : memref<16x64xf32, #tpu.memory_space<vmem>>, vector<2x32xf32>
    tpu.vector_store %arg13[%c0_146, %c32_147], %567 {strides = array<i32>} : memref<16x64xf32, #tpu.memory_space<vmem>>, vector<2x32xf32>,
    %c0_148 = arith.constant 0 : index
    %c0_149 = arith.constant 0 : index
    %569 = vector.load %arg13[%c0_148, %c0_149] : memref<16x64xf32, #tpu.memory_space<vmem>>, vector<16x64xf32>
    %c1_150 = arith.constant 1 : index
    %c0_151 = arith.constant 0 : index
    %c0_152 = arith.constant 0 : index
    %570 = vector.load %arg3[%c1_150, %c0_151, %c0_152] : memref<5x64x256xf32, #tpu.memory_space<vmem>>, vector<1x64x256xf32>
    %571 = vector.shape_cast %570 : vector<1x64x256xf32> to vector<64x256xf32>
    %c1_153 = arith.constant 1 : index
    %c0_154 = arith.constant 0 : index
    %c0_155 = arith.constant 0 : index
    %572 = vector.load %arg4[%c1_153, %c0_154, %c0_155] : memref<5x64x256xf32, #tpu.memory_space<vmem>>, vector<1x64x256xf32>
    %573 = vector.shape_cast %572 : vector<1x64x256xf32> to vector<64x256xf32>
    %c2_156 = arith.constant 2 : index
    %c0_157 = arith.constant 0 : index
    %c0_158 = arith.constant 0 : index
    %574 = vector.load %arg5[%c2_156, %c0_157, %c0_158] : memref<6x1x256xf32, #tpu.memory_space<vmem>>, vector<1x1x256xf32>
    %575 = vector.shape_cast %574 : vector<1x1x256xf32> to vector<1x256xf32>
    %c2_159 = arith.constant 2 : index
    %c0_160 = arith.constant 0 : index
    %c0_161 = arith.constant 0 : index
    %576 = vector.load %arg6[%c2_159, %c0_160, %c0_161] : memref<6x64x256xf32, #tpu.memory_space<vmem>>, vector<1x64x256xf32>
    %577 = vector.shape_cast %576 : vector<1x64x256xf32> to vector<64x256xf32>
    %cst_162 = arith.constant dense<0.000000e+00> : vector<16x256xf32>
    %578 = tpu.matmul %569, %571, %cst_162 {dimension_numbers = #tpu.dot_dimension_numbers<[1], [0], [0], [1], [0, 0, 1, 1], [], []>} : vector<16x64xf32>, vector<64x256xf32>, vector<16x256xf32> -> vector<16x256xf32>
    %579 = vector.broadcast %575 : vector<1x256xf32> to vector<16x256xf32>
    %580 = arith.addf %578, %579 : vector<16x256xf32>
    %cst_163 = arith.constant dense<0.000000e+00> : vector<16x256xf32>
    %581 = tpu.matmul %569, %573, %cst_163 {dimension_numbers = #tpu.dot_dimension_numbers<[1], [0], [0], [1], [0, 0, 1, 1], [], []>} : vector<16x64xf32>, vector<64x256xf32>, vector<16x256xf32> -> vector<16x256xf32>
    %cst_164 = arith.constant dense<0.000000e+00> : vector<2x256xf32>
    %582 = tpu.matmul %0, %577, %cst_164 {dimension_numbers = #tpu.dot_dimension_numbers<[1], [0], [0], [1], [0, 0, 1, 1], [], []>} : vector<2x64xf32>, vector<64x256xf32>, vector<2x256xf32> -> vector<2x256xf32>
    %583 = vector.extract_strided_slice %580 {offsets = [0, 0], sizes = [2, 256], strides = [1, 1]} : vector<16x256xf32> to vector<2x256xf32>
    %584 = vector.extract_strided_slice %581 {offsets = [14, 0], sizes = [2, 256], strides = [1, 1]} : vector<16x256xf32> to vector<2x256xf32>
    %585 = arith.addf %583, %584 : vector<2x256xf32>
    %586 = arith.addf %585, %582 : vector<2x256xf32>
    %587 = vector.extract_strided_slice %586 {offsets = [0, 0], sizes = [2, 64], strides = [1, 1]} : vector<2x256xf32> to vector<2x64xf32>
    %588 = arith.negf %587 : vector<2x64xf32>
    %589 = math.exp %588 : vector<2x64xf32>
    %cst_165 = arith.constant 1.000000e+00 : f32
    %590 = vector.broadcast %cst_165 : f32 to vector<2x64xf32>
    %591 = arith.addf %590, %589 : vector<2x64xf32>
    %592 = arith.divf %590, %591 : vector<2x64xf32>
    %593 = vector.extract_strided_slice %586 {offsets = [0, 64], sizes = [2, 64], strides = [1, 1]} : vector<2x256xf32> to vector<2x64xf32>
    %594 = arith.negf %593 : vector<2x64xf32>
    %595 = math.exp %594 : vector<2x64xf32>
    %cst_166 = arith.constant 1.000000e+00 : f32
    %596 = vector.broadcast %cst_166 : f32 to vector<2x64xf32>
    %597 = arith.addf %596, %595 : vector<2x64xf32>
    %598 = arith.divf %596, %597 : vector<2x64xf32>
    %599 = vector.extract_strided_slice %586 {offsets = [0, 128], sizes = [2, 64], strides = [1, 1]} : vector<2x256xf32> to vector<2x64xf32>
    %600 = math.tanh %599 : vector<2x64xf32>
    %601 = vector.extract_strided_slice %586 {offsets = [0, 192], sizes = [2, 64], strides = [1, 1]} : vector<2x256xf32> to vector<2x64xf32>
    %602 = arith.negf %601 : vector<2x64xf32>
    %603 = math.exp %602 : vector<2x64xf32>
    %cst_167 = arith.constant 1.000000e+00 : f32
    %604 = vector.broadcast %cst_167 : f32 to vector<2x64xf32>
    %605 = arith.addf %604, %603 : vector<2x64xf32>
    %606 = arith.divf %604, %605 : vector<2x64xf32>
    %607 = arith.mulf %598, %0 : vector<2x64xf32>
    %608 = arith.mulf %592, %600 : vector<2x64xf32>
    %609 = arith.addf %607, %608 : vector<2x64xf32>
    %610 = math.tanh %609 : vector<2x64xf32>
    %611 = arith.mulf %606, %610 : vector<2x64xf32>
    %612 = vector.extract_strided_slice %611 {offsets = [0, 0], sizes = [2, 32], strides = [1, 1]} : vector<2x64xf32> to vector<2x32xf32>
    %c0_168 = arith.constant 0 : index
    %c0_169 = arith.constant 0 : index
    %613 = vector.load %arg12[%c0_168, %c0_169] : memref<16x64xf32, #tpu.memory_space<vmem>>, vector<2x32xf32>
    tpu.vector_store %arg12[%c0_168, %c0_169], %612 {strides = array<i32>} : memref<16x64xf32, #tpu.memory_space<vmem>>, vector<2x32xf32>,
    %614 = vector.extract_strided_slice %611 {offsets = [0, 32], sizes = [2, 32], strides = [1, 1]} : vector<2x64xf32> to vector<2x32xf32>
    %c14_170 = arith.constant 14 : index
    %c32_171 = arith.constant 32 : index
    %615 = vector.load %arg12[%c14_170, %c32_171] : memref<16x64xf32, #tpu.memory_space<vmem>>, vector<2x32xf32>
    tpu.vector_store %arg12[%c14_170, %c32_171], %614 {strides = array<i32>} : memref<16x64xf32, #tpu.memory_space<vmem>>, vector<2x32xf32>,
    %cst_172 = arith.constant dense<0.000000e+00> : vector<2x256xf32>
    %616 = tpu.matmul %611, %577, %cst_172 {dimension_numbers = #tpu.dot_dimension_numbers<[1], [0], [0], [1], [0, 0, 1, 1], [], []>} : vector<2x64xf32>, vector<64x256xf32>, vector<2x256xf32> -> vector<2x256xf32>
    %617 = vector.extract_strided_slice %580 {offsets = [2, 0], sizes = [2, 256], strides = [1, 1]} : vector<16x256xf32> to vector<2x256xf32>
    %618 = vector.extract_strided_slice %581 {offsets = [12, 0], sizes = [2, 256], strides = [1, 1]} : vector<16x256xf32> to vector<2x256xf32>
    %619 = arith.addf %617, %618 : vector<2x256xf32>
    %620 = arith.addf %619, %616 : vector<2x256xf32>
    %621 = vector.extract_strided_slice %620 {offsets = [0, 0], sizes = [2, 64], strides = [1, 1]} : vector<2x256xf32> to vector<2x64xf32>
    %622 = arith.negf %621 : vector<2x64xf32>
    %623 = math.exp %622 : vector<2x64xf32>
    %cst_173 = arith.constant 1.000000e+00 : f32
    %624 = vector.broadcast %cst_173 : f32 to vector<2x64xf32>
    %625 = arith.addf %624, %623 : vector<2x64xf32>
    %626 = arith.divf %624, %625 : vector<2x64xf32>
    %627 = vector.extract_strided_slice %620 {offsets = [0, 64], sizes = [2, 64], strides = [1, 1]} : vector<2x256xf32> to vector<2x64xf32>
    %628 = arith.negf %627 : vector<2x64xf32>
    %629 = math.exp %628 : vector<2x64xf32>
    %cst_174 = arith.constant 1.000000e+00 : f32
    %630 = vector.broadcast %cst_174 : f32 to vector<2x64xf32>
    %631 = arith.addf %630, %629 : vector<2x64xf32>
    %632 = arith.divf %630, %631 : vector<2x64xf32>
    %633 = vector.extract_strided_slice %620 {offsets = [0, 128], sizes = [2, 64], strides = [1, 1]} : vector<2x256xf32> to vector<2x64xf32>
    %634 = math.tanh %633 : vector<2x64xf32>
    %635 = vector.extract_strided_slice %620 {offsets = [0, 192], sizes = [2, 64], strides = [1, 1]} : vector<2x256xf32> to vector<2x64xf32>
    %636 = arith.negf %635 : vector<2x64xf32>
    %637 = math.exp %636 : vector<2x64xf32>
    %cst_175 = arith.constant 1.000000e+00 : f32
    %638 = vector.broadcast %cst_175 : f32 to vector<2x64xf32>
    %639 = arith.addf %638, %637 : vector<2x64xf32>
    %640 = arith.divf %638, %639 : vector<2x64xf32>
    %641 = arith.mulf %632, %609 : vector<2x64xf32>
    %642 = arith.mulf %626, %634 : vector<2x64xf32>
    %643 = arith.addf %641, %642 : vector<2x64xf32>
    %644 = math.tanh %643 : vector<2x64xf32>
    %645 = arith.mulf %640, %644 : vector<2x64xf32>
    %646 = vector.extract_strided_slice %645 {offsets = [0, 0], sizes = [2, 32], strides = [1, 1]} : vector<2x64xf32> to vector<2x32xf32>
    %c2_176 = arith.constant 2 : index
    %c0_177 = arith.constant 0 : index
    %647 = vector.load %arg12[%c2_176, %c0_177] : memref<16x64xf32, #tpu.memory_space<vmem>>, vector<2x32xf32>
    tpu.vector_store %arg12[%c2_176, %c0_177], %646 {strides = array<i32>} : memref<16x64xf32, #tpu.memory_space<vmem>>, vector<2x32xf32>,
    %648 = vector.extract_strided_slice %645 {offsets = [0, 32], sizes = [2, 32], strides = [1, 1]} : vector<2x64xf32> to vector<2x32xf32>
    %c12_178 = arith.constant 12 : index
    %c32_179 = arith.constant 32 : index
    %649 = vector.load %arg12[%c12_178, %c32_179] : memref<16x64xf32, #tpu.memory_space<vmem>>, vector<2x32xf32>
    tpu.vector_store %arg12[%c12_178, %c32_179], %648 {strides = array<i32>} : memref<16x64xf32, #tpu.memory_space<vmem>>, vector<2x32xf32>,
    %cst_180 = arith.constant dense<0.000000e+00> : vector<2x256xf32>
    %650 = tpu.matmul %645, %577, %cst_180 {dimension_numbers = #tpu.dot_dimension_numbers<[1], [0], [0], [1], [0, 0, 1, 1], [], []>} : vector<2x64xf32>, vector<64x256xf32>, vector<2x256xf32> -> vector<2x256xf32>
    %651 = vector.extract_strided_slice %580 {offsets = [4, 0], sizes = [2, 256], strides = [1, 1]} : vector<16x256xf32> to vector<2x256xf32>
    %652 = vector.extract_strided_slice %581 {offsets = [10, 0], sizes = [2, 256], strides = [1, 1]} : vector<16x256xf32> to vector<2x256xf32>
    %653 = arith.addf %651, %652 : vector<2x256xf32>
    %654 = arith.addf %653, %650 : vector<2x256xf32>
    %655 = vector.extract_strided_slice %654 {offsets = [0, 0], sizes = [2, 64], strides = [1, 1]} : vector<2x256xf32> to vector<2x64xf32>
    %656 = arith.negf %655 : vector<2x64xf32>
    %657 = math.exp %656 : vector<2x64xf32>
    %cst_181 = arith.constant 1.000000e+00 : f32
    %658 = vector.broadcast %cst_181 : f32 to vector<2x64xf32>
    %659 = arith.addf %658, %657 : vector<2x64xf32>
    %660 = arith.divf %658, %659 : vector<2x64xf32>
    %661 = vector.extract_strided_slice %654 {offsets = [0, 64], sizes = [2, 64], strides = [1, 1]} : vector<2x256xf32> to vector<2x64xf32>
    %662 = arith.negf %661 : vector<2x64xf32>
    %663 = math.exp %662 : vector<2x64xf32>
    %cst_182 = arith.constant 1.000000e+00 : f32
    %664 = vector.broadcast %cst_182 : f32 to vector<2x64xf32>
    %665 = arith.addf %664, %663 : vector<2x64xf32>
    %666 = arith.divf %664, %665 : vector<2x64xf32>
    %667 = vector.extract_strided_slice %654 {offsets = [0, 128], sizes = [2, 64], strides = [1, 1]} : vector<2x256xf32> to vector<2x64xf32>
    %668 = math.tanh %667 : vector<2x64xf32>
    %669 = vector.extract_strided_slice %654 {offsets = [0, 192], sizes = [2, 64], strides = [1, 1]} : vector<2x256xf32> to vector<2x64xf32>
    %670 = arith.negf %669 : vector<2x64xf32>
    %671 = math.exp %670 : vector<2x64xf32>
    %cst_183 = arith.constant 1.000000e+00 : f32
    %672 = vector.broadcast %cst_183 : f32 to vector<2x64xf32>
    %673 = arith.addf %672, %671 : vector<2x64xf32>
    %674 = arith.divf %672, %673 : vector<2x64xf32>
    %675 = arith.mulf %666, %643 : vector<2x64xf32>
    %676 = arith.mulf %660, %668 : vector<2x64xf32>
    %677 = arith.addf %675, %676 : vector<2x64xf32>
    %678 = math.tanh %677 : vector<2x64xf32>
    %679 = arith.mulf %674, %678 : vector<2x64xf32>
    %680 = vector.extract_strided_slice %679 {offsets = [0, 0], sizes = [2, 32], strides = [1, 1]} : vector<2x64xf32> to vector<2x32xf32>
    %c4_184 = arith.constant 4 : index
    %c0_185 = arith.constant 0 : index
    %681 = vector.load %arg12[%c4_184, %c0_185] : memref<16x64xf32, #tpu.memory_space<vmem>>, vector<2x32xf32>
    tpu.vector_store %arg12[%c4_184, %c0_185], %680 {strides = array<i32>} : memref<16x64xf32, #tpu.memory_space<vmem>>, vector<2x32xf32>,
    %682 = vector.extract_strided_slice %679 {offsets = [0, 32], sizes = [2, 32], strides = [1, 1]} : vector<2x64xf32> to vector<2x32xf32>
    %c10_186 = arith.constant 10 : index
    %c32_187 = arith.constant 32 : index
    %683 = vector.load %arg12[%c10_186, %c32_187] : memref<16x64xf32, #tpu.memory_space<vmem>>, vector<2x32xf32>
    tpu.vector_store %arg12[%c10_186, %c32_187], %682 {strides = array<i32>} : memref<16x64xf32, #tpu.memory_space<vmem>>, vector<2x32xf32>,
    %cst_188 = arith.constant dense<0.000000e+00> : vector<2x256xf32>
    %684 = tpu.matmul %679, %577, %cst_188 {dimension_numbers = #tpu.dot_dimension_numbers<[1], [0], [0], [1], [0, 0, 1, 1], [], []>} : vector<2x64xf32>, vector<64x256xf32>, vector<2x256xf32> -> vector<2x256xf32>
    %685 = vector.extract_strided_slice %580 {offsets = [6, 0], sizes = [2, 256], strides = [1, 1]} : vector<16x256xf32> to vector<2x256xf32>
    %686 = vector.extract_strided_slice %581 {offsets = [8, 0], sizes = [2, 256], strides = [1, 1]} : vector<16x256xf32> to vector<2x256xf32>
    %687 = arith.addf %685, %686 : vector<2x256xf32>
    %688 = arith.addf %687, %684 : vector<2x256xf32>
    %689 = vector.extract_strided_slice %688 {offsets = [0, 0], sizes = [2, 64], strides = [1, 1]} : vector<2x256xf32> to vector<2x64xf32>
    %690 = arith.negf %689 : vector<2x64xf32>
    %691 = math.exp %690 : vector<2x64xf32>
    %cst_189 = arith.constant 1.000000e+00 : f32
    %692 = vector.broadcast %cst_189 : f32 to vector<2x64xf32>
    %693 = arith.addf %692, %691 : vector<2x64xf32>
    %694 = arith.divf %692, %693 : vector<2x64xf32>
    %695 = vector.extract_strided_slice %688 {offsets = [0, 64], sizes = [2, 64], strides = [1, 1]} : vector<2x256xf32> to vector<2x64xf32>
    %696 = arith.negf %695 : vector<2x64xf32>
    %697 = math.exp %696 : vector<2x64xf32>
    %cst_190 = arith.constant 1.000000e+00 : f32
    %698 = vector.broadcast %cst_190 : f32 to vector<2x64xf32>
    %699 = arith.addf %698, %697 : vector<2x64xf32>
    %700 = arith.divf %698, %699 : vector<2x64xf32>
    %701 = vector.extract_strided_slice %688 {offsets = [0, 128], sizes = [2, 64], strides = [1, 1]} : vector<2x256xf32> to vector<2x64xf32>
    %702 = math.tanh %701 : vector<2x64xf32>
    %703 = vector.extract_strided_slice %688 {offsets = [0, 192], sizes = [2, 64], strides = [1, 1]} : vector<2x256xf32> to vector<2x64xf32>
    %704 = arith.negf %703 : vector<2x64xf32>
    %705 = math.exp %704 : vector<2x64xf32>
    %cst_191 = arith.constant 1.000000e+00 : f32
    %706 = vector.broadcast %cst_191 : f32 to vector<2x64xf32>
    %707 = arith.addf %706, %705 : vector<2x64xf32>
    %708 = arith.divf %706, %707 : vector<2x64xf32>
    %709 = arith.mulf %700, %677 : vector<2x64xf32>
    %710 = arith.mulf %694, %702 : vector<2x64xf32>
    %711 = arith.addf %709, %710 : vector<2x64xf32>
    %712 = math.tanh %711 : vector<2x64xf32>
    %713 = arith.mulf %708, %712 : vector<2x64xf32>
    %714 = vector.extract_strided_slice %713 {offsets = [0, 0], sizes = [2, 32], strides = [1, 1]} : vector<2x64xf32> to vector<2x32xf32>
    %c6_192 = arith.constant 6 : index
    %c0_193 = arith.constant 0 : index
    %715 = vector.load %arg12[%c6_192, %c0_193] : memref<16x64xf32, #tpu.memory_space<vmem>>, vector<2x32xf32>
    tpu.vector_store %arg12[%c6_192, %c0_193], %714 {strides = array<i32>} : memref<16x64xf32, #tpu.memory_space<vmem>>, vector<2x32xf32>,
    %716 = vector.extract_strided_slice %713 {offsets = [0, 32], sizes = [2, 32], strides = [1, 1]} : vector<2x64xf32> to vector<2x32xf32>
    %c8_194 = arith.constant 8 : index
    %c32_195 = arith.constant 32 : index
    %717 = vector.load %arg12[%c8_194, %c32_195] : memref<16x64xf32, #tpu.memory_space<vmem>>, vector<2x32xf32>
    tpu.vector_store %arg12[%c8_194, %c32_195], %716 {strides = array<i32>} : memref<16x64xf32, #tpu.memory_space<vmem>>, vector<2x32xf32>,
    %cst_196 = arith.constant dense<0.000000e+00> : vector<2x256xf32>
    %718 = tpu.matmul %713, %577, %cst_196 {dimension_numbers = #tpu.dot_dimension_numbers<[1], [0], [0], [1], [0, 0, 1, 1], [], []>} : vector<2x64xf32>, vector<64x256xf32>, vector<2x256xf32> -> vector<2x256xf32>
    %719 = vector.extract_strided_slice %580 {offsets = [8, 0], sizes = [2, 256], strides = [1, 1]} : vector<16x256xf32> to vector<2x256xf32>
    %720 = vector.extract_strided_slice %581 {offsets = [6, 0], sizes = [2, 256], strides = [1, 1]} : vector<16x256xf32> to vector<2x256xf32>
    %721 = arith.addf %719, %720 : vector<2x256xf32>
    %722 = arith.addf %721, %718 : vector<2x256xf32>
    %723 = vector.extract_strided_slice %722 {offsets = [0, 0], sizes = [2, 64], strides = [1, 1]} : vector<2x256xf32> to vector<2x64xf32>
    %724 = arith.negf %723 : vector<2x64xf32>
    %725 = math.exp %724 : vector<2x64xf32>
    %cst_197 = arith.constant 1.000000e+00 : f32
    %726 = vector.broadcast %cst_197 : f32 to vector<2x64xf32>
    %727 = arith.addf %726, %725 : vector<2x64xf32>
    %728 = arith.divf %726, %727 : vector<2x64xf32>
    %729 = vector.extract_strided_slice %722 {offsets = [0, 64], sizes = [2, 64], strides = [1, 1]} : vector<2x256xf32> to vector<2x64xf32>
    %730 = arith.negf %729 : vector<2x64xf32>
    %731 = math.exp %730 : vector<2x64xf32>
    %cst_198 = arith.constant 1.000000e+00 : f32
    %732 = vector.broadcast %cst_198 : f32 to vector<2x64xf32>
    %733 = arith.addf %732, %731 : vector<2x64xf32>
    %734 = arith.divf %732, %733 : vector<2x64xf32>
    %735 = vector.extract_strided_slice %722 {offsets = [0, 128], sizes = [2, 64], strides = [1, 1]} : vector<2x256xf32> to vector<2x64xf32>
    %736 = math.tanh %735 : vector<2x64xf32>
    %737 = vector.extract_strided_slice %722 {offsets = [0, 192], sizes = [2, 64], strides = [1, 1]} : vector<2x256xf32> to vector<2x64xf32>
    %738 = arith.negf %737 : vector<2x64xf32>
    %739 = math.exp %738 : vector<2x64xf32>
    %cst_199 = arith.constant 1.000000e+00 : f32
    %740 = vector.broadcast %cst_199 : f32 to vector<2x64xf32>
    %741 = arith.addf %740, %739 : vector<2x64xf32>
    %742 = arith.divf %740, %741 : vector<2x64xf32>
    %743 = arith.mulf %734, %711 : vector<2x64xf32>
    %744 = arith.mulf %728, %736 : vector<2x64xf32>
    %745 = arith.addf %743, %744 : vector<2x64xf32>
    %746 = math.tanh %745 : vector<2x64xf32>
    %747 = arith.mulf %742, %746 : vector<2x64xf32>
    %748 = vector.extract_strided_slice %747 {offsets = [0, 0], sizes = [2, 32], strides = [1, 1]} : vector<2x64xf32> to vector<2x32xf32>
    %c8_200 = arith.constant 8 : index
    %c0_201 = arith.constant 0 : index
    %749 = vector.load %arg12[%c8_200, %c0_201] : memref<16x64xf32, #tpu.memory_space<vmem>>, vector<2x32xf32>
    tpu.vector_store %arg12[%c8_200, %c0_201], %748 {strides = array<i32>} : memref<16x64xf32, #tpu.memory_space<vmem>>, vector<2x32xf32>,
    %750 = vector.extract_strided_slice %747 {offsets = [0, 32], sizes = [2, 32], strides = [1, 1]} : vector<2x64xf32> to vector<2x32xf32>
    %c6_202 = arith.constant 6 : index
    %c32_203 = arith.constant 32 : index
    %751 = vector.load %arg12[%c6_202, %c32_203] : memref<16x64xf32, #tpu.memory_space<vmem>>, vector<2x32xf32>
    tpu.vector_store %arg12[%c6_202, %c32_203], %750 {strides = array<i32>} : memref<16x64xf32, #tpu.memory_space<vmem>>, vector<2x32xf32>,
    %cst_204 = arith.constant dense<0.000000e+00> : vector<2x256xf32>
    %752 = tpu.matmul %747, %577, %cst_204 {dimension_numbers = #tpu.dot_dimension_numbers<[1], [0], [0], [1], [0, 0, 1, 1], [], []>} : vector<2x64xf32>, vector<64x256xf32>, vector<2x256xf32> -> vector<2x256xf32>
    %753 = vector.extract_strided_slice %580 {offsets = [10, 0], sizes = [2, 256], strides = [1, 1]} : vector<16x256xf32> to vector<2x256xf32>
    %754 = vector.extract_strided_slice %581 {offsets = [4, 0], sizes = [2, 256], strides = [1, 1]} : vector<16x256xf32> to vector<2x256xf32>
    %755 = arith.addf %753, %754 : vector<2x256xf32>
    %756 = arith.addf %755, %752 : vector<2x256xf32>
    %757 = vector.extract_strided_slice %756 {offsets = [0, 0], sizes = [2, 64], strides = [1, 1]} : vector<2x256xf32> to vector<2x64xf32>
    %758 = arith.negf %757 : vector<2x64xf32>
    %759 = math.exp %758 : vector<2x64xf32>
    %cst_205 = arith.constant 1.000000e+00 : f32
    %760 = vector.broadcast %cst_205 : f32 to vector<2x64xf32>
    %761 = arith.addf %760, %759 : vector<2x64xf32>
    %762 = arith.divf %760, %761 : vector<2x64xf32>
    %763 = vector.extract_strided_slice %756 {offsets = [0, 64], sizes = [2, 64], strides = [1, 1]} : vector<2x256xf32> to vector<2x64xf32>
    %764 = arith.negf %763 : vector<2x64xf32>
    %765 = math.exp %764 : vector<2x64xf32>
    %cst_206 = arith.constant 1.000000e+00 : f32
    %766 = vector.broadcast %cst_206 : f32 to vector<2x64xf32>
    %767 = arith.addf %766, %765 : vector<2x64xf32>
    %768 = arith.divf %766, %767 : vector<2x64xf32>
    %769 = vector.extract_strided_slice %756 {offsets = [0, 128], sizes = [2, 64], strides = [1, 1]} : vector<2x256xf32> to vector<2x64xf32>
    %770 = math.tanh %769 : vector<2x64xf32>
    %771 = vector.extract_strided_slice %756 {offsets = [0, 192], sizes = [2, 64], strides = [1, 1]} : vector<2x256xf32> to vector<2x64xf32>
    %772 = arith.negf %771 : vector<2x64xf32>
    %773 = math.exp %772 : vector<2x64xf32>
    %cst_207 = arith.constant 1.000000e+00 : f32
    %774 = vector.broadcast %cst_207 : f32 to vector<2x64xf32>
    %775 = arith.addf %774, %773 : vector<2x64xf32>
    %776 = arith.divf %774, %775 : vector<2x64xf32>
    %777 = arith.mulf %768, %745 : vector<2x64xf32>
    %778 = arith.mulf %762, %770 : vector<2x64xf32>
    %779 = arith.addf %777, %778 : vector<2x64xf32>
    %780 = math.tanh %779 : vector<2x64xf32>
    %781 = arith.mulf %776, %780 : vector<2x64xf32>
    %782 = vector.extract_strided_slice %781 {offsets = [0, 0], sizes = [2, 32], strides = [1, 1]} : vector<2x64xf32> to vector<2x32xf32>
    %c10_208 = arith.constant 10 : index
    %c0_209 = arith.constant 0 : index
    %783 = vector.load %arg12[%c10_208, %c0_209] : memref<16x64xf32, #tpu.memory_space<vmem>>, vector<2x32xf32>
    tpu.vector_store %arg12[%c10_208, %c0_209], %782 {strides = array<i32>} : memref<16x64xf32, #tpu.memory_space<vmem>>, vector<2x32xf32>,
    %784 = vector.extract_strided_slice %781 {offsets = [0, 32], sizes = [2, 32], strides = [1, 1]} : vector<2x64xf32> to vector<2x32xf32>
    %c4_210 = arith.constant 4 : index
    %c32_211 = arith.constant 32 : index
    %785 = vector.load %arg12[%c4_210, %c32_211] : memref<16x64xf32, #tpu.memory_space<vmem>>, vector<2x32xf32>
    tpu.vector_store %arg12[%c4_210, %c32_211], %784 {strides = array<i32>} : memref<16x64xf32, #tpu.memory_space<vmem>>, vector<2x32xf32>,
    %cst_212 = arith.constant dense<0.000000e+00> : vector<2x256xf32>
    %786 = tpu.matmul %781, %577, %cst_212 {dimension_numbers = #tpu.dot_dimension_numbers<[1], [0], [0], [1], [0, 0, 1, 1], [], []>} : vector<2x64xf32>, vector<64x256xf32>, vector<2x256xf32> -> vector<2x256xf32>
    %787 = vector.extract_strided_slice %580 {offsets = [12, 0], sizes = [2, 256], strides = [1, 1]} : vector<16x256xf32> to vector<2x256xf32>
    %788 = vector.extract_strided_slice %581 {offsets = [2, 0], sizes = [2, 256], strides = [1, 1]} : vector<16x256xf32> to vector<2x256xf32>
    %789 = arith.addf %787, %788 : vector<2x256xf32>
    %790 = arith.addf %789, %786 : vector<2x256xf32>
    %791 = vector.extract_strided_slice %790 {offsets = [0, 0], sizes = [2, 64], strides = [1, 1]} : vector<2x256xf32> to vector<2x64xf32>
    %792 = arith.negf %791 : vector<2x64xf32>
    %793 = math.exp %792 : vector<2x64xf32>
    %cst_213 = arith.constant 1.000000e+00 : f32
    %794 = vector.broadcast %cst_213 : f32 to vector<2x64xf32>
    %795 = arith.addf %794, %793 : vector<2x64xf32>
    %796 = arith.divf %794, %795 : vector<2x64xf32>
    %797 = vector.extract_strided_slice %790 {offsets = [0, 64], sizes = [2, 64], strides = [1, 1]} : vector<2x256xf32> to vector<2x64xf32>
    %798 = arith.negf %797 : vector<2x64xf32>
    %799 = math.exp %798 : vector<2x64xf32>
    %cst_214 = arith.constant 1.000000e+00 : f32
    %800 = vector.broadcast %cst_214 : f32 to vector<2x64xf32>
    %801 = arith.addf %800, %799 : vector<2x64xf32>
    %802 = arith.divf %800, %801 : vector<2x64xf32>
    %803 = vector.extract_strided_slice %790 {offsets = [0, 128], sizes = [2, 64], strides = [1, 1]} : vector<2x256xf32> to vector<2x64xf32>
    %804 = math.tanh %803 : vector<2x64xf32>
    %805 = vector.extract_strided_slice %790 {offsets = [0, 192], sizes = [2, 64], strides = [1, 1]} : vector<2x256xf32> to vector<2x64xf32>
    %806 = arith.negf %805 : vector<2x64xf32>
    %807 = math.exp %806 : vector<2x64xf32>
    %cst_215 = arith.constant 1.000000e+00 : f32
    %808 = vector.broadcast %cst_215 : f32 to vector<2x64xf32>
    %809 = arith.addf %808, %807 : vector<2x64xf32>
    %810 = arith.divf %808, %809 : vector<2x64xf32>
    %811 = arith.mulf %802, %779 : vector<2x64xf32>
    %812 = arith.mulf %796, %804 : vector<2x64xf32>
    %813 = arith.addf %811, %812 : vector<2x64xf32>
    %814 = math.tanh %813 : vector<2x64xf32>
    %815 = arith.mulf %810, %814 : vector<2x64xf32>
    %816 = vector.extract_strided_slice %815 {offsets = [0, 0], sizes = [2, 32], strides = [1, 1]} : vector<2x64xf32> to vector<2x32xf32>
    %c12_216 = arith.constant 12 : index
    %c0_217 = arith.constant 0 : index
    %817 = vector.load %arg12[%c12_216, %c0_217] : memref<16x64xf32, #tpu.memory_space<vmem>>, vector<2x32xf32>
    tpu.vector_store %arg12[%c12_216, %c0_217], %816 {strides = array<i32>} : memref<16x64xf32, #tpu.memory_space<vmem>>, vector<2x32xf32>,
    %818 = vector.extract_strided_slice %815 {offsets = [0, 32], sizes = [2, 32], strides = [1, 1]} : vector<2x64xf32> to vector<2x32xf32>
    %c2_218 = arith.constant 2 : index
    %c32_219 = arith.constant 32 : index
    %819 = vector.load %arg12[%c2_218, %c32_219] : memref<16x64xf32, #tpu.memory_space<vmem>>, vector<2x32xf32>
    tpu.vector_store %arg12[%c2_218, %c32_219], %818 {strides = array<i32>} : memref<16x64xf32, #tpu.memory_space<vmem>>, vector<2x32xf32>,
    %cst_220 = arith.constant dense<0.000000e+00> : vector<2x256xf32>
    %820 = tpu.matmul %815, %577, %cst_220 {dimension_numbers = #tpu.dot_dimension_numbers<[1], [0], [0], [1], [0, 0, 1, 1], [], []>} : vector<2x64xf32>, vector<64x256xf32>, vector<2x256xf32> -> vector<2x256xf32>
    %821 = vector.extract_strided_slice %580 {offsets = [14, 0], sizes = [2, 256], strides = [1, 1]} : vector<16x256xf32> to vector<2x256xf32>
    %822 = vector.extract_strided_slice %581 {offsets = [0, 0], sizes = [2, 256], strides = [1, 1]} : vector<16x256xf32> to vector<2x256xf32>
    %823 = arith.addf %821, %822 : vector<2x256xf32>
    %824 = arith.addf %823, %820 : vector<2x256xf32>
    %825 = vector.extract_strided_slice %824 {offsets = [0, 0], sizes = [2, 64], strides = [1, 1]} : vector<2x256xf32> to vector<2x64xf32>
    %826 = arith.negf %825 : vector<2x64xf32>
    %827 = math.exp %826 : vector<2x64xf32>
    %cst_221 = arith.constant 1.000000e+00 : f32
    %828 = vector.broadcast %cst_221 : f32 to vector<2x64xf32>
    %829 = arith.addf %828, %827 : vector<2x64xf32>
    %830 = arith.divf %828, %829 : vector<2x64xf32>
    %831 = vector.extract_strided_slice %824 {offsets = [0, 64], sizes = [2, 64], strides = [1, 1]} : vector<2x256xf32> to vector<2x64xf32>
    %832 = arith.negf %831 : vector<2x64xf32>
    %833 = math.exp %832 : vector<2x64xf32>
    %cst_222 = arith.constant 1.000000e+00 : f32
    %834 = vector.broadcast %cst_222 : f32 to vector<2x64xf32>
    %835 = arith.addf %834, %833 : vector<2x64xf32>
    %836 = arith.divf %834, %835 : vector<2x64xf32>
    %837 = vector.extract_strided_slice %824 {offsets = [0, 128], sizes = [2, 64], strides = [1, 1]} : vector<2x256xf32> to vector<2x64xf32>
    %838 = math.tanh %837 : vector<2x64xf32>
    %839 = vector.extract_strided_slice %824 {offsets = [0, 192], sizes = [2, 64], strides = [1, 1]} : vector<2x256xf32> to vector<2x64xf32>
    %840 = arith.negf %839 : vector<2x64xf32>
    %841 = math.exp %840 : vector<2x64xf32>
    %cst_223 = arith.constant 1.000000e+00 : f32
    %842 = vector.broadcast %cst_223 : f32 to vector<2x64xf32>
    %843 = arith.addf %842, %841 : vector<2x64xf32>
    %844 = arith.divf %842, %843 : vector<2x64xf32>
    %845 = arith.mulf %836, %813 : vector<2x64xf32>
    %846 = arith.mulf %830, %838 : vector<2x64xf32>
    %847 = arith.addf %845, %846 : vector<2x64xf32>
    %848 = math.tanh %847 : vector<2x64xf32>
    %849 = arith.mulf %844, %848 : vector<2x64xf32>
    %850 = vector.extract_strided_slice %849 {offsets = [0, 0], sizes = [2, 32], strides = [1, 1]} : vector<2x64xf32> to vector<2x32xf32>
    %c14_224 = arith.constant 14 : index
    %c0_225 = arith.constant 0 : index
    %851 = vector.load %arg12[%c14_224, %c0_225] : memref<16x64xf32, #tpu.memory_space<vmem>>, vector<2x32xf32>
    tpu.vector_store %arg12[%c14_224, %c0_225], %850 {strides = array<i32>} : memref<16x64xf32, #tpu.memory_space<vmem>>, vector<2x32xf32>,
    %852 = vector.extract_strided_slice %849 {offsets = [0, 32], sizes = [2, 32], strides = [1, 1]} : vector<2x64xf32> to vector<2x32xf32>
    %c0_226 = arith.constant 0 : index
    %c32_227 = arith.constant 32 : index
    %853 = vector.load %arg12[%c0_226, %c32_227] : memref<16x64xf32, #tpu.memory_space<vmem>>, vector<2x32xf32>
    tpu.vector_store %arg12[%c0_226, %c32_227], %852 {strides = array<i32>} : memref<16x64xf32, #tpu.memory_space<vmem>>, vector<2x32xf32>,
    %c0_228 = arith.constant 0 : index
    %c0_229 = arith.constant 0 : index
    %854 = vector.load %arg12[%c0_228, %c0_229] : memref<16x64xf32, #tpu.memory_space<vmem>>, vector<16x64xf32>
    %c2_230 = arith.constant 2 : index
    %c0_231 = arith.constant 0 : index
    %c0_232 = arith.constant 0 : index
    %855 = vector.load %arg3[%c2_230, %c0_231, %c0_232] : memref<5x64x256xf32, #tpu.memory_space<vmem>>, vector<1x64x256xf32>
    %856 = vector.shape_cast %855 : vector<1x64x256xf32> to vector<64x256xf32>
    %c2_233 = arith.constant 2 : index
    %c0_234 = arith.constant 0 : index
    %c0_235 = arith.constant 0 : index
    %857 = vector.load %arg4[%c2_233, %c0_234, %c0_235] : memref<5x64x256xf32, #tpu.memory_space<vmem>>, vector<1x64x256xf32>
    %858 = vector.shape_cast %857 : vector<1x64x256xf32> to vector<64x256xf32>
    %c3 = arith.constant 3 : index
    %c0_236 = arith.constant 0 : index
    %c0_237 = arith.constant 0 : index
    %859 = vector.load %arg5[%c3, %c0_236, %c0_237] : memref<6x1x256xf32, #tpu.memory_space<vmem>>, vector<1x1x256xf32>
    %860 = vector.shape_cast %859 : vector<1x1x256xf32> to vector<1x256xf32>
    %c3_238 = arith.constant 3 : index
    %c0_239 = arith.constant 0 : index
    %c0_240 = arith.constant 0 : index
    %861 = vector.load %arg6[%c3_238, %c0_239, %c0_240] : memref<6x64x256xf32, #tpu.memory_space<vmem>>, vector<1x64x256xf32>
    %862 = vector.shape_cast %861 : vector<1x64x256xf32> to vector<64x256xf32>
    %cst_241 = arith.constant dense<0.000000e+00> : vector<16x256xf32>
    %863 = tpu.matmul %854, %856, %cst_241 {dimension_numbers = #tpu.dot_dimension_numbers<[1], [0], [0], [1], [0, 0, 1, 1], [], []>} : vector<16x64xf32>, vector<64x256xf32>, vector<16x256xf32> -> vector<16x256xf32>
    %864 = vector.broadcast %860 : vector<1x256xf32> to vector<16x256xf32>
    %865 = arith.addf %863, %864 : vector<16x256xf32>
    %cst_242 = arith.constant dense<0.000000e+00> : vector<16x256xf32>
    %866 = tpu.matmul %854, %858, %cst_242 {dimension_numbers = #tpu.dot_dimension_numbers<[1], [0], [0], [1], [0, 0, 1, 1], [], []>} : vector<16x64xf32>, vector<64x256xf32>, vector<16x256xf32> -> vector<16x256xf32>
    %cst_243 = arith.constant dense<0.000000e+00> : vector<2x256xf32>
    %867 = tpu.matmul %279, %862, %cst_243 {dimension_numbers = #tpu.dot_dimension_numbers<[1], [0], [0], [1], [0, 0, 1, 1], [], []>} : vector<2x64xf32>, vector<64x256xf32>, vector<2x256xf32> -> vector<2x256xf32>
    %868 = vector.extract_strided_slice %865 {offsets = [0, 0], sizes = [2, 256], strides = [1, 1]} : vector<16x256xf32> to vector<2x256xf32>
    %869 = vector.extract_strided_slice %866 {offsets = [14, 0], sizes = [2, 256], strides = [1, 1]} : vector<16x256xf32> to vector<2x256xf32>
    %870 = arith.addf %868, %869 : vector<2x256xf32>
    %871 = arith.addf %870, %867 : vector<2x256xf32>
    %872 = vector.extract_strided_slice %871 {offsets = [0, 0], sizes = [2, 64], strides = [1, 1]} : vector<2x256xf32> to vector<2x64xf32>
    %873 = arith.negf %872 : vector<2x64xf32>
    %874 = math.exp %873 : vector<2x64xf32>
    %cst_244 = arith.constant 1.000000e+00 : f32
    %875 = vector.broadcast %cst_244 : f32 to vector<2x64xf32>
    %876 = arith.addf %875, %874 : vector<2x64xf32>
    %877 = arith.divf %875, %876 : vector<2x64xf32>
    %878 = vector.extract_strided_slice %871 {offsets = [0, 64], sizes = [2, 64], strides = [1, 1]} : vector<2x256xf32> to vector<2x64xf32>
    %879 = arith.negf %878 : vector<2x64xf32>
    %880 = math.exp %879 : vector<2x64xf32>
    %cst_245 = arith.constant 1.000000e+00 : f32
    %881 = vector.broadcast %cst_245 : f32 to vector<2x64xf32>
    %882 = arith.addf %881, %880 : vector<2x64xf32>
    %883 = arith.divf %881, %882 : vector<2x64xf32>
    %884 = vector.extract_strided_slice %871 {offsets = [0, 128], sizes = [2, 64], strides = [1, 1]} : vector<2x256xf32> to vector<2x64xf32>
    %885 = math.tanh %884 : vector<2x64xf32>
    %886 = vector.extract_strided_slice %871 {offsets = [0, 192], sizes = [2, 64], strides = [1, 1]} : vector<2x256xf32> to vector<2x64xf32>
    %887 = arith.negf %886 : vector<2x64xf32>
    %888 = math.exp %887 : vector<2x64xf32>
    %cst_246 = arith.constant 1.000000e+00 : f32
    %889 = vector.broadcast %cst_246 : f32 to vector<2x64xf32>
    %890 = arith.addf %889, %888 : vector<2x64xf32>
    %891 = arith.divf %889, %890 : vector<2x64xf32>
    %892 = arith.mulf %883, %277 : vector<2x64xf32>
    %893 = arith.mulf %877, %885 : vector<2x64xf32>
    %894 = arith.addf %892, %893 : vector<2x64xf32>
    %895 = math.tanh %894 : vector<2x64xf32>
    %896 = arith.mulf %891, %895 : vector<2x64xf32>
    %897 = vector.extract_strided_slice %896 {offsets = [0, 0], sizes = [2, 32], strides = [1, 1]} : vector<2x64xf32> to vector<2x32xf32>
    %c0_247 = arith.constant 0 : index
    %c0_248 = arith.constant 0 : index
    %898 = vector.load %arg13[%c0_247, %c0_248] : memref<16x64xf32, #tpu.memory_space<vmem>>, vector<2x32xf32>
    tpu.vector_store %arg13[%c0_247, %c0_248], %897 {strides = array<i32>} : memref<16x64xf32, #tpu.memory_space<vmem>>, vector<2x32xf32>,
    %899 = vector.extract_strided_slice %896 {offsets = [0, 32], sizes = [2, 32], strides = [1, 1]} : vector<2x64xf32> to vector<2x32xf32>
    %c14_249 = arith.constant 14 : index
    %c32_250 = arith.constant 32 : index
    %900 = vector.load %arg13[%c14_249, %c32_250] : memref<16x64xf32, #tpu.memory_space<vmem>>, vector<2x32xf32>
    tpu.vector_store %arg13[%c14_249, %c32_250], %899 {strides = array<i32>} : memref<16x64xf32, #tpu.memory_space<vmem>>, vector<2x32xf32>,
    %cst_251 = arith.constant dense<0.000000e+00> : vector<2x256xf32>
    %901 = tpu.matmul %896, %862, %cst_251 {dimension_numbers = #tpu.dot_dimension_numbers<[1], [0], [0], [1], [0, 0, 1, 1], [], []>} : vector<2x64xf32>, vector<64x256xf32>, vector<2x256xf32> -> vector<2x256xf32>
    %902 = vector.extract_strided_slice %865 {offsets = [2, 0], sizes = [2, 256], strides = [1, 1]} : vector<16x256xf32> to vector<2x256xf32>
    %903 = vector.extract_strided_slice %866 {offsets = [12, 0], sizes = [2, 256], strides = [1, 1]} : vector<16x256xf32> to vector<2x256xf32>
    %904 = arith.addf %902, %903 : vector<2x256xf32>
    %905 = arith.addf %904, %901 : vector<2x256xf32>
    %906 = vector.extract_strided_slice %905 {offsets = [0, 0], sizes = [2, 64], strides = [1, 1]} : vector<2x256xf32> to vector<2x64xf32>
    %907 = arith.negf %906 : vector<2x64xf32>
    %908 = math.exp %907 : vector<2x64xf32>
    %cst_252 = arith.constant 1.000000e+00 : f32
    %909 = vector.broadcast %cst_252 : f32 to vector<2x64xf32>
    %910 = arith.addf %909, %908 : vector<2x64xf32>
    %911 = arith.divf %909, %910 : vector<2x64xf32>
    %912 = vector.extract_strided_slice %905 {offsets = [0, 64], sizes = [2, 64], strides = [1, 1]} : vector<2x256xf32> to vector<2x64xf32>
    %913 = arith.negf %912 : vector<2x64xf32>
    %914 = math.exp %913 : vector<2x64xf32>
    %cst_253 = arith.constant 1.000000e+00 : f32
    %915 = vector.broadcast %cst_253 : f32 to vector<2x64xf32>
    %916 = arith.addf %915, %914 : vector<2x64xf32>
    %917 = arith.divf %915, %916 : vector<2x64xf32>
    %918 = vector.extract_strided_slice %905 {offsets = [0, 128], sizes = [2, 64], strides = [1, 1]} : vector<2x256xf32> to vector<2x64xf32>
    %919 = math.tanh %918 : vector<2x64xf32>
    %920 = vector.extract_strided_slice %905 {offsets = [0, 192], sizes = [2, 64], strides = [1, 1]} : vector<2x256xf32> to vector<2x64xf32>
    %921 = arith.negf %920 : vector<2x64xf32>
    %922 = math.exp %921 : vector<2x64xf32>
    %cst_254 = arith.constant 1.000000e+00 : f32
    %923 = vector.broadcast %cst_254 : f32 to vector<2x64xf32>
    %924 = arith.addf %923, %922 : vector<2x64xf32>
    %925 = arith.divf %923, %924 : vector<2x64xf32>
    %926 = arith.mulf %917, %894 : vector<2x64xf32>
    %927 = arith.mulf %911, %919 : vector<2x64xf32>
    %928 = arith.addf %926, %927 : vector<2x64xf32>
    %929 = math.tanh %928 : vector<2x64xf32>
    %930 = arith.mulf %925, %929 : vector<2x64xf32>
    %931 = vector.extract_strided_slice %930 {offsets = [0, 0], sizes = [2, 32], strides = [1, 1]} : vector<2x64xf32> to vector<2x32xf32>
    %c2_255 = arith.constant 2 : index
    %c0_256 = arith.constant 0 : index
    %932 = vector.load %arg13[%c2_255, %c0_256] : memref<16x64xf32, #tpu.memory_space<vmem>>, vector<2x32xf32>
    tpu.vector_store %arg13[%c2_255, %c0_256], %931 {strides = array<i32>} : memref<16x64xf32, #tpu.memory_space<vmem>>, vector<2x32xf32>,
    %933 = vector.extract_strided_slice %930 {offsets = [0, 32], sizes = [2, 32], strides = [1, 1]} : vector<2x64xf32> to vector<2x32xf32>
    %c12_257 = arith.constant 12 : index
    %c32_258 = arith.constant 32 : index
    %934 = vector.load %arg13[%c12_257, %c32_258] : memref<16x64xf32, #tpu.memory_space<vmem>>, vector<2x32xf32>
    tpu.vector_store %arg13[%c12_257, %c32_258], %933 {strides = array<i32>} : memref<16x64xf32, #tpu.memory_space<vmem>>, vector<2x32xf32>,
    %cst_259 = arith.constant dense<0.000000e+00> : vector<2x256xf32>
    %935 = tpu.matmul %930, %862, %cst_259 {dimension_numbers = #tpu.dot_dimension_numbers<[1], [0], [0], [1], [0, 0, 1, 1], [], []>} : vector<2x64xf32>, vector<64x256xf32>, vector<2x256xf32> -> vector<2x256xf32>
    %936 = vector.extract_strided_slice %865 {offsets = [4, 0], sizes = [2, 256], strides = [1, 1]} : vector<16x256xf32> to vector<2x256xf32>
    %937 = vector.extract_strided_slice %866 {offsets = [10, 0], sizes = [2, 256], strides = [1, 1]} : vector<16x256xf32> to vector<2x256xf32>
    %938 = arith.addf %936, %937 : vector<2x256xf32>
    %939 = arith.addf %938, %935 : vector<2x256xf32>
    %940 = vector.extract_strided_slice %939 {offsets = [0, 0], sizes = [2, 64], strides = [1, 1]} : vector<2x256xf32> to vector<2x64xf32>
    %941 = arith.negf %940 : vector<2x64xf32>
    %942 = math.exp %941 : vector<2x64xf32>
    %cst_260 = arith.constant 1.000000e+00 : f32
    %943 = vector.broadcast %cst_260 : f32 to vector<2x64xf32>
    %944 = arith.addf %943, %942 : vector<2x64xf32>
    %945 = arith.divf %943, %944 : vector<2x64xf32>
    %946 = vector.extract_strided_slice %939 {offsets = [0, 64], sizes = [2, 64], strides = [1, 1]} : vector<2x256xf32> to vector<2x64xf32>
    %947 = arith.negf %946 : vector<2x64xf32>
    %948 = math.exp %947 : vector<2x64xf32>
    %cst_261 = arith.constant 1.000000e+00 : f32
    %949 = vector.broadcast %cst_261 : f32 to vector<2x64xf32>
    %950 = arith.addf %949, %948 : vector<2x64xf32>
    %951 = arith.divf %949, %950 : vector<2x64xf32>
    %952 = vector.extract_strided_slice %939 {offsets = [0, 128], sizes = [2, 64], strides = [1, 1]} : vector<2x256xf32> to vector<2x64xf32>
    %953 = math.tanh %952 : vector<2x64xf32>
    %954 = vector.extract_strided_slice %939 {offsets = [0, 192], sizes = [2, 64], strides = [1, 1]} : vector<2x256xf32> to vector<2x64xf32>
    %955 = arith.negf %954 : vector<2x64xf32>
    %956 = math.exp %955 : vector<2x64xf32>
    %cst_262 = arith.constant 1.000000e+00 : f32
    %957 = vector.broadcast %cst_262 : f32 to vector<2x64xf32>
    %958 = arith.addf %957, %956 : vector<2x64xf32>
    %959 = arith.divf %957, %958 : vector<2x64xf32>
    %960 = arith.mulf %951, %928 : vector<2x64xf32>
    %961 = arith.mulf %945, %953 : vector<2x64xf32>
    %962 = arith.addf %960, %961 : vector<2x64xf32>
    %963 = math.tanh %962 : vector<2x64xf32>
    %964 = arith.mulf %959, %963 : vector<2x64xf32>
    %965 = vector.extract_strided_slice %964 {offsets = [0, 0], sizes = [2, 32], strides = [1, 1]} : vector<2x64xf32> to vector<2x32xf32>
    %c4_263 = arith.constant 4 : index
    %c0_264 = arith.constant 0 : index
    %966 = vector.load %arg13[%c4_263, %c0_264] : memref<16x64xf32, #tpu.memory_space<vmem>>, vector<2x32xf32>
    tpu.vector_store %arg13[%c4_263, %c0_264], %965 {strides = array<i32>} : memref<16x64xf32, #tpu.memory_space<vmem>>, vector<2x32xf32>,
    %967 = vector.extract_strided_slice %964 {offsets = [0, 32], sizes = [2, 32], strides = [1, 1]} : vector<2x64xf32> to vector<2x32xf32>
    %c10_265 = arith.constant 10 : index
    %c32_266 = arith.constant 32 : index
    %968 = vector.load %arg13[%c10_265, %c32_266] : memref<16x64xf32, #tpu.memory_space<vmem>>, vector<2x32xf32>
    tpu.vector_store %arg13[%c10_265, %c32_266], %967 {strides = array<i32>} : memref<16x64xf32, #tpu.memory_space<vmem>>, vector<2x32xf32>,
    %cst_267 = arith.constant dense<0.000000e+00> : vector<2x256xf32>
    %969 = tpu.matmul %964, %862, %cst_267 {dimension_numbers = #tpu.dot_dimension_numbers<[1], [0], [0], [1], [0, 0, 1, 1], [], []>} : vector<2x64xf32>, vector<64x256xf32>, vector<2x256xf32> -> vector<2x256xf32>
    %970 = vector.extract_strided_slice %865 {offsets = [6, 0], sizes = [2, 256], strides = [1, 1]} : vector<16x256xf32> to vector<2x256xf32>
    %971 = vector.extract_strided_slice %866 {offsets = [8, 0], sizes = [2, 256], strides = [1, 1]} : vector<16x256xf32> to vector<2x256xf32>
    %972 = arith.addf %970, %971 : vector<2x256xf32>
    %973 = arith.addf %972, %969 : vector<2x256xf32>
    %974 = vector.extract_strided_slice %973 {offsets = [0, 0], sizes = [2, 64], strides = [1, 1]} : vector<2x256xf32> to vector<2x64xf32>
    %975 = arith.negf %974 : vector<2x64xf32>
    %976 = math.exp %975 : vector<2x64xf32>
    %cst_268 = arith.constant 1.000000e+00 : f32
    %977 = vector.broadcast %cst_268 : f32 to vector<2x64xf32>
    %978 = arith.addf %977, %976 : vector<2x64xf32>
    %979 = arith.divf %977, %978 : vector<2x64xf32>
    %980 = vector.extract_strided_slice %973 {offsets = [0, 64], sizes = [2, 64], strides = [1, 1]} : vector<2x256xf32> to vector<2x64xf32>
    %981 = arith.negf %980 : vector<2x64xf32>
    %982 = math.exp %981 : vector<2x64xf32>
    %cst_269 = arith.constant 1.000000e+00 : f32
    %983 = vector.broadcast %cst_269 : f32 to vector<2x64xf32>
    %984 = arith.addf %983, %982 : vector<2x64xf32>
    %985 = arith.divf %983, %984 : vector<2x64xf32>
    %986 = vector.extract_strided_slice %973 {offsets = [0, 128], sizes = [2, 64], strides = [1, 1]} : vector<2x256xf32> to vector<2x64xf32>
    %987 = math.tanh %986 : vector<2x64xf32>
    %988 = vector.extract_strided_slice %973 {offsets = [0, 192], sizes = [2, 64], strides = [1, 1]} : vector<2x256xf32> to vector<2x64xf32>
    %989 = arith.negf %988 : vector<2x64xf32>
    %990 = math.exp %989 : vector<2x64xf32>
    %cst_270 = arith.constant 1.000000e+00 : f32
    %991 = vector.broadcast %cst_270 : f32 to vector<2x64xf32>
    %992 = arith.addf %991, %990 : vector<2x64xf32>
    %993 = arith.divf %991, %992 : vector<2x64xf32>
    %994 = arith.mulf %985, %962 : vector<2x64xf32>
    %995 = arith.mulf %979, %987 : vector<2x64xf32>
    %996 = arith.addf %994, %995 : vector<2x64xf32>
    %997 = math.tanh %996 : vector<2x64xf32>
    %998 = arith.mulf %993, %997 : vector<2x64xf32>
    %999 = vector.extract_strided_slice %998 {offsets = [0, 0], sizes = [2, 32], strides = [1, 1]} : vector<2x64xf32> to vector<2x32xf32>
    %c6_271 = arith.constant 6 : index
    %c0_272 = arith.constant 0 : index
    %1000 = vector.load %arg13[%c6_271, %c0_272] : memref<16x64xf32, #tpu.memory_space<vmem>>, vector<2x32xf32>
    tpu.vector_store %arg13[%c6_271, %c0_272], %999 {strides = array<i32>} : memref<16x64xf32, #tpu.memory_space<vmem>>, vector<2x32xf32>,
    %1001 = vector.extract_strided_slice %998 {offsets = [0, 32], sizes = [2, 32], strides = [1, 1]} : vector<2x64xf32> to vector<2x32xf32>
    %c8_273 = arith.constant 8 : index
    %c32_274 = arith.constant 32 : index
    %1002 = vector.load %arg13[%c8_273, %c32_274] : memref<16x64xf32, #tpu.memory_space<vmem>>, vector<2x32xf32>
    tpu.vector_store %arg13[%c8_273, %c32_274], %1001 {strides = array<i32>} : memref<16x64xf32, #tpu.memory_space<vmem>>, vector<2x32xf32>,
    %cst_275 = arith.constant dense<0.000000e+00> : vector<2x256xf32>
    %1003 = tpu.matmul %998, %862, %cst_275 {dimension_numbers = #tpu.dot_dimension_numbers<[1], [0], [0], [1], [0, 0, 1, 1], [], []>} : vector<2x64xf32>, vector<64x256xf32>, vector<2x256xf32> -> vector<2x256xf32>
    %1004 = vector.extract_strided_slice %865 {offsets = [8, 0], sizes = [2, 256], strides = [1, 1]} : vector<16x256xf32> to vector<2x256xf32>
    %1005 = vector.extract_strided_slice %866 {offsets = [6, 0], sizes = [2, 256], strides = [1, 1]} : vector<16x256xf32> to vector<2x256xf32>
    %1006 = arith.addf %1004, %1005 : vector<2x256xf32>
    %1007 = arith.addf %1006, %1003 : vector<2x256xf32>
    %1008 = vector.extract_strided_slice %1007 {offsets = [0, 0], sizes = [2, 64], strides = [1, 1]} : vector<2x256xf32> to vector<2x64xf32>
    %1009 = arith.negf %1008 : vector<2x64xf32>
    %1010 = math.exp %1009 : vector<2x64xf32>
    %cst_276 = arith.constant 1.000000e+00 : f32
    %1011 = vector.broadcast %cst_276 : f32 to vector<2x64xf32>
    %1012 = arith.addf %1011, %1010 : vector<2x64xf32>
    %1013 = arith.divf %1011, %1012 : vector<2x64xf32>
    %1014 = vector.extract_strided_slice %1007 {offsets = [0, 64], sizes = [2, 64], strides = [1, 1]} : vector<2x256xf32> to vector<2x64xf32>
    %1015 = arith.negf %1014 : vector<2x64xf32>
    %1016 = math.exp %1015 : vector<2x64xf32>
    %cst_277 = arith.constant 1.000000e+00 : f32
    %1017 = vector.broadcast %cst_277 : f32 to vector<2x64xf32>
    %1018 = arith.addf %1017, %1016 : vector<2x64xf32>
    %1019 = arith.divf %1017, %1018 : vector<2x64xf32>
    %1020 = vector.extract_strided_slice %1007 {offsets = [0, 128], sizes = [2, 64], strides = [1, 1]} : vector<2x256xf32> to vector<2x64xf32>
    %1021 = math.tanh %1020 : vector<2x64xf32>
    %1022 = vector.extract_strided_slice %1007 {offsets = [0, 192], sizes = [2, 64], strides = [1, 1]} : vector<2x256xf32> to vector<2x64xf32>
    %1023 = arith.negf %1022 : vector<2x64xf32>
    %1024 = math.exp %1023 : vector<2x64xf32>
    %cst_278 = arith.constant 1.000000e+00 : f32
    %1025 = vector.broadcast %cst_278 : f32 to vector<2x64xf32>
    %1026 = arith.addf %1025, %1024 : vector<2x64xf32>
    %1027 = arith.divf %1025, %1026 : vector<2x64xf32>
    %1028 = arith.mulf %1019, %996 : vector<2x64xf32>
    %1029 = arith.mulf %1013, %1021 : vector<2x64xf32>
    %1030 = arith.addf %1028, %1029 : vector<2x64xf32>
    %1031 = math.tanh %1030 : vector<2x64xf32>
    %1032 = arith.mulf %1027, %1031 : vector<2x64xf32>
    %1033 = vector.extract_strided_slice %1032 {offsets = [0, 0], sizes = [2, 32], strides = [1, 1]} : vector<2x64xf32> to vector<2x32xf32>
    %c8_279 = arith.constant 8 : index
    %c0_280 = arith.constant 0 : index
    %1034 = vector.load %arg13[%c8_279, %c0_280] : memref<16x64xf32, #tpu.memory_space<vmem>>, vector<2x32xf32>
    tpu.vector_store %arg13[%c8_279, %c0_280], %1033 {strides = array<i32>} : memref<16x64xf32, #tpu.memory_space<vmem>>, vector<2x32xf32>,
    %1035 = vector.extract_strided_slice %1032 {offsets = [0, 32], sizes = [2, 32], strides = [1, 1]} : vector<2x64xf32> to vector<2x32xf32>
    %c6_281 = arith.constant 6 : index
    %c32_282 = arith.constant 32 : index
    %1036 = vector.load %arg13[%c6_281, %c32_282] : memref<16x64xf32, #tpu.memory_space<vmem>>, vector<2x32xf32>
    tpu.vector_store %arg13[%c6_281, %c32_282], %1035 {strides = array<i32>} : memref<16x64xf32, #tpu.memory_space<vmem>>, vector<2x32xf32>,
    %cst_283 = arith.constant dense<0.000000e+00> : vector<2x256xf32>
    %1037 = tpu.matmul %1032, %862, %cst_283 {dimension_numbers = #tpu.dot_dimension_numbers<[1], [0], [0], [1], [0, 0, 1, 1], [], []>} : vector<2x64xf32>, vector<64x256xf32>, vector<2x256xf32> -> vector<2x256xf32>
    %1038 = vector.extract_strided_slice %865 {offsets = [10, 0], sizes = [2, 256], strides = [1, 1]} : vector<16x256xf32> to vector<2x256xf32>
    %1039 = vector.extract_strided_slice %866 {offsets = [4, 0], sizes = [2, 256], strides = [1, 1]} : vector<16x256xf32> to vector<2x256xf32>
    %1040 = arith.addf %1038, %1039 : vector<2x256xf32>
    %1041 = arith.addf %1040, %1037 : vector<2x256xf32>
    %1042 = vector.extract_strided_slice %1041 {offsets = [0, 0], sizes = [2, 64], strides = [1, 1]} : vector<2x256xf32> to vector<2x64xf32>
    %1043 = arith.negf %1042 : vector<2x64xf32>
    %1044 = math.exp %1043 : vector<2x64xf32>
    %cst_284 = arith.constant 1.000000e+00 : f32
    %1045 = vector.broadcast %cst_284 : f32 to vector<2x64xf32>
    %1046 = arith.addf %1045, %1044 : vector<2x64xf32>
    %1047 = arith.divf %1045, %1046 : vector<2x64xf32>
    %1048 = vector.extract_strided_slice %1041 {offsets = [0, 64], sizes = [2, 64], strides = [1, 1]} : vector<2x256xf32> to vector<2x64xf32>
    %1049 = arith.negf %1048 : vector<2x64xf32>
    %1050 = math.exp %1049 : vector<2x64xf32>
    %cst_285 = arith.constant 1.000000e+00 : f32
    %1051 = vector.broadcast %cst_285 : f32 to vector<2x64xf32>
    %1052 = arith.addf %1051, %1050 : vector<2x64xf32>
    %1053 = arith.divf %1051, %1052 : vector<2x64xf32>
    %1054 = vector.extract_strided_slice %1041 {offsets = [0, 128], sizes = [2, 64], strides = [1, 1]} : vector<2x256xf32> to vector<2x64xf32>
    %1055 = math.tanh %1054 : vector<2x64xf32>
    %1056 = vector.extract_strided_slice %1041 {offsets = [0, 192], sizes = [2, 64], strides = [1, 1]} : vector<2x256xf32> to vector<2x64xf32>
    %1057 = arith.negf %1056 : vector<2x64xf32>
    %1058 = math.exp %1057 : vector<2x64xf32>
    %cst_286 = arith.constant 1.000000e+00 : f32
    %1059 = vector.broadcast %cst_286 : f32 to vector<2x64xf32>
    %1060 = arith.addf %1059, %1058 : vector<2x64xf32>
    %1061 = arith.divf %1059, %1060 : vector<2x64xf32>
    %1062 = arith.mulf %1053, %1030 : vector<2x64xf32>
    %1063 = arith.mulf %1047, %1055 : vector<2x64xf32>
    %1064 = arith.addf %1062, %1063 : vector<2x64xf32>
    %1065 = math.tanh %1064 : vector<2x64xf32>
    %1066 = arith.mulf %1061, %1065 : vector<2x64xf32>
    %1067 = vector.extract_strided_slice %1066 {offsets = [0, 0], sizes = [2, 32], strides = [1, 1]} : vector<2x64xf32> to vector<2x32xf32>
    %c10_287 = arith.constant 10 : index
    %c0_288 = arith.constant 0 : index
    %1068 = vector.load %arg13[%c10_287, %c0_288] : memref<16x64xf32, #tpu.memory_space<vmem>>, vector<2x32xf32>
    tpu.vector_store %arg13[%c10_287, %c0_288], %1067 {strides = array<i32>} : memref<16x64xf32, #tpu.memory_space<vmem>>, vector<2x32xf32>,
    %1069 = vector.extract_strided_slice %1066 {offsets = [0, 32], sizes = [2, 32], strides = [1, 1]} : vector<2x64xf32> to vector<2x32xf32>
    %c4_289 = arith.constant 4 : index
    %c32_290 = arith.constant 32 : index
    %1070 = vector.load %arg13[%c4_289, %c32_290] : memref<16x64xf32, #tpu.memory_space<vmem>>, vector<2x32xf32>
    tpu.vector_store %arg13[%c4_289, %c32_290], %1069 {strides = array<i32>} : memref<16x64xf32, #tpu.memory_space<vmem>>, vector<2x32xf32>,
    %cst_291 = arith.constant dense<0.000000e+00> : vector<2x256xf32>
    %1071 = tpu.matmul %1066, %862, %cst_291 {dimension_numbers = #tpu.dot_dimension_numbers<[1], [0], [0], [1], [0, 0, 1, 1], [], []>} : vector<2x64xf32>, vector<64x256xf32>, vector<2x256xf32> -> vector<2x256xf32>
    %1072 = vector.extract_strided_slice %865 {offsets = [12, 0], sizes = [2, 256], strides = [1, 1]} : vector<16x256xf32> to vector<2x256xf32>
    %1073 = vector.extract_strided_slice %866 {offsets = [2, 0], sizes = [2, 256], strides = [1, 1]} : vector<16x256xf32> to vector<2x256xf32>
    %1074 = arith.addf %1072, %1073 : vector<2x256xf32>
    %1075 = arith.addf %1074, %1071 : vector<2x256xf32>
    %1076 = vector.extract_strided_slice %1075 {offsets = [0, 0], sizes = [2, 64], strides = [1, 1]} : vector<2x256xf32> to vector<2x64xf32>
    %1077 = arith.negf %1076 : vector<2x64xf32>
    %1078 = math.exp %1077 : vector<2x64xf32>
    %cst_292 = arith.constant 1.000000e+00 : f32
    %1079 = vector.broadcast %cst_292 : f32 to vector<2x64xf32>
    %1080 = arith.addf %1079, %1078 : vector<2x64xf32>
    %1081 = arith.divf %1079, %1080 : vector<2x64xf32>
    %1082 = vector.extract_strided_slice %1075 {offsets = [0, 64], sizes = [2, 64], strides = [1, 1]} : vector<2x256xf32> to vector<2x64xf32>
    %1083 = arith.negf %1082 : vector<2x64xf32>
    %1084 = math.exp %1083 : vector<2x64xf32>
    %cst_293 = arith.constant 1.000000e+00 : f32
    %1085 = vector.broadcast %cst_293 : f32 to vector<2x64xf32>
    %1086 = arith.addf %1085, %1084 : vector<2x64xf32>
    %1087 = arith.divf %1085, %1086 : vector<2x64xf32>
    %1088 = vector.extract_strided_slice %1075 {offsets = [0, 128], sizes = [2, 64], strides = [1, 1]} : vector<2x256xf32> to vector<2x64xf32>
    %1089 = math.tanh %1088 : vector<2x64xf32>
    %1090 = vector.extract_strided_slice %1075 {offsets = [0, 192], sizes = [2, 64], strides = [1, 1]} : vector<2x256xf32> to vector<2x64xf32>
    %1091 = arith.negf %1090 : vector<2x64xf32>
    %1092 = math.exp %1091 : vector<2x64xf32>
    %cst_294 = arith.constant 1.000000e+00 : f32
    %1093 = vector.broadcast %cst_294 : f32 to vector<2x64xf32>
    %1094 = arith.addf %1093, %1092 : vector<2x64xf32>
    %1095 = arith.divf %1093, %1094 : vector<2x64xf32>
    %1096 = arith.mulf %1087, %1064 : vector<2x64xf32>
    %1097 = arith.mulf %1081, %1089 : vector<2x64xf32>
    %1098 = arith.addf %1096, %1097 : vector<2x64xf32>
    %1099 = math.tanh %1098 : vector<2x64xf32>
    %1100 = arith.mulf %1095, %1099 : vector<2x64xf32>
    %1101 = vector.extract_strided_slice %1100 {offsets = [0, 0], sizes = [2, 32], strides = [1, 1]} : vector<2x64xf32> to vector<2x32xf32>
    %c12_295 = arith.constant 12 : index
    %c0_296 = arith.constant 0 : index
    %1102 = vector.load %arg13[%c12_295, %c0_296] : memref<16x64xf32, #tpu.memory_space<vmem>>, vector<2x32xf32>
    tpu.vector_store %arg13[%c12_295, %c0_296], %1101 {strides = array<i32>} : memref<16x64xf32, #tpu.memory_space<vmem>>, vector<2x32xf32>,
    %1103 = vector.extract_strided_slice %1100 {offsets = [0, 32], sizes = [2, 32], strides = [1, 1]} : vector<2x64xf32> to vector<2x32xf32>
    %c2_297 = arith.constant 2 : index
    %c32_298 = arith.constant 32 : index
    %1104 = vector.load %arg13[%c2_297, %c32_298] : memref<16x64xf32, #tpu.memory_space<vmem>>, vector<2x32xf32>
    tpu.vector_store %arg13[%c2_297, %c32_298], %1103 {strides = array<i32>} : memref<16x64xf32, #tpu.memory_space<vmem>>, vector<2x32xf32>,
    %cst_299 = arith.constant dense<0.000000e+00> : vector<2x256xf32>
    %1105 = tpu.matmul %1100, %862, %cst_299 {dimension_numbers = #tpu.dot_dimension_numbers<[1], [0], [0], [1], [0, 0, 1, 1], [], []>} : vector<2x64xf32>, vector<64x256xf32>, vector<2x256xf32> -> vector<2x256xf32>
    %1106 = vector.extract_strided_slice %865 {offsets = [14, 0], sizes = [2, 256], strides = [1, 1]} : vector<16x256xf32> to vector<2x256xf32>
    %1107 = vector.extract_strided_slice %866 {offsets = [0, 0], sizes = [2, 256], strides = [1, 1]} : vector<16x256xf32> to vector<2x256xf32>
    %1108 = arith.addf %1106, %1107 : vector<2x256xf32>
    %1109 = arith.addf %1108, %1105 : vector<2x256xf32>
    %1110 = vector.extract_strided_slice %1109 {offsets = [0, 0], sizes = [2, 64], strides = [1, 1]} : vector<2x256xf32> to vector<2x64xf32>
    %1111 = arith.negf %1110 : vector<2x64xf32>
    %1112 = math.exp %1111 : vector<2x64xf32>
    %cst_300 = arith.constant 1.000000e+00 : f32
    %1113 = vector.broadcast %cst_300 : f32 to vector<2x64xf32>
    %1114 = arith.addf %1113, %1112 : vector<2x64xf32>
    %1115 = arith.divf %1113, %1114 : vector<2x64xf32>
    %1116 = vector.extract_strided_slice %1109 {offsets = [0, 64], sizes = [2, 64], strides = [1, 1]} : vector<2x256xf32> to vector<2x64xf32>
    %1117 = arith.negf %1116 : vector<2x64xf32>
    %1118 = math.exp %1117 : vector<2x64xf32>
    %cst_301 = arith.constant 1.000000e+00 : f32
    %1119 = vector.broadcast %cst_301 : f32 to vector<2x64xf32>
    %1120 = arith.addf %1119, %1118 : vector<2x64xf32>
    %1121 = arith.divf %1119, %1120 : vector<2x64xf32>
    %1122 = vector.extract_strided_slice %1109 {offsets = [0, 128], sizes = [2, 64], strides = [1, 1]} : vector<2x256xf32> to vector<2x64xf32>
    %1123 = math.tanh %1122 : vector<2x64xf32>
    %1124 = vector.extract_strided_slice %1109 {offsets = [0, 192], sizes = [2, 64], strides = [1, 1]} : vector<2x256xf32> to vector<2x64xf32>
    %1125 = arith.negf %1124 : vector<2x64xf32>
    %1126 = math.exp %1125 : vector<2x64xf32>
    %cst_302 = arith.constant 1.000000e+00 : f32
    %1127 = vector.broadcast %cst_302 : f32 to vector<2x64xf32>
    %1128 = arith.addf %1127, %1126 : vector<2x64xf32>
    %1129 = arith.divf %1127, %1128 : vector<2x64xf32>
    %1130 = arith.mulf %1121, %1098 : vector<2x64xf32>
    %1131 = arith.mulf %1115, %1123 : vector<2x64xf32>
    %1132 = arith.addf %1130, %1131 : vector<2x64xf32>
    %1133 = math.tanh %1132 : vector<2x64xf32>
    %1134 = arith.mulf %1129, %1133 : vector<2x64xf32>
    %1135 = vector.extract_strided_slice %1134 {offsets = [0, 0], sizes = [2, 32], strides = [1, 1]} : vector<2x64xf32> to vector<2x32xf32>
    %c14_303 = arith.constant 14 : index
    %c0_304 = arith.constant 0 : index
    %1136 = vector.load %arg13[%c14_303, %c0_304] : memref<16x64xf32, #tpu.memory_space<vmem>>, vector<2x32xf32>
    tpu.vector_store %arg13[%c14_303, %c0_304], %1135 {strides = array<i32>} : memref<16x64xf32, #tpu.memory_space<vmem>>, vector<2x32xf32>,
    %1137 = vector.extract_strided_slice %1134 {offsets = [0, 32], sizes = [2, 32], strides = [1, 1]} : vector<2x64xf32> to vector<2x32xf32>
    %c0_305 = arith.constant 0 : index
    %c32_306 = arith.constant 32 : index
    %1138 = vector.load %arg13[%c0_305, %c32_306] : memref<16x64xf32, #tpu.memory_space<vmem>>, vector<2x32xf32>
    tpu.vector_store %arg13[%c0_305, %c32_306], %1137 {strides = array<i32>} : memref<16x64xf32, #tpu.memory_space<vmem>>, vector<2x32xf32>,
    %c0_307 = arith.constant 0 : index
    %c0_308 = arith.constant 0 : index
    %1139 = vector.load %arg13[%c0_307, %c0_308] : memref<16x64xf32, #tpu.memory_space<vmem>>, vector<16x64xf32>
    %c3_309 = arith.constant 3 : index
    %c0_310 = arith.constant 0 : index
    %c0_311 = arith.constant 0 : index
    %1140 = vector.load %arg3[%c3_309, %c0_310, %c0_311] : memref<5x64x256xf32, #tpu.memory_space<vmem>>, vector<1x64x256xf32>
    %1141 = vector.shape_cast %1140 : vector<1x64x256xf32> to vector<64x256xf32>
    %c3_312 = arith.constant 3 : index
    %c0_313 = arith.constant 0 : index
    %c0_314 = arith.constant 0 : index
    %1142 = vector.load %arg4[%c3_312, %c0_313, %c0_314] : memref<5x64x256xf32, #tpu.memory_space<vmem>>, vector<1x64x256xf32>
    %1143 = vector.shape_cast %1142 : vector<1x64x256xf32> to vector<64x256xf32>
    %c4_315 = arith.constant 4 : index
    %c0_316 = arith.constant 0 : index
    %c0_317 = arith.constant 0 : index
    %1144 = vector.load %arg5[%c4_315, %c0_316, %c0_317] : memref<6x1x256xf32, #tpu.memory_space<vmem>>, vector<1x1x256xf32>
    %1145 = vector.shape_cast %1144 : vector<1x1x256xf32> to vector<1x256xf32>
    %c4_318 = arith.constant 4 : index
    %c0_319 = arith.constant 0 : index
    %c0_320 = arith.constant 0 : index
    %1146 = vector.load %arg6[%c4_318, %c0_319, %c0_320] : memref<6x64x256xf32, #tpu.memory_space<vmem>>, vector<1x64x256xf32>
    %1147 = vector.shape_cast %1146 : vector<1x64x256xf32> to vector<64x256xf32>
    %cst_321 = arith.constant dense<0.000000e+00> : vector<16x256xf32>
    %1148 = tpu.matmul %1139, %1141, %cst_321 {dimension_numbers = #tpu.dot_dimension_numbers<[1], [0], [0], [1], [0, 0, 1, 1], [], []>} : vector<16x64xf32>, vector<64x256xf32>, vector<16x256xf32> -> vector<16x256xf32>
    %1149 = vector.broadcast %1145 : vector<1x256xf32> to vector<16x256xf32>
    %1150 = arith.addf %1148, %1149 : vector<16x256xf32>
    %cst_322 = arith.constant dense<0.000000e+00> : vector<16x256xf32>
    %1151 = tpu.matmul %1139, %1143, %cst_322 {dimension_numbers = #tpu.dot_dimension_numbers<[1], [0], [0], [1], [0, 0, 1, 1], [], []>} : vector<16x64xf32>, vector<64x256xf32>, vector<16x256xf32> -> vector<16x256xf32>
    %cst_323 = arith.constant dense<0.000000e+00> : vector<2x256xf32>
    %1152 = tpu.matmul %564, %1147, %cst_323 {dimension_numbers = #tpu.dot_dimension_numbers<[1], [0], [0], [1], [0, 0, 1, 1], [], []>} : vector<2x64xf32>, vector<64x256xf32>, vector<2x256xf32> -> vector<2x256xf32>
    %1153 = vector.extract_strided_slice %1150 {offsets = [0, 0], sizes = [2, 256], strides = [1, 1]} : vector<16x256xf32> to vector<2x256xf32>
    %1154 = vector.extract_strided_slice %1151 {offsets = [14, 0], sizes = [2, 256], strides = [1, 1]} : vector<16x256xf32> to vector<2x256xf32>
    %1155 = arith.addf %1153, %1154 : vector<2x256xf32>
    %1156 = arith.addf %1155, %1152 : vector<2x256xf32>
    %1157 = vector.extract_strided_slice %1156 {offsets = [0, 0], sizes = [2, 64], strides = [1, 1]} : vector<2x256xf32> to vector<2x64xf32>
    %1158 = arith.negf %1157 : vector<2x64xf32>
    %1159 = math.exp %1158 : vector<2x64xf32>
    %cst_324 = arith.constant 1.000000e+00 : f32
    %1160 = vector.broadcast %cst_324 : f32 to vector<2x64xf32>
    %1161 = arith.addf %1160, %1159 : vector<2x64xf32>
    %1162 = arith.divf %1160, %1161 : vector<2x64xf32>
    %1163 = vector.extract_strided_slice %1156 {offsets = [0, 64], sizes = [2, 64], strides = [1, 1]} : vector<2x256xf32> to vector<2x64xf32>
    %1164 = arith.negf %1163 : vector<2x64xf32>
    %1165 = math.exp %1164 : vector<2x64xf32>
    %cst_325 = arith.constant 1.000000e+00 : f32
    %1166 = vector.broadcast %cst_325 : f32 to vector<2x64xf32>
    %1167 = arith.addf %1166, %1165 : vector<2x64xf32>
    %1168 = arith.divf %1166, %1167 : vector<2x64xf32>
    %1169 = vector.extract_strided_slice %1156 {offsets = [0, 128], sizes = [2, 64], strides = [1, 1]} : vector<2x256xf32> to vector<2x64xf32>
    %1170 = math.tanh %1169 : vector<2x64xf32>
    %1171 = vector.extract_strided_slice %1156 {offsets = [0, 192], sizes = [2, 64], strides = [1, 1]} : vector<2x256xf32> to vector<2x64xf32>
    %1172 = arith.negf %1171 : vector<2x64xf32>
    %1173 = math.exp %1172 : vector<2x64xf32>
    %cst_326 = arith.constant 1.000000e+00 : f32
    %1174 = vector.broadcast %cst_326 : f32 to vector<2x64xf32>
    %1175 = arith.addf %1174, %1173 : vector<2x64xf32>
    %1176 = arith.divf %1174, %1175 : vector<2x64xf32>
    %1177 = arith.mulf %1168, %562 : vector<2x64xf32>
    %1178 = arith.mulf %1162, %1170 : vector<2x64xf32>
    %1179 = arith.addf %1177, %1178 : vector<2x64xf32>
    %1180 = math.tanh %1179 : vector<2x64xf32>
    %1181 = arith.mulf %1176, %1180 : vector<2x64xf32>
    %1182 = vector.extract_strided_slice %1181 {offsets = [0, 0], sizes = [2, 32], strides = [1, 1]} : vector<2x64xf32> to vector<2x32xf32>
    %c0_327 = arith.constant 0 : index
    %c0_328 = arith.constant 0 : index
    %1183 = vector.load %arg12[%c0_327, %c0_328] : memref<16x64xf32, #tpu.memory_space<vmem>>, vector<2x32xf32>
    tpu.vector_store %arg12[%c0_327, %c0_328], %1182 {strides = array<i32>} : memref<16x64xf32, #tpu.memory_space<vmem>>, vector<2x32xf32>,
    %1184 = vector.extract_strided_slice %1181 {offsets = [0, 32], sizes = [2, 32], strides = [1, 1]} : vector<2x64xf32> to vector<2x32xf32>
    %c14_329 = arith.constant 14 : index
    %c32_330 = arith.constant 32 : index
    %1185 = vector.load %arg12[%c14_329, %c32_330] : memref<16x64xf32, #tpu.memory_space<vmem>>, vector<2x32xf32>
    tpu.vector_store %arg12[%c14_329, %c32_330], %1184 {strides = array<i32>} : memref<16x64xf32, #tpu.memory_space<vmem>>, vector<2x32xf32>,
    %cst_331 = arith.constant dense<0.000000e+00> : vector<2x256xf32>
    %1186 = tpu.matmul %1181, %1147, %cst_331 {dimension_numbers = #tpu.dot_dimension_numbers<[1], [0], [0], [1], [0, 0, 1, 1], [], []>} : vector<2x64xf32>, vector<64x256xf32>, vector<2x256xf32> -> vector<2x256xf32>
    %1187 = vector.extract_strided_slice %1150 {offsets = [2, 0], sizes = [2, 256], strides = [1, 1]} : vector<16x256xf32> to vector<2x256xf32>
    %1188 = vector.extract_strided_slice %1151 {offsets = [12, 0], sizes = [2, 256], strides = [1, 1]} : vector<16x256xf32> to vector<2x256xf32>
    %1189 = arith.addf %1187, %1188 : vector<2x256xf32>
    %1190 = arith.addf %1189, %1186 : vector<2x256xf32>
    %1191 = vector.extract_strided_slice %1190 {offsets = [0, 0], sizes = [2, 64], strides = [1, 1]} : vector<2x256xf32> to vector<2x64xf32>
    %1192 = arith.negf %1191 : vector<2x64xf32>
    %1193 = math.exp %1192 : vector<2x64xf32>
    %cst_332 = arith.constant 1.000000e+00 : f32
    %1194 = vector.broadcast %cst_332 : f32 to vector<2x64xf32>
    %1195 = arith.addf %1194, %1193 : vector<2x64xf32>
    %1196 = arith.divf %1194, %1195 : vector<2x64xf32>
    %1197 = vector.extract_strided_slice %1190 {offsets = [0, 64], sizes = [2, 64], strides = [1, 1]} : vector<2x256xf32> to vector<2x64xf32>
    %1198 = arith.negf %1197 : vector<2x64xf32>
    %1199 = math.exp %1198 : vector<2x64xf32>
    %cst_333 = arith.constant 1.000000e+00 : f32
    %1200 = vector.broadcast %cst_333 : f32 to vector<2x64xf32>
    %1201 = arith.addf %1200, %1199 : vector<2x64xf32>
    %1202 = arith.divf %1200, %1201 : vector<2x64xf32>
    %1203 = vector.extract_strided_slice %1190 {offsets = [0, 128], sizes = [2, 64], strides = [1, 1]} : vector<2x256xf32> to vector<2x64xf32>
    %1204 = math.tanh %1203 : vector<2x64xf32>
    %1205 = vector.extract_strided_slice %1190 {offsets = [0, 192], sizes = [2, 64], strides = [1, 1]} : vector<2x256xf32> to vector<2x64xf32>
    %1206 = arith.negf %1205 : vector<2x64xf32>
    %1207 = math.exp %1206 : vector<2x64xf32>
    %cst_334 = arith.constant 1.000000e+00 : f32
    %1208 = vector.broadcast %cst_334 : f32 to vector<2x64xf32>
    %1209 = arith.addf %1208, %1207 : vector<2x64xf32>
    %1210 = arith.divf %1208, %1209 : vector<2x64xf32>
    %1211 = arith.mulf %1202, %1179 : vector<2x64xf32>
    %1212 = arith.mulf %1196, %1204 : vector<2x64xf32>
    %1213 = arith.addf %1211, %1212 : vector<2x64xf32>
    %1214 = math.tanh %1213 : vector<2x64xf32>
    %1215 = arith.mulf %1210, %1214 : vector<2x64xf32>
    %1216 = vector.extract_strided_slice %1215 {offsets = [0, 0], sizes = [2, 32], strides = [1, 1]} : vector<2x64xf32> to vector<2x32xf32>
    %c2_335 = arith.constant 2 : index
    %c0_336 = arith.constant 0 : index
    %1217 = vector.load %arg12[%c2_335, %c0_336] : memref<16x64xf32, #tpu.memory_space<vmem>>, vector<2x32xf32>
    tpu.vector_store %arg12[%c2_335, %c0_336], %1216 {strides = array<i32>} : memref<16x64xf32, #tpu.memory_space<vmem>>, vector<2x32xf32>,
    %1218 = vector.extract_strided_slice %1215 {offsets = [0, 32], sizes = [2, 32], strides = [1, 1]} : vector<2x64xf32> to vector<2x32xf32>
    %c12_337 = arith.constant 12 : index
    %c32_338 = arith.constant 32 : index
    %1219 = vector.load %arg12[%c12_337, %c32_338] : memref<16x64xf32, #tpu.memory_space<vmem>>, vector<2x32xf32>
    tpu.vector_store %arg12[%c12_337, %c32_338], %1218 {strides = array<i32>} : memref<16x64xf32, #tpu.memory_space<vmem>>, vector<2x32xf32>,
    %cst_339 = arith.constant dense<0.000000e+00> : vector<2x256xf32>
    %1220 = tpu.matmul %1215, %1147, %cst_339 {dimension_numbers = #tpu.dot_dimension_numbers<[1], [0], [0], [1], [0, 0, 1, 1], [], []>} : vector<2x64xf32>, vector<64x256xf32>, vector<2x256xf32> -> vector<2x256xf32>
    %1221 = vector.extract_strided_slice %1150 {offsets = [4, 0], sizes = [2, 256], strides = [1, 1]} : vector<16x256xf32> to vector<2x256xf32>
    %1222 = vector.extract_strided_slice %1151 {offsets = [10, 0], sizes = [2, 256], strides = [1, 1]} : vector<16x256xf32> to vector<2x256xf32>
    %1223 = arith.addf %1221, %1222 : vector<2x256xf32>
    %1224 = arith.addf %1223, %1220 : vector<2x256xf32>
    %1225 = vector.extract_strided_slice %1224 {offsets = [0, 0], sizes = [2, 64], strides = [1, 1]} : vector<2x256xf32> to vector<2x64xf32>
    %1226 = arith.negf %1225 : vector<2x64xf32>
    %1227 = math.exp %1226 : vector<2x64xf32>
    %cst_340 = arith.constant 1.000000e+00 : f32
    %1228 = vector.broadcast %cst_340 : f32 to vector<2x64xf32>
    %1229 = arith.addf %1228, %1227 : vector<2x64xf32>
    %1230 = arith.divf %1228, %1229 : vector<2x64xf32>
    %1231 = vector.extract_strided_slice %1224 {offsets = [0, 64], sizes = [2, 64], strides = [1, 1]} : vector<2x256xf32> to vector<2x64xf32>
    %1232 = arith.negf %1231 : vector<2x64xf32>
    %1233 = math.exp %1232 : vector<2x64xf32>
    %cst_341 = arith.constant 1.000000e+00 : f32
    %1234 = vector.broadcast %cst_341 : f32 to vector<2x64xf32>
    %1235 = arith.addf %1234, %1233 : vector<2x64xf32>
    %1236 = arith.divf %1234, %1235 : vector<2x64xf32>
    %1237 = vector.extract_strided_slice %1224 {offsets = [0, 128], sizes = [2, 64], strides = [1, 1]} : vector<2x256xf32> to vector<2x64xf32>
    %1238 = math.tanh %1237 : vector<2x64xf32>
    %1239 = vector.extract_strided_slice %1224 {offsets = [0, 192], sizes = [2, 64], strides = [1, 1]} : vector<2x256xf32> to vector<2x64xf32>
    %1240 = arith.negf %1239 : vector<2x64xf32>
    %1241 = math.exp %1240 : vector<2x64xf32>
    %cst_342 = arith.constant 1.000000e+00 : f32
    %1242 = vector.broadcast %cst_342 : f32 to vector<2x64xf32>
    %1243 = arith.addf %1242, %1241 : vector<2x64xf32>
    %1244 = arith.divf %1242, %1243 : vector<2x64xf32>
    %1245 = arith.mulf %1236, %1213 : vector<2x64xf32>
    %1246 = arith.mulf %1230, %1238 : vector<2x64xf32>
    %1247 = arith.addf %1245, %1246 : vector<2x64xf32>
    %1248 = math.tanh %1247 : vector<2x64xf32>
    %1249 = arith.mulf %1244, %1248 : vector<2x64xf32>
    %1250 = vector.extract_strided_slice %1249 {offsets = [0, 0], sizes = [2, 32], strides = [1, 1]} : vector<2x64xf32> to vector<2x32xf32>
    %c4_343 = arith.constant 4 : index
    %c0_344 = arith.constant 0 : index
    %1251 = vector.load %arg12[%c4_343, %c0_344] : memref<16x64xf32, #tpu.memory_space<vmem>>, vector<2x32xf32>
    tpu.vector_store %arg12[%c4_343, %c0_344], %1250 {strides = array<i32>} : memref<16x64xf32, #tpu.memory_space<vmem>>, vector<2x32xf32>,
    %1252 = vector.extract_strided_slice %1249 {offsets = [0, 32], sizes = [2, 32], strides = [1, 1]} : vector<2x64xf32> to vector<2x32xf32>
    %c10_345 = arith.constant 10 : index
    %c32_346 = arith.constant 32 : index
    %1253 = vector.load %arg12[%c10_345, %c32_346] : memref<16x64xf32, #tpu.memory_space<vmem>>, vector<2x32xf32>
    tpu.vector_store %arg12[%c10_345, %c32_346], %1252 {strides = array<i32>} : memref<16x64xf32, #tpu.memory_space<vmem>>, vector<2x32xf32>,
    %cst_347 = arith.constant dense<0.000000e+00> : vector<2x256xf32>
    %1254 = tpu.matmul %1249, %1147, %cst_347 {dimension_numbers = #tpu.dot_dimension_numbers<[1], [0], [0], [1], [0, 0, 1, 1], [], []>} : vector<2x64xf32>, vector<64x256xf32>, vector<2x256xf32> -> vector<2x256xf32>
    %1255 = vector.extract_strided_slice %1150 {offsets = [6, 0], sizes = [2, 256], strides = [1, 1]} : vector<16x256xf32> to vector<2x256xf32>
    %1256 = vector.extract_strided_slice %1151 {offsets = [8, 0], sizes = [2, 256], strides = [1, 1]} : vector<16x256xf32> to vector<2x256xf32>
    %1257 = arith.addf %1255, %1256 : vector<2x256xf32>
    %1258 = arith.addf %1257, %1254 : vector<2x256xf32>
    %1259 = vector.extract_strided_slice %1258 {offsets = [0, 0], sizes = [2, 64], strides = [1, 1]} : vector<2x256xf32> to vector<2x64xf32>
    %1260 = arith.negf %1259 : vector<2x64xf32>
    %1261 = math.exp %1260 : vector<2x64xf32>
    %cst_348 = arith.constant 1.000000e+00 : f32
    %1262 = vector.broadcast %cst_348 : f32 to vector<2x64xf32>
    %1263 = arith.addf %1262, %1261 : vector<2x64xf32>
    %1264 = arith.divf %1262, %1263 : vector<2x64xf32>
    %1265 = vector.extract_strided_slice %1258 {offsets = [0, 64], sizes = [2, 64], strides = [1, 1]} : vector<2x256xf32> to vector<2x64xf32>
    %1266 = arith.negf %1265 : vector<2x64xf32>
    %1267 = math.exp %1266 : vector<2x64xf32>
    %cst_349 = arith.constant 1.000000e+00 : f32
    %1268 = vector.broadcast %cst_349 : f32 to vector<2x64xf32>
    %1269 = arith.addf %1268, %1267 : vector<2x64xf32>
    %1270 = arith.divf %1268, %1269 : vector<2x64xf32>
    %1271 = vector.extract_strided_slice %1258 {offsets = [0, 128], sizes = [2, 64], strides = [1, 1]} : vector<2x256xf32> to vector<2x64xf32>
    %1272 = math.tanh %1271 : vector<2x64xf32>
    %1273 = vector.extract_strided_slice %1258 {offsets = [0, 192], sizes = [2, 64], strides = [1, 1]} : vector<2x256xf32> to vector<2x64xf32>
    %1274 = arith.negf %1273 : vector<2x64xf32>
    %1275 = math.exp %1274 : vector<2x64xf32>
    %cst_350 = arith.constant 1.000000e+00 : f32
    %1276 = vector.broadcast %cst_350 : f32 to vector<2x64xf32>
    %1277 = arith.addf %1276, %1275 : vector<2x64xf32>
    %1278 = arith.divf %1276, %1277 : vector<2x64xf32>
    %1279 = arith.mulf %1270, %1247 : vector<2x64xf32>
    %1280 = arith.mulf %1264, %1272 : vector<2x64xf32>
    %1281 = arith.addf %1279, %1280 : vector<2x64xf32>
    %1282 = math.tanh %1281 : vector<2x64xf32>
    %1283 = arith.mulf %1278, %1282 : vector<2x64xf32>
    %1284 = vector.extract_strided_slice %1283 {offsets = [0, 0], sizes = [2, 32], strides = [1, 1]} : vector<2x64xf32> to vector<2x32xf32>
    %c6_351 = arith.constant 6 : index
    %c0_352 = arith.constant 0 : index
    %1285 = vector.load %arg12[%c6_351, %c0_352] : memref<16x64xf32, #tpu.memory_space<vmem>>, vector<2x32xf32>
    tpu.vector_store %arg12[%c6_351, %c0_352], %1284 {strides = array<i32>} : memref<16x64xf32, #tpu.memory_space<vmem>>, vector<2x32xf32>,
    %1286 = vector.extract_strided_slice %1283 {offsets = [0, 32], sizes = [2, 32], strides = [1, 1]} : vector<2x64xf32> to vector<2x32xf32>
    %c8_353 = arith.constant 8 : index
    %c32_354 = arith.constant 32 : index
    %1287 = vector.load %arg12[%c8_353, %c32_354] : memref<16x64xf32, #tpu.memory_space<vmem>>, vector<2x32xf32>
    tpu.vector_store %arg12[%c8_353, %c32_354], %1286 {strides = array<i32>} : memref<16x64xf32, #tpu.memory_space<vmem>>, vector<2x32xf32>,
    %cst_355 = arith.constant dense<0.000000e+00> : vector<2x256xf32>
    %1288 = tpu.matmul %1283, %1147, %cst_355 {dimension_numbers = #tpu.dot_dimension_numbers<[1], [0], [0], [1], [0, 0, 1, 1], [], []>} : vector<2x64xf32>, vector<64x256xf32>, vector<2x256xf32> -> vector<2x256xf32>
    %1289 = vector.extract_strided_slice %1150 {offsets = [8, 0], sizes = [2, 256], strides = [1, 1]} : vector<16x256xf32> to vector<2x256xf32>
    %1290 = vector.extract_strided_slice %1151 {offsets = [6, 0], sizes = [2, 256], strides = [1, 1]} : vector<16x256xf32> to vector<2x256xf32>
    %1291 = arith.addf %1289, %1290 : vector<2x256xf32>
    %1292 = arith.addf %1291, %1288 : vector<2x256xf32>
    %1293 = vector.extract_strided_slice %1292 {offsets = [0, 0], sizes = [2, 64], strides = [1, 1]} : vector<2x256xf32> to vector<2x64xf32>
    %1294 = arith.negf %1293 : vector<2x64xf32>
    %1295 = math.exp %1294 : vector<2x64xf32>
    %cst_356 = arith.constant 1.000000e+00 : f32
    %1296 = vector.broadcast %cst_356 : f32 to vector<2x64xf32>
    %1297 = arith.addf %1296, %1295 : vector<2x64xf32>
    %1298 = arith.divf %1296, %1297 : vector<2x64xf32>
    %1299 = vector.extract_strided_slice %1292 {offsets = [0, 64], sizes = [2, 64], strides = [1, 1]} : vector<2x256xf32> to vector<2x64xf32>
    %1300 = arith.negf %1299 : vector<2x64xf32>
    %1301 = math.exp %1300 : vector<2x64xf32>
    %cst_357 = arith.constant 1.000000e+00 : f32
    %1302 = vector.broadcast %cst_357 : f32 to vector<2x64xf32>
    %1303 = arith.addf %1302, %1301 : vector<2x64xf32>
    %1304 = arith.divf %1302, %1303 : vector<2x64xf32>
    %1305 = vector.extract_strided_slice %1292 {offsets = [0, 128], sizes = [2, 64], strides = [1, 1]} : vector<2x256xf32> to vector<2x64xf32>
    %1306 = math.tanh %1305 : vector<2x64xf32>
    %1307 = vector.extract_strided_slice %1292 {offsets = [0, 192], sizes = [2, 64], strides = [1, 1]} : vector<2x256xf32> to vector<2x64xf32>
    %1308 = arith.negf %1307 : vector<2x64xf32>
    %1309 = math.exp %1308 : vector<2x64xf32>
    %cst_358 = arith.constant 1.000000e+00 : f32
    %1310 = vector.broadcast %cst_358 : f32 to vector<2x64xf32>
    %1311 = arith.addf %1310, %1309 : vector<2x64xf32>
    %1312 = arith.divf %1310, %1311 : vector<2x64xf32>
    %1313 = arith.mulf %1304, %1281 : vector<2x64xf32>
    %1314 = arith.mulf %1298, %1306 : vector<2x64xf32>
    %1315 = arith.addf %1313, %1314 : vector<2x64xf32>
    %1316 = math.tanh %1315 : vector<2x64xf32>
    %1317 = arith.mulf %1312, %1316 : vector<2x64xf32>
    %1318 = vector.extract_strided_slice %1317 {offsets = [0, 0], sizes = [2, 32], strides = [1, 1]} : vector<2x64xf32> to vector<2x32xf32>
    %c8_359 = arith.constant 8 : index
    %c0_360 = arith.constant 0 : index
    %1319 = vector.load %arg12[%c8_359, %c0_360] : memref<16x64xf32, #tpu.memory_space<vmem>>, vector<2x32xf32>
    tpu.vector_store %arg12[%c8_359, %c0_360], %1318 {strides = array<i32>} : memref<16x64xf32, #tpu.memory_space<vmem>>, vector<2x32xf32>,
    %1320 = vector.extract_strided_slice %1317 {offsets = [0, 32], sizes = [2, 32], strides = [1, 1]} : vector<2x64xf32> to vector<2x32xf32>
    %c6_361 = arith.constant 6 : index
    %c32_362 = arith.constant 32 : index
    %1321 = vector.load %arg12[%c6_361, %c32_362] : memref<16x64xf32, #tpu.memory_space<vmem>>, vector<2x32xf32>
    tpu.vector_store %arg12[%c6_361, %c32_362], %1320 {strides = array<i32>} : memref<16x64xf32, #tpu.memory_space<vmem>>, vector<2x32xf32>,
    %cst_363 = arith.constant dense<0.000000e+00> : vector<2x256xf32>
    %1322 = tpu.matmul %1317, %1147, %cst_363 {dimension_numbers = #tpu.dot_dimension_numbers<[1], [0], [0], [1], [0, 0, 1, 1], [], []>} : vector<2x64xf32>, vector<64x256xf32>, vector<2x256xf32> -> vector<2x256xf32>
    %1323 = vector.extract_strided_slice %1150 {offsets = [10, 0], sizes = [2, 256], strides = [1, 1]} : vector<16x256xf32> to vector<2x256xf32>
    %1324 = vector.extract_strided_slice %1151 {offsets = [4, 0], sizes = [2, 256], strides = [1, 1]} : vector<16x256xf32> to vector<2x256xf32>
    %1325 = arith.addf %1323, %1324 : vector<2x256xf32>
    %1326 = arith.addf %1325, %1322 : vector<2x256xf32>
    %1327 = vector.extract_strided_slice %1326 {offsets = [0, 0], sizes = [2, 64], strides = [1, 1]} : vector<2x256xf32> to vector<2x64xf32>
    %1328 = arith.negf %1327 : vector<2x64xf32>
    %1329 = math.exp %1328 : vector<2x64xf32>
    %cst_364 = arith.constant 1.000000e+00 : f32
    %1330 = vector.broadcast %cst_364 : f32 to vector<2x64xf32>
    %1331 = arith.addf %1330, %1329 : vector<2x64xf32>
    %1332 = arith.divf %1330, %1331 : vector<2x64xf32>
    %1333 = vector.extract_strided_slice %1326 {offsets = [0, 64], sizes = [2, 64], strides = [1, 1]} : vector<2x256xf32> to vector<2x64xf32>
    %1334 = arith.negf %1333 : vector<2x64xf32>
    %1335 = math.exp %1334 : vector<2x64xf32>
    %cst_365 = arith.constant 1.000000e+00 : f32
    %1336 = vector.broadcast %cst_365 : f32 to vector<2x64xf32>
    %1337 = arith.addf %1336, %1335 : vector<2x64xf32>
    %1338 = arith.divf %1336, %1337 : vector<2x64xf32>
    %1339 = vector.extract_strided_slice %1326 {offsets = [0, 128], sizes = [2, 64], strides = [1, 1]} : vector<2x256xf32> to vector<2x64xf32>
    %1340 = math.tanh %1339 : vector<2x64xf32>
    %1341 = vector.extract_strided_slice %1326 {offsets = [0, 192], sizes = [2, 64], strides = [1, 1]} : vector<2x256xf32> to vector<2x64xf32>
    %1342 = arith.negf %1341 : vector<2x64xf32>
    %1343 = math.exp %1342 : vector<2x64xf32>
    %cst_366 = arith.constant 1.000000e+00 : f32
    %1344 = vector.broadcast %cst_366 : f32 to vector<2x64xf32>
    %1345 = arith.addf %1344, %1343 : vector<2x64xf32>
    %1346 = arith.divf %1344, %1345 : vector<2x64xf32>
    %1347 = arith.mulf %1338, %1315 : vector<2x64xf32>
    %1348 = arith.mulf %1332, %1340 : vector<2x64xf32>
    %1349 = arith.addf %1347, %1348 : vector<2x64xf32>
    %1350 = math.tanh %1349 : vector<2x64xf32>
    %1351 = arith.mulf %1346, %1350 : vector<2x64xf32>
    %1352 = vector.extract_strided_slice %1351 {offsets = [0, 0], sizes = [2, 32], strides = [1, 1]} : vector<2x64xf32> to vector<2x32xf32>
    %c10_367 = arith.constant 10 : index
    %c0_368 = arith.constant 0 : index
    %1353 = vector.load %arg12[%c10_367, %c0_368] : memref<16x64xf32, #tpu.memory_space<vmem>>, vector<2x32xf32>
    tpu.vector_store %arg12[%c10_367, %c0_368], %1352 {strides = array<i32>} : memref<16x64xf32, #tpu.memory_space<vmem>>, vector<2x32xf32>,
    %1354 = vector.extract_strided_slice %1351 {offsets = [0, 32], sizes = [2, 32], strides = [1, 1]} : vector<2x64xf32> to vector<2x32xf32>
    %c4_369 = arith.constant 4 : index
    %c32_370 = arith.constant 32 : index
    %1355 = vector.load %arg12[%c4_369, %c32_370] : memref<16x64xf32, #tpu.memory_space<vmem>>, vector<2x32xf32>
    tpu.vector_store %arg12[%c4_369, %c32_370], %1354 {strides = array<i32>} : memref<16x64xf32, #tpu.memory_space<vmem>>, vector<2x32xf32>,
    %cst_371 = arith.constant dense<0.000000e+00> : vector<2x256xf32>
    %1356 = tpu.matmul %1351, %1147, %cst_371 {dimension_numbers = #tpu.dot_dimension_numbers<[1], [0], [0], [1], [0, 0, 1, 1], [], []>} : vector<2x64xf32>, vector<64x256xf32>, vector<2x256xf32> -> vector<2x256xf32>
    %1357 = vector.extract_strided_slice %1150 {offsets = [12, 0], sizes = [2, 256], strides = [1, 1]} : vector<16x256xf32> to vector<2x256xf32>
    %1358 = vector.extract_strided_slice %1151 {offsets = [2, 0], sizes = [2, 256], strides = [1, 1]} : vector<16x256xf32> to vector<2x256xf32>
    %1359 = arith.addf %1357, %1358 : vector<2x256xf32>
    %1360 = arith.addf %1359, %1356 : vector<2x256xf32>
    %1361 = vector.extract_strided_slice %1360 {offsets = [0, 0], sizes = [2, 64], strides = [1, 1]} : vector<2x256xf32> to vector<2x64xf32>
    %1362 = arith.negf %1361 : vector<2x64xf32>
    %1363 = math.exp %1362 : vector<2x64xf32>
    %cst_372 = arith.constant 1.000000e+00 : f32
    %1364 = vector.broadcast %cst_372 : f32 to vector<2x64xf32>
    %1365 = arith.addf %1364, %1363 : vector<2x64xf32>
    %1366 = arith.divf %1364, %1365 : vector<2x64xf32>
    %1367 = vector.extract_strided_slice %1360 {offsets = [0, 64], sizes = [2, 64], strides = [1, 1]} : vector<2x256xf32> to vector<2x64xf32>
    %1368 = arith.negf %1367 : vector<2x64xf32>
    %1369 = math.exp %1368 : vector<2x64xf32>
    %cst_373 = arith.constant 1.000000e+00 : f32
    %1370 = vector.broadcast %cst_373 : f32 to vector<2x64xf32>
    %1371 = arith.addf %1370, %1369 : vector<2x64xf32>
    %1372 = arith.divf %1370, %1371 : vector<2x64xf32>
    %1373 = vector.extract_strided_slice %1360 {offsets = [0, 128], sizes = [2, 64], strides = [1, 1]} : vector<2x256xf32> to vector<2x64xf32>
    %1374 = math.tanh %1373 : vector<2x64xf32>
    %1375 = vector.extract_strided_slice %1360 {offsets = [0, 192], sizes = [2, 64], strides = [1, 1]} : vector<2x256xf32> to vector<2x64xf32>
    %1376 = arith.negf %1375 : vector<2x64xf32>
    %1377 = math.exp %1376 : vector<2x64xf32>
    %cst_374 = arith.constant 1.000000e+00 : f32
    %1378 = vector.broadcast %cst_374 : f32 to vector<2x64xf32>
    %1379 = arith.addf %1378, %1377 : vector<2x64xf32>
    %1380 = arith.divf %1378, %1379 : vector<2x64xf32>
    %1381 = arith.mulf %1372, %1349 : vector<2x64xf32>
    %1382 = arith.mulf %1366, %1374 : vector<2x64xf32>
    %1383 = arith.addf %1381, %1382 : vector<2x64xf32>
    %1384 = math.tanh %1383 : vector<2x64xf32>
    %1385 = arith.mulf %1380, %1384 : vector<2x64xf32>
    %1386 = vector.extract_strided_slice %1385 {offsets = [0, 0], sizes = [2, 32], strides = [1, 1]} : vector<2x64xf32> to vector<2x32xf32>
    %c12_375 = arith.constant 12 : index
    %c0_376 = arith.constant 0 : index
    %1387 = vector.load %arg12[%c12_375, %c0_376] : memref<16x64xf32, #tpu.memory_space<vmem>>, vector<2x32xf32>
    tpu.vector_store %arg12[%c12_375, %c0_376], %1386 {strides = array<i32>} : memref<16x64xf32, #tpu.memory_space<vmem>>, vector<2x32xf32>,
    %1388 = vector.extract_strided_slice %1385 {offsets = [0, 32], sizes = [2, 32], strides = [1, 1]} : vector<2x64xf32> to vector<2x32xf32>
    %c2_377 = arith.constant 2 : index
    %c32_378 = arith.constant 32 : index
    %1389 = vector.load %arg12[%c2_377, %c32_378] : memref<16x64xf32, #tpu.memory_space<vmem>>, vector<2x32xf32>
    tpu.vector_store %arg12[%c2_377, %c32_378], %1388 {strides = array<i32>} : memref<16x64xf32, #tpu.memory_space<vmem>>, vector<2x32xf32>,
    %cst_379 = arith.constant dense<0.000000e+00> : vector<2x256xf32>
    %1390 = tpu.matmul %1385, %1147, %cst_379 {dimension_numbers = #tpu.dot_dimension_numbers<[1], [0], [0], [1], [0, 0, 1, 1], [], []>} : vector<2x64xf32>, vector<64x256xf32>, vector<2x256xf32> -> vector<2x256xf32>
    %1391 = vector.extract_strided_slice %1150 {offsets = [14, 0], sizes = [2, 256], strides = [1, 1]} : vector<16x256xf32> to vector<2x256xf32>
    %1392 = vector.extract_strided_slice %1151 {offsets = [0, 0], sizes = [2, 256], strides = [1, 1]} : vector<16x256xf32> to vector<2x256xf32>
    %1393 = arith.addf %1391, %1392 : vector<2x256xf32>
    %1394 = arith.addf %1393, %1390 : vector<2x256xf32>
    %1395 = vector.extract_strided_slice %1394 {offsets = [0, 0], sizes = [2, 64], strides = [1, 1]} : vector<2x256xf32> to vector<2x64xf32>
    %1396 = arith.negf %1395 : vector<2x64xf32>
    %1397 = math.exp %1396 : vector<2x64xf32>
    %cst_380 = arith.constant 1.000000e+00 : f32
    %1398 = vector.broadcast %cst_380 : f32 to vector<2x64xf32>
    %1399 = arith.addf %1398, %1397 : vector<2x64xf32>
    %1400 = arith.divf %1398, %1399 : vector<2x64xf32>
    %1401 = vector.extract_strided_slice %1394 {offsets = [0, 64], sizes = [2, 64], strides = [1, 1]} : vector<2x256xf32> to vector<2x64xf32>
    %1402 = arith.negf %1401 : vector<2x64xf32>
    %1403 = math.exp %1402 : vector<2x64xf32>
    %cst_381 = arith.constant 1.000000e+00 : f32
    %1404 = vector.broadcast %cst_381 : f32 to vector<2x64xf32>
    %1405 = arith.addf %1404, %1403 : vector<2x64xf32>
    %1406 = arith.divf %1404, %1405 : vector<2x64xf32>
    %1407 = vector.extract_strided_slice %1394 {offsets = [0, 128], sizes = [2, 64], strides = [1, 1]} : vector<2x256xf32> to vector<2x64xf32>
    %1408 = math.tanh %1407 : vector<2x64xf32>
    %1409 = vector.extract_strided_slice %1394 {offsets = [0, 192], sizes = [2, 64], strides = [1, 1]} : vector<2x256xf32> to vector<2x64xf32>
    %1410 = arith.negf %1409 : vector<2x64xf32>
    %1411 = math.exp %1410 : vector<2x64xf32>
    %cst_382 = arith.constant 1.000000e+00 : f32
    %1412 = vector.broadcast %cst_382 : f32 to vector<2x64xf32>
    %1413 = arith.addf %1412, %1411 : vector<2x64xf32>
    %1414 = arith.divf %1412, %1413 : vector<2x64xf32>
    %1415 = arith.mulf %1406, %1383 : vector<2x64xf32>
    %1416 = arith.mulf %1400, %1408 : vector<2x64xf32>
    %1417 = arith.addf %1415, %1416 : vector<2x64xf32>
    %1418 = math.tanh %1417 : vector<2x64xf32>
    %1419 = arith.mulf %1414, %1418 : vector<2x64xf32>
    %1420 = vector.extract_strided_slice %1419 {offsets = [0, 0], sizes = [2, 32], strides = [1, 1]} : vector<2x64xf32> to vector<2x32xf32>
    %c14_383 = arith.constant 14 : index
    %c0_384 = arith.constant 0 : index
    %1421 = vector.load %arg12[%c14_383, %c0_384] : memref<16x64xf32, #tpu.memory_space<vmem>>, vector<2x32xf32>
    tpu.vector_store %arg12[%c14_383, %c0_384], %1420 {strides = array<i32>} : memref<16x64xf32, #tpu.memory_space<vmem>>, vector<2x32xf32>,
    %1422 = vector.extract_strided_slice %1419 {offsets = [0, 32], sizes = [2, 32], strides = [1, 1]} : vector<2x64xf32> to vector<2x32xf32>
    %c0_385 = arith.constant 0 : index
    %c32_386 = arith.constant 32 : index
    %1423 = vector.load %arg12[%c0_385, %c32_386] : memref<16x64xf32, #tpu.memory_space<vmem>>, vector<2x32xf32>
    tpu.vector_store %arg12[%c0_385, %c32_386], %1422 {strides = array<i32>} : memref<16x64xf32, #tpu.memory_space<vmem>>, vector<2x32xf32>,
    %c0_387 = arith.constant 0 : index
    %c0_388 = arith.constant 0 : index
    %1424 = vector.load %arg12[%c0_387, %c0_388] : memref<16x64xf32, #tpu.memory_space<vmem>>, vector<16x64xf32>
    %c4_389 = arith.constant 4 : index
    %c0_390 = arith.constant 0 : index
    %c0_391 = arith.constant 0 : index
    %1425 = vector.load %arg3[%c4_389, %c0_390, %c0_391] : memref<5x64x256xf32, #tpu.memory_space<vmem>>, vector<1x64x256xf32>
    %1426 = vector.shape_cast %1425 : vector<1x64x256xf32> to vector<64x256xf32>
    %c4_392 = arith.constant 4 : index
    %c0_393 = arith.constant 0 : index
    %c0_394 = arith.constant 0 : index
    %1427 = vector.load %arg4[%c4_392, %c0_393, %c0_394] : memref<5x64x256xf32, #tpu.memory_space<vmem>>, vector<1x64x256xf32>
    %1428 = vector.shape_cast %1427 : vector<1x64x256xf32> to vector<64x256xf32>
    %c5 = arith.constant 5 : index
    %c0_395 = arith.constant 0 : index
    %c0_396 = arith.constant 0 : index
    %1429 = vector.load %arg5[%c5, %c0_395, %c0_396] : memref<6x1x256xf32, #tpu.memory_space<vmem>>, vector<1x1x256xf32>
    %1430 = vector.shape_cast %1429 : vector<1x1x256xf32> to vector<1x256xf32>
    %c5_397 = arith.constant 5 : index
    %c0_398 = arith.constant 0 : index
    %c0_399 = arith.constant 0 : index
    %1431 = vector.load %arg6[%c5_397, %c0_398, %c0_399] : memref<6x64x256xf32, #tpu.memory_space<vmem>>, vector<1x64x256xf32>
    %1432 = vector.shape_cast %1431 : vector<1x64x256xf32> to vector<64x256xf32>
    %cst_400 = arith.constant dense<0.000000e+00> : vector<16x256xf32>
    %1433 = tpu.matmul %1424, %1426, %cst_400 {dimension_numbers = #tpu.dot_dimension_numbers<[1], [0], [0], [1], [0, 0, 1, 1], [], []>} : vector<16x64xf32>, vector<64x256xf32>, vector<16x256xf32> -> vector<16x256xf32>
    %1434 = vector.broadcast %1430 : vector<1x256xf32> to vector<16x256xf32>
    %1435 = arith.addf %1433, %1434 : vector<16x256xf32>
    %cst_401 = arith.constant dense<0.000000e+00> : vector<16x256xf32>
    %1436 = tpu.matmul %1424, %1428, %cst_401 {dimension_numbers = #tpu.dot_dimension_numbers<[1], [0], [0], [1], [0, 0, 1, 1], [], []>} : vector<16x64xf32>, vector<64x256xf32>, vector<16x256xf32> -> vector<16x256xf32>
    %cst_402 = arith.constant dense<0.000000e+00> : vector<2x256xf32>
    %1437 = tpu.matmul %849, %1432, %cst_402 {dimension_numbers = #tpu.dot_dimension_numbers<[1], [0], [0], [1], [0, 0, 1, 1], [], []>} : vector<2x64xf32>, vector<64x256xf32>, vector<2x256xf32> -> vector<2x256xf32>
    %1438 = vector.extract_strided_slice %1435 {offsets = [0, 0], sizes = [2, 256], strides = [1, 1]} : vector<16x256xf32> to vector<2x256xf32>
    %1439 = vector.extract_strided_slice %1436 {offsets = [14, 0], sizes = [2, 256], strides = [1, 1]} : vector<16x256xf32> to vector<2x256xf32>
    %1440 = arith.addf %1438, %1439 : vector<2x256xf32>
    %1441 = arith.addf %1440, %1437 : vector<2x256xf32>
    %1442 = vector.extract_strided_slice %1441 {offsets = [0, 0], sizes = [2, 64], strides = [1, 1]} : vector<2x256xf32> to vector<2x64xf32>
    %1443 = arith.negf %1442 : vector<2x64xf32>
    %1444 = math.exp %1443 : vector<2x64xf32>
    %cst_403 = arith.constant 1.000000e+00 : f32
    %1445 = vector.broadcast %cst_403 : f32 to vector<2x64xf32>
    %1446 = arith.addf %1445, %1444 : vector<2x64xf32>
    %1447 = arith.divf %1445, %1446 : vector<2x64xf32>
    %1448 = vector.extract_strided_slice %1441 {offsets = [0, 64], sizes = [2, 64], strides = [1, 1]} : vector<2x256xf32> to vector<2x64xf32>
    %1449 = arith.negf %1448 : vector<2x64xf32>
    %1450 = math.exp %1449 : vector<2x64xf32>
    %cst_404 = arith.constant 1.000000e+00 : f32
    %1451 = vector.broadcast %cst_404 : f32 to vector<2x64xf32>
    %1452 = arith.addf %1451, %1450 : vector<2x64xf32>
    %1453 = arith.divf %1451, %1452 : vector<2x64xf32>
    %1454 = vector.extract_strided_slice %1441 {offsets = [0, 128], sizes = [2, 64], strides = [1, 1]} : vector<2x256xf32> to vector<2x64xf32>
    %1455 = math.tanh %1454 : vector<2x64xf32>
    %1456 = vector.extract_strided_slice %1441 {offsets = [0, 192], sizes = [2, 64], strides = [1, 1]} : vector<2x256xf32> to vector<2x64xf32>
    %1457 = arith.negf %1456 : vector<2x64xf32>
    %1458 = math.exp %1457 : vector<2x64xf32>
    %cst_405 = arith.constant 1.000000e+00 : f32
    %1459 = vector.broadcast %cst_405 : f32 to vector<2x64xf32>
    %1460 = arith.addf %1459, %1458 : vector<2x64xf32>
    %1461 = arith.divf %1459, %1460 : vector<2x64xf32>
    %1462 = arith.mulf %1453, %847 : vector<2x64xf32>
    %1463 = arith.mulf %1447, %1455 : vector<2x64xf32>
    %1464 = arith.addf %1462, %1463 : vector<2x64xf32>
    %1465 = math.tanh %1464 : vector<2x64xf32>
    %1466 = arith.mulf %1461, %1465 : vector<2x64xf32>
    %1467 = vector.extract_strided_slice %1466 {offsets = [0, 0], sizes = [2, 32], strides = [1, 1]} : vector<2x64xf32> to vector<2x32xf32>
    %c0_406 = arith.constant 0 : index
    %c0_407 = arith.constant 0 : index
    %1468 = vector.load %arg13[%c0_406, %c0_407] : memref<16x64xf32, #tpu.memory_space<vmem>>, vector<2x32xf32>
    tpu.vector_store %arg13[%c0_406, %c0_407], %1467 {strides = array<i32>} : memref<16x64xf32, #tpu.memory_space<vmem>>, vector<2x32xf32>,
    %1469 = vector.extract_strided_slice %1466 {offsets = [0, 32], sizes = [2, 32], strides = [1, 1]} : vector<2x64xf32> to vector<2x32xf32>
    %c14_408 = arith.constant 14 : index
    %c32_409 = arith.constant 32 : index
    %1470 = vector.load %arg13[%c14_408, %c32_409] : memref<16x64xf32, #tpu.memory_space<vmem>>, vector<2x32xf32>
    tpu.vector_store %arg13[%c14_408, %c32_409], %1469 {strides = array<i32>} : memref<16x64xf32, #tpu.memory_space<vmem>>, vector<2x32xf32>,
    %cst_410 = arith.constant dense<0.000000e+00> : vector<2x256xf32>
    %1471 = tpu.matmul %1466, %1432, %cst_410 {dimension_numbers = #tpu.dot_dimension_numbers<[1], [0], [0], [1], [0, 0, 1, 1], [], []>} : vector<2x64xf32>, vector<64x256xf32>, vector<2x256xf32> -> vector<2x256xf32>
    %1472 = vector.extract_strided_slice %1435 {offsets = [2, 0], sizes = [2, 256], strides = [1, 1]} : vector<16x256xf32> to vector<2x256xf32>
    %1473 = vector.extract_strided_slice %1436 {offsets = [12, 0], sizes = [2, 256], strides = [1, 1]} : vector<16x256xf32> to vector<2x256xf32>
    %1474 = arith.addf %1472, %1473 : vector<2x256xf32>
    %1475 = arith.addf %1474, %1471 : vector<2x256xf32>
    %1476 = vector.extract_strided_slice %1475 {offsets = [0, 0], sizes = [2, 64], strides = [1, 1]} : vector<2x256xf32> to vector<2x64xf32>
    %1477 = arith.negf %1476 : vector<2x64xf32>
    %1478 = math.exp %1477 : vector<2x64xf32>
    %cst_411 = arith.constant 1.000000e+00 : f32
    %1479 = vector.broadcast %cst_411 : f32 to vector<2x64xf32>
    %1480 = arith.addf %1479, %1478 : vector<2x64xf32>
    %1481 = arith.divf %1479, %1480 : vector<2x64xf32>
    %1482 = vector.extract_strided_slice %1475 {offsets = [0, 64], sizes = [2, 64], strides = [1, 1]} : vector<2x256xf32> to vector<2x64xf32>
    %1483 = arith.negf %1482 : vector<2x64xf32>
    %1484 = math.exp %1483 : vector<2x64xf32>
    %cst_412 = arith.constant 1.000000e+00 : f32
    %1485 = vector.broadcast %cst_412 : f32 to vector<2x64xf32>
    %1486 = arith.addf %1485, %1484 : vector<2x64xf32>
    %1487 = arith.divf %1485, %1486 : vector<2x64xf32>
    %1488 = vector.extract_strided_slice %1475 {offsets = [0, 128], sizes = [2, 64], strides = [1, 1]} : vector<2x256xf32> to vector<2x64xf32>
    %1489 = math.tanh %1488 : vector<2x64xf32>
    %1490 = vector.extract_strided_slice %1475 {offsets = [0, 192], sizes = [2, 64], strides = [1, 1]} : vector<2x256xf32> to vector<2x64xf32>
    %1491 = arith.negf %1490 : vector<2x64xf32>
    %1492 = math.exp %1491 : vector<2x64xf32>
    %cst_413 = arith.constant 1.000000e+00 : f32
    %1493 = vector.broadcast %cst_413 : f32 to vector<2x64xf32>
    %1494 = arith.addf %1493, %1492 : vector<2x64xf32>
    %1495 = arith.divf %1493, %1494 : vector<2x64xf32>
    %1496 = arith.mulf %1487, %1464 : vector<2x64xf32>
    %1497 = arith.mulf %1481, %1489 : vector<2x64xf32>
    %1498 = arith.addf %1496, %1497 : vector<2x64xf32>
    %1499 = math.tanh %1498 : vector<2x64xf32>
    %1500 = arith.mulf %1495, %1499 : vector<2x64xf32>
    %1501 = vector.extract_strided_slice %1500 {offsets = [0, 0], sizes = [2, 32], strides = [1, 1]} : vector<2x64xf32> to vector<2x32xf32>
    %c2_414 = arith.constant 2 : index
    %c0_415 = arith.constant 0 : index
    %1502 = vector.load %arg13[%c2_414, %c0_415] : memref<16x64xf32, #tpu.memory_space<vmem>>, vector<2x32xf32>
    tpu.vector_store %arg13[%c2_414, %c0_415], %1501 {strides = array<i32>} : memref<16x64xf32, #tpu.memory_space<vmem>>, vector<2x32xf32>,
    %1503 = vector.extract_strided_slice %1500 {offsets = [0, 32], sizes = [2, 32], strides = [1, 1]} : vector<2x64xf32> to vector<2x32xf32>
    %c12_416 = arith.constant 12 : index
    %c32_417 = arith.constant 32 : index
    %1504 = vector.load %arg13[%c12_416, %c32_417] : memref<16x64xf32, #tpu.memory_space<vmem>>, vector<2x32xf32>
    tpu.vector_store %arg13[%c12_416, %c32_417], %1503 {strides = array<i32>} : memref<16x64xf32, #tpu.memory_space<vmem>>, vector<2x32xf32>,
    %cst_418 = arith.constant dense<0.000000e+00> : vector<2x256xf32>
    %1505 = tpu.matmul %1500, %1432, %cst_418 {dimension_numbers = #tpu.dot_dimension_numbers<[1], [0], [0], [1], [0, 0, 1, 1], [], []>} : vector<2x64xf32>, vector<64x256xf32>, vector<2x256xf32> -> vector<2x256xf32>
    %1506 = vector.extract_strided_slice %1435 {offsets = [4, 0], sizes = [2, 256], strides = [1, 1]} : vector<16x256xf32> to vector<2x256xf32>
    %1507 = vector.extract_strided_slice %1436 {offsets = [10, 0], sizes = [2, 256], strides = [1, 1]} : vector<16x256xf32> to vector<2x256xf32>
    %1508 = arith.addf %1506, %1507 : vector<2x256xf32>
    %1509 = arith.addf %1508, %1505 : vector<2x256xf32>
    %1510 = vector.extract_strided_slice %1509 {offsets = [0, 0], sizes = [2, 64], strides = [1, 1]} : vector<2x256xf32> to vector<2x64xf32>
    %1511 = arith.negf %1510 : vector<2x64xf32>
    %1512 = math.exp %1511 : vector<2x64xf32>
    %cst_419 = arith.constant 1.000000e+00 : f32
    %1513 = vector.broadcast %cst_419 : f32 to vector<2x64xf32>
    %1514 = arith.addf %1513, %1512 : vector<2x64xf32>
    %1515 = arith.divf %1513, %1514 : vector<2x64xf32>
    %1516 = vector.extract_strided_slice %1509 {offsets = [0, 64], sizes = [2, 64], strides = [1, 1]} : vector<2x256xf32> to vector<2x64xf32>
    %1517 = arith.negf %1516 : vector<2x64xf32>
    %1518 = math.exp %1517 : vector<2x64xf32>
    %cst_420 = arith.constant 1.000000e+00 : f32
    %1519 = vector.broadcast %cst_420 : f32 to vector<2x64xf32>
    %1520 = arith.addf %1519, %1518 : vector<2x64xf32>
    %1521 = arith.divf %1519, %1520 : vector<2x64xf32>
    %1522 = vector.extract_strided_slice %1509 {offsets = [0, 128], sizes = [2, 64], strides = [1, 1]} : vector<2x256xf32> to vector<2x64xf32>
    %1523 = math.tanh %1522 : vector<2x64xf32>
    %1524 = vector.extract_strided_slice %1509 {offsets = [0, 192], sizes = [2, 64], strides = [1, 1]} : vector<2x256xf32> to vector<2x64xf32>
    %1525 = arith.negf %1524 : vector<2x64xf32>
    %1526 = math.exp %1525 : vector<2x64xf32>
    %cst_421 = arith.constant 1.000000e+00 : f32
    %1527 = vector.broadcast %cst_421 : f32 to vector<2x64xf32>
    %1528 = arith.addf %1527, %1526 : vector<2x64xf32>
    %1529 = arith.divf %1527, %1528 : vector<2x64xf32>
    %1530 = arith.mulf %1521, %1498 : vector<2x64xf32>
    %1531 = arith.mulf %1515, %1523 : vector<2x64xf32>
    %1532 = arith.addf %1530, %1531 : vector<2x64xf32>
    %1533 = math.tanh %1532 : vector<2x64xf32>
    %1534 = arith.mulf %1529, %1533 : vector<2x64xf32>
    %1535 = vector.extract_strided_slice %1534 {offsets = [0, 0], sizes = [2, 32], strides = [1, 1]} : vector<2x64xf32> to vector<2x32xf32>
    %c4_422 = arith.constant 4 : index
    %c0_423 = arith.constant 0 : index
    %1536 = vector.load %arg13[%c4_422, %c0_423] : memref<16x64xf32, #tpu.memory_space<vmem>>, vector<2x32xf32>
    tpu.vector_store %arg13[%c4_422, %c0_423], %1535 {strides = array<i32>} : memref<16x64xf32, #tpu.memory_space<vmem>>, vector<2x32xf32>,
    %1537 = vector.extract_strided_slice %1534 {offsets = [0, 32], sizes = [2, 32], strides = [1, 1]} : vector<2x64xf32> to vector<2x32xf32>
    %c10_424 = arith.constant 10 : index
    %c32_425 = arith.constant 32 : index
    %1538 = vector.load %arg13[%c10_424, %c32_425] : memref<16x64xf32, #tpu.memory_space<vmem>>, vector<2x32xf32>
    tpu.vector_store %arg13[%c10_424, %c32_425], %1537 {strides = array<i32>} : memref<16x64xf32, #tpu.memory_space<vmem>>, vector<2x32xf32>,
    %cst_426 = arith.constant dense<0.000000e+00> : vector<2x256xf32>
    %1539 = tpu.matmul %1534, %1432, %cst_426 {dimension_numbers = #tpu.dot_dimension_numbers<[1], [0], [0], [1], [0, 0, 1, 1], [], []>} : vector<2x64xf32>, vector<64x256xf32>, vector<2x256xf32> -> vector<2x256xf32>
    %1540 = vector.extract_strided_slice %1435 {offsets = [6, 0], sizes = [2, 256], strides = [1, 1]} : vector<16x256xf32> to vector<2x256xf32>
    %1541 = vector.extract_strided_slice %1436 {offsets = [8, 0], sizes = [2, 256], strides = [1, 1]} : vector<16x256xf32> to vector<2x256xf32>
    %1542 = arith.addf %1540, %1541 : vector<2x256xf32>
    %1543 = arith.addf %1542, %1539 : vector<2x256xf32>
    %1544 = vector.extract_strided_slice %1543 {offsets = [0, 0], sizes = [2, 64], strides = [1, 1]} : vector<2x256xf32> to vector<2x64xf32>
    %1545 = arith.negf %1544 : vector<2x64xf32>
    %1546 = math.exp %1545 : vector<2x64xf32>
    %cst_427 = arith.constant 1.000000e+00 : f32
    %1547 = vector.broadcast %cst_427 : f32 to vector<2x64xf32>
    %1548 = arith.addf %1547, %1546 : vector<2x64xf32>
    %1549 = arith.divf %1547, %1548 : vector<2x64xf32>
    %1550 = vector.extract_strided_slice %1543 {offsets = [0, 64], sizes = [2, 64], strides = [1, 1]} : vector<2x256xf32> to vector<2x64xf32>
    %1551 = arith.negf %1550 : vector<2x64xf32>
    %1552 = math.exp %1551 : vector<2x64xf32>
    %cst_428 = arith.constant 1.000000e+00 : f32
    %1553 = vector.broadcast %cst_428 : f32 to vector<2x64xf32>
    %1554 = arith.addf %1553, %1552 : vector<2x64xf32>
    %1555 = arith.divf %1553, %1554 : vector<2x64xf32>
    %1556 = vector.extract_strided_slice %1543 {offsets = [0, 128], sizes = [2, 64], strides = [1, 1]} : vector<2x256xf32> to vector<2x64xf32>
    %1557 = math.tanh %1556 : vector<2x64xf32>
    %1558 = vector.extract_strided_slice %1543 {offsets = [0, 192], sizes = [2, 64], strides = [1, 1]} : vector<2x256xf32> to vector<2x64xf32>
    %1559 = arith.negf %1558 : vector<2x64xf32>
    %1560 = math.exp %1559 : vector<2x64xf32>
    %cst_429 = arith.constant 1.000000e+00 : f32
    %1561 = vector.broadcast %cst_429 : f32 to vector<2x64xf32>
    %1562 = arith.addf %1561, %1560 : vector<2x64xf32>
    %1563 = arith.divf %1561, %1562 : vector<2x64xf32>
    %1564 = arith.mulf %1555, %1532 : vector<2x64xf32>
    %1565 = arith.mulf %1549, %1557 : vector<2x64xf32>
    %1566 = arith.addf %1564, %1565 : vector<2x64xf32>
    %1567 = math.tanh %1566 : vector<2x64xf32>
    %1568 = arith.mulf %1563, %1567 : vector<2x64xf32>
    %1569 = vector.extract_strided_slice %1568 {offsets = [0, 0], sizes = [2, 32], strides = [1, 1]} : vector<2x64xf32> to vector<2x32xf32>
    %c6_430 = arith.constant 6 : index
    %c0_431 = arith.constant 0 : index
    %1570 = vector.load %arg13[%c6_430, %c0_431] : memref<16x64xf32, #tpu.memory_space<vmem>>, vector<2x32xf32>
    tpu.vector_store %arg13[%c6_430, %c0_431], %1569 {strides = array<i32>} : memref<16x64xf32, #tpu.memory_space<vmem>>, vector<2x32xf32>,
    %1571 = vector.extract_strided_slice %1568 {offsets = [0, 32], sizes = [2, 32], strides = [1, 1]} : vector<2x64xf32> to vector<2x32xf32>
    %c8_432 = arith.constant 8 : index
    %c32_433 = arith.constant 32 : index
    %1572 = vector.load %arg13[%c8_432, %c32_433] : memref<16x64xf32, #tpu.memory_space<vmem>>, vector<2x32xf32>
    tpu.vector_store %arg13[%c8_432, %c32_433], %1571 {strides = array<i32>} : memref<16x64xf32, #tpu.memory_space<vmem>>, vector<2x32xf32>,
    %cst_434 = arith.constant dense<0.000000e+00> : vector<2x256xf32>
    %1573 = tpu.matmul %1568, %1432, %cst_434 {dimension_numbers = #tpu.dot_dimension_numbers<[1], [0], [0], [1], [0, 0, 1, 1], [], []>} : vector<2x64xf32>, vector<64x256xf32>, vector<2x256xf32> -> vector<2x256xf32>
    %1574 = vector.extract_strided_slice %1435 {offsets = [8, 0], sizes = [2, 256], strides = [1, 1]} : vector<16x256xf32> to vector<2x256xf32>
    %1575 = vector.extract_strided_slice %1436 {offsets = [6, 0], sizes = [2, 256], strides = [1, 1]} : vector<16x256xf32> to vector<2x256xf32>
    %1576 = arith.addf %1574, %1575 : vector<2x256xf32>
    %1577 = arith.addf %1576, %1573 : vector<2x256xf32>
    %1578 = vector.extract_strided_slice %1577 {offsets = [0, 0], sizes = [2, 64], strides = [1, 1]} : vector<2x256xf32> to vector<2x64xf32>
    %1579 = arith.negf %1578 : vector<2x64xf32>
    %1580 = math.exp %1579 : vector<2x64xf32>
    %cst_435 = arith.constant 1.000000e+00 : f32
    %1581 = vector.broadcast %cst_435 : f32 to vector<2x64xf32>
    %1582 = arith.addf %1581, %1580 : vector<2x64xf32>
    %1583 = arith.divf %1581, %1582 : vector<2x64xf32>
    %1584 = vector.extract_strided_slice %1577 {offsets = [0, 64], sizes = [2, 64], strides = [1, 1]} : vector<2x256xf32> to vector<2x64xf32>
    %1585 = arith.negf %1584 : vector<2x64xf32>
    %1586 = math.exp %1585 : vector<2x64xf32>
    %cst_436 = arith.constant 1.000000e+00 : f32
    %1587 = vector.broadcast %cst_436 : f32 to vector<2x64xf32>
    %1588 = arith.addf %1587, %1586 : vector<2x64xf32>
    %1589 = arith.divf %1587, %1588 : vector<2x64xf32>
    %1590 = vector.extract_strided_slice %1577 {offsets = [0, 128], sizes = [2, 64], strides = [1, 1]} : vector<2x256xf32> to vector<2x64xf32>
    %1591 = math.tanh %1590 : vector<2x64xf32>
    %1592 = vector.extract_strided_slice %1577 {offsets = [0, 192], sizes = [2, 64], strides = [1, 1]} : vector<2x256xf32> to vector<2x64xf32>
    %1593 = arith.negf %1592 : vector<2x64xf32>
    %1594 = math.exp %1593 : vector<2x64xf32>
    %cst_437 = arith.constant 1.000000e+00 : f32
    %1595 = vector.broadcast %cst_437 : f32 to vector<2x64xf32>
    %1596 = arith.addf %1595, %1594 : vector<2x64xf32>
    %1597 = arith.divf %1595, %1596 : vector<2x64xf32>
    %1598 = arith.mulf %1589, %1566 : vector<2x64xf32>
    %1599 = arith.mulf %1583, %1591 : vector<2x64xf32>
    %1600 = arith.addf %1598, %1599 : vector<2x64xf32>
    %1601 = math.tanh %1600 : vector<2x64xf32>
    %1602 = arith.mulf %1597, %1601 : vector<2x64xf32>
    %1603 = vector.extract_strided_slice %1602 {offsets = [0, 0], sizes = [2, 32], strides = [1, 1]} : vector<2x64xf32> to vector<2x32xf32>
    %c8_438 = arith.constant 8 : index
    %c0_439 = arith.constant 0 : index
    %1604 = vector.load %arg13[%c8_438, %c0_439] : memref<16x64xf32, #tpu.memory_space<vmem>>, vector<2x32xf32>
    tpu.vector_store %arg13[%c8_438, %c0_439], %1603 {strides = array<i32>} : memref<16x64xf32, #tpu.memory_space<vmem>>, vector<2x32xf32>,
    %1605 = vector.extract_strided_slice %1602 {offsets = [0, 32], sizes = [2, 32], strides = [1, 1]} : vector<2x64xf32> to vector<2x32xf32>
    %c6_440 = arith.constant 6 : index
    %c32_441 = arith.constant 32 : index
    %1606 = vector.load %arg13[%c6_440, %c32_441] : memref<16x64xf32, #tpu.memory_space<vmem>>, vector<2x32xf32>
    tpu.vector_store %arg13[%c6_440, %c32_441], %1605 {strides = array<i32>} : memref<16x64xf32, #tpu.memory_space<vmem>>, vector<2x32xf32>,
    %cst_442 = arith.constant dense<0.000000e+00> : vector<2x256xf32>
    %1607 = tpu.matmul %1602, %1432, %cst_442 {dimension_numbers = #tpu.dot_dimension_numbers<[1], [0], [0], [1], [0, 0, 1, 1], [], []>} : vector<2x64xf32>, vector<64x256xf32>, vector<2x256xf32> -> vector<2x256xf32>
    %1608 = vector.extract_strided_slice %1435 {offsets = [10, 0], sizes = [2, 256], strides = [1, 1]} : vector<16x256xf32> to vector<2x256xf32>
    %1609 = vector.extract_strided_slice %1436 {offsets = [4, 0], sizes = [2, 256], strides = [1, 1]} : vector<16x256xf32> to vector<2x256xf32>
    %1610 = arith.addf %1608, %1609 : vector<2x256xf32>
    %1611 = arith.addf %1610, %1607 : vector<2x256xf32>
    %1612 = vector.extract_strided_slice %1611 {offsets = [0, 0], sizes = [2, 64], strides = [1, 1]} : vector<2x256xf32> to vector<2x64xf32>
    %1613 = arith.negf %1612 : vector<2x64xf32>
    %1614 = math.exp %1613 : vector<2x64xf32>
    %cst_443 = arith.constant 1.000000e+00 : f32
    %1615 = vector.broadcast %cst_443 : f32 to vector<2x64xf32>
    %1616 = arith.addf %1615, %1614 : vector<2x64xf32>
    %1617 = arith.divf %1615, %1616 : vector<2x64xf32>
    %1618 = vector.extract_strided_slice %1611 {offsets = [0, 64], sizes = [2, 64], strides = [1, 1]} : vector<2x256xf32> to vector<2x64xf32>
    %1619 = arith.negf %1618 : vector<2x64xf32>
    %1620 = math.exp %1619 : vector<2x64xf32>
    %cst_444 = arith.constant 1.000000e+00 : f32
    %1621 = vector.broadcast %cst_444 : f32 to vector<2x64xf32>
    %1622 = arith.addf %1621, %1620 : vector<2x64xf32>
    %1623 = arith.divf %1621, %1622 : vector<2x64xf32>
    %1624 = vector.extract_strided_slice %1611 {offsets = [0, 128], sizes = [2, 64], strides = [1, 1]} : vector<2x256xf32> to vector<2x64xf32>
    %1625 = math.tanh %1624 : vector<2x64xf32>
    %1626 = vector.extract_strided_slice %1611 {offsets = [0, 192], sizes = [2, 64], strides = [1, 1]} : vector<2x256xf32> to vector<2x64xf32>
    %1627 = arith.negf %1626 : vector<2x64xf32>
    %1628 = math.exp %1627 : vector<2x64xf32>
    %cst_445 = arith.constant 1.000000e+00 : f32
    %1629 = vector.broadcast %cst_445 : f32 to vector<2x64xf32>
    %1630 = arith.addf %1629, %1628 : vector<2x64xf32>
    %1631 = arith.divf %1629, %1630 : vector<2x64xf32>
    %1632 = arith.mulf %1623, %1600 : vector<2x64xf32>
    %1633 = arith.mulf %1617, %1625 : vector<2x64xf32>
    %1634 = arith.addf %1632, %1633 : vector<2x64xf32>
    %1635 = math.tanh %1634 : vector<2x64xf32>
    %1636 = arith.mulf %1631, %1635 : vector<2x64xf32>
    %1637 = vector.extract_strided_slice %1636 {offsets = [0, 0], sizes = [2, 32], strides = [1, 1]} : vector<2x64xf32> to vector<2x32xf32>
    %c10_446 = arith.constant 10 : index
    %c0_447 = arith.constant 0 : index
    %1638 = vector.load %arg13[%c10_446, %c0_447] : memref<16x64xf32, #tpu.memory_space<vmem>>, vector<2x32xf32>
    tpu.vector_store %arg13[%c10_446, %c0_447], %1637 {strides = array<i32>} : memref<16x64xf32, #tpu.memory_space<vmem>>, vector<2x32xf32>,
    %1639 = vector.extract_strided_slice %1636 {offsets = [0, 32], sizes = [2, 32], strides = [1, 1]} : vector<2x64xf32> to vector<2x32xf32>
    %c4_448 = arith.constant 4 : index
    %c32_449 = arith.constant 32 : index
    %1640 = vector.load %arg13[%c4_448, %c32_449] : memref<16x64xf32, #tpu.memory_space<vmem>>, vector<2x32xf32>
    tpu.vector_store %arg13[%c4_448, %c32_449], %1639 {strides = array<i32>} : memref<16x64xf32, #tpu.memory_space<vmem>>, vector<2x32xf32>,
    %cst_450 = arith.constant dense<0.000000e+00> : vector<2x256xf32>
    %1641 = tpu.matmul %1636, %1432, %cst_450 {dimension_numbers = #tpu.dot_dimension_numbers<[1], [0], [0], [1], [0, 0, 1, 1], [], []>} : vector<2x64xf32>, vector<64x256xf32>, vector<2x256xf32> -> vector<2x256xf32>
    %1642 = vector.extract_strided_slice %1435 {offsets = [12, 0], sizes = [2, 256], strides = [1, 1]} : vector<16x256xf32> to vector<2x256xf32>
    %1643 = vector.extract_strided_slice %1436 {offsets = [2, 0], sizes = [2, 256], strides = [1, 1]} : vector<16x256xf32> to vector<2x256xf32>
    %1644 = arith.addf %1642, %1643 : vector<2x256xf32>
    %1645 = arith.addf %1644, %1641 : vector<2x256xf32>
    %1646 = vector.extract_strided_slice %1645 {offsets = [0, 0], sizes = [2, 64], strides = [1, 1]} : vector<2x256xf32> to vector<2x64xf32>
    %1647 = arith.negf %1646 : vector<2x64xf32>
    %1648 = math.exp %1647 : vector<2x64xf32>
    %cst_451 = arith.constant 1.000000e+00 : f32
    %1649 = vector.broadcast %cst_451 : f32 to vector<2x64xf32>
    %1650 = arith.addf %1649, %1648 : vector<2x64xf32>
    %1651 = arith.divf %1649, %1650 : vector<2x64xf32>
    %1652 = vector.extract_strided_slice %1645 {offsets = [0, 64], sizes = [2, 64], strides = [1, 1]} : vector<2x256xf32> to vector<2x64xf32>
    %1653 = arith.negf %1652 : vector<2x64xf32>
    %1654 = math.exp %1653 : vector<2x64xf32>
    %cst_452 = arith.constant 1.000000e+00 : f32
    %1655 = vector.broadcast %cst_452 : f32 to vector<2x64xf32>
    %1656 = arith.addf %1655, %1654 : vector<2x64xf32>
    %1657 = arith.divf %1655, %1656 : vector<2x64xf32>
    %1658 = vector.extract_strided_slice %1645 {offsets = [0, 128], sizes = [2, 64], strides = [1, 1]} : vector<2x256xf32> to vector<2x64xf32>
    %1659 = math.tanh %1658 : vector<2x64xf32>
    %1660 = vector.extract_strided_slice %1645 {offsets = [0, 192], sizes = [2, 64], strides = [1, 1]} : vector<2x256xf32> to vector<2x64xf32>
    %1661 = arith.negf %1660 : vector<2x64xf32>
    %1662 = math.exp %1661 : vector<2x64xf32>
    %cst_453 = arith.constant 1.000000e+00 : f32
    %1663 = vector.broadcast %cst_453 : f32 to vector<2x64xf32>
    %1664 = arith.addf %1663, %1662 : vector<2x64xf32>
    %1665 = arith.divf %1663, %1664 : vector<2x64xf32>
    %1666 = arith.mulf %1657, %1634 : vector<2x64xf32>
    %1667 = arith.mulf %1651, %1659 : vector<2x64xf32>
    %1668 = arith.addf %1666, %1667 : vector<2x64xf32>
    %1669 = math.tanh %1668 : vector<2x64xf32>
    %1670 = arith.mulf %1665, %1669 : vector<2x64xf32>
    %1671 = vector.extract_strided_slice %1670 {offsets = [0, 0], sizes = [2, 32], strides = [1, 1]} : vector<2x64xf32> to vector<2x32xf32>
    %c12_454 = arith.constant 12 : index
    %c0_455 = arith.constant 0 : index
    %1672 = vector.load %arg13[%c12_454, %c0_455] : memref<16x64xf32, #tpu.memory_space<vmem>>, vector<2x32xf32>
    tpu.vector_store %arg13[%c12_454, %c0_455], %1671 {strides = array<i32>} : memref<16x64xf32, #tpu.memory_space<vmem>>, vector<2x32xf32>,
    %1673 = vector.extract_strided_slice %1670 {offsets = [0, 32], sizes = [2, 32], strides = [1, 1]} : vector<2x64xf32> to vector<2x32xf32>
    %c2_456 = arith.constant 2 : index
    %c32_457 = arith.constant 32 : index
    %1674 = vector.load %arg13[%c2_456, %c32_457] : memref<16x64xf32, #tpu.memory_space<vmem>>, vector<2x32xf32>
    tpu.vector_store %arg13[%c2_456, %c32_457], %1673 {strides = array<i32>} : memref<16x64xf32, #tpu.memory_space<vmem>>, vector<2x32xf32>,
    %cst_458 = arith.constant dense<0.000000e+00> : vector<2x256xf32>
    %1675 = tpu.matmul %1670, %1432, %cst_458 {dimension_numbers = #tpu.dot_dimension_numbers<[1], [0], [0], [1], [0, 0, 1, 1], [], []>} : vector<2x64xf32>, vector<64x256xf32>, vector<2x256xf32> -> vector<2x256xf32>
    %1676 = vector.extract_strided_slice %1435 {offsets = [14, 0], sizes = [2, 256], strides = [1, 1]} : vector<16x256xf32> to vector<2x256xf32>
    %1677 = vector.extract_strided_slice %1436 {offsets = [0, 0], sizes = [2, 256], strides = [1, 1]} : vector<16x256xf32> to vector<2x256xf32>
    %1678 = arith.addf %1676, %1677 : vector<2x256xf32>
    %1679 = arith.addf %1678, %1675 : vector<2x256xf32>
    %1680 = vector.extract_strided_slice %1679 {offsets = [0, 0], sizes = [2, 64], strides = [1, 1]} : vector<2x256xf32> to vector<2x64xf32>
    %1681 = arith.negf %1680 : vector<2x64xf32>
    %1682 = math.exp %1681 : vector<2x64xf32>
    %cst_459 = arith.constant 1.000000e+00 : f32
    %1683 = vector.broadcast %cst_459 : f32 to vector<2x64xf32>
    %1684 = arith.addf %1683, %1682 : vector<2x64xf32>
    %1685 = arith.divf %1683, %1684 : vector<2x64xf32>
    %1686 = vector.extract_strided_slice %1679 {offsets = [0, 64], sizes = [2, 64], strides = [1, 1]} : vector<2x256xf32> to vector<2x64xf32>
    %1687 = arith.negf %1686 : vector<2x64xf32>
    %1688 = math.exp %1687 : vector<2x64xf32>
    %cst_460 = arith.constant 1.000000e+00 : f32
    %1689 = vector.broadcast %cst_460 : f32 to vector<2x64xf32>
    %1690 = arith.addf %1689, %1688 : vector<2x64xf32>
    %1691 = arith.divf %1689, %1690 : vector<2x64xf32>
    %1692 = vector.extract_strided_slice %1679 {offsets = [0, 128], sizes = [2, 64], strides = [1, 1]} : vector<2x256xf32> to vector<2x64xf32>
    %1693 = math.tanh %1692 : vector<2x64xf32>
    %1694 = vector.extract_strided_slice %1679 {offsets = [0, 192], sizes = [2, 64], strides = [1, 1]} : vector<2x256xf32> to vector<2x64xf32>
    %1695 = arith.negf %1694 : vector<2x64xf32>
    %1696 = math.exp %1695 : vector<2x64xf32>
    %cst_461 = arith.constant 1.000000e+00 : f32
    %1697 = vector.broadcast %cst_461 : f32 to vector<2x64xf32>
    %1698 = arith.addf %1697, %1696 : vector<2x64xf32>
    %1699 = arith.divf %1697, %1698 : vector<2x64xf32>
    %1700 = arith.mulf %1691, %1668 : vector<2x64xf32>
    %1701 = arith.mulf %1685, %1693 : vector<2x64xf32>
    %1702 = arith.addf %1700, %1701 : vector<2x64xf32>
    %1703 = math.tanh %1702 : vector<2x64xf32>
    %1704 = arith.mulf %1699, %1703 : vector<2x64xf32>
    %1705 = vector.extract_strided_slice %1704 {offsets = [0, 0], sizes = [2, 32], strides = [1, 1]} : vector<2x64xf32> to vector<2x32xf32>
    %c14_462 = arith.constant 14 : index
    %c0_463 = arith.constant 0 : index
    %1706 = vector.load %arg13[%c14_462, %c0_463] : memref<16x64xf32, #tpu.memory_space<vmem>>, vector<2x32xf32>
    tpu.vector_store %arg13[%c14_462, %c0_463], %1705 {strides = array<i32>} : memref<16x64xf32, #tpu.memory_space<vmem>>, vector<2x32xf32>,
    %1707 = vector.extract_strided_slice %1704 {offsets = [0, 32], sizes = [2, 32], strides = [1, 1]} : vector<2x64xf32> to vector<2x32xf32>
    %c0_464 = arith.constant 0 : index
    %c32_465 = arith.constant 32 : index
    %1708 = vector.load %arg13[%c0_464, %c32_465] : memref<16x64xf32, #tpu.memory_space<vmem>>, vector<2x32xf32>
    tpu.vector_store %arg13[%c0_464, %c32_465], %1707 {strides = array<i32>} : memref<16x64xf32, #tpu.memory_space<vmem>>, vector<2x32xf32>,
    %c0_466 = arith.constant 0 : index
    %c0_467 = arith.constant 0 : index
    %1709 = vector.load %arg13[%c0_466, %c0_467] : memref<16x64xf32, #tpu.memory_space<vmem>>, vector<16x64xf32>
    %cst_468 = arith.constant dense<0.000000e+00> : vector<64xf32>
    %1710 = vector.multi_reduction <add>, %1709, %cst_468 [0] : vector<16x64xf32> to vector<64xf32>
    %1711 = vector.shape_cast %1710 : vector<64xf32> to vector<1x64xf32>
    %cst_469 = arith.constant 1.600000e+01 : f32
    %1712 = vector.broadcast %cst_469 : f32 to vector<1x64xf32>
    %1713 = arith.divf %1711, %1712 : vector<1x64xf32>
    %1714 = vector.broadcast %1713 : vector<1x64xf32> to vector<16x64xf32>
    %1715 = arith.subf %1709, %1714 : vector<16x64xf32>
    %1716 = arith.mulf %1715, %1715 : vector<16x64xf32>
    %cst_470 = arith.constant dense<0.000000e+00> : vector<64xf32>
    %1717 = vector.multi_reduction <add>, %1716, %cst_470 [0] : vector<16x64xf32> to vector<64xf32>
    %1718 = vector.shape_cast %1717 : vector<64xf32> to vector<1x64xf32>
    %cst_471 = arith.constant 1.600000e+01 : f32
    %1719 = vector.broadcast %cst_471 : f32 to vector<1x64xf32>
    %1720 = arith.divf %1718, %1719 : vector<1x64xf32>
    %1721 = vector.broadcast %1713 : vector<1x64xf32> to vector<16x64xf32>
    %1722 = arith.subf %1709, %1721 : vector<16x64xf32>
    %cst_472 = arith.constant 9.99999974E-6 : f32
    %1723 = vector.broadcast %cst_472 : f32 to vector<1x64xf32>
    %1724 = arith.addf %1720, %1723 : vector<1x64xf32>
    %1725 = math.rsqrt %1724 : vector<1x64xf32>
    %1726 = vector.broadcast %1725 : vector<1x64xf32> to vector<16x64xf32>
    %1727 = arith.mulf %1722, %1726 : vector<16x64xf32>
    %c0_473 = arith.constant 0 : index
    %c0_474 = arith.constant 0 : index
    %1728 = vector.load %arg7[%c0_473, %c0_474] : memref<64x64xf32, #tpu.memory_space<vmem>>, vector<64x64xf32>
    %cst_475 = arith.constant dense<0.000000e+00> : vector<16x64xf32>
    %1729 = tpu.matmul %1727, %1728, %cst_475 {dimension_numbers = #tpu.dot_dimension_numbers<[1], [0], [0], [1], [0, 0, 1, 1], [], []>} : vector<16x64xf32>, vector<64x64xf32>, vector<16x64xf32> -> vector<16x64xf32>
    %c0_476 = arith.constant 0 : index
    %c0_477 = arith.constant 0 : index
    %1730 = vector.load %arg8[%c0_476, %c0_477] : memref<1x64xf32, #tpu.memory_space<vmem>>, vector<1x64xf32>
    %1731 = vector.broadcast %1730 : vector<1x64xf32> to vector<16x64xf32>
    %1732 = arith.addf %1729, %1731 : vector<16x64xf32>
    %1733 = math.tanh %1732 : vector<16x64xf32>
    %c0_478 = arith.constant 0 : index
    %c0_479 = arith.constant 0 : index
    %1734 = vector.load %arg9[%c0_478, %c0_479] : memref<64x16xf32, #tpu.memory_space<vmem>>, vector<64x16xf32>
    %cst_480 = arith.constant dense<0.000000e+00> : vector<16x16xf32>
    %1735 = tpu.matmul %1733, %1734, %cst_480 {dimension_numbers = #tpu.dot_dimension_numbers<[1], [0], [0], [1], [0, 0, 1, 1], [], []>} : vector<16x64xf32>, vector<64x16xf32>, vector<16x16xf32> -> vector<16x16xf32>
    %c0_481 = arith.constant 0 : index
    %c0_482 = arith.constant 0 : index
    %1736 = vector.load %arg10[%c0_481, %c0_482] : memref<1x16xf32, #tpu.memory_space<vmem>>, vector<1x16xf32>
    %1737 = vector.broadcast %1736 : vector<1x16xf32> to vector<16x16xf32>
    %1738 = arith.addf %1735, %1737 : vector<16x16xf32>
    %1739 = math.tanh %1738 : vector<16x16xf32>
    %cst_483 = arith.constant dense<0xFF800000> : vector<16xf32>
    %1740 = vector.multi_reduction <maximumf>, %1739, %cst_483 [1] : vector<16x16xf32> to vector<16xf32>
    %1741 = vector.shape_cast %1740 : vector<16xf32> to vector<16x1xf32>
    %1742 = vector.broadcast %1741 : vector<16x1xf32> to vector<16x16xf32>
    %1743 = arith.subf %1739, %1742 : vector<16x16xf32>
    %1744 = math.exp %1743 : vector<16x16xf32>
    %cst_484 = arith.constant dense<0.000000e+00> : vector<16xf32>
    %1745 = vector.multi_reduction <add>, %1744, %cst_484 [1] : vector<16x16xf32> to vector<16xf32>
    %1746 = vector.shape_cast %1745 : vector<16xf32> to vector<16x1xf32>
    %1747 = vector.broadcast %1746 : vector<16x1xf32> to vector<16x16xf32>
    %1748 = arith.divf %1744, %1747 : vector<16x16xf32>
    %1749 = vector.extract_strided_slice %1748 {offsets = [0, 0], sizes = [1, 16], strides = [1, 1]} : vector<16x16xf32> to vector<1x16xf32>
    %c0_485 = arith.constant 0 : index
    %c0_486 = arith.constant 0 : index
    %1750 = vector.load %arg11[%c0_485, %c0_486] : memref<16x16xf32, #tpu.memory_space<vmem>>, vector<1x16xf32>
    tpu.vector_store %arg11[%c0_485, %c0_486], %1749 {strides = array<i32>} : memref<16x16xf32, #tpu.memory_space<vmem>>, vector<1x16xf32>,
    %1751 = vector.extract_strided_slice %1748 {offsets = [1, 0], sizes = [1, 16], strides = [1, 1]} : vector<16x16xf32> to vector<1x16xf32>
    %c8_487 = arith.constant 8 : index
    %c0_488 = arith.constant 0 : index
    %1752 = vector.load %arg11[%c8_487, %c0_488] : memref<16x16xf32, #tpu.memory_space<vmem>>, vector<1x16xf32>
    tpu.vector_store %arg11[%c8_487, %c0_488], %1751 {strides = array<i32>} : memref<16x16xf32, #tpu.memory_space<vmem>>, vector<1x16xf32>,
    %1753 = vector.extract_strided_slice %1748 {offsets = [2, 0], sizes = [1, 16], strides = [1, 1]} : vector<16x16xf32> to vector<1x16xf32>
    %c1_489 = arith.constant 1 : index
    %c0_490 = arith.constant 0 : index
    %1754 = vector.load %arg11[%c1_489, %c0_490] : memref<16x16xf32, #tpu.memory_space<vmem>>, vector<1x16xf32>
    tpu.vector_store %arg11[%c1_489, %c0_490], %1753 {strides = array<i32>} : memref<16x16xf32, #tpu.memory_space<vmem>>, vector<1x16xf32>,
    %1755 = vector.extract_strided_slice %1748 {offsets = [3, 0], sizes = [1, 16], strides = [1, 1]} : vector<16x16xf32> to vector<1x16xf32>
    %c9 = arith.constant 9 : index
    %c0_491 = arith.constant 0 : index
    %1756 = vector.load %arg11[%c9, %c0_491] : memref<16x16xf32, #tpu.memory_space<vmem>>, vector<1x16xf32>
    tpu.vector_store %arg11[%c9, %c0_491], %1755 {strides = array<i32>} : memref<16x16xf32, #tpu.memory_space<vmem>>, vector<1x16xf32>,
    %1757 = vector.extract_strided_slice %1748 {offsets = [4, 0], sizes = [1, 16], strides = [1, 1]} : vector<16x16xf32> to vector<1x16xf32>
    %c2_492 = arith.constant 2 : index
    %c0_493 = arith.constant 0 : index
    %1758 = vector.load %arg11[%c2_492, %c0_493] : memref<16x16xf32, #tpu.memory_space<vmem>>, vector<1x16xf32>
    tpu.vector_store %arg11[%c2_492, %c0_493], %1757 {strides = array<i32>} : memref<16x16xf32, #tpu.memory_space<vmem>>, vector<1x16xf32>,
    %1759 = vector.extract_strided_slice %1748 {offsets = [5, 0], sizes = [1, 16], strides = [1, 1]} : vector<16x16xf32> to vector<1x16xf32>
    %c10_494 = arith.constant 10 : index
    %c0_495 = arith.constant 0 : index
    %1760 = vector.load %arg11[%c10_494, %c0_495] : memref<16x16xf32, #tpu.memory_space<vmem>>, vector<1x16xf32>
    tpu.vector_store %arg11[%c10_494, %c0_495], %1759 {strides = array<i32>} : memref<16x16xf32, #tpu.memory_space<vmem>>, vector<1x16xf32>,
    %1761 = vector.extract_strided_slice %1748 {offsets = [6, 0], sizes = [1, 16], strides = [1, 1]} : vector<16x16xf32> to vector<1x16xf32>
    %c3_496 = arith.constant 3 : index
    %c0_497 = arith.constant 0 : index
    %1762 = vector.load %arg11[%c3_496, %c0_497] : memref<16x16xf32, #tpu.memory_space<vmem>>, vector<1x16xf32>
    tpu.vector_store %arg11[%c3_496, %c0_497], %1761 {strides = array<i32>} : memref<16x16xf32, #tpu.memory_space<vmem>>, vector<1x16xf32>,
    %1763 = vector.extract_strided_slice %1748 {offsets = [7, 0], sizes = [1, 16], strides = [1, 1]} : vector<16x16xf32> to vector<1x16xf32>
    %c11 = arith.constant 11 : index
    %c0_498 = arith.constant 0 : index
    %1764 = vector.load %arg11[%c11, %c0_498] : memref<16x16xf32, #tpu.memory_space<vmem>>, vector<1x16xf32>
    tpu.vector_store %arg11[%c11, %c0_498], %1763 {strides = array<i32>} : memref<16x16xf32, #tpu.memory_space<vmem>>, vector<1x16xf32>,
    %1765 = vector.extract_strided_slice %1748 {offsets = [8, 0], sizes = [1, 16], strides = [1, 1]} : vector<16x16xf32> to vector<1x16xf32>
    %c4_499 = arith.constant 4 : index
    %c0_500 = arith.constant 0 : index
    %1766 = vector.load %arg11[%c4_499, %c0_500] : memref<16x16xf32, #tpu.memory_space<vmem>>, vector<1x16xf32>
    tpu.vector_store %arg11[%c4_499, %c0_500], %1765 {strides = array<i32>} : memref<16x16xf32, #tpu.memory_space<vmem>>, vector<1x16xf32>,
    %1767 = vector.extract_strided_slice %1748 {offsets = [9, 0], sizes = [1, 16], strides = [1, 1]} : vector<16x16xf32> to vector<1x16xf32>
    %c12_501 = arith.constant 12 : index
    %c0_502 = arith.constant 0 : index
    %1768 = vector.load %arg11[%c12_501, %c0_502] : memref<16x16xf32, #tpu.memory_space<vmem>>, vector<1x16xf32>
    tpu.vector_store %arg11[%c12_501, %c0_502], %1767 {strides = array<i32>} : memref<16x16xf32, #tpu.memory_space<vmem>>, vector<1x16xf32>,
    %1769 = vector.extract_strided_slice %1748 {offsets = [10, 0], sizes = [1, 16], strides = [1, 1]} : vector<16x16xf32> to vector<1x16xf32>
    %c5_503 = arith.constant 5 : index
    %c0_504 = arith.constant 0 : index
    %1770 = vector.load %arg11[%c5_503, %c0_504] : memref<16x16xf32, #tpu.memory_space<vmem>>, vector<1x16xf32>
    tpu.vector_store %arg11[%c5_503, %c0_504], %1769 {strides = array<i32>} : memref<16x16xf32, #tpu.memory_space<vmem>>, vector<1x16xf32>,
    %1771 = vector.extract_strided_slice %1748 {offsets = [11, 0], sizes = [1, 16], strides = [1, 1]} : vector<16x16xf32> to vector<1x16xf32>
    %c13 = arith.constant 13 : index
    %c0_505 = arith.constant 0 : index
    %1772 = vector.load %arg11[%c13, %c0_505] : memref<16x16xf32, #tpu.memory_space<vmem>>, vector<1x16xf32>
    tpu.vector_store %arg11[%c13, %c0_505], %1771 {strides = array<i32>} : memref<16x16xf32, #tpu.memory_space<vmem>>, vector<1x16xf32>,
    %1773 = vector.extract_strided_slice %1748 {offsets = [12, 0], sizes = [1, 16], strides = [1, 1]} : vector<16x16xf32> to vector<1x16xf32>
    %c6_506 = arith.constant 6 : index
    %c0_507 = arith.constant 0 : index
    %1774 = vector.load %arg11[%c6_506, %c0_507] : memref<16x16xf32, #tpu.memory_space<vmem>>, vector<1x16xf32>
    tpu.vector_store %arg11[%c6_506, %c0_507], %1773 {strides = array<i32>} : memref<16x16xf32, #tpu.memory_space<vmem>>, vector<1x16xf32>,
    %1775 = vector.extract_strided_slice %1748 {offsets = [13, 0], sizes = [1, 16], strides = [1, 1]} : vector<16x16xf32> to vector<1x16xf32>
    %c14_508 = arith.constant 14 : index
    %c0_509 = arith.constant 0 : index
    %1776 = vector.load %arg11[%c14_508, %c0_509] : memref<16x16xf32, #tpu.memory_space<vmem>>, vector<1x16xf32>
    tpu.vector_store %arg11[%c14_508, %c0_509], %1775 {strides = array<i32>} : memref<16x16xf32, #tpu.memory_space<vmem>>, vector<1x16xf32>,
    %1777 = vector.extract_strided_slice %1748 {offsets = [14, 0], sizes = [1, 16], strides = [1, 1]} : vector<16x16xf32> to vector<1x16xf32>
    %c7 = arith.constant 7 : index
    %c0_510 = arith.constant 0 : index
    %1778 = vector.load %arg11[%c7, %c0_510] : memref<16x16xf32, #tpu.memory_space<vmem>>, vector<1x16xf32>
    tpu.vector_store %arg11[%c7, %c0_510], %1777 {strides = array<i32>} : memref<16x16xf32, #tpu.memory_space<vmem>>, vector<1x16xf32>,
    %1779 = vector.extract_strided_slice %1748 {offsets = [15, 0], sizes = [1, 16], strides = [1, 1]} : vector<16x16xf32> to vector<1x16xf32>
    %c15 = arith.constant 15 : index
    %c0_511 = arith.constant 0 : index
    %1780 = vector.load %arg11[%c15, %c0_511] : memref<16x16xf32, #tpu.memory_space<vmem>>, vector<1x16xf32>
    tpu.vector_store %arg11[%c15, %c0_511], %1779 {strides = array<i32>} : memref<16x16xf32, #tpu.memory_space<vmem>>, vector<1x16xf32>,
    return
  }
}

</mosaic_0001>

<bundles_post_ra>
// kernel: slot_filling_forward.1
= control target key start
LH: loop header
LB: loop body
LE: loop exit
PB: predicated region body
PF: predicated region fallthrough
CT: control target
= control target key end

     0   :  { %16 = vsyncpa [#allocation5], 0  ;;  %s10621_s0 = inlined_call_operand.vmem [shape: f32[16,8], index: 0, kind: input, shape index: {}]   ;;  %s10622_s1 = inlined_call_operand.vmem [shape: f32[8,256], index: 1, kind: input, shape index: {}]   ;;  %s10623_s2 = inlined_call_operand.vmem [shape: f32[8,256], index: 2, kind: input, shape index: {}]   ;;  %s10624_s3 = inlined_call_operand.hbm [shape: f32[5,64,256], index: 3, kind: input, shape index: {}]   ;;  %s10625_s4 = inlined_call_operand.hbm [shape: f32[5,64,256], index: 4, kind: input, shape index: {}]   ;;  %s10626_s5 = inlined_call_operand.vmem [shape: f32[6,1,256], index: 5, kind: input, shape index: {}]   ;;  %s10627_s6 = inlined_call_operand.hbm [shape: f32[6,64,256], index: 6, kind: input, shape index: {}]   ;;  %s10628_s7 = inlined_call_operand.vmem [shape: f32[64,64], index: 7, kind: input, shape index: {}]   ;;  %s10629_s8 = inlined_call_operand.vmem [shape: f32[1,64], index: 8, kind: input, shape index: {}]   ;;  %s10630_s9 = inlined_call_operand.vmem [shape: f32[64,16], index: 9, kind: input, shape index: {}]   ;;  %s10631_s10 = inlined_call_operand.vmem [shape: f32[1,16], index: 10, kind: input, shape index: {}]   ;;  %s10632_s11 = inlined_call_operand.hbm [shape: f32[16,16], index: 11, kind: output, shape index: {}]  }
   0x1   :  { %17 = vsyncpa [#allocation8], 0 }
   0x2   :  { %18 = vsyncpa [#allocation6], 0  ;;  %s9155_s17 = smov [#allocation7]   ;;  %s9156_s19 = smov [#allocation4]  }
   0x3   :  { %s42_s18 = sshll.u32 %s9155_s17, 4  ;;  %s30_s20 = sshll.u32 %s9156_s19, 4  ;;  %s43_s18 = int_to_ptr.vmem [resolvable:$true] %s42_s18  ;;  %s9225_s20 = int_to_ptr.vmem [resolvable:$true] %s30_s20 }
   0x4   :  { %s9061_s23 = scalar_lea.hbm %s10625_s4, 10240 }
   0x5   :  { %p9062_p0 = scmp.ne.s32.totalorder %s10625_s4, %s9061_s23  ;;  %p9065_p1 = scmp.lt.u32.totalorder %s9061_s23, %s10625_s4 }
   0x7   :  { %p9067_p2 = pnand %p9065_p1, %p9062_p0 }
   0x9   :  { %9070 = shalt.err (!%p9067_p2)
}
   0xa   :  { %s9071_s28 = scalar_lea.vmem %s43_s18, 10240  ;;  %p9076_p4 = scmp.lt.s32.totalorder %s43_s18, %s43_s18 }
   0xb   :  { %p9072_p3 = scmp.ne.s32.totalorder %s43_s18, %s9071_s28  ;;  %p9077_p5 = scmp.lt.s32.totalorder %s9071_s28, %s9071_s28 }
   0xd   :  { %p9078_p6 = por %p9077_p5, %p9076_p4 }
   0xf   :  { %p9079_p7 = pnand %p9078_p6, %p9072_p3 }
  0x11   :  { %9082 = shalt.err (!%p9079_p7)
}
  0x12   :  { %s9157_s29 = smov 256   ;;  %s9158_s30 = smov 16  }
  0x13   :  { %48 = dma.hbm_to_vmem [thread:$0]  %s10625_s4, 10240, %s43_s18, [#allocation8], %s9157_s29, %s9157_s29, %s9158_s30  }
  0x14   :  { %s9083_s16 = scalar_lea.hbm %s10624_s3, 10240 }
  0x15   :  { %p9084_p8 = scmp.ne.s32.totalorder %s10624_s3, %s9083_s16  ;;  %p9087_p9 = scmp.lt.u32.totalorder %s9083_s16, %s10624_s3 }
  0x17   :  { %p9089_p10 = pnand %p9087_p9, %p9084_p8 }
  0x19   :  { %9092 = shalt.err (!%p9089_p10)
}
  0x1a   :  { %s9093_s23 = scalar_lea.vmem %s9225_s20, 10240  ;;  %p9098_p12 = scmp.lt.s32.totalorder %s9225_s20, %s9225_s20 }
  0x1b   :  { %p9094_p11 = scmp.ne.s32.totalorder %s9225_s20, %s9093_s23  ;;  %p9099_p13 = scmp.lt.s32.totalorder %s9093_s23, %s9093_s23 }
  0x1d   :  { %p9100_p0 = por %p9099_p13, %p9098_p12 }
  0x1f   :  { %p9101_p1 = pnand %p9100_p0, %p9094_p11 }
  0x21   :  { %9104 = shalt.err (!%p9101_p1)
}
  0x22   :  { %36 = dma.hbm_to_vmem [thread:$0]  %s10624_s3, 10240, %s9225_s20, [#allocation5], %s9157_s29, %s9157_s29, %s9158_s30  }
  0x23   :  { %s9159_s24 = smov [#allocation9]   ;;  %s9105_s28 = scalar_lea.hbm %s10627_s6, 12288 }
  0x24   :  { %s56_s25 = sshll.u32 %s9159_s24, 4  ;;  %p9106_p2 = scmp.ne.s32.totalorder %s10627_s6, %s9105_s28  ;;  %s57_s25 = int_to_ptr.vmem [resolvable:$true] %s56_s25 }
  0x25   :  { %p9109_p3 = scmp.lt.u32.totalorder %s9105_s28, %s10627_s6 }
  0x27   :  { %p9111_p4 = pnand %p9109_p3, %p9106_p2 }
  0x29   :  { %9114 = shalt.err (!%p9111_p4)
}
  0x2a   :  { %s9115_s16 = scalar_lea.vmem %s57_s25, 12288  ;;  %p9120_p6 = scmp.lt.s32.totalorder %s57_s25, %s57_s25 }
  0x2b   :  { %p9116_p5 = scmp.ne.s32.totalorder %s57_s25, %s9115_s16  ;;  %p9121_p7 = scmp.lt.s32.totalorder %s9115_s16, %s9115_s16 }
  0x2d   :  { %p9122_p8 = por %p9121_p7, %p9120_p6 }
  0x2f   :  { %p9123_p9 = pnand %p9122_p8, %p9116_p5 }
  0x31   :  { %9126 = shalt.err (!%p9123_p9)
}
  0x32   :  { %62 = dma.hbm_to_vmem [thread:$0]  %s10627_s6, 12288, %s57_s25, [#allocation8], %s9157_s29, %s9157_s29, %s9158_s30  }
  0x33   :  { %9149 = dma.done.wait [#allocation5], 10240  }
  0x34   :  { %9150 = vsyncadd [#allocation5], 4294957056 }
  0x35   :  { %9151 = dma.done.wait [#allocation8], 22528  }
  0x36   :  { %9152 = vsyncadd [#allocation8], 4294944768  ;;  %v9160_v0 = vmov 0.0   ;;  %v83_v1 = vld [vmem:[%s10622_s1 + $0x8] sm:$0xff]  ;;  %v82_v3 = vld [vmem:[%s10622_s1] sm:$0xff]  ;;  %vm114_vm0 = vcmask 64512   ;;  %v104_v31 = vlaneseq }
  0x37   :  { %185 = vmatprep.mubr.f32.mxu0 %v9160_v0  ;;  %262 = vmatprep.mubr.f32.mxu1 %v9160_v0  ;;  %v85_v2 = vld [vmem:[%s10623_s2 + $0x8] sm:$0xff]  ;;  %v84_v4 = vld [vmem:[%s10623_s2] sm:$0xff]  ;;  %v90_v7 = vld [vmem:[#allocation9 + $0x18] sm:$0xff]  ;;  %s9161_s25 = smov 64   ;;  %vm386_vm1 = vcmask 254976   ;;  %vm388_vm2 = vcmask 517376  }
  0x38   :  { %121 = vmatprep.subr.mxu0 %v83_v1  ;;  %198 = vmatprep.subr.mxu1 %v85_v2  ;;  %v80_v5 = vld [vmem:[%s10621_s0] sm:$0xff]  ;;  %v88_v6 = vld [vmem:[#allocation9 + $0x8] sm:$0xff]  ;;  %v89_v9 = vld [vmem:[#allocation9 + $0x10] sm:$0xff]  ;;  %v105_v32 = vshrl.u32 %v104_v31, 7  ;;  %vm275_vm3 = vcmask 523264   ;;  %vm506_vm4 = vcmask 257026  }
  0x39   :  { %122 = vmatpush1.msra.mxu0 %v82_v3  ;;  %199 = vmatpush1.msra.mxu1 %v84_v4  ;;  %v87_v8 = vld [vmem:[#allocation9] sm:$0xff]  ;;  %v9296_v10 = vpack.c.bf16 %v90_v7, %v88_v6  ;;  %v81_v12 = vld [vmem:[%s10621_s0 + $0x8] sm:$0xff]  ;;  %v94_v14 = vld [vmem:[#allocation9 + $0x38] sm:$0xff]  ;;  %vm508_vm5 = vcmask 519426   ;;  %vm740_vm6 = vcmask 261126   ;;  %vm742_vm7 = vcmask 523526  }
  0x3a   :  { %7263 = vmatmul.mubr.msk.f32.vlgmr.msra.gmra.mrb[0].mxu0 %vm114_vm0, %v80_v5  ;;  %7265 = vmatmul.mubr.msk.f32.vlgmr.msra.gmra.mrb[0].mxu1 %vm114_vm0, %v80_v5  ;;  %v9298_v11 = vpack.c.bf16 %v89_v9, %v87_v8  ;;  %v92_v13 = vld [vmem:[#allocation9 + $0x28] sm:$0xff]  ;;  %v91_v16 = vld [vmem:[#allocation9 + $0x20] sm:$0xff]  ;;  %v93_v17 = vld [vmem:[#allocation9 + $0x30] sm:$0xff]  ;;  %v9349_v33 = vsub.s32 0, %v105_v32  ;;  %v9354_v35 = vsub.s32 1, %v105_v32  ;;  %vm623_vm8 = vcmask 259076  }
  0x3b   :  { %268 = vmatprep.mubr.f32.mxu1 %v9160_v0  ;;  %v9304_v15 = vpack.c.bf16 %v94_v14, %v92_v13  ;;  %191 = vmatprep.mubr.f32.mxu0 %v9160_v0  ;;  %v96_v18 = vld [vmem:[#allocation9 + $0x48] sm:$0xff]  ;;  %v98_v19 = vld [vmem:[#allocation9 + $0x58] sm:$0xff]  ;;  %v9310_v20 = vpack.c.bf16 %v93_v17, %v91_v16  ;;  %v95_v22 = vld [vmem:[#allocation9 + $0x40] sm:$0xff]  ;;  %vm625_vm9 = vcmask 521476   ;;  %vm7198_vm10 = vcmask 130048  }
  0x3c   :  { %7498 = vmatprep.subr.bf16.mxu0 %v9296_v10  ;;  %7514 = vmatprep.subr.bf16.mxu1 %v9296_v10  ;;  %v9315_v21 = vpack.c.bf16 %v98_v19, %v96_v18  ;;  %v97_v23 = vld [vmem:[#allocation9 + $0x50] sm:$0xff]  ;;  %v100_v24 = vld [vmem:[#allocation9 + $0x68] sm:$0xff]  ;;  %v102_v25 = vld [vmem:[#allocation9 + $0x78] sm:$0xff]  ;;  %vm7221_vm11 = vcmask 122880   ;;  %vm7223_vm12 = vcmask 123905   ;;  %vm7225_vm13 = vcmask 124930  }
  0x3d   :  { %7500 = vmatpush1.bf16.msra.mxu0 %v9298_v11  ;;  %7516 = vmatpush1.bf16.msra.mxu1 %v9298_v11  ;;  %v9322_v26 = vpack.c.bf16 %v97_v23, %v95_v22  ;;  %v9326_v27 = vpack.c.bf16 %v102_v25, %v100_v24  ;;  %v99_v28 = vld [vmem:[#allocation9 + $0x60] sm:$0xff]  ;;  %v101_v29 = vld [vmem:[#allocation9 + $0x70] sm:$0xff]  ;;  %vm7227_vm14 = vcmask 125955   ;;  %vm7229_vm15 = vcmask 126980  }
  0x3e   :  { %7266 = vmatmul.mubr.msk.f32.gmra.mrb[2].mxu1 %vm114_vm0, %v81_v12  ;;  %7502 = vmatprep.subr.bf16.mxu0 %v9304_v15  ;;  %v9330_v30 = vpack.c.bf16 %v101_v29, %v99_v28  ;;  %v86_v34 = vld [vmem:[%s10626_s5] sm:$0x3] }
  0x3f   :  { %7264 = vmatmul.mubr.msk.f32.gmra.mrb[2].mxu0 %vm114_vm0, %v81_v12  ;;  %7518 = vmatprep.subr.bf16.mxu1 %v9304_v15  ;;  %v107_v36 = vrot.slane %v86_v34, %v9349_v33  ;;  %v111_v41 = vrot.slane %v86_v34, %v9354_v35  ;;  %vm7231_vm0 = vcmask 128005  }
  0x40   :  { %343 = vmatprep.mubr.f32.mxu0 %v9160_v0  ;;  %456 = vmatprep.mubr.f32.mxu1 %v9160_v0 }
  0x41   :  { %7504 = vmatpush1.bf16.msra.mxu0 %v9310_v20  ;;  %7520 = vmatpush1.bf16.msra.mxu1 %v9310_v20 }
  0x42   :  { %7506 = vmatprep.subr.bf16.mxu0 %v9315_v21  ;;  %7522 = vmatprep.subr.bf16.mxu1 %v9315_v21 }
  0x45   :  { %7508 = vmatpush1.bf16.msra.mxu0 %v9322_v26  ;;  %7524 = vmatpush1.bf16.msra.mxu1 %v9322_v26 }
  0x46   :  { %7510 = vmatprep.subr.bf16.mxu0 %v9326_v27  ;;  %7526 = vmatprep.subr.bf16.mxu1 %v9326_v27 }
  0x49   :  { %7512 = vmatpush1.bf16.msra.mxu0 %v9330_v30  ;;  %7528 = vmatpush1.bf16.msra.mxu1 %v9330_v30 }
  0x4a   :  { %7530 = vmatprep.subr.bf16.mxu0 %v9296_v10  ;;  %7546 = vmatprep.subr.bf16.mxu1 %v9296_v10 }
  0x4c   :  { %344 = vmatmul.mubr.f32.vlgmr.msra.gmra.mrb[4].mxu0 %v9160_v0 }
  0x4d   :  { %7532 = vmatpush1.bf16.msra.mxu0 %v9298_v11  ;;  %579 = vmatprep.mubr.f32.mxu0 %v9160_v0 }
  0x4e   :  { %7534 = vmatprep.subr.bf16.mxu0 %v9304_v15 }
  0x51   :  { %7536 = vmatpush1.bf16.msra.mxu0 %v9310_v20 }
  0x52   :  { %7538 = vmatprep.subr.bf16.mxu0 %v9315_v21 }
  0x55   :  { %7540 = vmatpush1.bf16.msra.mxu0 %v9322_v26 }
  0x56   :  { %7542 = vmatprep.subr.bf16.mxu0 %v9326_v27 }
  0x59   :  { %7544 = vmatpush1.bf16.msra.mxu0 %v9330_v30 }
  0x5a   :  { %7562 = vmatprep.subr.bf16.mxu0 %v9296_v10 }
 0x10d   :  { %v187_v37 = vpop.f32.mrb[0].mxu0  ;;  %v264_v38 = vpop.f32.mrb[0].mxu1 }
 0x10e   :  { %v189_v39 = vpop.f32.mrb[1].mxu0  ;;  %v266_v40 = vpop.f32.mrb[1].mxu1  ;;  %v188_v42 = vadd.f32 %v187_v37, %v107_v36  ;;  %v822_v43 = vrot.slane %v264_v38, 6  ;;  %v934_v44 = vrot.slane %v264_v38, 2 }
 0x10f   :  { %v823_v46 = vrot.slane %v266_v40, 6  ;;  %v935_v47 = vrot.slane %v266_v40, 2  ;;  %v190_v52 = vadd.f32 %v189_v39, %v111_v41 }
 0x111   :  { %v270_v45 = vpop.f32.mrb[2].mxu1 }
 0x112   :  { %v352_v48 = vrot.slane %v270_v45, 6  ;;  %v463_v49 = vrot.slane %v270_v45, 2  ;;  %v272_v50 = vpop.f32.mrb[3].mxu1  ;;  %v193_v51 = vpop.f32.mrb[2].mxu0 }
 0x113   :  { %v353_v53 = vrot.slane %v272_v50, 6  ;;  %v464_v54 = vrot.slane %v272_v50, 2  ;;  %v194_v55 = vadd.f32 %v193_v51, %v107_v36  ;;  %v195_v56 = vpop.f32.mrb[3].mxu0 }
 0x114   :  { %v9358_v57 = vadd.f32 %v463_v49, %v188_v42  ;;  %v196_v58 = vadd.f32 %v195_v56, %v111_v41  ;;  %v9360_v59 = vadd.f32 %v352_v48, %v188_v42 }
 0x115   :  { %v9362_v60 = vadd.f32 %v464_v54, %v190_v52  ;;  %v9364_v61 = vadd.f32 %v934_v44, %v194_v55  ;;  %v9366_v62 = vadd.f32 %v353_v53, %v190_v52  ;;  %v9368_v63 = vadd.f32 %v822_v43, %v194_v55 }
 0x116   :  { %v9370_v1 = vadd.f32 %v935_v47, %v196_v58  ;;  %v9372_v2 = vadd.f32 %v823_v46, %v196_v58 }
 0x11f   :  { %v345_v3 = vpop.f32.mrb[4].mxu0 }
 0x120   :  { %v358_v4 = vadd.f32 %v9360_v59, %v345_v3  ;;  %v347_v5 = vpop.f32.mrb[5].mxu0 }
 0x121   :  { %v359_v7 = vadd.f32 %v9366_v62, %v347_v5 }
 0x122   :  { %v7267_v6 = vmul.f32 -1.442695, %v358_v4 }
 0x123   :  { %v7268_v16 = vmul.f32 -1.442695, %v359_v7 }
 0x124   :  { %8467 = vpow2.f32 %v7267_v6 }
 0x125   :  { %8469 = vtanh.f32 %v359_v7 }
 0x12e   :  { %v8468_v8 = vpop.eup %8467 }
 0x12f   :  { %v363_v9 = vadd.f32 1.0, %v8468_v8  ;;  %v8470_v12 = vpop.eup %8469 }
 0x131   :  { %8471 = vrcp.f32 %v363_v9 }
 0x132   :  { %8473 = vpow2.f32 %v7268_v16 }
 0x13b   :  { %v8472_v13 = vpop.eup %8471 }
 0x13c   :  { %v374_v14 = vmul.f32 %v8472_v13, %v8470_v12  ;;  %v8474_v17 = vpop.eup %8473  ;;  %v373_v19 = vmul.f32 0.0, %v8472_v13 }
 0x13d   :  { %v370_v18 = vadd.f32 1.0, %v8474_v17 }
 0x13e   :  { %376 = vrot.lane.b32.xlu0 %v374_v14, %s9161_s25 }
 0x13f   :  { %8475 = vrcp.f32 %v370_v18 }
 0x149   :  { %v8476_v24 = vpop.eup %8475 }
 0x1b0   :  { %v377_v22 = vpop.permute.xlu0 %376 }
 0x1b1   :  { %v379_v23 = vadd.f32 %v377_v22, %v373_v19 }
 0x1b3   :  { %8477 = vtanh.f32 %v379_v23  ;;  %v491_v43 = vrot.slane %v379_v23, 6 }
 0x1bd   :  { %v8478_v25 = vpop.eup %8477 }
 0x1be   :  { %v381_v28 = vmul.f32 %v8478_v25, %v8476_v24 }
 0x1c0   :  { %383 = vrot.lane.b32.xlu0 %v381_v28, %s9161_s25 }
 0x232   :  { %v384_v29 = vpop.permute.xlu0 %383 }
 0x233   :  { %387 = vst.msk [vmem:[#allocation2] sm:$0x3] %vm386_vm1, %v384_v29  ;;  %7269 = vmatmul.mubr.msk.f32.vlgmr.msra.gmra.mrb[4].mxu1 %vm275_vm3, %v384_v29 }
 0x234   :  { %389 = vst.msk [vmem:[#allocation2 + $0xe] sm:$0x3] %vm388_vm2, %v384_v29  ;;  %7548 = vmatpush1.bf16.msra.mxu1 %v9298_v11  ;;  %696 = vmatprep.mubr.f32.mxu1 %v9160_v0 }
 0x235   :  { %7550 = vmatprep.subr.bf16.mxu1 %v9304_v15 }
 0x238   :  { %7552 = vmatpush1.bf16.msra.mxu1 %v9310_v20 }
 0x239   :  { %7554 = vmatprep.subr.bf16.mxu1 %v9315_v21 }
 0x23c   :  { %7556 = vmatpush1.bf16.msra.mxu1 %v9322_v26 }
 0x23d   :  { %7558 = vmatprep.subr.bf16.mxu1 %v9326_v27 }
 0x240   :  { %7560 = vmatpush1.bf16.msra.mxu1 %v9330_v30 }
 0x241   :  { %7578 = vmatprep.subr.bf16.mxu1 %v9296_v10 }
 0x306   :  { %v458_v31 = vpop.f32.mrb[4].mxu1 }
 0x307   :  { %v471_v32 = vrot.slane %v458_v31, 6  ;;  %v460_v34 = vpop.f32.mrb[5].mxu1 }
 0x308   :  { %v472_v38 = vrot.slane %v460_v34, 6 }
 0x309   :  { %v475_v36 = vadd.f32 %v471_v32, %v9358_v57 }
 0x30a   :  { %v476_v39 = vadd.f32 %v472_v38, %v9362_v60 }
 0x30b   :  { %v7270_v37 = vmul.f32 -1.442695, %v475_v36 }
 0x30c   :  { %v7271_v47 = vmul.f32 -1.442695, %v476_v39 }
 0x30d   :  { %8479 = vpow2.f32 %v7270_v37 }
 0x30e   :  { %8481 = vtanh.f32 %v476_v39 }
 0x317   :  { %v8480_v40 = vpop.eup %8479 }
 0x318   :  { %v480_v41 = vadd.f32 1.0, %v8480_v40  ;;  %v8482_v42 = vpop.eup %8481 }
 0x31a   :  { %8483 = vrcp.f32 %v480_v41 }
 0x31b   :  { %8485 = vpow2.f32 %v7271_v47 }
 0x324   :  { %v8484_v44 = vpop.eup %8483 }
 0x325   :  { %v494_v45 = vmul.f32 %v8484_v44, %v8482_v42  ;;  %v493_v46 = vmul.f32 %v8484_v44, %v491_v43  ;;  %v8486_v48 = vpop.eup %8485 }
 0x326   :  { %v487_v49 = vadd.f32 1.0, %v8486_v48 }
 0x327   :  { %496 = vrot.lane.b32.xlu1 %v494_v45, %s9161_s25 }
 0x328   :  { %8487 = vrcp.f32 %v487_v49 }
 0x332   :  { %v8488_v52 = vpop.eup %8487 }
 0x399   :  { %v497_v50 = vpop.permute.xlu1 %496 }
 0x39a   :  { %v499_v51 = vadd.f32 %v497_v50, %v493_v46 }
 0x39c   :  { %8489 = vtanh.f32 %v499_v51  ;;  %v608_v14 = vrot.slane %v499_v51, 6 }
 0x3a6   :  { %v8490_v53 = vpop.eup %8489 }
 0x3a7   :  { %v9393_v54 = vmul.f32 %v8490_v53, %v8488_v52 }
 0x3a9   :  { %v510_v55 = vrot.slane %v9393_v54, 2 }
 0x3ab   :  { %511 = vrot.lane.b32.xlu1 %v510_v55, %s9161_s25 }
 0x41d   :  { %v512_v56 = vpop.permute.xlu1 %511 }
 0x41e   :  { %7272 = vmatmul.mubr.msk.f32.vlgmr.msra.gmra.mrb[6].mxu0 %vm275_vm3, %v512_v56 }
 0x41f   :  { %7564 = vmatpush1.bf16.msra.mxu0 %v9298_v11  ;;  %813 = vmatprep.mubr.f32.mxu0 %v9160_v0 }
 0x420   :  { %7566 = vmatprep.subr.bf16.mxu0 %v9304_v15 }
 0x423   :  { %7568 = vmatpush1.bf16.msra.mxu0 %v9310_v20 }
 0x424   :  { %7570 = vmatprep.subr.bf16.mxu0 %v9315_v21 }
 0x427   :  { %7572 = vmatpush1.bf16.msra.mxu0 %v9322_v26 }
 0x428   :  { %7574 = vmatprep.subr.bf16.mxu0 %v9326_v27 }
 0x42b   :  { %7576 = vmatpush1.bf16.msra.mxu0 %v9330_v30 }
 0x42c   :  { %7594 = vmatprep.subr.bf16.mxu0 %v9296_v10 }
 0x4f1   :  { %v581_v58 = vpop.f32.mrb[6].mxu0 }
 0x4f2   :  { %v588_v3 = vrot.slane %v581_v58, 4  ;;  %v583_v4 = vpop.f32.mrb[7].mxu0 }
 0x4f3   :  { %v589_v7 = vrot.slane %v583_v4, 4 }
 0x4f4   :  { %v592_v5 = vadd.f32 %v588_v3, %v9360_v59 }
 0x4f5   :  { %v593_v8 = vadd.f32 %v589_v7, %v9366_v62 }
 0x4f6   :  { %v7273_v6 = vmul.f32 -1.442695, %v592_v5 }
 0x4f7   :  { %v7274_v19 = vmul.f32 -1.442695, %v593_v8 }
 0x4f8   :  { %8491 = vpow2.f32 %v7273_v6 }
 0x4f9   :  { %8493 = vtanh.f32 %v593_v8 }
 0x502   :  { %v8492_v9 = vpop.eup %8491 }
 0x503   :  { %v597_v12 = vadd.f32 1.0, %v8492_v9  ;;  %v8494_v13 = vpop.eup %8493 }
 0x505   :  { %8495 = vrcp.f32 %v597_v12 }
 0x506   :  { %8497 = vpow2.f32 %v7274_v19 }
 0x50f   :  { %v8496_v16 = vpop.eup %8495 }
 0x510   :  { %v611_v17 = vmul.f32 %v8496_v16, %v8494_v13  ;;  %v610_v18 = vmul.f32 %v8496_v16, %v608_v14  ;;  %v8498_v22 = vpop.eup %8497 }
 0x511   :  { %v604_v59 = vadd.f32 1.0, %v8498_v22 }
 0x512   :  { %613 = vrot.lane.b32.xlu0 %v611_v17, %s9161_s25 }
 0x513   :  { %8499 = vrcp.f32 %v604_v59 }
 0x51d   :  { %v8500_v62 = vpop.eup %8499 }
 0x584   :  { %v614_v23 = vpop.permute.xlu0 %613 }
 0x585   :  { %v616_v24 = vadd.f32 %v614_v23, %v610_v18 }
 0x587   :  { %8501 = vtanh.f32 %v616_v24  ;;  %v725_v44 = vrot.slane %v616_v24, 6 }
 0x591   :  { %v8502_v25 = vpop.eup %8501 }
 0x592   :  { %v9410_v28 = vmul.f32 %v8502_v25, %v8500_v62 }
 0x594   :  { %v627_v29 = vrot.slane %v9410_v28, 4 }
 0x596   :  { %628 = vrot.lane.b32.xlu1 %v627_v29, %s9161_s25 }
 0x608   :  { %v629_v31 = vpop.permute.xlu1 %628 }
 0x609   :  { %7275 = vmatmul.mubr.msk.f32.vlgmr.msra.gmra.mrb[6].mxu1 %vm275_vm3, %v629_v31 }
 0x60a   :  { %7580 = vmatpush1.bf16.msra.mxu1 %v9298_v11  ;;  %927 = vmatprep.mubr.f32.mxu1 %v9160_v0 }
 0x60b   :  { %7582 = vmatprep.subr.bf16.mxu1 %v9304_v15 }
 0x60e   :  { %7584 = vmatpush1.bf16.msra.mxu1 %v9310_v20 }
 0x60f   :  { %7586 = vmatprep.subr.bf16.mxu1 %v9315_v21 }
 0x612   :  { %7588 = vmatpush1.bf16.msra.mxu1 %v9322_v26 }
 0x613   :  { %7590 = vmatprep.subr.bf16.mxu1 %v9326_v27 }
 0x616   :  { %7592 = vmatpush1.bf16.msra.mxu1 %v9330_v30 }
 0x617   :  { %7610 = vmatprep.subr.bf16.mxu1 %v9296_v10 }
 0x6dc   :  { %v698_v32 = vpop.f32.mrb[6].mxu1 }
 0x6dd   :  { %v705_v34 = vrot.slane %v698_v32, 2  ;;  %v700_v36 = vpop.f32.mrb[7].mxu1 }
 0x6de   :  { %v706_v39 = vrot.slane %v700_v36, 2 }
 0x6df   :  { %v709_v37 = vadd.f32 %v705_v34, %v9358_v57 }
 0x6e0   :  { %v710_v40 = vadd.f32 %v706_v39, %v9362_v60 }
 0x6e1   :  { %v7276_v38 = vmul.f32 -1.442695, %v709_v37 }
 0x6e2   :  { %v7277_v10 = vmul.f32 -1.442695, %v710_v40 }
 0x6e3   :  { %8503 = vpow2.f32 %v7276_v38 }
 0x6e4   :  { %8505 = vtanh.f32 %v710_v40 }
 0x6ed   :  { %v8504_v41 = vpop.eup %8503 }
 0x6ee   :  { %v714_v42 = vadd.f32 1.0, %v8504_v41  ;;  %v8506_v43 = vpop.eup %8505 }
 0x6f0   :  { %8507 = vrcp.f32 %v714_v42 }
 0x6f1   :  { %8509 = vpow2.f32 %v7277_v10 }
 0x6fa   :  { %v8508_v45 = vpop.eup %8507 }
 0x6fb   :  { %v728_v46 = vmul.f32 %v8508_v45, %v8506_v43  ;;  %v727_v47 = vmul.f32 %v8508_v45, %v725_v44  ;;  %v8510_v48 = vpop.eup %8509 }
 0x6fc   :  { %v721_v57 = vadd.f32 1.0, %v8510_v48 }
 0x6fd   :  { %730 = vrot.lane.b32.xlu0 %v728_v46, %s9161_s25 }
 0x6fe   :  { %8511 = vrcp.f32 %v721_v57 }
 0x708   :  { %v8512_v60 = vpop.eup %8511 }
 0x76f   :  { %v731_v49 = vpop.permute.xlu0 %730 }
 0x770   :  { %v733_v50 = vadd.f32 %v731_v49, %v727_v47 }
 0x772   :  { %8513 = vtanh.f32 %v733_v50  ;;  %v844_v9 = vrot.slane %v733_v50, 6 }
 0x77c   :  { %v8514_v51 = vpop.eup %8513 }
 0x77d   :  { %v9427_v52 = vmul.f32 %v8514_v51, %v8512_v60 }
 0x77f   :  { %v744_v53 = vrot.slane %v9427_v52, 6 }
 0x781   :  { %745 = vrot.lane.b32.xlu1 %v744_v53, %s9161_s25 }
 0x7f3   :  { %v746_v55 = vpop.permute.xlu1 %745 }
 0x7f4   :  { %7278 = vmatmul.mubr.msk.f32.vlgmr.msra.gmra.mrb[8].mxu0 %vm275_vm3, %v746_v55 }
 0x7f5   :  { %7596 = vmatpush1.bf16.msra.mxu0 %v9298_v11  ;;  %1048 = vmatprep.mubr.f32.mxu0 %v9160_v0 }
 0x7f6   :  { %7598 = vmatprep.subr.bf16.mxu0 %v9304_v15 }
 0x7f9   :  { %7600 = vmatpush1.bf16.msra.mxu0 %v9310_v20 }
 0x7fa   :  { %7602 = vmatprep.subr.bf16.mxu0 %v9315_v21 }
 0x7fd   :  { %7604 = vmatpush1.bf16.msra.mxu0 %v9322_v26 }
 0x7fe   :  { %7606 = vmatprep.subr.bf16.mxu0 %v9326_v27 }
 0x801   :  { %7608 = vmatpush1.bf16.msra.mxu0 %v9330_v30 }
 0x8c7   :  { %v815_v56 = vpop.f32.mrb[8].mxu0 }
 0x8c8   :  { %v828_v58 = vadd.f32 %v9368_v63, %v815_v56  ;;  %v817_v3 = vpop.f32.mrb[9].mxu0 }
 0x8c9   :  { %v829_v5 = vadd.f32 %v9372_v2, %v817_v3 }
 0x8ca   :  { %v7279_v4 = vmul.f32 -1.442695, %v828_v58 }
 0x8cb   :  { %v7280_v16 = vmul.f32 -1.442695, %v829_v5 }
 0x8cc   :  { %8515 = vpow2.f32 %v7279_v4 }
 0x8cd   :  { %8517 = vtanh.f32 %v829_v5 }
 0x8d6   :  { %v8516_v6 = vpop.eup %8515 }
 0x8d7   :  { %v833_v7 = vadd.f32 1.0, %v8516_v6  ;;  %v8518_v8 = vpop.eup %8517 }
 0x8d9   :  { %8519 = vrcp.f32 %v833_v7 }
 0x8da   :  { %8521 = vpow2.f32 %v7280_v16 }
 0x8e3   :  { %v8520_v12 = vpop.eup %8519 }
 0x8e4   :  { %v847_v13 = vmul.f32 %v8520_v12, %v8518_v8  ;;  %v846_v14 = vmul.f32 %v8520_v12, %v844_v9  ;;  %v8522_v17 = vpop.eup %8521 }
 0x8e5   :  { %v840_v18 = vadd.f32 1.0, %v8522_v17 }
 0x8e6   :  { %849 = vrot.lane.b32.xlu0 %v847_v13, %s9161_s25 }
 0x8e7   :  { %8523 = vrcp.f32 %v840_v18 }
 0x8f1   :  { %v8524_v59 = vpop.eup %8523 }
 0x958   :  { %v850_v19 = vpop.permute.xlu0 %849 }
 0x959   :  { %v852_v22 = vadd.f32 %v850_v19, %v846_v14 }
 0x95b   :  { %8525 = vtanh.f32 %v852_v22 }
 0x965   :  { %v8526_v23 = vpop.eup %8525 }
 0x966   :  { %v854_v24 = vmul.f32 %v8526_v23, %v8524_v59 }
 0x968   :  { %856 = vrot.lane.b32.xlu1 %v854_v24, %s9161_s25 }
 0x9da   :  { %v9444_v62 = vpop.permute.xlu1 %856 }
 0x9db   :  { %7281 = vmatmul.mubr.msk.f32.vlgmr.msra.gmra.mrb[8].mxu1 %vm275_vm3, %v9444_v62 }
 0x9dc   :  { %7612 = vmatpush1.bf16.msra.mxu1 %v9298_v11  ;;  %1163 = vmatprep.mubr.f32.mxu1 %v9160_v0 }
 0x9dd   :  { %7614 = vmatprep.subr.bf16.mxu1 %v9304_v15 }
 0x9e0   :  { %7616 = vmatpush1.bf16.msra.mxu1 %v9310_v20 }
 0x9e1   :  { %7618 = vmatprep.subr.bf16.mxu1 %v9315_v21 }
 0x9e4   :  { %7620 = vmatpush1.bf16.msra.mxu1 %v9322_v26  ;;  %v962_v26 = vrot.slane %v852_v22, 6 }
 0x9e5   :  { %7622 = vmatprep.subr.bf16.mxu1 %v9326_v27 }
 0x9e8   :  { %7624 = vmatpush1.bf16.msra.mxu1 %v9330_v30 }
 0xaae   :  { %v929_v25 = vpop.f32.mrb[8].mxu1 }
 0xaaf   :  { %v942_v29 = vrot.slane %v929_v25, 6  ;;  %v931_v31 = vpop.f32.mrb[9].mxu1 }
 0xab0   :  { %v943_v34 = vrot.slane %v931_v31, 6 }
 0xab1   :  { %v946_v32 = vadd.f32 %v942_v29, %v9364_v61 }
 0xab2   :  { %v947_v15 = vadd.f32 %v943_v34, %v9370_v1 }
 0xab3   :  { %v7282_v11 = vmul.f32 -1.442695, %v946_v32 }
 0xab4   :  { %v7283_v30 = vmul.f32 -1.442695, %v947_v15 }
 0xab5   :  { %8527 = vpow2.f32 %v7282_v11 }
 0xab6   :  { %8529 = vtanh.f32 %v947_v15 }
 0xabf   :  { %v8528_v36 = vpop.eup %8527 }
 0xac0   :  { %v951_v20 = vadd.f32 1.0, %v8528_v36  ;;  %v8530_v21 = vpop.eup %8529  ;;  %v1212_v36 = vld [vmem:[#allocation4 + $0x8] sm:$0xff] }
 0xac2   :  { %8531 = vrcp.f32 %v951_v20  ;;  %v1214_v20 = vld [vmem:[#allocation4 + $0x18] sm:$0xff] }
 0xac3   :  { %8533 = vpow2.f32 %v7283_v30  ;;  %v1227_v30 = vld [vmem:[#allocation7] sm:$0xff] }
 0xacc   :  { %v8532_v37 = vpop.eup %8531 }
 0xacd   :  { %v965_v27 = vmul.f32 %v8532_v37, %v8530_v21  ;;  %v964_v38 = vmul.f32 %v8532_v37, %v962_v26  ;;  %v8534_v39 = vpop.eup %8533  ;;  %v1211_v21 = vld [vmem:[#allocation4] sm:$0xff]  ;;  %v1213_v26 = vld [vmem:[#allocation4 + $0x10] sm:$0xff]  ;;  %v1228_v37 = vld [vmem:[#allocation7 + $0x8] sm:$0xff] }
 0xace   :  { %v958_v40 = vadd.f32 1.0, %v8534_v39  ;;  %v1229_v39 = vld [vmem:[#allocation7 + $0x10] sm:$0xff] }
 0xacf   :  { %967 = vrot.lane.b32.xlu0 %v965_v27, %s9161_s25  ;;  %v1230_v27 = vld [vmem:[#allocation7 + $0x18] sm:$0xff] }
 0xad0   :  { %8535 = vrcp.f32 %v958_v40  ;;  %v1216_v40 = vld [vmem:[#allocation4 + $0x28] sm:$0xff] }
 0xada   :  { %v8536_v43 = vpop.eup %8535 }
 0xb41   :  { %v968_v41 = vpop.permute.xlu0 %967 }
 0xb42   :  { %v970_v42 = vadd.f32 %v968_v41, %v964_v38  ;;  %v7641_v38 = vpack.c.bf16 %v1230_v27, %v1228_v37  ;;  %v7643_v41 = vpack.c.bf16 %v1229_v39, %v1227_v30  ;;  %v1255_v39 = vld [vmem:[#allocation9 + $0xc8] sm:$0xff] }
 0xb44   :  { %8537 = vtanh.f32 %v970_v42  ;;  %v1077_v58 = vrot.slane %v970_v42, 6  ;;  %v1218_v42 = vld [vmem:[#allocation4 + $0x38] sm:$0xff]  ;;  %7642 = vmatprep.subr.bf16.mxu1 %v7641_v38  ;;  %v1252_v38 = vld [vmem:[#allocation9 + $0xb0] sm:$0xff] }
 0xb4e   :  { %v8538_v44 = vpop.eup %8537 }
 0xb4f   :  { %v9459_v45 = vmul.f32 %v8538_v44, %v8536_v43  ;;  %v1215_v43 = vld [vmem:[#allocation4 + $0x20] sm:$0xff]  ;;  %v1217_v44 = vld [vmem:[#allocation4 + $0x30] sm:$0xff] }
 0xb51   :  { %v979_v46 = vrot.slane %v9459_v45, 2 }
 0xb53   :  { %980 = vrot.lane.b32.xlu1 %v979_v46, %s9161_s25  ;;  %v7629_v46 = vpack.c.bf16 %v1218_v42, %v1216_v40  ;;  %v1257_v40 = vld [vmem:[#allocation9 + $0xd8] sm:$0xff] }
 0xb54   :  { %v9522_v42 = vpack.c.bf16 %v1257_v40, %v1255_v39 }
 0xbc5   :  { %v981_v47 = vpop.permute.xlu1 %980 }
 0xbc6   :  { %7284 = vmatmul.mubr.msk.f32.vlgmr.msra.gmra.mrb[10].mxu0 %vm275_vm3, %v981_v47  ;;  %v7631_v47 = vpack.c.bf16 %v1217_v44, %v1215_v43  ;;  %v1254_v43 = vld [vmem:[#allocation9 + $0xc0] sm:$0xff]  ;;  %v1256_v44 = vld [vmem:[#allocation9 + $0xd0] sm:$0xff] }
 0xbc7   :  { %1343 = vmatprep.mubr.f32.mxu0 %v9160_v0 }
 0xc99   :  { %v1050_v10 = vpop.f32.mrb[10].mxu0 }
 0xc9a   :  { %v1057_v48 = vrot.slane %v1050_v10, 4  ;;  %v1052_v57 = vpop.f32.mrb[11].mxu0  ;;  %v1232_v10 = vld [vmem:[#allocation7 + $0x28] sm:$0xff] }
 0xc9b   :  { %v1058_v60 = vrot.slane %v1052_v57, 4  ;;  %v1231_v57 = vld [vmem:[#allocation7 + $0x20] sm:$0xff] }
 0xc9c   :  { %v1061_v49 = vadd.f32 %v1057_v48, %v9368_v63  ;;  %v1234_v48 = vld [vmem:[#allocation7 + $0x38] sm:$0xff] }
 0xc9d   :  { %v1062_v51 = vadd.f32 %v1058_v60, %v9372_v2  ;;  %v1222_v60 = vld [vmem:[#allocation4 + $0x58] sm:$0xff] }
 0xc9e   :  { %v7285_v50 = vmul.f32 -1.442695, %v1061_v49  ;;  %v7645_v49 = vpack.c.bf16 %v1234_v48, %v1232_v10  ;;  %v1261_v10 = vld [vmem:[#allocation9 + $0xf8] sm:$0xff]  ;;  %v9528_v48 = vpack.c.bf16 %v1256_v44, %v1254_v43 }
 0xc9f   :  { %v7286_v6 = vmul.f32 -1.442695, %v1062_v51 }
 0xca0   :  { %8539 = vpow2.f32 %v7285_v50  ;;  %v1220_v50 = vld [vmem:[#allocation4 + $0x48] sm:$0xff] }
 0xca1   :  { %8541 = vtanh.f32 %v1062_v51 }
 0xcaa   :  { %v8540_v53 = vpop.eup %8539 }
 0xcab   :  { %v1066_v55 = vadd.f32 1.0, %v8540_v53  ;;  %v8542_v56 = vpop.eup %8541  ;;  %v7633_v53 = vpack.c.bf16 %v1222_v60, %v1220_v50  ;;  %v7290_v60 = vld [vmem:[%s10626_s5 + $0x2] sm:$0x3] }
 0xcad   :  { %8543 = vrcp.f32 %v1066_v55 }
 0xcae   :  { %8545 = vpow2.f32 %v7286_v6  ;;  %v1236_v6 = vld [vmem:[#allocation7 + $0x48] sm:$0xff] }
 0xcb7   :  { %v8544_v3 = vpop.eup %8543 }
 0xcb8   :  { %v1080_v4 = vmul.f32 %v8544_v3, %v8542_v56  ;;  %v1079_v5 = vmul.f32 %v8544_v3, %v1077_v58  ;;  %v8546_v7 = vpop.eup %8545 }
 0xcb9   :  { %v1073_v63 = vadd.f32 1.0, %v8546_v7 }
 0xcba   :  { %1082 = vrot.lane.b32.xlu0 %v1080_v4, %s9161_s25  ;;  %v1219_v4 = vld [vmem:[#allocation4 + $0x40] sm:$0xff] }
 0xcbb   :  { %8547 = vrcp.f32 %v1073_v63 }
 0xcc5   :  { %v8548_v2 = vpop.eup %8547 }
 0xd2c   :  { %v1083_v8 = vpop.permute.xlu0 %1082 }
 0xd2d   :  { %v1085_v9 = vadd.f32 %v1083_v8, %v1079_v5  ;;  %v1221_v5 = vld [vmem:[#allocation4 + $0x50] sm:$0xff]  ;;  %v1238_v8 = vld [vmem:[#allocation7 + $0x58] sm:$0xff] }
 0xd2e   :  { %v7635_v63 = vpack.c.bf16 %v1221_v5, %v1219_v4 }
 0xd2f   :  { %8549 = vtanh.f32 %v1085_v9  ;;  %v1192_v32 = vrot.slane %v1085_v9, 6  ;;  %v1237_v9 = vld [vmem:[#allocation7 + $0x50] sm:$0xff] }
 0xd39   :  { %v8550_v12 = vpop.eup %8549 }
 0xd3a   :  { %v1087_v13 = vmul.f32 %v8550_v12, %v8548_v2  ;;  %v7649_v2 = vpack.c.bf16 %v1238_v8, %v1236_v6 }
 0xd3c   :  { %v1094_v14 = vrot.slane %v1087_v13, 4 }
 0xd3e   :  { %1095 = vrot.lane.b32.xlu1 %v1094_v14, %s9161_s25  ;;  %v1226_v14 = vld [vmem:[#allocation4 + $0x78] sm:$0xff] }
 0xd42   :  { %503 = vrot.lane.b32.xlu1 %v9393_v54, %s9161_s25 }
 0xd46   :  { %737 = vrot.lane.b32.xlu1 %v9427_v52, %s9161_s25 }
 0xd4a   :  { %1089 = vrot.lane.b32.xlu1 %v1087_v13, %s9161_s25  ;;  %v1224_v13 = vld [vmem:[#allocation4 + $0x68] sm:$0xff] }
 0xdb0   :  { %v1096_v16 = vpop.permute.xlu1 %1095 }
 0xdb1   :  { %7287 = vmatmul.mubr.msk.f32.vlgmr.msra.gmra.mrb[10].mxu1 %vm275_vm3, %v1096_v16 }
 0xdb2   :  { %1420 = vmatprep.mubr.f32.mxu1 %v9160_v0  ;;  %7644 = vmatpush1.bf16.msra.mxu1 %v7643_v41 }
 0xdb3   :  { %7646 = vmatprep.subr.bf16.mxu1 %v7645_v49  ;;  %v1258_v49 = vld [vmem:[#allocation9 + $0xe0] sm:$0xff] }
 0xdb4   :  { %v504_v17 = vpop.permute.xlu1 %503 }
 0xdb5   :  { %507 = vst.msk [vmem:[#allocation2] sm:$0xc] %vm506_vm4, %v504_v17 }
 0xdb6   :  { %509 = vst.msk [vmem:[#allocation2 + $0xa] sm:$0xc] %vm508_vm5, %v504_v17  ;;  %v7637_v17 = vpack.c.bf16 %v1226_v14, %v1224_v13 }
 0xdb8   :  { %v738_v54 = vpop.permute.xlu1 %737 }
 0xdb9   :  { %741 = vst.msk [vmem:[#allocation2] sm:$0xc0] %vm740_vm6, %v738_v54 }
 0xdba   :  { %743 = vst.msk [vmem:[#allocation2 + $0x2] sm:$0xc0] %vm742_vm7, %v738_v54  ;;  %v1223_v54 = vld [vmem:[#allocation4 + $0x60] sm:$0xff] }
 0xdbb   :  { %859 = vst.msk [vmem:[#allocation2 + $0x8] sm:$0x3] %vm386_vm1, %v9444_v62 }
 0xdbc   :  { %860 = vst.msk [vmem:[#allocation2 + $0x6] sm:$0x3] %vm388_vm2, %v9444_v62  ;;  %v1090_v52 = vpop.permute.xlu1 %1089 }
 0xdbd   :  { %1092 = vst.msk [vmem:[#allocation2 + $0x8] sm:$0x30] %vm623_vm8, %v1090_v52 }
 0xdbe   :  { %1093 = vst.msk [vmem:[#allocation2 - $0x2] sm:$0x30] %vm625_vm9, %v1090_v52  ;;  %v1225_v52 = vld [vmem:[#allocation4 + $0x70] sm:$0xff] }
 0xe84   :  { %v1165_v18 = vpop.f32.mrb[10].mxu1 }
 0xe85   :  { %v1172_v19 = vrot.slane %v1165_v18, 2  ;;  %v1167_v22 = vpop.f32.mrb[11].mxu1  ;;  %v1240_v18 = vld [vmem:[#allocation7 + $0x68] sm:$0xff] }
 0xe86   :  { %v1173_v24 = vrot.slane %v1167_v22, 2  ;;  %v1242_v22 = vld [vmem:[#allocation7 + $0x78] sm:$0xff] }
 0xe87   :  { %v1176_v59 = vadd.f32 %v1172_v19, %v9364_v61  ;;  %v7625_v61 = vpack.c.bf16 %v1214_v20, %v1212_v36  ;;  %v7639_v19 = vpack.c.bf16 %v1225_v52, %v1223_v54  ;;  %v1246_v20 = vld [vmem:[#allocation9 + $0x80] sm:$0xff] }
 0xe88   :  { %v1177_v25 = vadd.f32 %v1173_v24, %v9370_v1  ;;  %v7627_v1 = vpack.c.bf16 %v1213_v26, %v1211_v21  ;;  %v7653_v24 = vpack.c.bf16 %v1242_v22, %v1240_v18  ;;  %v1248_v21 = vld [vmem:[#allocation9 + $0x90] sm:$0xff]  ;;  %v1253_v26 = vld [vmem:[#allocation9 + $0xb8] sm:$0xff] }
 0xe89   :  { %v7288_v23 = vmul.f32 -1.442695, %v1176_v59  ;;  %7626 = vmatprep.subr.bf16.mxu0 %v7625_v61  ;;  %v1239_v59 = vld [vmem:[#allocation7 + $0x60] sm:$0xff]  ;;  %v1251_v61 = vld [vmem:[#allocation9 + $0xa8] sm:$0xff]  ;;  %v9510_v37 = vpack.c.bf16 %v1248_v21, %v1246_v20 }
 0xe8a   :  { %7628 = vmatpush1.bf16.msra.mxu0 %v7627_v1  ;;  %v7289_v55 = vmul.f32 -1.442695, %v1177_v25  ;;  %v9512_v27 = vpack.c.bf16 %v1253_v26, %v1251_v61  ;;  %v1250_v1 = vld [vmem:[#allocation9 + $0xa0] sm:$0xff] }
 0xe8b   :  { %8551 = vpow2.f32 %v7288_v23  ;;  %7630 = vmatprep.subr.bf16.mxu0 %v7629_v46  ;;  %v1241_v23 = vld [vmem:[#allocation7 + $0x70] sm:$0xff]  ;;  %v9518_v41 = vpack.c.bf16 %v1252_v38, %v1250_v1 }
 0xe8c   :  { %8553 = vtanh.f32 %v1177_v25  ;;  %v7655_v25 = vpack.c.bf16 %v1241_v23, %v1239_v59 }
 0xe8e   :  { %7632 = vmatpush1.bf16.msra.mxu0 %v7631_v47  ;;  %v1259_v47 = vld [vmem:[#allocation9 + $0xe8] sm:$0xff] }
 0xe8f   :  { %7634 = vmatprep.subr.bf16.mxu0 %v7633_v53 }
 0xe92   :  { %7636 = vmatpush1.bf16.msra.mxu0 %v7635_v63 }
 0xe93   :  { %7638 = vmatprep.subr.bf16.mxu0 %v7637_v17 }
 0xe95   :  { %v8552_v29 = vpop.eup %8551 }
 0xe96   :  { %v1181_v31 = vadd.f32 1.0, %v8552_v29  ;;  %v8554_v62 = vpop.eup %8553  ;;  %7640 = vmatpush1.bf16.msra.mxu0 %v7639_v19  ;;  %v1247_v29 = vld [vmem:[#allocation9 + $0x88] sm:$0xff] }
 0xe98   :  { %8555 = vrcp.f32 %v1181_v31  ;;  %v1249_v31 = vld [vmem:[#allocation9 + $0x98] sm:$0xff] }
 0xe99   :  { %8557 = vpow2.f32 %v7289_v55 }
 0xea2   :  { %v8556_v11 = vpop.eup %8555 }
 0xea3   :  { %v1195_v34 = vmul.f32 %v8556_v11, %v8554_v62  ;;  %v1194_v15 = vmul.f32 %v8556_v11, %v1192_v32  ;;  %v8558_v56 = vpop.eup %8557  ;;  %v9498_v32 = vpack.c.bf16 %v1249_v31, %v1247_v29 }
 0xea4   :  { %v1188_v58 = vadd.f32 1.0, %v8558_v56  ;;  %v1270_v56 = vrot.slane %v7290_v60, %v9354_v35 }
 0xea5   :  { %1197 = vrot.lane.b32.xlu0 %v1195_v34, %s9161_s25  ;;  %7658 = vmatprep.subr.bf16.mxu0 %v9498_v32 }
 0xea6   :  { %8559 = vrcp.f32 %v1188_v58 }
 0xea9   :  { %620 = vrot.lane.b32.xlu0 %v9410_v28, %s9161_s25  ;;  %v1233_v28 = vld [vmem:[#allocation7 + $0x30] sm:$0xff] }
 0xeaa   :  { %v7647_v51 = vpack.c.bf16 %v1233_v28, %v1231_v57  ;;  %v9532_v57 = vpack.c.bf16 %v1261_v10, %v1259_v47  ;;  %v1260_v28 = vld [vmem:[#allocation9 + $0xf0] sm:$0xff] }
 0xeab   :  { %v9539_v50 = vpack.c.bf16 %v1260_v28, %v1258_v49 }
 0xeac   :  { %7648 = vmatpush1.bf16.msra.mxu1 %v7647_v51  ;;  %v1266_v51 = vrot.slane %v7290_v60, %v9349_v33 }
 0xead   :  { %974 = vrot.lane.b32.xlu0 %v9459_v45, %s9161_s25  ;;  %v1235_v45 = vld [vmem:[#allocation7 + $0x40] sm:$0xff]  ;;  %7650 = vmatprep.subr.bf16.mxu1 %v7649_v2 }
 0xeae   :  { %v7651_v12 = vpack.c.bf16 %v1237_v9, %v1235_v45 }
 0xeb0   :  { %7652 = vmatpush1.bf16.msra.mxu1 %v7651_v12  ;;  %v8560_v11 = vpop.eup %8559 }
 0xeb1   :  { %7654 = vmatprep.subr.bf16.mxu1 %v7653_v24 }
 0xeb4   :  { %7656 = vmatpush1.bf16.msra.mxu1 %v7655_v25 }
 0xeb5   :  { %7674 = vmatprep.subr.bf16.mxu1 %v9498_v32 }
 0xf17   :  { %v1198_v3 = vpop.permute.xlu0 %1197 }
 0xf18   :  { %v9493_v7 = vadd.f32 %v1198_v3, %v1194_v15 }
 0xf1a   :  { %8561 = vtanh.f32 %v9493_v7 }
 0xf1b   :  { %v621_v16 = vpop.permute.xlu0 %620 }
 0xf1c   :  { %624 = vst.msk [vmem:[#allocation2] sm:$0x30] %vm623_vm8, %v621_v16 }
 0xf1d   :  { %626 = vst.msk [vmem:[#allocation2 + $0x6] sm:$0x30] %vm625_vm9, %v621_v16 }
 0xf1f   :  { %v975_v62 = vpop.permute.xlu0 %974 }
 0xf20   :  { %977 = vst.msk [vmem:[#allocation2 + $0x8] sm:$0xc] %vm506_vm4, %v975_v62 }
 0xf21   :  { %978 = vst.msk [vmem:[#allocation2 + $0x2] sm:$0xc] %vm508_vm5, %v975_v62 }
 0xf24   :  { %v8562_v34 = vpop.eup %8561 }
 0xf25   :  { %v9504_v15 = vmul.f32 %v8562_v34, %v8560_v11 }
 0xf27   :  { %1204 = vrot.lane.b32.xlu0 %v9504_v15, %s9161_s25 }
 0xf99   :  { %v1205_v36 = vpop.permute.xlu0 %1204 }
 0xf9a   :  { %1207 = vst.msk [vmem:[#allocation2 + $0x8] sm:$0xc0] %vm740_vm6, %v1205_v36 }
 0xf9b   :  { %1208 = vst.msk [vmem:[#allocation2 - $0x6] sm:$0xc0] %vm742_vm7, %v1205_v36 }
 0xfa1   :  { %v1210_v46 = vld [vmem:[#allocation2 + $0x8] sm:$0xff] }
 0xfa2   :  { %v1209_v30 = vld [vmem:[#allocation2] sm:$0xff] }
 0xfa3   :  { %7291 = vmatmul.mubr.msk.f32.vlgmr.msra.gmra.mrb[12].mxu0 %vm275_vm3, %v1209_v30  ;;  %7293 = vmatmul.mubr.msk.f32.vlgmr.msra.gmra.mrb[12].mxu1 %vm275_vm3, %v1209_v30 }
 0xfa4   :  { %7660 = vmatpush1.bf16.msra.mxu0 %v9510_v37  ;;  %1349 = vmatprep.mubr.f32.mxu0 %v9160_v0 }
 0xfa5   :  { %1426 = vmatprep.mubr.f32.mxu1 %v9160_v0  ;;  %7662 = vmatprep.subr.bf16.mxu0 %v9512_v27 }
 0xfa6   :  { %7676 = vmatpush1.bf16.msra.mxu1 %v9510_v37 }
 0xfa7   :  { %7292 = vmatmul.mubr.msk.f32.gmra.mrb[14].mxu0 %vm275_vm3, %v1210_v46  ;;  %7294 = vmatmul.mubr.msk.f32.gmra.mrb[14].mxu1 %vm275_vm3, %v1210_v46 }
 0xfa8   :  { %7664 = vmatpush1.bf16.msra.mxu0 %v9518_v41  ;;  %1497 = vmatprep.mubr.f32.mxu0 %v9160_v0 }
 0xfa9   :  { %7666 = vmatprep.subr.bf16.mxu0 %v9522_v42  ;;  %7678 = vmatprep.subr.bf16.mxu1 %v9512_v27 }
 0xfaa   :  { %7680 = vmatpush1.bf16.msra.mxu1 %v9518_v41  ;;  %1608 = vmatprep.mubr.f32.mxu1 %v9160_v0 }
 0xfab   :  { %7682 = vmatprep.subr.bf16.mxu1 %v9522_v42 }
 0xfac   :  { %7668 = vmatpush1.bf16.msra.mxu0 %v9528_v48 }
 0xfad   :  { %7670 = vmatprep.subr.bf16.mxu0 %v9532_v57 }
 0xfae   :  { %7684 = vmatpush1.bf16.msra.mxu1 %v9528_v48 }
 0xfaf   :  { %7686 = vmatprep.subr.bf16.mxu1 %v9532_v57 }
 0xfb0   :  { %7672 = vmatpush1.bf16.msra.mxu0 %v9539_v50 }
 0xfb1   :  { %7690 = vmatprep.subr.bf16.mxu0 %v9498_v32 }
 0xfb2   :  { %7688 = vmatpush1.bf16.msra.mxu1 %v9539_v50 }
 0xfb3   :  { %1498 = vmatmul.mubr.f32.vlgmr.msra.gmra.mrb[16].mxu0 %v9160_v0  ;;  %7706 = vmatprep.subr.bf16.mxu1 %v9498_v32 }
 0xfb4   :  { %7692 = vmatpush1.bf16.msra.mxu0 %v9510_v37  ;;  %1729 = vmatprep.mubr.f32.mxu0 %v9160_v0 }
 0xfb5   :  { %7694 = vmatprep.subr.bf16.mxu0 %v9512_v27 }
 0xfb8   :  { %7696 = vmatpush1.bf16.msra.mxu0 %v9518_v41 }
 0xfb9   :  { %7698 = vmatprep.subr.bf16.mxu0 %v9522_v42 }
 0xfbc   :  { %7700 = vmatpush1.bf16.msra.mxu0 %v9528_v48 }
 0xfbd   :  { %7702 = vmatprep.subr.bf16.mxu0 %v9532_v57 }
 0xfc0   :  { %7704 = vmatpush1.bf16.msra.mxu0 %v9539_v50 }
 0xfc1   :  { %7722 = vmatprep.subr.bf16.mxu0 %v9498_v32 }
0x1076   :  { %v1345_v53 = vpop.f32.mrb[12].mxu0  ;;  %v1422_v55 = vpop.f32.mrb[12].mxu1 }
0x1077   :  { %v1347_v58 = vpop.f32.mrb[13].mxu0  ;;  %v1424_v3 = vpop.f32.mrb[13].mxu1  ;;  %v1346_v4 = vadd.f32 %v1345_v53, %v1266_v51  ;;  %v1968_v5 = vrot.slane %v1422_v55, 6  ;;  %v2080_v6 = vrot.slane %v1422_v55, 2 }
0x1078   :  { %v1348_v63 = vadd.f32 %v1347_v58, %v1270_v56  ;;  %v1969_v9 = vrot.slane %v1424_v3, 6  ;;  %v2081_v17 = vrot.slane %v1424_v3, 2 }
0x107a   :  { %v1351_v8 = vpop.f32.mrb[14].mxu0  ;;  %v1428_v45 = vpop.f32.mrb[14].mxu1 }
0x107b   :  { %v1352_v2 = vadd.f32 %v1351_v8, %v1266_v51  ;;  %v1506_v12 = vrot.slane %v1428_v45, 6  ;;  %v1615_v13 = vrot.slane %v1428_v45, 2  ;;  %v1353_v14 = vpop.f32.mrb[15].mxu0  ;;  %v1430_v16 = vpop.f32.mrb[15].mxu1 }
0x107c   :  { %v1354_v54 = vadd.f32 %v1353_v14, %v1270_v56  ;;  %v1507_v52 = vrot.slane %v1430_v16, 6  ;;  %v1616_v18 = vrot.slane %v1430_v16, 2 }
0x107d   :  { %v9563_v19 = vadd.f32 %v2080_v6, %v1352_v2  ;;  %v9565_v22 = vadd.f32 %v1615_v13, %v1346_v4  ;;  %v9567_v59 = vadd.f32 %v1506_v12, %v1346_v4  ;;  %v9569_v23 = vadd.f32 %v1968_v5, %v1352_v2 }
0x107e   :  { %v9571_v24 = vadd.f32 %v2081_v17, %v1354_v54  ;;  %v9573_v25 = vadd.f32 %v1616_v18, %v1348_v63  ;;  %v9575_v29 = vadd.f32 %v1507_v52, %v1348_v63  ;;  %v9577_v31 = vadd.f32 %v1969_v9, %v1354_v54 }
0x1086   :  { %v1499_v62 = vpop.f32.mrb[16].mxu0 }
0x1087   :  { %v1512_v11 = vadd.f32 %v9567_v59, %v1499_v62  ;;  %v1501_v34 = vpop.f32.mrb[17].mxu0 }
0x1088   :  { %v1513_v20 = vadd.f32 %v9575_v29, %v1501_v34 }
0x1089   :  { %v7295_v36 = vmul.f32 -1.442695, %v1512_v11 }
0x108a   :  { %v7296_v30 = vmul.f32 -1.442695, %v1513_v20 }
0x108b   :  { %8563 = vpow2.f32 %v7295_v36 }
0x108c   :  { %8565 = vtanh.f32 %v1513_v20 }
0x1095   :  { %v8564_v21 = vpop.eup %8563 }
0x1096   :  { %v1517_v61 = vadd.f32 1.0, %v8564_v21  ;;  %v8566_v26 = vpop.eup %8565 }
0x1098   :  { %8567 = vrcp.f32 %v1517_v61 }
0x1099   :  { %8569 = vpow2.f32 %v7296_v30 }
0x10a2   :  { %v8568_v1 = vpop.eup %8567 }
0x10a3   :  { %v1528_v38 = vmul.f32 %v8568_v1, %v8566_v26  ;;  %v8570_v39 = vpop.eup %8569  ;;  %v1527_v43 = vmul.f32 0.0, %v8568_v1 }
0x10a4   :  { %v1524_v40 = vadd.f32 1.0, %v8570_v39 }
0x10a5   :  { %1530 = vrot.lane.b32.xlu1 %v1528_v38, %s9161_s25 }
0x10a6   :  { %8571 = vrcp.f32 %v1524_v40 }
0x10b0   :  { %v8572_v47 = vpop.eup %8571 }
0x1117   :  { %v1531_v44 = vpop.permute.xlu1 %1530 }
0x1118   :  { %v1533_v46 = vadd.f32 %v1531_v44, %v1527_v43 }
0x111a   :  { %8573 = vtanh.f32 %v1533_v46  ;;  %v1643_v63 = vrot.slane %v1533_v46, 6 }
0x1124   :  { %v8574_v10 = vpop.eup %8573 }
0x1125   :  { %v1535_v49 = vmul.f32 %v8574_v10, %v8572_v47 }
0x1127   :  { %1537 = vrot.lane.b32.xlu0 %v1535_v49, %s9161_s25 }
0x1199   :  { %v1538_v28 = vpop.permute.xlu0 %1537 }
0x119a   :  { %1540 = vst.msk [vmem:[#allocation3] sm:$0x3] %vm386_vm1, %v1538_v28  ;;  %7297 = vmatmul.mubr.msk.f32.vlgmr.msra.gmra.mrb[16].mxu1 %vm275_vm3, %v1538_v28 }
0x119b   :  { %1541 = vst.msk [vmem:[#allocation3 + $0xe] sm:$0x3] %vm388_vm2, %v1538_v28  ;;  %7708 = vmatpush1.bf16.msra.mxu1 %v9510_v37  ;;  %1844 = vmatprep.mubr.f32.mxu1 %v9160_v0 }
0x119c   :  { %7710 = vmatprep.subr.bf16.mxu1 %v9512_v27 }
0x119f   :  { %7712 = vmatpush1.bf16.msra.mxu1 %v9518_v41 }
0x11a0   :  { %7714 = vmatprep.subr.bf16.mxu1 %v9522_v42 }
0x11a3   :  { %7716 = vmatpush1.bf16.msra.mxu1 %v9528_v48 }
0x11a4   :  { %7718 = vmatprep.subr.bf16.mxu1 %v9532_v57 }
0x11a7   :  { %7720 = vmatpush1.bf16.msra.mxu1 %v9539_v50 }
0x11a8   :  { %7738 = vmatprep.subr.bf16.mxu1 %v9498_v32 }
0x126d   :  { %v1610_v60 = vpop.f32.mrb[16].mxu1 }
0x126e   :  { %v1623_v51 = vrot.slane %v1610_v60, 6  ;;  %v1612_v53 = vpop.f32.mrb[17].mxu1 }
0x126f   :  { %v1624_v58 = vrot.slane %v1612_v53, 6 }
0x1270   :  { %v1627_v55 = vadd.f32 %v1623_v51, %v9565_v22 }
0x1271   :  { %v1628_v3 = vadd.f32 %v1624_v58, %v9573_v25 }
0x1272   :  { %v7298_v56 = vmul.f32 -1.442695, %v1627_v55 }
0x1273   :  { %v7299_v2 = vmul.f32 -1.442695, %v1628_v3 }
0x1274   :  { %8575 = vpow2.f32 %v7298_v56 }
0x1275   :  { %8577 = vtanh.f32 %v1628_v3 }
0x127e   :  { %v8576_v4 = vpop.eup %8575 }
0x127f   :  { %v1632_v5 = vadd.f32 1.0, %v8576_v4  ;;  %v8578_v6 = vpop.eup %8577 }
0x1281   :  { %8579 = vrcp.f32 %v1632_v5 }
0x1282   :  { %8581 = vpow2.f32 %v7299_v2 }
0x128b   :  { %v8580_v8 = vpop.eup %8579 }
0x128c   :  { %v1646_v45 = vmul.f32 %v8580_v8, %v8578_v6  ;;  %v1645_v9 = vmul.f32 %v8580_v8, %v1643_v63  ;;  %v8582_v12 = vpop.eup %8581 }
0x128d   :  { %v1639_v13 = vadd.f32 1.0, %v8582_v12 }
0x128e   :  { %1648 = vrot.lane.b32.xlu1 %v1646_v45, %s9161_s25 }
0x128f   :  { %8583 = vrcp.f32 %v1639_v13 }
0x1299   :  { %v8584_v17 = vpop.eup %8583 }
0x1300   :  { %v1649_v14 = vpop.permute.xlu1 %1648 }
0x1301   :  { %v1651_v16 = vadd.f32 %v1649_v14, %v1645_v9 }
0x1303   :  { %8585 = vtanh.f32 %v1651_v16  ;;  %v1758_v39 = vrot.slane %v1651_v16, 6 }
0x130d   :  { %v8586_v54 = vpop.eup %8585 }
0x130e   :  { %v9598_v52 = vmul.f32 %v8586_v54, %v8584_v17 }
0x1310   :  { %v1660_v18 = vrot.slane %v9598_v52, 2 }
0x1312   :  { %1661 = vrot.lane.b32.xlu0 %v1660_v18, %s9161_s25 }
0x1384   :  { %v1662_v62 = vpop.permute.xlu0 %1661 }
0x1385   :  { %7300 = vmatmul.mubr.msk.f32.vlgmr.msra.gmra.mrb[18].mxu0 %vm275_vm3, %v1662_v62 }
0x1386   :  { %7724 = vmatpush1.bf16.msra.mxu0 %v9510_v37  ;;  %1959 = vmatprep.mubr.f32.mxu0 %v9160_v0 }
0x1387   :  { %7726 = vmatprep.subr.bf16.mxu0 %v9512_v27 }
0x138a   :  { %7728 = vmatpush1.bf16.msra.mxu0 %v9518_v41 }
0x138b   :  { %7730 = vmatprep.subr.bf16.mxu0 %v9522_v42 }
0x138e   :  { %7732 = vmatpush1.bf16.msra.mxu0 %v9528_v48 }
0x138f   :  { %7734 = vmatprep.subr.bf16.mxu0 %v9532_v57 }
0x1392   :  { %7736 = vmatpush1.bf16.msra.mxu0 %v9539_v50 }
0x1393   :  { %7754 = vmatprep.subr.bf16.mxu0 %v9498_v32 }
0x1458   :  { %v1731_v11 = vpop.f32.mrb[18].mxu0 }
0x1459   :  { %v1738_v34 = vrot.slane %v1731_v11, 4  ;;  %v1733_v36 = vpop.f32.mrb[19].mxu0 }
0x145a   :  { %v1739_v61 = vrot.slane %v1733_v36, 4 }
0x145b   :  { %v1742_v20 = vadd.f32 %v1738_v34, %v9567_v59 }
0x145c   :  { %v1743_v26 = vadd.f32 %v1739_v61, %v9575_v29 }
0x145d   :  { %v7301_v21 = vmul.f32 -1.442695, %v1742_v20 }
0x145e   :  { %v7302_v46 = vmul.f32 -1.442695, %v1743_v26 }
0x145f   :  { %8587 = vpow2.f32 %v7301_v21 }
0x1460   :  { %8589 = vtanh.f32 %v1743_v26 }
0x1469   :  { %v8588_v1 = vpop.eup %8587 }
0x146a   :  { %v1747_v38 = vadd.f32 1.0, %v8588_v1  ;;  %v8590_v30 = vpop.eup %8589 }
0x146c   :  { %8591 = vrcp.f32 %v1747_v38 }
0x146d   :  { %8593 = vpow2.f32 %v7302_v46 }
0x1476   :  { %v8592_v40 = vpop.eup %8591 }
0x1477   :  { %v1761_v43 = vmul.f32 %v8592_v40, %v8590_v30  ;;  %v1760_v44 = vmul.f32 %v8592_v40, %v1758_v39  ;;  %v8594_v47 = vpop.eup %8593 }
0x1478   :  { %v1754_v59 = vadd.f32 1.0, %v8594_v47 }
0x1479   :  { %1763 = vrot.lane.b32.xlu1 %v1761_v43, %s9161_s25 }
0x147a   :  { %8595 = vrcp.f32 %v1754_v59 }
0x1484   :  { %v8596_v29 = vpop.eup %8595 }
0x14eb   :  { %v1764_v10 = vpop.permute.xlu1 %1763 }
0x14ec   :  { %v1766_v49 = vadd.f32 %v1764_v10, %v1760_v44 }
0x14ee   :  { %8597 = vtanh.f32 %v1766_v49  ;;  %v1873_v9 = vrot.slane %v1766_v49, 6 }
0x14f8   :  { %v8598_v28 = vpop.eup %8597 }
0x14f9   :  { %v9615_v60 = vmul.f32 %v8598_v28, %v8596_v29 }
0x14fb   :  { %v1775_v51 = vrot.slane %v9615_v60, 4 }
0x14fd   :  { %1776 = vrot.lane.b32.xlu0 %v1775_v51, %s9161_s25 }
0x156f   :  { %v1777_v53 = vpop.permute.xlu0 %1776 }
0x1570   :  { %7303 = vmatmul.mubr.msk.f32.vlgmr.msra.gmra.mrb[18].mxu1 %vm275_vm3, %v1777_v53 }
0x1571   :  { %7740 = vmatpush1.bf16.msra.mxu1 %v9510_v37  ;;  %2073 = vmatprep.mubr.f32.mxu1 %v9160_v0 }
0x1572   :  { %7742 = vmatprep.subr.bf16.mxu1 %v9512_v27 }
0x1575   :  { %7744 = vmatpush1.bf16.msra.mxu1 %v9518_v41 }
0x1576   :  { %7746 = vmatprep.subr.bf16.mxu1 %v9522_v42 }
0x1579   :  { %7748 = vmatpush1.bf16.msra.mxu1 %v9528_v48 }
0x157a   :  { %7750 = vmatprep.subr.bf16.mxu1 %v9532_v57 }
0x157d   :  { %7752 = vmatpush1.bf16.msra.mxu1 %v9539_v50 }
0x157e   :  { %7770 = vmatprep.subr.bf16.mxu1 %v9498_v32 }
0x1643   :  { %v1846_v55 = vpop.f32.mrb[18].mxu1 }
0x1644   :  { %v1853_v56 = vrot.slane %v1846_v55, 2  ;;  %v1848_v58 = vpop.f32.mrb[19].mxu1 }
0x1645   :  { %v1854_v5 = vrot.slane %v1848_v58, 2 }
0x1646   :  { %v1857_v3 = vadd.f32 %v1853_v56, %v9565_v22 }
0x1647   :  { %v1858_v6 = vadd.f32 %v1854_v5, %v9573_v25 }
0x1648   :  { %v7304_v4 = vmul.f32 -1.442695, %v1857_v3 }
0x1649   :  { %v7305_v32 = vmul.f32 -1.442695, %v1858_v6 }
0x164a   :  { %8599 = vpow2.f32 %v7304_v4 }
0x164b   :  { %8601 = vtanh.f32 %v1858_v6 }
0x1654   :  { %v8600_v63 = vpop.eup %8599 }
0x1655   :  { %v1862_v8 = vadd.f32 1.0, %v8600_v63  ;;  %v8602_v45 = vpop.eup %8601 }
0x1657   :  { %8603 = vrcp.f32 %v1862_v8 }
0x1658   :  { %8605 = vpow2.f32 %v7305_v32 }
0x1661   :  { %v8604_v2 = vpop.eup %8603 }
0x1662   :  { %v1876_v12 = vmul.f32 %v8604_v2, %v8602_v45  ;;  %v1875_v13 = vmul.f32 %v8604_v2, %v1873_v9  ;;  %v8606_v14 = vpop.eup %8605 }
0x1663   :  { %v1869_v22 = vadd.f32 1.0, %v8606_v14 }
0x1664   :  { %1878 = vrot.lane.b32.xlu1 %v1876_v12, %s9161_s25 }
0x1665   :  { %8607 = vrcp.f32 %v1869_v22 }
0x166f   :  { %v8608_v25 = vpop.eup %8607 }
0x16d6   :  { %v1879_v16 = vpop.permute.xlu1 %1878 }
0x16d7   :  { %v1881_v17 = vadd.f32 %v1879_v16, %v1875_v13 }
0x16d9   :  { %8609 = vtanh.f32 %v1881_v17  ;;  %v1990_v30 = vrot.slane %v1881_v17, 6 }
0x16e3   :  { %v8610_v54 = vpop.eup %8609 }
0x16e4   :  { %v9632_v18 = vmul.f32 %v8610_v54, %v8608_v25 }
0x16e6   :  { %v1890_v62 = vrot.slane %v9632_v18, 6 }
0x16e8   :  { %1891 = vrot.lane.b32.xlu0 %v1890_v62, %s9161_s25 }
0x175a   :  { %v1892_v11 = vpop.permute.xlu0 %1891 }
0x175b   :  { %7306 = vmatmul.mubr.msk.f32.vlgmr.msra.gmra.mrb[20].mxu0 %vm275_vm3, %v1892_v11 }
0x175c   :  { %7756 = vmatpush1.bf16.msra.mxu0 %v9510_v37  ;;  %2194 = vmatprep.mubr.f32.mxu0 %v9160_v0 }
0x175d   :  { %7758 = vmatprep.subr.bf16.mxu0 %v9512_v27 }
0x1760   :  { %7760 = vmatpush1.bf16.msra.mxu0 %v9518_v41 }
0x1761   :  { %7762 = vmatprep.subr.bf16.mxu0 %v9522_v42 }
0x1764   :  { %7764 = vmatpush1.bf16.msra.mxu0 %v9528_v48 }
0x1765   :  { %7766 = vmatprep.subr.bf16.mxu0 %v9532_v57 }
0x1768   :  { %7768 = vmatpush1.bf16.msra.mxu0 %v9539_v50 }
0x182e   :  { %v1961_v34 = vpop.f32.mrb[20].mxu0 }
0x182f   :  { %v1974_v36 = vadd.f32 %v9569_v23, %v1961_v34  ;;  %v1963_v20 = vpop.f32.mrb[21].mxu0 }
0x1830   :  { %v1975_v61 = vadd.f32 %v9577_v31, %v1963_v20 }
0x1831   :  { %v7307_v21 = vmul.f32 -1.442695, %v1974_v36 }
0x1832   :  { %v7308_v44 = vmul.f32 -1.442695, %v1975_v61 }
0x1833   :  { %8611 = vpow2.f32 %v7307_v21 }
0x1834   :  { %8613 = vtanh.f32 %v1975_v61 }
0x183d   :  { %v8612_v26 = vpop.eup %8611 }
0x183e   :  { %v1979_v1 = vadd.f32 1.0, %v8612_v26  ;;  %v8614_v38 = vpop.eup %8613 }
0x1840   :  { %8615 = vrcp.f32 %v1979_v1 }
0x1841   :  { %8617 = vpow2.f32 %v7308_v44 }
0x184a   :  { %v8616_v39 = vpop.eup %8615 }
0x184b   :  { %v1993_v40 = vmul.f32 %v8616_v39, %v8614_v38  ;;  %v1992_v43 = vmul.f32 %v8616_v39, %v1990_v30  ;;  %v8618_v46 = vpop.eup %8617 }
0x184c   :  { %v1986_v47 = vadd.f32 1.0, %v8618_v46 }
0x184d   :  { %1995 = vrot.lane.b32.xlu1 %v1993_v40, %s9161_s25 }
0x184e   :  { %8619 = vrcp.f32 %v1986_v47 }
0x1858   :  { %v8620_v49 = vpop.eup %8619 }
0x18bf   :  { %v1996_v59 = vpop.permute.xlu1 %1995 }
0x18c0   :  { %v1998_v10 = vadd.f32 %v1996_v59, %v1992_v43 }
0x18c2   :  { %8621 = vtanh.f32 %v1998_v10 }
0x18cc   :  { %v8622_v29 = vpop.eup %8621 }
0x18cd   :  { %v2000_v28 = vmul.f32 %v8622_v29, %v8620_v49 }
0x18cf   :  { %2002 = vrot.lane.b32.xlu0 %v2000_v28, %s9161_s25 }
0x1941   :  { %v9649_v51 = vpop.permute.xlu0 %2002 }
0x1942   :  { %7309 = vmatmul.mubr.msk.f32.vlgmr.msra.gmra.mrb[20].mxu1 %vm275_vm3, %v9649_v51 }
0x1943   :  { %7772 = vmatpush1.bf16.msra.mxu1 %v9510_v37  ;;  %2309 = vmatprep.mubr.f32.mxu1 %v9160_v0 }
0x1944   :  { %7774 = vmatprep.subr.bf16.mxu1 %v9512_v27 }
0x1947   :  { %7776 = vmatpush1.bf16.msra.mxu1 %v9518_v41 }
0x1948   :  { %7778 = vmatprep.subr.bf16.mxu1 %v9522_v42 }
0x194b   :  { %7780 = vmatpush1.bf16.msra.mxu1 %v9528_v48  ;;  %v2108_v48 = vrot.slane %v1998_v10, 6 }
0x194c   :  { %7782 = vmatprep.subr.bf16.mxu1 %v9532_v57 }
0x194f   :  { %7784 = vmatpush1.bf16.msra.mxu1 %v9539_v50 }
0x1a15   :  { %v2075_v53 = vpop.f32.mrb[20].mxu1 }
0x1a16   :  { %v2088_v55 = vrot.slane %v2075_v53, 6  ;;  %v2077_v56 = vpop.f32.mrb[21].mxu1 }
0x1a17   :  { %v2089_v3 = vrot.slane %v2077_v56, 6 }
0x1a18   :  { %v2092_v58 = vadd.f32 %v2088_v55, %v9563_v19 }
0x1a19   :  { %v2093_v27 = vadd.f32 %v2089_v3, %v9571_v24 }
0x1a1a   :  { %v7310_v37 = vmul.f32 -1.442695, %v2092_v58 }
0x1a1b   :  { %v7311_v50 = vmul.f32 -1.442695, %v2093_v27 }
0x1a1c   :  { %8623 = vpow2.f32 %v7310_v37 }
0x1a1d   :  { %8625 = vtanh.f32 %v2093_v27 }
0x1a26   :  { %v8624_v4 = vpop.eup %8623 }
0x1a27   :  { %v2097_v41 = vadd.f32 1.0, %v8624_v4  ;;  %v8626_v42 = vpop.eup %8625 }
0x1a29   :  { %8627 = vrcp.f32 %v2097_v41 }
0x1a2a   :  { %8629 = vpow2.f32 %v7311_v50  ;;  %v2378_v50 = vld [vmem:[#allocation7 + $0x98] sm:$0xff] }
0x1a33   :  { %v8628_v5 = vpop.eup %8627 }
0x1a34   :  { %v2111_v57 = vmul.f32 %v8628_v5, %v8626_v42  ;;  %v2110_v6 = vmul.f32 %v8628_v5, %v2108_v48  ;;  %v8630_v63 = vpop.eup %8629  ;;  %v2359_v42 = vld [vmem:[#allocation4 + $0x88] sm:$0xff]  ;;  %v2361_v48 = vld [vmem:[#allocation4 + $0x98] sm:$0xff]  ;;  %v2358_v5 = vld [vmem:[#allocation4 + $0x80] sm:$0xff] }
0x1a35   :  { %v2104_v8 = vadd.f32 1.0, %v8630_v63 }
0x1a36   :  { %2113 = vrot.lane.b32.xlu1 %v2111_v57, %s9161_s25  ;;  %v2360_v57 = vld [vmem:[#allocation4 + $0x90] sm:$0xff] }
0x1a37   :  { %8631 = vrcp.f32 %v2104_v8  ;;  %v2375_v8 = vld [vmem:[#allocation7 + $0x80] sm:$0xff] }
0x1a41   :  { %v8632_v2 = vpop.eup %8631 }
0x1aa8   :  { %v2114_v45 = vpop.permute.xlu1 %2113 }
0x1aa9   :  { %v2116_v9 = vadd.f32 %v2114_v45, %v2110_v6  ;;  %v2376_v6 = vld [vmem:[#allocation7 + $0x88] sm:$0xff]  ;;  %v2377_v45 = vld [vmem:[#allocation7 + $0x90] sm:$0xff] }
0x1aaa   :  { %v7801_v63 = vpack.c.bf16 %v2378_v50, %v2376_v6  ;;  %v2399_v6 = vld [vmem:[#allocation9 + $0x128] sm:$0xff]  ;;  %v2401_v50 = vld [vmem:[#allocation9 + $0x138] sm:$0xff] }
0x1aab   :  { %8633 = vtanh.f32 %v2116_v9  ;;  %v2223_v21 = vrot.slane %v2116_v9, 6  ;;  %v2363_v9 = vld [vmem:[#allocation4 + $0xa8] sm:$0xff] }
0x1aac   :  { %7802 = vmatprep.subr.bf16.mxu1 %v7801_v63  ;;  %v9717_v63 = vpack.c.bf16 %v2401_v50, %v2399_v6 }
0x1ab5   :  { %v8634_v12 = vpop.eup %8633 }
0x1ab6   :  { %v9664_v13 = vmul.f32 %v8634_v12, %v8632_v2  ;;  %v7803_v2 = vpack.c.bf16 %v2377_v45, %v2375_v8  ;;  %v2365_v12 = vld [vmem:[#allocation4 + $0xb8] sm:$0xff]  ;;  %v2398_v8 = vld [vmem:[#allocation9 + $0x120] sm:$0xff]  ;;  %v2400_v45 = vld [vmem:[#allocation9 + $0x130] sm:$0xff] }
0x1ab8   :  { %v2125_v32 = vrot.slane %v9664_v13, 2 }
0x1aba   :  { %2126 = vrot.lane.b32.xlu0 %v2125_v32, %s9161_s25  ;;  %v2362_v32 = vld [vmem:[#allocation4 + $0xa0] sm:$0xff] }
0x1b2c   :  { %v2127_v14 = vpop.permute.xlu0 %2126 }
0x1b2d   :  { %7312 = vmatmul.mubr.msk.f32.vlgmr.msra.gmra.mrb[22].mxu0 %vm275_vm3, %v2127_v14  ;;  %v2364_v14 = vld [vmem:[#allocation4 + $0xb0] sm:$0xff] }
0x1b2e   :  { %2491 = vmatprep.mubr.f32.mxu0 %v9160_v0 }
0x1c00   :  { %v2196_v22 = vpop.f32.mrb[22].mxu0 }
0x1c01   :  { %v2203_v16 = vrot.slane %v2196_v22, 4  ;;  %v2198_v17 = vpop.f32.mrb[23].mxu0  ;;  %v7789_v22 = vpack.c.bf16 %v2365_v12, %v2363_v9  ;;  %v2405_v12 = vld [vmem:[#allocation9 + $0x158] sm:$0xff] }
0x1c02   :  { %v2204_v62 = vrot.slane %v2198_v17, 4  ;;  %v2380_v17 = vld [vmem:[#allocation7 + $0xa8] sm:$0xff] }
0x1c03   :  { %v2207_v25 = vadd.f32 %v2203_v16, %v9569_v23  ;;  %v7791_v16 = vpack.c.bf16 %v2364_v14, %v2362_v32  ;;  %v9723_v32 = vpack.c.bf16 %v2400_v45, %v2398_v8 }
0x1c04   :  { %v2208_v11 = vadd.f32 %v2204_v62, %v9577_v31 }
0x1c05   :  { %v7313_v54 = vmul.f32 -1.442695, %v2207_v25  ;;  %v2382_v25 = vld [vmem:[#allocation7 + $0xb8] sm:$0xff] }
0x1c06   :  { %v7314_v38 = vmul.f32 -1.442695, %v2208_v11  ;;  %v7805_v62 = vpack.c.bf16 %v2382_v25, %v2380_v17  ;;  %v2407_v25 = vld [vmem:[#allocation9 + $0x168] sm:$0xff] }
0x1c07   :  { %8635 = vpow2.f32 %v7313_v54  ;;  %v2379_v54 = vld [vmem:[#allocation7 + $0xa0] sm:$0xff] }
0x1c08   :  { %8637 = vtanh.f32 %v2208_v11  ;;  %v2367_v11 = vld [vmem:[#allocation4 + $0xc8] sm:$0xff] }
0x1c11   :  { %v8636_v34 = vpop.eup %8635 }
0x1c12   :  { %v2212_v36 = vadd.f32 1.0, %v8636_v34  ;;  %v8638_v20 = vpop.eup %8637  ;;  %v2369_v34 = vld [vmem:[#allocation4 + $0xd8] sm:$0xff] }
0x1c14   :  { %8639 = vrcp.f32 %v2212_v36 }
0x1c15   :  { %8641 = vpow2.f32 %v7314_v38  ;;  %v2366_v38 = vld [vmem:[#allocation4 + $0xc0] sm:$0xff] }
0x1c1e   :  { %v8640_v61 = vpop.eup %8639 }
0x1c1f   :  { %v2226_v26 = vmul.f32 %v8640_v61, %v8638_v20  ;;  %v2225_v1 = vmul.f32 %v8640_v61, %v2223_v21  ;;  %v8642_v30 = vpop.eup %8641  ;;  %v7793_v20 = vpack.c.bf16 %v2369_v34, %v2367_v11  ;;  %v2406_v11 = vld [vmem:[#allocation9 + $0x160] sm:$0xff]  ;;  %v2408_v34 = vld [vmem:[#allocation9 + $0x170] sm:$0xff] }
0x1c20   :  { %v2219_v23 = vadd.f32 1.0, %v8642_v30  ;;  %v2368_v30 = vld [vmem:[#allocation4 + $0xd0] sm:$0xff] }
0x1c21   :  { %2228 = vrot.lane.b32.xlu1 %v2226_v26, %s9161_s25 }
0x1c22   :  { %8643 = vrcp.f32 %v2219_v23  ;;  %v2384_v23 = vld [vmem:[#allocation7 + $0xc8] sm:$0xff] }
0x1c2c   :  { %v8644_v31 = vpop.eup %8643 }
0x1c93   :  { %v2229_v39 = vpop.permute.xlu1 %2228 }
0x1c94   :  { %v2231_v40 = vadd.f32 %v2229_v39, %v2225_v1 }
0x1c96   :  { %8645 = vtanh.f32 %v2231_v40  ;;  %v2338_v3 = vrot.slane %v2231_v40, 6  ;;  %v7795_v40 = vpack.c.bf16 %v2368_v30, %v2366_v38 }
0x1ca0   :  { %v8646_v43 = vpop.eup %8645 }
0x1ca1   :  { %v2233_v44 = vmul.f32 %v8646_v43, %v8644_v31  ;;  %v2386_v31 = vld [vmem:[#allocation7 + $0xd8] sm:$0xff]  ;;  %v2385_v43 = vld [vmem:[#allocation7 + $0xd0] sm:$0xff] }
0x1ca3   :  { %v2240_v46 = vrot.slane %v2233_v44, 4 }
0x1ca5   :  { %2241 = vrot.lane.b32.xlu0 %v2240_v46, %s9161_s25 }
0x1ca9   :  { %1655 = vrot.lane.b32.xlu0 %v9598_v52, %s9161_s25 }
0x1cad   :  { %1885 = vrot.lane.b32.xlu0 %v9632_v18, %s9161_s25 }
0x1cb1   :  { %2235 = vrot.lane.b32.xlu0 %v2233_v44, %s9161_s25  ;;  %v7809_v44 = vpack.c.bf16 %v2386_v31, %v2384_v23 }
0x1d17   :  { %v2242_v47 = vpop.permute.xlu0 %2241 }
0x1d18   :  { %7315 = vmatmul.mubr.msk.f32.vlgmr.msra.gmra.mrb[22].mxu1 %vm275_vm3, %v2242_v47  ;;  %v2371_v47 = vld [vmem:[#allocation4 + $0xe8] sm:$0xff] }
0x1d19   :  { %2568 = vmatprep.mubr.f32.mxu1 %v9160_v0  ;;  %7804 = vmatpush1.bf16.msra.mxu1 %v7803_v2  ;;  %v2403_v2 = vld [vmem:[#allocation9 + $0x148] sm:$0xff] }
0x1d1a   :  { %7806 = vmatprep.subr.bf16.mxu1 %v7805_v62  ;;  %v9727_v14 = vpack.c.bf16 %v2405_v12, %v2403_v2 }
0x1d1b   :  { %v1656_v59 = vpop.permute.xlu0 %1655 }
0x1d1c   :  { %1658 = vst.msk [vmem:[#allocation3] sm:$0xc] %vm506_vm4, %v1656_v59 }
0x1d1d   :  { %1659 = vst.msk [vmem:[#allocation3 + $0xa] sm:$0xc] %vm508_vm5, %v1656_v59  ;;  %v2373_v59 = vld [vmem:[#allocation4 + $0xf8] sm:$0xff] }
0x1d1f   :  { %v1886_v10 = vpop.permute.xlu0 %1885 }
0x1d20   :  { %1888 = vst.msk [vmem:[#allocation3] sm:$0xc0] %vm740_vm6, %v1886_v10 }
0x1d21   :  { %1889 = vst.msk [vmem:[#allocation3 + $0x2] sm:$0xc0] %vm742_vm7, %v1886_v10 }
0x1d22   :  { %2005 = vst.msk [vmem:[#allocation3 + $0x8] sm:$0x3] %vm386_vm1, %v9649_v51 }
0x1d23   :  { %2006 = vst.msk [vmem:[#allocation3 + $0x6] sm:$0x3] %vm388_vm2, %v9649_v51  ;;  %v2236_v52 = vpop.permute.xlu0 %2235 }
0x1d24   :  { %2238 = vst.msk [vmem:[#allocation3 + $0x8] sm:$0x30] %vm623_vm8, %v2236_v52 }
0x1d25   :  { %2239 = vst.msk [vmem:[#allocation3 - $0x2] sm:$0x30] %vm625_vm9, %v2236_v52  ;;  %v7797_v52 = vpack.c.bf16 %v2373_v59, %v2371_v47 }
0x1deb   :  { %v2311_v18 = vpop.f32.mrb[22].mxu1 }
0x1dec   :  { %v2318_v49 = vrot.slane %v2311_v18, 2  ;;  %v2313_v29 = vpop.f32.mrb[23].mxu1  ;;  %v2370_v18 = vld [vmem:[#allocation4 + $0xe0] sm:$0xff] }
0x1ded   :  { %v2319_v55 = vrot.slane %v2313_v29, 2  ;;  %v2388_v29 = vld [vmem:[#allocation7 + $0xe8] sm:$0xff] }
0x1dee   :  { %v2322_v28 = vadd.f32 %v2318_v49, %v9563_v19  ;;  %v7785_v19 = vpack.c.bf16 %v2361_v48, %v2359_v42  ;;  %v2372_v49 = vld [vmem:[#allocation4 + $0xf0] sm:$0xff] }
0x1def   :  { %v2323_v56 = vadd.f32 %v2319_v55, %v9571_v24  ;;  %v7787_v24 = vpack.c.bf16 %v2360_v57, %v2358_v5  ;;  %v2387_v55 = vld [vmem:[#allocation7 + $0xe0] sm:$0xff]  ;;  %v2396_v57 = vld [vmem:[#allocation9 + $0x110] sm:$0xff] }
0x1df0   :  { %v7316_v53 = vmul.f32 -1.442695, %v2322_v28  ;;  %7786 = vmatprep.subr.bf16.mxu0 %v7785_v19  ;;  %v7799_v28 = vpack.c.bf16 %v2372_v49, %v2370_v18  ;;  %v2394_v19 = vld [vmem:[#allocation9 + $0x100] sm:$0xff] }
0x1df1   :  { %7788 = vmatpush1.bf16.msra.mxu0 %v7787_v24  ;;  %v7317_v21 = vmul.f32 -1.442695, %v2323_v56  ;;  %v9715_v24 = vpack.c.bf16 %v2396_v57, %v2394_v19 }
0x1df2   :  { %8647 = vpow2.f32 %v7316_v53  ;;  %7790 = vmatprep.subr.bf16.mxu0 %v7789_v22  ;;  %v2390_v53 = vld [vmem:[#allocation7 + $0xf8] sm:$0xff]  ;;  %v2402_v22 = vld [vmem:[#allocation9 + $0x140] sm:$0xff] }
0x1df3   :  { %8649 = vtanh.f32 %v2323_v56  ;;  %v2389_v56 = vld [vmem:[#allocation7 + $0xf0] sm:$0xff] }
0x1df5   :  { %7792 = vmatpush1.bf16.msra.mxu0 %v7791_v16  ;;  %v2404_v16 = vld [vmem:[#allocation9 + $0x150] sm:$0xff] }
0x1df6   :  { %7794 = vmatprep.subr.bf16.mxu0 %v7793_v20  ;;  %v9733_v62 = vpack.c.bf16 %v2404_v16, %v2402_v22  ;;  %v7318_v20 = vld [vmem:[%s10626_s5 + $0x4] sm:$0x3] }
0x1df9   :  { %7796 = vmatpush1.bf16.msra.mxu0 %v7795_v40 }
0x1dfa   :  { %7798 = vmatprep.subr.bf16.mxu0 %v7797_v52 }
0x1dfc   :  { %v8648_v58 = vpop.eup %8647 }
0x1dfd   :  { %v2327_v37 = vadd.f32 1.0, %v8648_v58  ;;  %v8650_v51 = vpop.eup %8649  ;;  %v7813_v58 = vpack.c.bf16 %v2390_v53, %v2388_v29  ;;  %7800 = vmatpush1.bf16.msra.mxu0 %v7799_v28 }
0x1dff   :  { %8651 = vrcp.f32 %v2327_v37  ;;  %v7815_v37 = vpack.c.bf16 %v2389_v56, %v2387_v55 }
0x1e00   :  { %8653 = vpow2.f32 %v7317_v21  ;;  %v2414_v21 = vrot.slane %v7318_v20, %v9349_v33 }
0x1e09   :  { %v8652_v27 = vpop.eup %8651 }
0x1e0a   :  { %v2341_v4 = vmul.f32 %v8652_v27, %v8650_v51  ;;  %v2340_v41 = vmul.f32 %v8652_v27, %v2338_v3  ;;  %v8654_v61 = vpop.eup %8653  ;;  %v2395_v51 = vld [vmem:[#allocation9 + $0x108] sm:$0xff]  ;;  %v2397_v3 = vld [vmem:[#allocation9 + $0x118] sm:$0xff] }
0x1e0b   :  { %v2334_v26 = vadd.f32 1.0, %v8654_v61 }
0x1e0c   :  { %2343 = vrot.lane.b32.xlu1 %v2341_v4, %s9161_s25  ;;  %v9703_v4 = vpack.c.bf16 %v2397_v3, %v2395_v51 }
0x1e0d   :  { %8655 = vrcp.f32 %v2334_v26 }
0x1e0e   :  { %7818 = vmatprep.subr.bf16.mxu0 %v9703_v4 }
0x1e10   :  { %1770 = vrot.lane.b32.xlu1 %v9615_v60, %s9161_s25  ;;  %v2381_v60 = vld [vmem:[#allocation7 + $0xb0] sm:$0xff] }
0x1e11   :  { %v7807_v36 = vpack.c.bf16 %v2381_v60, %v2379_v54  ;;  %v2409_v54 = vld [vmem:[#allocation9 + $0x178] sm:$0xff] }
0x1e12   :  { %v9737_v60 = vpack.c.bf16 %v2409_v54, %v2407_v25 }
0x1e13   :  { %7808 = vmatpush1.bf16.msra.mxu1 %v7807_v36  ;;  %v9744_v36 = vpack.c.bf16 %v2408_v34, %v2406_v11 }
0x1e14   :  { %2120 = vrot.lane.b32.xlu1 %v9664_v13, %s9161_s25  ;;  %v2383_v13 = vld [vmem:[#allocation7 + $0xc0] sm:$0xff]  ;;  %7810 = vmatprep.subr.bf16.mxu1 %v7809_v44 }
0x1e15   :  { %v7811_v46 = vpack.c.bf16 %v2385_v43, %v2383_v13 }
0x1e17   :  { %7812 = vmatpush1.bf16.msra.mxu1 %v7811_v46 }
0x1e18   :  { %7814 = vmatprep.subr.bf16.mxu1 %v7813_v58 }
0x1e1b   :  { %7816 = vmatpush1.bf16.msra.mxu1 %v7815_v37 }
0x1e1c   :  { %7834 = vmatprep.subr.bf16.mxu1 %v9703_v4 }
0x1e7e   :  { %v2344_v1 = vpop.permute.xlu1 %2343 }
0x1e7f   :  { %v9698_v39 = vadd.f32 %v2344_v1, %v2340_v41  ;;  %v8656_v41 = vpop.eup %8655  ;;  %v2418_v1 = vrot.slane %v7318_v20, %v9354_v35 }
0x1e81   :  { %8657 = vtanh.f32 %v9698_v39 }
0x1e82   :  { %v1771_v10 = vpop.permute.xlu1 %1770 }
0x1e83   :  { %1773 = vst.msk [vmem:[#allocation3] sm:$0x30] %vm623_vm8, %v1771_v10 }
0x1e84   :  { %1774 = vst.msk [vmem:[#allocation3 + $0x6] sm:$0x30] %vm625_vm9, %v1771_v10 }
0x1e86   :  { %v2121_v27 = vpop.permute.xlu1 %2120 }
0x1e87   :  { %2123 = vst.msk [vmem:[#allocation3 + $0x8] sm:$0xc] %vm506_vm4, %v2121_v27 }
0x1e88   :  { %2124 = vst.msk [vmem:[#allocation3 + $0x2] sm:$0xc] %vm508_vm5, %v2121_v27 }
0x1e8b   :  { %v8658_v42 = vpop.eup %8657 }
0x1e8c   :  { %v9709_v48 = vmul.f32 %v8658_v42, %v8656_v41 }
0x1e8e   :  { %2350 = vrot.lane.b32.xlu1 %v9709_v48, %s9161_s25 }
0x1f00   :  { %v2351_v5 = vpop.permute.xlu1 %2350 }
0x1f01   :  { %2353 = vst.msk [vmem:[#allocation3 + $0x8] sm:$0xc0] %vm740_vm6, %v2351_v5 }
0x1f02   :  { %2354 = vst.msk [vmem:[#allocation3 - $0x6] sm:$0xc0] %vm742_vm7, %v2351_v5 }
0x1f08   :  { %v2356_v17 = vld [vmem:[#allocation3 + $0x8] sm:$0xff] }
0x1f09   :  { %v2355_v9 = vld [vmem:[#allocation3] sm:$0xff] }
0x1f0a   :  { %7319 = vmatmul.mubr.msk.f32.vlgmr.msra.gmra.mrb[24].mxu0 %vm275_vm3, %v2355_v9  ;;  %7321 = vmatmul.mubr.msk.f32.vlgmr.msra.gmra.mrb[24].mxu1 %vm275_vm3, %v2355_v9 }
0x1f0b   :  { %7820 = vmatpush1.bf16.msra.mxu0 %v9715_v24  ;;  %2497 = vmatprep.mubr.f32.mxu0 %v9160_v0 }
0x1f0c   :  { %2574 = vmatprep.mubr.f32.mxu1 %v9160_v0  ;;  %7822 = vmatprep.subr.bf16.mxu0 %v9717_v63 }
0x1f0d   :  { %7836 = vmatpush1.bf16.msra.mxu1 %v9715_v24 }
0x1f0e   :  { %7320 = vmatmul.mubr.msk.f32.gmra.mrb[26].mxu0 %vm275_vm3, %v2356_v17  ;;  %7322 = vmatmul.mubr.msk.f32.gmra.mrb[26].mxu1 %vm275_vm3, %v2356_v17 }
0x1f0f   :  { %7824 = vmatpush1.bf16.msra.mxu0 %v9723_v32  ;;  %2645 = vmatprep.mubr.f32.mxu0 %v9160_v0 }
0x1f10   :  { %7826 = vmatprep.subr.bf16.mxu0 %v9727_v14  ;;  %7838 = vmatprep.subr.bf16.mxu1 %v9717_v63 }
0x1f11   :  { %7840 = vmatpush1.bf16.msra.mxu1 %v9723_v32  ;;  %2756 = vmatprep.mubr.f32.mxu1 %v9160_v0 }
0x1f12   :  { %7842 = vmatprep.subr.bf16.mxu1 %v9727_v14 }
0x1f13   :  { %7828 = vmatpush1.bf16.msra.mxu0 %v9733_v62 }
0x1f14   :  { %7830 = vmatprep.subr.bf16.mxu0 %v9737_v60 }
0x1f15   :  { %7844 = vmatpush1.bf16.msra.mxu1 %v9733_v62 }
0x1f16   :  { %7846 = vmatprep.subr.bf16.mxu1 %v9737_v60 }
0x1f17   :  { %7832 = vmatpush1.bf16.msra.mxu0 %v9744_v36 }
0x1f18   :  { %7850 = vmatprep.subr.bf16.mxu0 %v9703_v4 }
0x1f19   :  { %7848 = vmatpush1.bf16.msra.mxu1 %v9744_v36 }
0x1f1a   :  { %2646 = vmatmul.mubr.f32.vlgmr.msra.gmra.mrb[28].mxu0 %v9160_v0  ;;  %7866 = vmatprep.subr.bf16.mxu1 %v9703_v4 }
0x1f1b   :  { %7852 = vmatpush1.bf16.msra.mxu0 %v9715_v24  ;;  %2877 = vmatprep.mubr.f32.mxu0 %v9160_v0 }
0x1f1c   :  { %7854 = vmatprep.subr.bf16.mxu0 %v9717_v63 }
0x1f1f   :  { %7856 = vmatpush1.bf16.msra.mxu0 %v9723_v32 }
0x1f20   :  { %7858 = vmatprep.subr.bf16.mxu0 %v9727_v14 }
0x1f23   :  { %7860 = vmatpush1.bf16.msra.mxu0 %v9733_v62 }
0x1f24   :  { %7862 = vmatprep.subr.bf16.mxu0 %v9737_v60 }
0x1f27   :  { %7864 = vmatpush1.bf16.msra.mxu0 %v9744_v36 }
0x1f28   :  { %7882 = vmatprep.subr.bf16.mxu0 %v9703_v4 }
0x1fdd   :  { %v2493_v61 = vpop.f32.mrb[24].mxu0  ;;  %v2570_v26 = vpop.f32.mrb[24].mxu1 }
0x1fde   :  { %v2495_v38 = vpop.f32.mrb[25].mxu0  ;;  %v2572_v30 = vpop.f32.mrb[25].mxu1  ;;  %v2494_v23 = vadd.f32 %v2493_v61, %v2414_v21  ;;  %v3116_v40 = vrot.slane %v2570_v26, 6  ;;  %v3228_v31 = vrot.slane %v2570_v26, 2 }
0x1fdf   :  { %v2496_v13 = vadd.f32 %v2495_v38, %v2418_v1  ;;  %v3117_v46 = vrot.slane %v2572_v30, 6  ;;  %v3229_v49 = vrot.slane %v2572_v30, 2 }
0x1fe1   :  { %v2499_v43 = vpop.f32.mrb[26].mxu0  ;;  %v2576_v44 = vpop.f32.mrb[26].mxu1 }
0x1fe2   :  { %v2500_v47 = vadd.f32 %v2499_v43, %v2414_v21  ;;  %v2654_v59 = vrot.slane %v2576_v44, 6  ;;  %v2763_v10 = vrot.slane %v2576_v44, 2  ;;  %v2501_v52 = vpop.f32.mrb[27].mxu0  ;;  %v2578_v18 = vpop.f32.mrb[27].mxu1 }
0x1fe3   :  { %v2502_v29 = vadd.f32 %v2501_v52, %v2418_v1  ;;  %v2655_v28 = vrot.slane %v2578_v18, 6  ;;  %v2764_v53 = vrot.slane %v2578_v18, 2 }
0x1fe4   :  { %v9768_v55 = vadd.f32 %v3228_v31, %v2500_v47  ;;  %v9770_v56 = vadd.f32 %v2763_v10, %v2494_v23  ;;  %v9772_v58 = vadd.f32 %v2654_v59, %v2494_v23  ;;  %v9774_v37 = vadd.f32 %v3116_v40, %v2500_v47 }
0x1fe5   :  { %v9776_v51 = vadd.f32 %v3229_v49, %v2502_v29  ;;  %v9778_v3 = vadd.f32 %v2764_v53, %v2496_v13  ;;  %v9780_v27 = vadd.f32 %v2655_v28, %v2496_v13  ;;  %v9782_v41 = vadd.f32 %v3117_v46, %v2502_v29 }
0x1fed   :  { %v2647_v42 = vpop.f32.mrb[28].mxu0 }
0x1fee   :  { %v2660_v5 = vadd.f32 %v9772_v58, %v2647_v42  ;;  %v2649_v19 = vpop.f32.mrb[29].mxu0 }
0x1fef   :  { %v2661_v6 = vadd.f32 %v9780_v27, %v2649_v19 }
0x1ff0   :  { %v7323_v57 = vmul.f32 -1.442695, %v2660_v5 }
0x1ff1   :  { %v7324_v12 = vmul.f32 -1.442695, %v2661_v6 }
0x1ff2   :  { %8659 = vpow2.f32 %v7323_v57 }
0x1ff3   :  { %8661 = vtanh.f32 %v2661_v6 }
0x1ffc   :  { %v8660_v50 = vpop.eup %8659 }
0x1ffd   :  { %v2665_v8 = vadd.f32 1.0, %v8660_v50  ;;  %v8662_v45 = vpop.eup %8661 }
0x1fff   :  { %8663 = vrcp.f32 %v2665_v8 }
0x2000   :  { %8665 = vpow2.f32 %v7324_v12 }
0x2009   :  { %v8664_v9 = vpop.eup %8663 }
0x200a   :  { %v2676_v2 = vmul.f32 %v8664_v9, %v8662_v45  ;;  %v8666_v22 = vpop.eup %8665  ;;  %v2675_v17 = vmul.f32 0.0, %v8664_v9 }
0x200b   :  { %v2672_v16 = vadd.f32 1.0, %v8666_v22 }
0x200c   :  { %2678 = vrot.lane.b32.xlu0 %v2676_v2, %s9161_s25 }
0x200d   :  { %8667 = vrcp.f32 %v2672_v16 }
0x2017   :  { %v8668_v11 = vpop.eup %8667 }
0x207e   :  { %v2679_v25 = vpop.permute.xlu0 %2678 }
0x207f   :  { %v2681_v54 = vadd.f32 %v2679_v25, %v2675_v17 }
0x2081   :  { %8669 = vtanh.f32 %v2681_v54  ;;  %v2791_v44 = vrot.slane %v2681_v54, 6 }
0x208b   :  { %v8670_v34 = vpop.eup %8669 }
0x208c   :  { %v2683_v20 = vmul.f32 %v8670_v34, %v8668_v11 }
0x208e   :  { %2685 = vrot.lane.b32.xlu1 %v2683_v20, %s9161_s25 }
0x2100   :  { %v2686_v21 = vpop.permute.xlu1 %2685 }
0x2101   :  { %2688 = vst.msk [vmem:[#allocation2] sm:$0x3] %vm386_vm1, %v2686_v21  ;;  %7325 = vmatmul.mubr.msk.f32.vlgmr.msra.gmra.mrb[28].mxu1 %vm275_vm3, %v2686_v21 }
0x2102   :  { %2689 = vst.msk [vmem:[#allocation2 + $0xe] sm:$0x3] %vm388_vm2, %v2686_v21  ;;  %7868 = vmatpush1.bf16.msra.mxu1 %v9715_v24  ;;  %2992 = vmatprep.mubr.f32.mxu1 %v9160_v0 }
0x2103   :  { %7870 = vmatprep.subr.bf16.mxu1 %v9717_v63 }
0x2106   :  { %7872 = vmatpush1.bf16.msra.mxu1 %v9723_v32 }
0x2107   :  { %7874 = vmatprep.subr.bf16.mxu1 %v9727_v14 }
0x210a   :  { %7876 = vmatpush1.bf16.msra.mxu1 %v9733_v62 }
0x210b   :  { %7878 = vmatprep.subr.bf16.mxu1 %v9737_v60 }
0x210e   :  { %7880 = vmatpush1.bf16.msra.mxu1 %v9744_v36 }
0x210f   :  { %7898 = vmatprep.subr.bf16.mxu1 %v9703_v4 }
0x21d4   :  { %v2758_v61 = vpop.f32.mrb[28].mxu1 }
0x21d5   :  { %v2771_v26 = vrot.slane %v2758_v61, 6  ;;  %v2760_v1 = vpop.f32.mrb[29].mxu1 }
0x21d6   :  { %v2772_v23 = vrot.slane %v2760_v1, 6 }
0x21d7   :  { %v2775_v38 = vadd.f32 %v2771_v26, %v9770_v56 }
0x21d8   :  { %v2776_v40 = vadd.f32 %v2772_v23, %v9778_v3 }
0x21d9   :  { %v7326_v30 = vmul.f32 -1.442695, %v2775_v38 }
0x21da   :  { %v7327_v10 = vmul.f32 -1.442695, %v2776_v40 }
0x21db   :  { %8671 = vpow2.f32 %v7326_v30 }
0x21dc   :  { %8673 = vtanh.f32 %v2776_v40 }
0x21e5   :  { %v8672_v31 = vpop.eup %8671 }
0x21e6   :  { %v2780_v13 = vadd.f32 1.0, %v8672_v31  ;;  %v8674_v43 = vpop.eup %8673 }
0x21e8   :  { %8675 = vrcp.f32 %v2780_v13 }
0x21e9   :  { %8677 = vpow2.f32 %v7327_v10 }
0x21f2   :  { %v8676_v46 = vpop.eup %8675 }
0x21f3   :  { %v2794_v47 = vmul.f32 %v8676_v46, %v8674_v43  ;;  %v2793_v59 = vmul.f32 %v8676_v46, %v2791_v44  ;;  %v8678_v52 = vpop.eup %8677 }
0x21f4   :  { %v2787_v18 = vadd.f32 1.0, %v8678_v52 }
0x21f5   :  { %2796 = vrot.lane.b32.xlu0 %v2794_v47, %s9161_s25 }
0x21f6   :  { %8679 = vrcp.f32 %v2787_v18 }
0x2200   :  { %v8680_v28 = vpop.eup %8679 }
0x2267   :  { %v2797_v49 = vpop.permute.xlu0 %2796 }
0x2268   :  { %v2799_v29 = vadd.f32 %v2797_v49, %v2793_v59 }
0x226a   :  { %8681 = vtanh.f32 %v2799_v29  ;;  %v2906_v17 = vrot.slane %v2799_v29, 6 }
0x2274   :  { %v8682_v53 = vpop.eup %8681 }
0x2275   :  { %v9803_v42 = vmul.f32 %v8682_v53, %v8680_v28 }
0x2277   :  { %v2808_v5 = vrot.slane %v9803_v42, 2 }
0x2279   :  { %2809 = vrot.lane.b32.xlu1 %v2808_v5, %s9161_s25 }
0x22eb   :  { %v2810_v19 = vpop.permute.xlu1 %2809 }
0x22ec   :  { %7328 = vmatmul.mubr.msk.f32.vlgmr.msra.gmra.mrb[30].mxu0 %vm275_vm3, %v2810_v19 }
0x22ed   :  { %7884 = vmatpush1.bf16.msra.mxu0 %v9715_v24  ;;  %3107 = vmatprep.mubr.f32.mxu0 %v9160_v0 }
0x22ee   :  { %7886 = vmatprep.subr.bf16.mxu0 %v9717_v63 }
0x22f1   :  { %7888 = vmatpush1.bf16.msra.mxu0 %v9723_v32 }
0x22f2   :  { %7890 = vmatprep.subr.bf16.mxu0 %v9727_v14 }
0x22f5   :  { %7892 = vmatpush1.bf16.msra.mxu0 %v9733_v62 }
0x22f6   :  { %7894 = vmatprep.subr.bf16.mxu0 %v9737_v60 }
0x22f9   :  { %7896 = vmatpush1.bf16.msra.mxu0 %v9744_v36 }
0x22fa   :  { %7914 = vmatprep.subr.bf16.mxu0 %v9703_v4 }
0x23bf   :  { %v2879_v57 = vpop.f32.mrb[30].mxu0 }
0x23c0   :  { %v2886_v6 = vrot.slane %v2879_v57, 4  ;;  %v2881_v50 = vpop.f32.mrb[31].mxu0 }
0x23c1   :  { %v2887_v9 = vrot.slane %v2881_v50, 4 }
0x23c2   :  { %v2890_v8 = vadd.f32 %v2886_v6, %v9772_v58 }
0x23c3   :  { %v2891_v2 = vadd.f32 %v2887_v9, %v9780_v27 }
0x23c4   :  { %v7329_v45 = vmul.f32 -1.442695, %v2890_v8 }
0x23c5   :  { %v7330_v34 = vmul.f32 -1.442695, %v2891_v2 }
0x23c6   :  { %8683 = vpow2.f32 %v7329_v45 }
0x23c7   :  { %8685 = vtanh.f32 %v2891_v2 }
0x23d0   :  { %v8684_v12 = vpop.eup %8683 }
0x23d1   :  { %v2895_v22 = vadd.f32 1.0, %v8684_v12  ;;  %v8686_v16 = vpop.eup %8685 }
0x23d3   :  { %8687 = vrcp.f32 %v2895_v22 }
0x23d4   :  { %8689 = vpow2.f32 %v7330_v34 }
0x23dd   :  { %v8688_v25 = vpop.eup %8687 }
0x23de   :  { %v2909_v54 = vmul.f32 %v8688_v25, %v8686_v16  ;;  %v2908_v11 = vmul.f32 %v8688_v25, %v2906_v17  ;;  %v8690_v20 = vpop.eup %8689 }
0x23df   :  { %v2902_v58 = vadd.f32 1.0, %v8690_v20 }
0x23e0   :  { %2911 = vrot.lane.b32.xlu0 %v2909_v54, %s9161_s25 }
0x23e1   :  { %8691 = vrcp.f32 %v2902_v58 }
0x23eb   :  { %v8692_v27 = vpop.eup %8691 }
0x2452   :  { %v2912_v21 = vpop.permute.xlu0 %2911 }
0x2453   :  { %v2914_v61 = vadd.f32 %v2912_v21, %v2908_v11 }
0x2455   :  { %8693 = vtanh.f32 %v2914_v61  ;;  %v3021_v52 = vrot.slane %v2914_v61, 6 }
0x245f   :  { %v8694_v26 = vpop.eup %8693 }
0x2460   :  { %v9820_v1 = vmul.f32 %v8694_v26, %v8692_v27 }
0x2462   :  { %v2923_v38 = vrot.slane %v9820_v1, 4 }
0x2464   :  { %2924 = vrot.lane.b32.xlu1 %v2923_v38, %s9161_s25 }
0x24d6   :  { %v2925_v30 = vpop.permute.xlu1 %2924 }
0x24d7   :  { %7331 = vmatmul.mubr.msk.f32.vlgmr.msra.gmra.mrb[30].mxu1 %vm275_vm3, %v2925_v30 }
0x24d8   :  { %7900 = vmatpush1.bf16.msra.mxu1 %v9715_v24  ;;  %3221 = vmatprep.mubr.f32.mxu1 %v9160_v0 }
0x24d9   :  { %7902 = vmatprep.subr.bf16.mxu1 %v9717_v63 }
0x24dc   :  { %7904 = vmatpush1.bf16.msra.mxu1 %v9723_v32 }
0x24dd   :  { %7906 = vmatprep.subr.bf16.mxu1 %v9727_v14 }
0x24e0   :  { %7908 = vmatpush1.bf16.msra.mxu1 %v9733_v62 }
0x24e1   :  { %7910 = vmatprep.subr.bf16.mxu1 %v9737_v60 }
0x24e4   :  { %7912 = vmatpush1.bf16.msra.mxu1 %v9744_v36 }
0x24e5   :  { %7930 = vmatprep.subr.bf16.mxu1 %v9703_v4 }
0x25aa   :  { %v2994_v23 = vpop.f32.mrb[30].mxu1 }
0x25ab   :  { %v3001_v40 = vrot.slane %v2994_v23, 2  ;;  %v2996_v31 = vpop.f32.mrb[31].mxu1 }
0x25ac   :  { %v3002_v44 = vrot.slane %v2996_v31, 2 }
0x25ad   :  { %v3005_v13 = vadd.f32 %v3001_v40, %v9770_v56 }
0x25ae   :  { %v3006_v46 = vadd.f32 %v3002_v44, %v9778_v3 }
0x25af   :  { %v7332_v43 = vmul.f32 -1.442695, %v3005_v13 }
0x25b0   :  { %v7333_v4 = vmul.f32 -1.442695, %v3006_v46 }
0x25b1   :  { %8695 = vpow2.f32 %v7332_v43 }
0x25b2   :  { %8697 = vtanh.f32 %v3006_v46 }
0x25bb   :  { %v8696_v47 = vpop.eup %8695 }
0x25bc   :  { %v3010_v59 = vadd.f32 1.0, %v8696_v47  ;;  %v8698_v10 = vpop.eup %8697 }
0x25be   :  { %8699 = vrcp.f32 %v3010_v59 }
0x25bf   :  { %8701 = vpow2.f32 %v7333_v4 }
0x25c8   :  { %v8700_v18 = vpop.eup %8699 }
0x25c9   :  { %v3024_v49 = vmul.f32 %v8700_v18, %v8698_v10  ;;  %v3023_v29 = vmul.f32 %v8700_v18, %v3021_v52  ;;  %v8702_v28 = vpop.eup %8701 }
0x25ca   :  { %v3017_v56 = vadd.f32 1.0, %v8702_v28 }
0x25cb   :  { %3026 = vrot.lane.b32.xlu0 %v3024_v49, %s9161_s25 }
0x25cc   :  { %8703 = vrcp.f32 %v3017_v56 }
0x25d6   :  { %v8704_v3 = vpop.eup %8703 }
0x263d   :  { %v3027_v53 = vpop.permute.xlu0 %3026 }
0x263e   :  { %v3029_v5 = vadd.f32 %v3027_v53, %v3023_v29 }
0x2640   :  { %8705 = vtanh.f32 %v3029_v5  ;;  %v3138_v25 = vrot.slane %v3029_v5, 6 }
0x264a   :  { %v8706_v19 = vpop.eup %8705 }
0x264b   :  { %v9837_v57 = vmul.f32 %v8706_v19, %v8704_v3 }
0x264d   :  { %v3038_v6 = vrot.slane %v9837_v57, 6 }
0x264f   :  { %3039 = vrot.lane.b32.xlu1 %v3038_v6, %s9161_s25 }
0x26c1   :  { %v3040_v50 = vpop.permute.xlu1 %3039 }
0x26c2   :  { %7334 = vmatmul.mubr.msk.f32.vlgmr.msra.gmra.mrb[32].mxu0 %vm275_vm3, %v3040_v50 }
0x26c3   :  { %7916 = vmatpush1.bf16.msra.mxu0 %v9715_v24  ;;  %3342 = vmatprep.mubr.f32.mxu0 %v9160_v0 }
0x26c4   :  { %7918 = vmatprep.subr.bf16.mxu0 %v9717_v63 }
0x26c7   :  { %7920 = vmatpush1.bf16.msra.mxu0 %v9723_v32 }
0x26c8   :  { %7922 = vmatprep.subr.bf16.mxu0 %v9727_v14 }
0x26cb   :  { %7924 = vmatpush1.bf16.msra.mxu0 %v9733_v62 }
0x26cc   :  { %7926 = vmatprep.subr.bf16.mxu0 %v9737_v60 }
0x26cf   :  { %7928 = vmatpush1.bf16.msra.mxu0 %v9744_v36 }
0x2795   :  { %v3109_v8 = vpop.f32.mrb[32].mxu0 }
0x2796   :  { %v3122_v45 = vadd.f32 %v9774_v37, %v3109_v8  ;;  %v3111_v9 = vpop.f32.mrb[33].mxu0 }
0x2797   :  { %v3123_v12 = vadd.f32 %v9782_v41, %v3111_v9 }
0x2798   :  { %v7335_v2 = vmul.f32 -1.442695, %v3122_v45 }
0x2799   :  { %v7336_v20 = vmul.f32 -1.442695, %v3123_v12 }
0x279a   :  { %8707 = vpow2.f32 %v7335_v2 }
0x279b   :  { %8709 = vtanh.f32 %v3123_v12 }
0x27a4   :  { %v8708_v22 = vpop.eup %8707 }
0x27a5   :  { %v3127_v16 = vadd.f32 1.0, %v8708_v22  ;;  %v8710_v17 = vpop.eup %8709 }
0x27a7   :  { %8711 = vrcp.f32 %v3127_v16 }
0x27a8   :  { %8713 = vpow2.f32 %v7336_v20 }
0x27b1   :  { %v8712_v54 = vpop.eup %8711 }
0x27b2   :  { %v3141_v11 = vmul.f32 %v8712_v54, %v8710_v17  ;;  %v3140_v34 = vmul.f32 %v8712_v54, %v3138_v25  ;;  %v8714_v58 = vpop.eup %8713 }
0x27b3   :  { %v3134_v21 = vadd.f32 1.0, %v8714_v58 }
0x27b4   :  { %3143 = vrot.lane.b32.xlu0 %v3141_v11, %s9161_s25 }
0x27b5   :  { %8715 = vrcp.f32 %v3134_v21 }
0x27bf   :  { %v8716_v26 = vpop.eup %8715 }
0x2826   :  { %v3144_v61 = vpop.permute.xlu0 %3143 }
0x2827   :  { %v3146_v27 = vadd.f32 %v3144_v61, %v3140_v34 }
0x2829   :  { %8717 = vtanh.f32 %v3146_v27 }
0x2833   :  { %v8718_v38 = vpop.eup %8717 }
0x2834   :  { %v3148_v30 = vmul.f32 %v8718_v38, %v8716_v26 }
0x2836   :  { %3150 = vrot.lane.b32.xlu1 %v3148_v30, %s9161_s25 }
0x28a8   :  { %v9854_v23 = vpop.permute.xlu1 %3150 }
0x28a9   :  { %7337 = vmatmul.mubr.msk.f32.vlgmr.msra.gmra.mrb[32].mxu1 %vm275_vm3, %v9854_v23 }
0x28aa   :  { %7932 = vmatpush1.bf16.msra.mxu1 %v9715_v24  ;;  %3457 = vmatprep.mubr.f32.mxu1 %v9160_v0 }
0x28ab   :  { %7934 = vmatprep.subr.bf16.mxu1 %v9717_v63 }
0x28ae   :  { %7936 = vmatpush1.bf16.msra.mxu1 %v9723_v32 }
0x28af   :  { %7938 = vmatprep.subr.bf16.mxu1 %v9727_v14 }
0x28b2   :  { %7940 = vmatpush1.bf16.msra.mxu1 %v9733_v62  ;;  %v3256_v62 = vrot.slane %v3146_v27, 6  ;;  %v3729_v27 = vrot.slane %v9504_v15, 6 }
0x28b3   :  { %7942 = vmatprep.subr.bf16.mxu1 %v9737_v60 }
0x28b6   :  { %7944 = vmatpush1.bf16.msra.mxu1 %v9744_v36 }
0x297c   :  { %v3223_v40 = vpop.f32.mrb[32].mxu1 }
0x297d   :  { %v3236_v31 = vrot.slane %v3223_v40, 6  ;;  %v3225_v13 = vpop.f32.mrb[33].mxu1 }
0x297e   :  { %v3237_v44 = vrot.slane %v3225_v13, 6 }
0x297f   :  { %v3240_v43 = vadd.f32 %v3236_v31, %v9768_v55 }
0x2980   :  { %v3241_v63 = vadd.f32 %v3237_v44, %v9776_v51 }
0x2981   :  { %v7338_v24 = vmul.f32 -1.442695, %v3240_v43 }
0x2982   :  { %v7339_v36 = vmul.f32 -1.442695, %v3241_v63 }
0x2983   :  { %8719 = vpow2.f32 %v7338_v24 }
0x2984   :  { %8721 = vtanh.f32 %v3241_v63 }
0x298d   :  { %v8720_v46 = vpop.eup %8719 }
0x298e   :  { %v3245_v32 = vadd.f32 1.0, %v8720_v46  ;;  %v8722_v14 = vpop.eup %8721 }
0x2990   :  { %8723 = vrcp.f32 %v3245_v32 }
0x2991   :  { %8725 = vpow2.f32 %v7339_v36  ;;  %v3508_v36 = vld [vmem:[#allocation4 + $0x110] sm:$0xff] }
0x299a   :  { %v8724_v47 = vpop.eup %8723 }
0x299b   :  { %v3259_v60 = vmul.f32 %v8724_v47, %v8722_v14  ;;  %v3258_v59 = vmul.f32 %v8724_v47, %v3256_v62  ;;  %v8726_v10 = vpop.eup %8725  ;;  %v3507_v47 = vld [vmem:[#allocation4 + $0x108] sm:$0xff] }
0x299c   :  { %v3252_v52 = vadd.f32 1.0, %v8726_v10  ;;  %v3524_v10 = vld [vmem:[#allocation7 + $0x108] sm:$0xff] }
0x299d   :  { %3261 = vrot.lane.b32.xlu0 %v3259_v60, %s9161_s25  ;;  %v3509_v60 = vld [vmem:[#allocation4 + $0x118] sm:$0xff] }
0x299e   :  { %8727 = vrcp.f32 %v3252_v52  ;;  %v3526_v52 = vld [vmem:[#allocation7 + $0x118] sm:$0xff] }
0x29a8   :  { %v8728_v29 = vpop.eup %8727 }
0x2a0f   :  { %v3262_v18 = vpop.permute.xlu0 %3261 }
0x2a10   :  { %v3264_v49 = vadd.f32 %v3262_v18, %v3258_v59  ;;  %v3506_v59 = vld [vmem:[#allocation4 + $0x100] sm:$0xff]  ;;  %v7961_v18 = vpack.c.bf16 %v3526_v52, %v3524_v10  ;;  %v3544_v10 = vld [vmem:[#allocation9 + $0x190] sm:$0xff]  ;;  %v3547_v52 = vld [vmem:[#allocation9 + $0x1a8] sm:$0xff] }
0x2a12   :  { %8729 = vtanh.f32 %v3264_v49  ;;  %v3371_v22 = vrot.slane %v3264_v49, 6  ;;  %v3523_v49 = vld [vmem:[#allocation7 + $0x100] sm:$0xff]  ;;  %7962 = vmatprep.subr.bf16.mxu1 %v7961_v18 }
0x2a1c   :  { %v8730_v4 = vpop.eup %8729 }
0x2a1d   :  { %v9869_v28 = vmul.f32 %v8730_v4, %v8728_v29  ;;  %v3525_v29 = vld [vmem:[#allocation7 + $0x110] sm:$0xff]  ;;  %v3511_v4 = vld [vmem:[#allocation4 + $0x128] sm:$0xff] }
0x2a1f   :  { %v3273_v56 = vrot.slane %v9869_v28, 2 }
0x2a21   :  { %3274 = vrot.lane.b32.xlu1 %v3273_v56, %s9161_s25  ;;  %v7963_v56 = vpack.c.bf16 %v3525_v29, %v3523_v49  ;;  %v3546_v29 = vld [vmem:[#allocation9 + $0x1a0] sm:$0xff] }
0x2a93   :  { %v3275_v53 = vpop.permute.xlu1 %3274 }
0x2a94   :  { %7340 = vmatmul.mubr.msk.f32.vlgmr.msra.gmra.mrb[34].mxu0 %vm275_vm3, %v3275_v53  ;;  %v3513_v53 = vld [vmem:[#allocation4 + $0x138] sm:$0xff] }
0x2a95   :  { %3639 = vmatprep.mubr.f32.mxu0 %v9160_v0 }
0x2b67   :  { %v3344_v5 = vpop.f32.mrb[34].mxu0 }
0x2b68   :  { %v3351_v3 = vrot.slane %v3344_v5, 4  ;;  %v3346_v19 = vpop.f32.mrb[35].mxu0  ;;  %v3510_v5 = vld [vmem:[#allocation4 + $0x120] sm:$0xff] }
0x2b69   :  { %v3352_v8 = vrot.slane %v3346_v19, 4  ;;  %v7949_v19 = vpack.c.bf16 %v3513_v53, %v3511_v4  ;;  %v3548_v4 = vld [vmem:[#allocation9 + $0x1b0] sm:$0xff]  ;;  %v3551_v53 = vld [vmem:[#allocation9 + $0x1c8] sm:$0xff] }
0x2b6a   :  { %v3355_v6 = vadd.f32 %v3351_v3, %v9774_v37  ;;  %v3512_v3 = vld [vmem:[#allocation4 + $0x130] sm:$0xff] }
0x2b6b   :  { %v3356_v45 = vadd.f32 %v3352_v8, %v9782_v41  ;;  %v3530_v8 = vld [vmem:[#allocation7 + $0x138] sm:$0xff] }
0x2b6c   :  { %v7341_v50 = vmul.f32 -1.442695, %v3355_v6  ;;  %v7951_v6 = vpack.c.bf16 %v3512_v3, %v3510_v5  ;;  %v3553_v5 = vld [vmem:[#allocation9 + $0x1d8] sm:$0xff]  ;;  %v9930_v3 = vpack.c.bf16 %v3548_v4, %v3546_v29 }
0x2b6d   :  { %v7342_v54 = vmul.f32 -1.442695, %v3356_v45 }
0x2b6e   :  { %8731 = vpow2.f32 %v7341_v50  ;;  %v3528_v50 = vld [vmem:[#allocation7 + $0x128] sm:$0xff] }
0x2b6f   :  { %8733 = vtanh.f32 %v3356_v45  ;;  %v3527_v45 = vld [vmem:[#allocation7 + $0x120] sm:$0xff] }
0x2b78   :  { %v8732_v9 = vpop.eup %8731 }
0x2b79   :  { %v3360_v2 = vadd.f32 1.0, %v8732_v9  ;;  %v8734_v12 = vpop.eup %8733  ;;  %v7965_v9 = vpack.c.bf16 %v3530_v8, %v3528_v50  ;;  %v3552_v50 = vld [vmem:[#allocation9 + $0x1d0] sm:$0xff] }
0x2b7b   :  { %8735 = vrcp.f32 %v3360_v2  ;;  %v3515_v2 = vld [vmem:[#allocation4 + $0x148] sm:$0xff] }
0x2b7c   :  { %8737 = vpow2.f32 %v7342_v54 }
0x2b85   :  { %v8736_v16 = vpop.eup %8735 }
0x2b86   :  { %v3374_v17 = vmul.f32 %v8736_v16, %v8734_v12  ;;  %v3373_v25 = vmul.f32 %v8736_v16, %v3371_v22  ;;  %v8738_v11 = vpop.eup %8737  ;;  %v3517_v12 = vld [vmem:[#allocation4 + $0x158] sm:$0xff] }
0x2b87   :  { %v3367_v37 = vadd.f32 1.0, %v8738_v11  ;;  %v7953_v16 = vpack.c.bf16 %v3517_v12, %v3515_v2  ;;  %v3554_v12 = vld [vmem:[#allocation9 + $0x1e0] sm:$0xff] }
0x2b88   :  { %3376 = vrot.lane.b32.xlu0 %v3374_v17, %s9161_s25 }
0x2b89   :  { %8739 = vrcp.f32 %v3367_v37  ;;  %v3514_v37 = vld [vmem:[#allocation4 + $0x140] sm:$0xff] }
0x2b93   :  { %v8740_v41 = vpop.eup %8739 }
0x2bfa   :  { %v3377_v34 = vpop.permute.xlu0 %3376 }
0x2bfb   :  { %v3379_v20 = vadd.f32 %v3377_v34, %v3373_v25  ;;  %v3516_v34 = vld [vmem:[#allocation4 + $0x150] sm:$0xff] }
0x2bfd   :  { %8741 = vtanh.f32 %v3379_v20  ;;  %v3486_v46 = vrot.slane %v3379_v20, 6  ;;  %v3532_v20 = vld [vmem:[#allocation7 + $0x148] sm:$0xff] }
0x2c07   :  { %v8742_v58 = vpop.eup %8741 }
0x2c08   :  { %v3381_v21 = vmul.f32 %v8742_v58, %v8740_v41  ;;  %v7955_v58 = vpack.c.bf16 %v3516_v34, %v3514_v37 }
0x2c0a   :  { %v3388_v61 = vrot.slane %v3381_v21, 4 }
0x2c0c   :  { %3389 = vrot.lane.b32.xlu1 %v3388_v61, %s9161_s25  ;;  %v3533_v61 = vld [vmem:[#allocation7 + $0x150] sm:$0xff] }
0x2c10   :  { %2803 = vrot.lane.b32.xlu1 %v9803_v42, %s9161_s25 }
0x2c14   :  { %3033 = vrot.lane.b32.xlu1 %v9837_v57, %s9161_s25 }
0x2c18   :  { %3383 = vrot.lane.b32.xlu1 %v3381_v21, %s9161_s25  ;;  %v3534_v21 = vld [vmem:[#allocation7 + $0x158] sm:$0xff] }
0x2c1c   :  { %3730 = vrot.lane.b32.xlu1 %v3729_v27, %s9161_s25  ;;  %v7969_v27 = vpack.c.bf16 %v3534_v21, %v3532_v20 }
0x2c7e   :  { %v3390_v26 = vpop.permute.xlu1 %3389 }
0x2c7f   :  { %7343 = vmatmul.mubr.msk.f32.vlgmr.msra.gmra.mrb[34].mxu1 %vm275_vm3, %v3390_v26 }
0x2c80   :  { %3716 = vmatprep.mubr.f32.mxu1 %v9160_v0  ;;  %7964 = vmatpush1.bf16.msra.mxu1 %v7963_v56 }
0x2c81   :  { %7966 = vmatprep.subr.bf16.mxu1 %v7965_v9  ;;  %v3557_v9 = vld [vmem:[#allocation9 + $0x1f8] sm:$0xff] }
0x2c82   :  { %v2804_v38 = vpop.permute.xlu1 %2803 }
0x2c83   :  { %2806 = vst.msk [vmem:[#allocation2] sm:$0xc] %vm506_vm4, %v2804_v38 }
0x2c84   :  { %2807 = vst.msk [vmem:[#allocation2 + $0xa] sm:$0xc] %vm508_vm5, %v2804_v38  ;;  %v3519_v38 = vld [vmem:[#allocation4 + $0x168] sm:$0xff] }
0x2c86   :  { %v3034_v42 = vpop.permute.xlu1 %3033 }
0x2c87   :  { %3036 = vst.msk [vmem:[#allocation2] sm:$0xc0] %vm740_vm6, %v3034_v42 }
0x2c88   :  { %3037 = vst.msk [vmem:[#allocation2 + $0x2] sm:$0xc0] %vm742_vm7, %v3034_v42  ;;  %v3521_v42 = vld [vmem:[#allocation4 + $0x178] sm:$0xff] }
0x2c89   :  { %3153 = vst.msk [vmem:[#allocation2 + $0x8] sm:$0x3] %vm386_vm1, %v9854_v23 }
0x2c8a   :  { %3154 = vst.msk [vmem:[#allocation2 + $0x6] sm:$0x3] %vm388_vm2, %v9854_v23  ;;  %v3384_v15 = vpop.permute.xlu1 %3383 }
0x2c8b   :  { %3386 = vst.msk [vmem:[#allocation2 + $0x8] sm:$0x30] %vm623_vm8, %v3384_v15 }
0x2c8c   :  { %3387 = vst.msk [vmem:[#allocation2 - $0x2] sm:$0x30] %vm625_vm9, %v3384_v15  ;;  %v3518_v15 = vld [vmem:[#allocation4 + $0x160] sm:$0xff] }
0x2d52   :  { %v3459_v57 = vpop.f32.mrb[34].mxu1 }
0x2d53   :  { %v3466_v30 = vrot.slane %v3459_v57, 2  ;;  %v3461_v40 = vpop.f32.mrb[35].mxu1 }
0x2d54   :  { %v3467_v43 = vrot.slane %v3461_v40, 2  ;;  %v3520_v40 = vld [vmem:[#allocation4 + $0x170] sm:$0xff] }
0x2d55   :  { %v3470_v31 = vadd.f32 %v3466_v30, %v9768_v55  ;;  %v7945_v55 = vpack.c.bf16 %v3509_v60, %v3507_v47  ;;  %v7957_v30 = vpack.c.bf16 %v3521_v42, %v3519_v38 }
0x2d56   :  { %v3471_v24 = vadd.f32 %v3467_v43, %v9776_v51  ;;  %v7947_v51 = vpack.c.bf16 %v3508_v36, %v3506_v59  ;;  %v7959_v43 = vpack.c.bf16 %v3520_v40, %v3518_v15  ;;  %v3542_v36 = vld [vmem:[#allocation9 + $0x180] sm:$0xff] }
0x2d57   :  { %v7344_v13 = vmul.f32 -1.442695, %v3470_v31  ;;  %7946 = vmatprep.subr.bf16.mxu0 %v7945_v55  ;;  %v3536_v31 = vld [vmem:[#allocation7 + $0x168] sm:$0xff]  ;;  %v9922_v18 = vpack.c.bf16 %v3544_v10, %v3542_v36 }
0x2d58   :  { %7948 = vmatpush1.bf16.msra.mxu0 %v7947_v51  ;;  %v7345_v17 = vmul.f32 -1.442695, %v3471_v24  ;;  %v3549_v51 = vld [vmem:[#allocation9 + $0x1b8] sm:$0xff] }
0x2d59   :  { %8743 = vpow2.f32 %v7344_v13  ;;  %7950 = vmatprep.subr.bf16.mxu0 %v7949_v19  ;;  %v3538_v13 = vld [vmem:[#allocation7 + $0x178] sm:$0xff]  ;;  %v9924_v49 = vpack.c.bf16 %v3549_v51, %v3547_v52  ;;  %v9934_v19 = vpack.c.bf16 %v3553_v5, %v3551_v53  ;;  %v3829_v5 = vrot.slane %v9493_v7, 6 }
0x2d5a   :  { %8745 = vtanh.f32 %v3471_v24  ;;  %v7973_v24 = vpack.c.bf16 %v3538_v13, %v3536_v31 }
0x2d5c   :  { %7952 = vmatpush1.bf16.msra.mxu0 %v7951_v6  ;;  %v3550_v6 = vld [vmem:[#allocation9 + $0x1c0] sm:$0xff] }
0x2d5d   :  { %7954 = vmatprep.subr.bf16.mxu0 %v7953_v16 }
0x2d60   :  { %7956 = vmatpush1.bf16.msra.mxu0 %v7955_v58 }
0x2d61   :  { %7958 = vmatprep.subr.bf16.mxu0 %v7957_v30 }
0x2d63   :  { %v8744_v44 = vpop.eup %8743 }
0x2d64   :  { %v3475_v63 = vadd.f32 1.0, %v8744_v44  ;;  %v8746_v23 = vpop.eup %8745  ;;  %v3535_v44 = vld [vmem:[#allocation7 + $0x160] sm:$0xff]  ;;  %7960 = vmatpush1.bf16.msra.mxu0 %v7959_v43 }
0x2d66   :  { %8747 = vrcp.f32 %v3475_v63  ;;  %v3537_v63 = vld [vmem:[#allocation7 + $0x170] sm:$0xff] }
0x2d67   :  { %8749 = vpow2.f32 %v7345_v17  ;;  %v3731_v17 = vpop.permute.xlu1 %3730 }
0x2d70   :  { %v8748_v32 = vpop.eup %8747 }
0x2d71   :  { %v3489_v14 = vmul.f32 %v8748_v32, %v8746_v23  ;;  %v3488_v62 = vmul.f32 %v8748_v32, %v3486_v46  ;;  %v8750_v25 = vpop.eup %8749  ;;  %v3543_v23 = vld [vmem:[#allocation9 + $0x188] sm:$0xff]  ;;  %v7975_v46 = vpack.c.bf16 %v3537_v63, %v3535_v44  ;;  %v3545_v32 = vld [vmem:[#allocation9 + $0x198] sm:$0xff] }
0x2d72   :  { %v3482_v54 = vadd.f32 1.0, %v8750_v25  ;;  %v7346_v25 = vld [vmem:[%s10626_s5 + $0x6] sm:$0x3] }
0x2d73   :  { %3491 = vrot.lane.b32.xlu0 %v3489_v14, %s9161_s25  ;;  %v9910_v14 = vpack.c.bf16 %v3545_v32, %v3543_v23  ;;  %v3566_v34 = vrot.slane %v7346_v25, %v9354_v35 }
0x2d74   :  { %8751 = vrcp.f32 %v3482_v54  ;;  %v3562_v54 = vrot.slane %v7346_v25, %v9349_v33 }
0x2d75   :  { %7978 = vmatprep.subr.bf16.mxu0 %v9910_v14 }
0x2d77   :  { %2918 = vrot.lane.b32.xlu0 %v9820_v1, %s9161_s25  ;;  %v3529_v1 = vld [vmem:[#allocation7 + $0x130] sm:$0xff] }
0x2d78   :  { %v7967_v22 = vpack.c.bf16 %v3529_v1, %v3527_v45  ;;  %v3555_v45 = vld [vmem:[#allocation9 + $0x1e8] sm:$0xff]  ;;  %v9940_v1 = vpack.c.bf16 %v3552_v50, %v3550_v6 }
0x2d79   :  { %v9944_v2 = vpack.c.bf16 %v3557_v9, %v3555_v45 }
0x2d7a   :  { %7968 = vmatpush1.bf16.msra.mxu1 %v7967_v22  ;;  %v3556_v22 = vld [vmem:[#allocation9 + $0x1f0] sm:$0xff] }
0x2d7b   :  { %3268 = vrot.lane.b32.xlu0 %v9869_v28, %s9161_s25  ;;  %v3531_v28 = vld [vmem:[#allocation7 + $0x140] sm:$0xff]  ;;  %7970 = vmatprep.subr.bf16.mxu1 %v7969_v27  ;;  %v9951_v16 = vpack.c.bf16 %v3556_v22, %v3554_v12 }
0x2d7c   :  { %v7971_v26 = vpack.c.bf16 %v3533_v61, %v3531_v28 }
0x2d7e   :  { %7972 = vmatpush1.bf16.msra.mxu1 %v7971_v26  ;;  %v8752_v47 = vpop.eup %8751 }
0x2d7f   :  { %7974 = vmatprep.subr.bf16.mxu1 %v7973_v24 }
0x2d82   :  { %7976 = vmatpush1.bf16.msra.mxu1 %v7975_v46 }
0x2d83   :  { %7994 = vmatprep.subr.bf16.mxu1 %v9910_v14 }
0x2de5   :  { %v3492_v11 = vpop.permute.xlu0 %3491 }
0x2de6   :  { %v9905_v41 = vadd.f32 %v3492_v11, %v3488_v62 }
0x2de8   :  { %8753 = vtanh.f32 %v9905_v41 }
0x2de9   :  { %v2919_v57 = vpop.permute.xlu0 %2918 }
0x2dea   :  { %2921 = vst.msk [vmem:[#allocation2] sm:$0x30] %vm623_vm8, %v2919_v57 }
0x2deb   :  { %2922 = vst.msk [vmem:[#allocation2 + $0x6] sm:$0x30] %vm625_vm9, %v2919_v57 }
0x2ded   :  { %v3269_v62 = vpop.permute.xlu0 %3268 }
0x2dee   :  { %3271 = vst.msk [vmem:[#allocation2 + $0x8] sm:$0xc] %vm506_vm4, %v3269_v62 }
0x2def   :  { %3272 = vst.msk [vmem:[#allocation2 + $0x2] sm:$0xc] %vm508_vm5, %v3269_v62 }
0x2df2   :  { %v8754_v60 = vpop.eup %8753 }
0x2df3   :  { %v9916_v59 = vmul.f32 %v8754_v60, %v8752_v47 }
0x2df5   :  { %3498 = vrot.lane.b32.xlu0 %v9916_v59, %s9161_s25 }
0x2e67   :  { %v3499_v55 = vpop.permute.xlu0 %3498 }
0x2e68   :  { %3501 = vst.msk [vmem:[#allocation2 + $0x8] sm:$0xc0] %vm740_vm6, %v3499_v55 }
0x2e69   :  { %3502 = vst.msk [vmem:[#allocation2 - $0x6] sm:$0xc0] %vm742_vm7, %v3499_v55 }
0x2e6f   :  { %v3504_v8 = vld [vmem:[#allocation2 + $0x8] sm:$0xff] }
0x2e70   :  { %v3503_v56 = vld [vmem:[#allocation2] sm:$0xff] }
0x2e71   :  { %7347 = vmatmul.mubr.msk.f32.vlgmr.msra.gmra.mrb[36].mxu0 %vm275_vm3, %v3503_v56  ;;  %7349 = vmatmul.mubr.msk.f32.vlgmr.msra.gmra.mrb[36].mxu1 %vm275_vm3, %v3503_v56 }
0x2e72   :  { %7980 = vmatpush1.bf16.msra.mxu0 %v9922_v18  ;;  %3645 = vmatprep.mubr.f32.mxu0 %v9160_v0 }
0x2e73   :  { %3722 = vmatprep.mubr.f32.mxu1 %v9160_v0  ;;  %7982 = vmatprep.subr.bf16.mxu0 %v9924_v49 }
0x2e74   :  { %7996 = vmatpush1.bf16.msra.mxu1 %v9922_v18 }
0x2e75   :  { %7348 = vmatmul.mubr.msk.f32.gmra.mrb[38].mxu0 %vm275_vm3, %v3504_v8  ;;  %7350 = vmatmul.mubr.msk.f32.gmra.mrb[38].mxu1 %vm275_vm3, %v3504_v8 }
0x2e76   :  { %7984 = vmatpush1.bf16.msra.mxu0 %v9930_v3  ;;  %3798 = vmatprep.mubr.f32.mxu0 %v9160_v0 }
0x2e77   :  { %7986 = vmatprep.subr.bf16.mxu0 %v9934_v19  ;;  %7998 = vmatprep.subr.bf16.mxu1 %v9924_v49 }
0x2e78   :  { %8000 = vmatpush1.bf16.msra.mxu1 %v9930_v3  ;;  %3912 = vmatprep.mubr.f32.mxu1 %v9160_v0 }
0x2e79   :  { %8002 = vmatprep.subr.bf16.mxu1 %v9934_v19 }
0x2e7a   :  { %7988 = vmatpush1.bf16.msra.mxu0 %v9940_v1 }
0x2e7b   :  { %7990 = vmatprep.subr.bf16.mxu0 %v9944_v2 }
0x2e7c   :  { %8004 = vmatpush1.bf16.msra.mxu1 %v9940_v1 }
0x2e7d   :  { %8006 = vmatprep.subr.bf16.mxu1 %v9944_v2 }
0x2e7e   :  { %7992 = vmatpush1.bf16.msra.mxu0 %v9951_v16 }
0x2e7f   :  { %8010 = vmatprep.subr.bf16.mxu0 %v9910_v14 }
0x2e80   :  { %8008 = vmatpush1.bf16.msra.mxu1 %v9951_v16 }
0x2e81   :  { %7351 = vmatmul.mubr.msk.f32.vlgmr.msra.gmra.mrb[40].mxu0 %vm275_vm3, %v3731_v17  ;;  %8026 = vmatprep.subr.bf16.mxu1 %v9910_v14 }
0x2e82   :  { %8012 = vmatpush1.bf16.msra.mxu0 %v9922_v18  ;;  %4033 = vmatprep.mubr.f32.mxu0 %v9160_v0 }
0x2e83   :  { %8014 = vmatprep.subr.bf16.mxu0 %v9924_v49 }
0x2e86   :  { %8016 = vmatpush1.bf16.msra.mxu0 %v9930_v3 }
0x2e87   :  { %8018 = vmatprep.subr.bf16.mxu0 %v9934_v19 }
0x2e8a   :  { %8020 = vmatpush1.bf16.msra.mxu0 %v9940_v1 }
0x2e8b   :  { %8022 = vmatprep.subr.bf16.mxu0 %v9944_v2 }
0x2e8e   :  { %8024 = vmatpush1.bf16.msra.mxu0 %v9951_v16 }
0x2e8f   :  { %8042 = vmatprep.subr.bf16.mxu0 %v9910_v14 }
0x2f44   :  { %v3641_v11 = vpop.f32.mrb[36].mxu0  ;;  %v3718_v37 = vpop.f32.mrb[36].mxu1 }
0x2f45   :  { %v3643_v20 = vpop.f32.mrb[37].mxu0  ;;  %v3720_v58 = vpop.f32.mrb[37].mxu1  ;;  %v3642_v21 = vadd.f32 %v3641_v11, %v3562_v54  ;;  %v4272_v28 = vrot.slane %v3718_v37, 6  ;;  %v4384_v61 = vrot.slane %v3718_v37, 2 }
0x2f46   :  { %v3644_v27 = vadd.f32 %v3643_v20, %v3566_v34  ;;  %v4273_v42 = vrot.slane %v3720_v58, 6  ;;  %v4385_v13 = vrot.slane %v3720_v58, 2 }
0x2f48   :  { %v3647_v26 = vpop.f32.mrb[38].mxu0  ;;  %v3724_v38 = vpop.f32.mrb[38].mxu1 }
0x2f49   :  { %v3648_v15 = vadd.f32 %v3647_v26, %v3562_v54  ;;  %v3807_v57 = vrot.slane %v3724_v38, 6  ;;  %v3919_v30 = vrot.slane %v3724_v38, 2  ;;  %v3649_v40 = vpop.f32.mrb[39].mxu0  ;;  %v3726_v31 = vpop.f32.mrb[39].mxu1 }
0x2f4a   :  { %v3650_v43 = vadd.f32 %v3649_v40, %v3566_v34  ;;  %v3808_v24 = vrot.slane %v3726_v31, 6  ;;  %v3920_v44 = vrot.slane %v3726_v31, 2 }
0x2f4b   :  { %v9975_v63 = vadd.f32 %v4384_v61, %v3648_v15  ;;  %v9977_v23 = vadd.f32 %v3919_v30, %v3642_v21  ;;  %v9979_v46 = vadd.f32 %v3807_v57, %v3642_v21  ;;  %v9981_v32 = vadd.f32 %v4272_v28, %v3648_v15 }
0x2f4c   :  { %v9983_v62 = vadd.f32 %v4385_v13, %v3650_v43  ;;  %v9985_v47 = vadd.f32 %v3920_v44, %v3644_v27  ;;  %v9987_v60 = vadd.f32 %v3808_v24, %v3644_v27  ;;  %v9989_v55 = vadd.f32 %v4273_v42, %v3650_v43 }
0x2f54   :  { %v3800_v36 = vpop.f32.mrb[40].mxu0 }
0x2f55   :  { %v3813_v10 = vadd.f32 %v9979_v46, %v3800_v36  ;;  %v3802_v52 = vpop.f32.mrb[41].mxu0 }
0x2f56   :  { %v3814_v29 = vadd.f32 %v9987_v60, %v3802_v52 }
0x2f57   :  { %v7352_v51 = vmul.f32 -1.442695, %v3813_v10 }
0x2f58   :  { %v7353_v45 = vmul.f32 -1.442695, %v3814_v29 }
0x2f59   :  { %8755 = vpow2.f32 %v7352_v51 }
0x2f5a   :  { %8757 = vtanh.f32 %v3814_v29 }
0x2f63   :  { %v8756_v4 = vpop.eup %8755 }
0x2f64   :  { %v3818_v56 = vadd.f32 1.0, %v8756_v4  ;;  %v8758_v53 = vpop.eup %8757 }
0x2f66   :  { %8759 = vrcp.f32 %v3818_v56 }
0x2f67   :  { %8761 = vpow2.f32 %v7353_v45 }
0x2f70   :  { %v8760_v6 = vpop.eup %8759 }
0x2f71   :  { %v3832_v50 = vmul.f32 %v8760_v6, %v8758_v53  ;;  %v3831_v8 = vmul.f32 %v8760_v6, %v3829_v5  ;;  %v8762_v9 = vpop.eup %8761 }
0x2f72   :  { %v3825_v12 = vadd.f32 1.0, %v8762_v9 }
0x2f73   :  { %3834 = vrot.lane.b32.xlu0 %v3832_v50, %s9161_s25 }
0x2f74   :  { %8763 = vrcp.f32 %v3825_v12 }
0x2f7e   :  { %v8764_v25 = vpop.eup %8763 }
0x2fe5   :  { %v3835_v22 = vpop.permute.xlu0 %3834 }
0x2fe6   :  { %v3837_v17 = vadd.f32 %v3835_v22, %v3831_v8 }
0x2fe8   :  { %8765 = vtanh.f32 %v3837_v17  ;;  %v3947_v42 = vrot.slane %v3837_v17, 6 }
0x2ff2   :  { %v8766_v54 = vpop.eup %8765 }
0x2ff3   :  { %v3839_v11 = vmul.f32 %v8766_v54, %v8764_v25 }
0x2ff5   :  { %3841 = vrot.lane.b32.xlu1 %v3839_v11, %s9161_s25 }
0x3067   :  { %v3842_v37 = vpop.permute.xlu1 %3841 }
0x3068   :  { %3844 = vst.msk [vmem:[#allocation3] sm:$0x3] %vm386_vm1, %v3842_v37  ;;  %7354 = vmatmul.mubr.msk.f32.vlgmr.msra.gmra.mrb[40].mxu1 %vm275_vm3, %v3842_v37 }
0x3069   :  { %3845 = vst.msk [vmem:[#allocation3 + $0xe] sm:$0x3] %vm388_vm2, %v3842_v37  ;;  %8028 = vmatpush1.bf16.msra.mxu1 %v9922_v18  ;;  %4148 = vmatprep.mubr.f32.mxu1 %v9160_v0 }
0x306a   :  { %8030 = vmatprep.subr.bf16.mxu1 %v9924_v49 }
0x306d   :  { %8032 = vmatpush1.bf16.msra.mxu1 %v9930_v3 }
0x306e   :  { %8034 = vmatprep.subr.bf16.mxu1 %v9934_v19 }
0x3071   :  { %8036 = vmatpush1.bf16.msra.mxu1 %v9940_v1 }
0x3072   :  { %8038 = vmatprep.subr.bf16.mxu1 %v9944_v2 }
0x3075   :  { %8040 = vmatpush1.bf16.msra.mxu1 %v9951_v16 }
0x3076   :  { %8058 = vmatprep.subr.bf16.mxu1 %v9910_v14 }
0x313b   :  { %v3914_v7 = vpop.f32.mrb[40].mxu1 }
0x313c   :  { %v3927_v34 = vrot.slane %v3914_v7, 6  ;;  %v3916_v20 = vpop.f32.mrb[41].mxu1 }
0x313d   :  { %v3928_v28 = vrot.slane %v3916_v20, 6 }
0x313e   :  { %v3931_v58 = vadd.f32 %v3927_v34, %v9977_v23 }
0x313f   :  { %v3932_v61 = vadd.f32 %v3928_v28, %v9985_v47 }
0x3140   :  { %v7355_v21 = vmul.f32 -1.442695, %v3931_v58 }
0x3141   :  { %v7356_v40 = vmul.f32 -1.442695, %v3932_v61 }
0x3142   :  { %8767 = vpow2.f32 %v7355_v21 }
0x3143   :  { %8769 = vtanh.f32 %v3932_v61 }
0x314c   :  { %v8768_v27 = vpop.eup %8767 }
0x314d   :  { %v3936_v26 = vadd.f32 1.0, %v8768_v27  ;;  %v8770_v38 = vpop.eup %8769 }
0x314f   :  { %8771 = vrcp.f32 %v3936_v26 }
0x3150   :  { %8773 = vpow2.f32 %v7356_v40 }
0x3159   :  { %v8772_v15 = vpop.eup %8771 }
0x315a   :  { %v3950_v57 = vmul.f32 %v8772_v15, %v8770_v38  ;;  %v3949_v30 = vmul.f32 %v8772_v15, %v3947_v42  ;;  %v8774_v31 = vpop.eup %8773 }
0x315b   :  { %v3943_v13 = vadd.f32 1.0, %v8774_v31 }
0x315c   :  { %3952 = vrot.lane.b32.xlu0 %v3950_v57, %s9161_s25 }
0x315d   :  { %8775 = vrcp.f32 %v3943_v13 }
0x3167   :  { %v8776_v44 = vpop.eup %8775 }
0x31ce   :  { %v3953_v43 = vpop.permute.xlu0 %3952 }
0x31cf   :  { %v3955_v24 = vadd.f32 %v3953_v43, %v3949_v30 }
0x31d1   :  { %8777 = vtanh.f32 %v3955_v24  ;;  %v4062_v12 = vrot.slane %v3955_v24, 6 }
0x31db   :  { %v8778_v36 = vpop.eup %8777 }
0x31dc   :  { %v10011_v10 = vmul.f32 %v8778_v36, %v8776_v44 }
0x31de   :  { %v3964_v52 = vrot.slane %v10011_v10, 2 }
0x31e0   :  { %3965 = vrot.lane.b32.xlu1 %v3964_v52, %s9161_s25 }
0x3252   :  { %v3966_v51 = vpop.permute.xlu1 %3965 }
0x3253   :  { %7357 = vmatmul.mubr.msk.f32.vlgmr.msra.gmra.mrb[42].mxu0 %vm275_vm3, %v3966_v51 }
0x3254   :  { %8044 = vmatpush1.bf16.msra.mxu0 %v9922_v18  ;;  %4263 = vmatprep.mubr.f32.mxu0 %v9160_v0 }
0x3255   :  { %8046 = vmatprep.subr.bf16.mxu0 %v9924_v49 }
0x3258   :  { %8048 = vmatpush1.bf16.msra.mxu0 %v9930_v3 }
0x3259   :  { %8050 = vmatprep.subr.bf16.mxu0 %v9934_v19 }
0x325c   :  { %8052 = vmatpush1.bf16.msra.mxu0 %v9940_v1 }
0x325d   :  { %8054 = vmatprep.subr.bf16.mxu0 %v9944_v2 }
0x3260   :  { %8056 = vmatpush1.bf16.msra.mxu0 %v9951_v16 }
0x3261   :  { %8074 = vmatprep.subr.bf16.mxu0 %v9910_v14 }
0x3326   :  { %v4035_v29 = vpop.f32.mrb[42].mxu0 }
0x3327   :  { %v4042_v4 = vrot.slane %v4035_v29, 4  ;;  %v4037_v56 = vpop.f32.mrb[43].mxu0 }
0x3328   :  { %v4043_v6 = vrot.slane %v4037_v56, 4 }
0x3329   :  { %v4046_v53 = vadd.f32 %v4042_v4, %v9979_v46 }
0x332a   :  { %v4047_v50 = vadd.f32 %v4043_v6, %v9987_v60 }
0x332b   :  { %v7358_v5 = vmul.f32 -1.442695, %v4046_v53 }
0x332c   :  { %v7359_v54 = vmul.f32 -1.442695, %v4047_v50 }
0x332d   :  { %8779 = vpow2.f32 %v7358_v5 }
0x332e   :  { %8781 = vtanh.f32 %v4047_v50 }
0x3337   :  { %v8780_v8 = vpop.eup %8779 }
0x3338   :  { %v4051_v45 = vadd.f32 1.0, %v8780_v8  ;;  %v8782_v9 = vpop.eup %8781 }
0x333a   :  { %8783 = vrcp.f32 %v4051_v45 }
0x333b   :  { %8785 = vpow2.f32 %v7359_v54 }
0x3344   :  { %v8784_v22 = vpop.eup %8783 }
0x3345   :  { %v4065_v17 = vmul.f32 %v8784_v22, %v8782_v9  ;;  %v4064_v25 = vmul.f32 %v8784_v22, %v4062_v12  ;;  %v8786_v11 = vpop.eup %8785 }
0x3346   :  { %v4058_v46 = vadd.f32 1.0, %v8786_v11 }
0x3347   :  { %4067 = vrot.lane.b32.xlu0 %v4065_v17, %s9161_s25 }
0x3348   :  { %8787 = vrcp.f32 %v4058_v46 }
0x3352   :  { %v8788_v60 = vpop.eup %8787 }
0x33b9   :  { %v4068_v37 = vpop.permute.xlu0 %4067 }
0x33ba   :  { %v4070_v7 = vadd.f32 %v4068_v37, %v4064_v25 }
0x33bc   :  { %8789 = vtanh.f32 %v4070_v7  ;;  %v4177_v31 = vrot.slane %v4070_v7, 6 }
0x33c6   :  { %v8790_v34 = vpop.eup %8789 }
0x33c7   :  { %v10028_v20 = vmul.f32 %v8790_v34, %v8788_v60 }
0x33c9   :  { %v4079_v58 = vrot.slane %v10028_v20, 4 }
0x33cb   :  { %4080 = vrot.lane.b32.xlu1 %v4079_v58, %s9161_s25 }
0x343d   :  { %v4081_v21 = vpop.permute.xlu1 %4080 }
0x343e   :  { %7360 = vmatmul.mubr.msk.f32.vlgmr.msra.gmra.mrb[42].mxu1 %vm275_vm3, %v4081_v21 }
0x343f   :  { %8060 = vmatpush1.bf16.msra.mxu1 %v9922_v18  ;;  %4377 = vmatprep.mubr.f32.mxu1 %v9160_v0 }
0x3440   :  { %8062 = vmatprep.subr.bf16.mxu1 %v9924_v49 }
0x3443   :  { %8064 = vmatpush1.bf16.msra.mxu1 %v9930_v3 }
0x3444   :  { %8066 = vmatprep.subr.bf16.mxu1 %v9934_v19 }
0x3447   :  { %8068 = vmatpush1.bf16.msra.mxu1 %v9940_v1 }
0x3448   :  { %8070 = vmatprep.subr.bf16.mxu1 %v9944_v2 }
0x344b   :  { %8072 = vmatpush1.bf16.msra.mxu1 %v9951_v16 }
0x344c   :  { %8090 = vmatprep.subr.bf16.mxu1 %v9910_v14 }
0x3511   :  { %v4150_v28 = vpop.f32.mrb[42].mxu1 }
0x3512   :  { %v4157_v61 = vrot.slane %v4150_v28, 2  ;;  %v4152_v27 = vpop.f32.mrb[43].mxu1 }
0x3513   :  { %v4158_v42 = vrot.slane %v4152_v27, 2 }
0x3514   :  { %v4161_v26 = vadd.f32 %v4157_v61, %v9977_v23 }
0x3515   :  { %v4162_v15 = vadd.f32 %v4158_v42, %v9985_v47 }
0x3516   :  { %v7361_v38 = vmul.f32 -1.442695, %v4161_v26 }
0x3517   :  { %v7362_v14 = vmul.f32 -1.442695, %v4162_v15 }
0x3518   :  { %8791 = vpow2.f32 %v7361_v38 }
0x3519   :  { %8793 = vtanh.f32 %v4162_v15 }
0x3522   :  { %v8792_v57 = vpop.eup %8791 }
0x3523   :  { %v4166_v30 = vadd.f32 1.0, %v8792_v57  ;;  %v8794_v40 = vpop.eup %8793 }
0x3525   :  { %8795 = vrcp.f32 %v4166_v30 }
0x3526   :  { %8797 = vpow2.f32 %v7362_v14 }
0x352f   :  { %v8796_v13 = vpop.eup %8795 }
0x3530   :  { %v4180_v43 = vmul.f32 %v8796_v13, %v8794_v40  ;;  %v4179_v24 = vmul.f32 %v8796_v13, %v4177_v31  ;;  %v8798_v44 = vpop.eup %8797 }
0x3531   :  { %v4173_v23 = vadd.f32 1.0, %v8798_v44 }
0x3532   :  { %4182 = vrot.lane.b32.xlu0 %v4180_v43, %s9161_s25 }
0x3533   :  { %8799 = vrcp.f32 %v4173_v23 }
0x353d   :  { %v8800_v47 = vpop.eup %8799 }
0x35a4   :  { %v4183_v36 = vpop.permute.xlu0 %4182 }
0x35a5   :  { %v4185_v52 = vadd.f32 %v4183_v36, %v4179_v24 }
0x35a7   :  { %8801 = vtanh.f32 %v4185_v52  ;;  %v4294_v22 = vrot.slane %v4185_v52, 6 }
0x35b1   :  { %v8802_v51 = vpop.eup %8801 }
0x35b2   :  { %v10045_v29 = vmul.f32 %v8802_v51, %v8800_v47 }
0x35b4   :  { %v4194_v4 = vrot.slane %v10045_v29, 6 }
0x35b6   :  { %4195 = vrot.lane.b32.xlu1 %v4194_v4, %s9161_s25 }
0x3628   :  { %v4196_v56 = vpop.permute.xlu1 %4195 }
0x3629   :  { %7363 = vmatmul.mubr.msk.f32.vlgmr.msra.gmra.mrb[44].mxu0 %vm275_vm3, %v4196_v56 }
0x362a   :  { %8076 = vmatpush1.bf16.msra.mxu0 %v9922_v18  ;;  %4498 = vmatprep.mubr.f32.mxu0 %v9160_v0 }
0x362b   :  { %8078 = vmatprep.subr.bf16.mxu0 %v9924_v49 }
0x362e   :  { %8080 = vmatpush1.bf16.msra.mxu0 %v9930_v3 }
0x362f   :  { %8082 = vmatprep.subr.bf16.mxu0 %v9934_v19 }
0x3632   :  { %8084 = vmatpush1.bf16.msra.mxu0 %v9940_v1 }
0x3633   :  { %8086 = vmatprep.subr.bf16.mxu0 %v9944_v2 }
0x3636   :  { %8088 = vmatpush1.bf16.msra.mxu0 %v9951_v16 }
0x36fc   :  { %v4265_v53 = vpop.f32.mrb[44].mxu0 }
0x36fd   :  { %v4278_v5 = vadd.f32 %v9981_v32, %v4265_v53  ;;  %v4267_v6 = vpop.f32.mrb[45].mxu0 }
0x36fe   :  { %v4279_v8 = vadd.f32 %v9989_v55, %v4267_v6 }
0x36ff   :  { %v7364_v50 = vmul.f32 -1.442695, %v4278_v5 }
0x3700   :  { %v7365_v11 = vmul.f32 -1.442695, %v4279_v8 }
0x3701   :  { %8803 = vpow2.f32 %v7364_v50 }
0x3702   :  { %8805 = vtanh.f32 %v4279_v8 }
0x370b   :  { %v8804_v45 = vpop.eup %8803 }
0x370c   :  { %v4283_v9 = vadd.f32 1.0, %v8804_v45  ;;  %v8806_v12 = vpop.eup %8805 }
0x370e   :  { %8807 = vrcp.f32 %v4283_v9 }
0x370f   :  { %8809 = vpow2.f32 %v7365_v11 }
0x3718   :  { %v8808_v17 = vpop.eup %8807 }
0x3719   :  { %v4297_v25 = vmul.f32 %v8808_v17, %v8806_v12  ;;  %v4296_v54 = vmul.f32 %v8808_v17, %v4294_v22  ;;  %v8810_v46 = vpop.eup %8809 }
0x371a   :  { %v4290_v37 = vadd.f32 1.0, %v8810_v46 }
0x371b   :  { %4299 = vrot.lane.b32.xlu0 %v4297_v25, %s9161_s25 }
0x371c   :  { %8811 = vrcp.f32 %v4290_v37 }
0x3726   :  { %v8812_v34 = vpop.eup %8811 }
0x378d   :  { %v4300_v7 = vpop.permute.xlu0 %4299 }
0x378e   :  { %v4302_v60 = vadd.f32 %v4300_v7, %v4296_v54 }
0x3790   :  { %8813 = vtanh.f32 %v4302_v60 }
0x379a   :  { %v8814_v58 = vpop.eup %8813 }
0x379b   :  { %v4304_v21 = vmul.f32 %v8814_v58, %v8812_v34 }
0x379d   :  { %4306 = vrot.lane.b32.xlu1 %v4304_v21, %s9161_s25 }
0x380f   :  { %v10062_v28 = vpop.permute.xlu1 %4306 }
0x3810   :  { %7366 = vmatmul.mubr.msk.f32.vlgmr.msra.gmra.mrb[44].mxu1 %vm275_vm3, %v10062_v28 }
0x3811   :  { %8092 = vmatpush1.bf16.msra.mxu1 %v9922_v18  ;;  %4613 = vmatprep.mubr.f32.mxu1 %v9160_v0 }
0x3812   :  { %8094 = vmatprep.subr.bf16.mxu1 %v9924_v49 }
0x3815   :  { %8096 = vmatpush1.bf16.msra.mxu1 %v9930_v3 }
0x3816   :  { %8098 = vmatprep.subr.bf16.mxu1 %v9934_v19 }
0x3819   :  { %8100 = vmatpush1.bf16.msra.mxu1 %v9940_v1  ;;  %v4412_v1 = vrot.slane %v4302_v60, 6  ;;  %v4885_v60 = vrot.slane %v9709_v48, 6 }
0x381a   :  { %8102 = vmatprep.subr.bf16.mxu1 %v9944_v2 }
0x381d   :  { %8104 = vmatpush1.bf16.msra.mxu1 %v9951_v16 }
0x38e3   :  { %v4379_v61 = vpop.f32.mrb[44].mxu1 }
0x38e4   :  { %v4392_v27 = vrot.slane %v4379_v61, 6  ;;  %v4381_v26 = vpop.f32.mrb[45].mxu1 }
0x38e5   :  { %v4393_v42 = vrot.slane %v4381_v26, 6 }
0x38e6   :  { %v4396_v38 = vadd.f32 %v4392_v27, %v9975_v63 }
0x38e7   :  { %v4397_v49 = vadd.f32 %v4393_v42, %v9983_v62 }
0x38e8   :  { %v7367_v18 = vmul.f32 -1.442695, %v4396_v38 }
0x38e9   :  { %v7368_v16 = vmul.f32 -1.442695, %v4397_v49 }
0x38ea   :  { %8815 = vpow2.f32 %v7367_v18 }
0x38eb   :  { %8817 = vtanh.f32 %v4397_v49 }
0x38f4   :  { %v8816_v15 = vpop.eup %8815 }
0x38f5   :  { %v4401_v3 = vadd.f32 1.0, %v8816_v15  ;;  %v8818_v19 = vpop.eup %8817 }
0x38f7   :  { %8819 = vrcp.f32 %v4401_v3 }
0x38f8   :  { %8821 = vpow2.f32 %v7368_v16  ;;  %v4664_v16 = vld [vmem:[#allocation4 + $0x190] sm:$0xff] }
0x3901   :  { %v8820_v57 = vpop.eup %8819 }
0x3902   :  { %v4415_v2 = vmul.f32 %v8820_v57, %v8818_v19  ;;  %v4414_v30 = vmul.f32 %v8820_v57, %v4412_v1  ;;  %v8822_v40 = vpop.eup %8821  ;;  %v4663_v57 = vld [vmem:[#allocation4 + $0x188] sm:$0xff] }
0x3903   :  { %v4408_v31 = vadd.f32 1.0, %v8822_v40  ;;  %v4680_v40 = vld [vmem:[#allocation7 + $0x188] sm:$0xff] }
0x3904   :  { %4417 = vrot.lane.b32.xlu0 %v4415_v2, %s9161_s25  ;;  %v4665_v2 = vld [vmem:[#allocation4 + $0x198] sm:$0xff] }
0x3905   :  { %8823 = vrcp.f32 %v4408_v31  ;;  %v4682_v31 = vld [vmem:[#allocation7 + $0x198] sm:$0xff] }
0x390f   :  { %v8824_v24 = vpop.eup %8823 }
0x3976   :  { %v4418_v13 = vpop.permute.xlu0 %4417 }
0x3977   :  { %v4420_v43 = vadd.f32 %v4418_v13, %v4414_v30  ;;  %v4662_v30 = vld [vmem:[#allocation4 + $0x180] sm:$0xff]  ;;  %v8121_v13 = vpack.c.bf16 %v4682_v31, %v4680_v40  ;;  %v4700_v40 = vld [vmem:[#allocation9 + $0x210] sm:$0xff]  ;;  %v4703_v31 = vld [vmem:[#allocation9 + $0x228] sm:$0xff] }
0x3979   :  { %8825 = vtanh.f32 %v4420_v43  ;;  %v4527_v45 = vrot.slane %v4420_v43, 6  ;;  %v4679_v43 = vld [vmem:[#allocation7 + $0x180] sm:$0xff]  ;;  %8122 = vmatprep.subr.bf16.mxu1 %v8121_v13 }
0x3983   :  { %v8826_v14 = vpop.eup %8825 }
0x3984   :  { %v10077_v44 = vmul.f32 %v8826_v14, %v8824_v24  ;;  %v4681_v24 = vld [vmem:[#allocation7 + $0x190] sm:$0xff]  ;;  %v4667_v14 = vld [vmem:[#allocation4 + $0x1a8] sm:$0xff] }
0x3986   :  { %v4429_v23 = vrot.slane %v10077_v44, 2 }
0x3988   :  { %4430 = vrot.lane.b32.xlu1 %v4429_v23, %s9161_s25  ;;  %v8123_v23 = vpack.c.bf16 %v4681_v24, %v4679_v43  ;;  %v4702_v24 = vld [vmem:[#allocation9 + $0x220] sm:$0xff] }
0x39fa   :  { %v4431_v36 = vpop.permute.xlu1 %4430 }
0x39fb   :  { %7369 = vmatmul.mubr.msk.f32.vlgmr.msra.gmra.mrb[46].mxu0 %vm275_vm3, %v4431_v36  ;;  %v4669_v36 = vld [vmem:[#allocation4 + $0x1b8] sm:$0xff] }
0x39fc   :  { %4795 = vmatprep.mubr.f32.mxu0 %v9160_v0 }
0x3ace   :  { %v4500_v52 = vpop.f32.mrb[46].mxu0 }
0x3acf   :  { %v4507_v47 = vrot.slane %v4500_v52, 4  ;;  %v4502_v51 = vpop.f32.mrb[47].mxu0  ;;  %v4666_v52 = vld [vmem:[#allocation4 + $0x1a0] sm:$0xff] }
0x3ad0   :  { %v4508_v53 = vrot.slane %v4502_v51, 4  ;;  %v8109_v51 = vpack.c.bf16 %v4669_v36, %v4667_v14  ;;  %v4704_v14 = vld [vmem:[#allocation9 + $0x230] sm:$0xff]  ;;  %v4707_v36 = vld [vmem:[#allocation9 + $0x248] sm:$0xff] }
0x3ad1   :  { %v4511_v4 = vadd.f32 %v4507_v47, %v9981_v32  ;;  %v4668_v47 = vld [vmem:[#allocation4 + $0x1b0] sm:$0xff] }
0x3ad2   :  { %v4512_v5 = vadd.f32 %v4508_v53, %v9989_v55  ;;  %v4686_v53 = vld [vmem:[#allocation7 + $0x1b8] sm:$0xff] }
0x3ad3   :  { %v7370_v56 = vmul.f32 -1.442695, %v4511_v4  ;;  %v8111_v4 = vpack.c.bf16 %v4668_v47, %v4666_v52  ;;  %v4709_v52 = vld [vmem:[#allocation9 + $0x258] sm:$0xff]  ;;  %v10132_v47 = vpack.c.bf16 %v4704_v14, %v4702_v24 }
0x3ad4   :  { %v7371_v17 = vmul.f32 -1.442695, %v4512_v5 }
0x3ad5   :  { %8827 = vpow2.f32 %v7370_v56  ;;  %v4684_v56 = vld [vmem:[#allocation7 + $0x1a8] sm:$0xff] }
0x3ad6   :  { %8829 = vtanh.f32 %v4512_v5  ;;  %v4683_v5 = vld [vmem:[#allocation7 + $0x1a0] sm:$0xff] }
0x3adf   :  { %v8828_v6 = vpop.eup %8827 }
0x3ae0   :  { %v4516_v50 = vadd.f32 1.0, %v8828_v6  ;;  %v8830_v8 = vpop.eup %8829  ;;  %v8125_v6 = vpack.c.bf16 %v4686_v53, %v4684_v56  ;;  %v4708_v56 = vld [vmem:[#allocation9 + $0x250] sm:$0xff] }
0x3ae2   :  { %8831 = vrcp.f32 %v4516_v50  ;;  %v4671_v50 = vld [vmem:[#allocation4 + $0x1c8] sm:$0xff] }
0x3ae3   :  { %8833 = vpow2.f32 %v7371_v17 }
0x3aec   :  { %v8832_v9 = vpop.eup %8831 }
0x3aed   :  { %v4530_v12 = vmul.f32 %v8832_v9, %v8830_v8  ;;  %v4529_v22 = vmul.f32 %v8832_v9, %v4527_v45  ;;  %v8834_v25 = vpop.eup %8833  ;;  %v4673_v8 = vld [vmem:[#allocation4 + $0x1d8] sm:$0xff] }
0x3aee   :  { %v4523_v32 = vadd.f32 1.0, %v8834_v25  ;;  %v8113_v9 = vpack.c.bf16 %v4673_v8, %v4671_v50  ;;  %v4710_v8 = vld [vmem:[#allocation9 + $0x260] sm:$0xff] }
0x3aef   :  { %4532 = vrot.lane.b32.xlu0 %v4530_v12, %s9161_s25 }
0x3af0   :  { %8835 = vrcp.f32 %v4523_v32  ;;  %v4670_v32 = vld [vmem:[#allocation4 + $0x1c0] sm:$0xff] }
0x3afa   :  { %v8836_v55 = vpop.eup %8835 }
0x3b61   :  { %v4533_v54 = vpop.permute.xlu0 %4532 }
0x3b62   :  { %v4535_v11 = vadd.f32 %v4533_v54, %v4529_v22  ;;  %v4672_v54 = vld [vmem:[#allocation4 + $0x1d0] sm:$0xff] }
0x3b64   :  { %8837 = vtanh.f32 %v4535_v11  ;;  %v4642_v15 = vrot.slane %v4535_v11, 6  ;;  %v4688_v11 = vld [vmem:[#allocation7 + $0x1c8] sm:$0xff] }
0x3b6e   :  { %v8838_v46 = vpop.eup %8837 }
0x3b6f   :  { %v4537_v37 = vmul.f32 %v8838_v46, %v8836_v55  ;;  %v8115_v46 = vpack.c.bf16 %v4672_v54, %v4670_v32 }
0x3b71   :  { %v4544_v7 = vrot.slane %v4537_v37, 4 }
0x3b73   :  { %4545 = vrot.lane.b32.xlu1 %v4544_v7, %s9161_s25  ;;  %v4687_v7 = vld [vmem:[#allocation7 + $0x1c0] sm:$0xff] }
0x3b77   :  { %3959 = vrot.lane.b32.xlu1 %v10011_v10, %s9161_s25 }
0x3b7b   :  { %4189 = vrot.lane.b32.xlu1 %v10045_v29, %s9161_s25 }
0x3b7f   :  { %4539 = vrot.lane.b32.xlu1 %v4537_v37, %s9161_s25  ;;  %v4690_v37 = vld [vmem:[#allocation7 + $0x1d8] sm:$0xff] }
0x3b83   :  { %4886 = vrot.lane.b32.xlu1 %v4885_v60, %s9161_s25  ;;  %v8129_v60 = vpack.c.bf16 %v4690_v37, %v4688_v11 }
0x3be5   :  { %v4546_v34 = vpop.permute.xlu1 %4545 }
0x3be6   :  { %7372 = vmatmul.mubr.msk.f32.vlgmr.msra.gmra.mrb[46].mxu1 %vm275_vm3, %v4546_v34 }
0x3be7   :  { %4872 = vmatprep.mubr.f32.mxu1 %v9160_v0  ;;  %8124 = vmatpush1.bf16.msra.mxu1 %v8123_v23 }
0x3be8   :  { %8126 = vmatprep.subr.bf16.mxu1 %v8125_v6  ;;  %v4713_v6 = vld [vmem:[#allocation9 + $0x278] sm:$0xff] }
0x3be9   :  { %v3960_v58 = vpop.permute.xlu1 %3959 }
0x3bea   :  { %3962 = vst.msk [vmem:[#allocation3] sm:$0xc] %vm506_vm4, %v3960_v58 }
0x3beb   :  { %3963 = vst.msk [vmem:[#allocation3 + $0xa] sm:$0xc] %vm508_vm5, %v3960_v58  ;;  %v4675_v58 = vld [vmem:[#allocation4 + $0x1e8] sm:$0xff] }
0x3bed   :  { %v4190_v10 = vpop.permute.xlu1 %4189 }
0x3bee   :  { %4192 = vst.msk [vmem:[#allocation3] sm:$0xc0] %vm740_vm6, %v4190_v10 }
0x3bef   :  { %4193 = vst.msk [vmem:[#allocation3 + $0x2] sm:$0xc0] %vm742_vm7, %v4190_v10  ;;  %v4677_v10 = vld [vmem:[#allocation4 + $0x1f8] sm:$0xff] }
0x3bf0   :  { %4309 = vst.msk [vmem:[#allocation3 + $0x8] sm:$0x3] %vm386_vm1, %v10062_v28 }
0x3bf1   :  { %4310 = vst.msk [vmem:[#allocation3 + $0x6] sm:$0x3] %vm388_vm2, %v10062_v28  ;;  %v4540_v48 = vpop.permute.xlu1 %4539 }
0x3bf2   :  { %4542 = vst.msk [vmem:[#allocation3 + $0x8] sm:$0x30] %vm623_vm8, %v4540_v48 }
0x3bf3   :  { %4543 = vst.msk [vmem:[#allocation3 - $0x2] sm:$0x30] %vm625_vm9, %v4540_v48  ;;  %v4674_v48 = vld [vmem:[#allocation4 + $0x1e0] sm:$0xff] }
0x3cb9   :  { %v4615_v29 = vpop.f32.mrb[46].mxu1 }
0x3cba   :  { %v4622_v21 = vrot.slane %v4615_v29, 2  ;;  %v4617_v61 = vpop.f32.mrb[47].mxu1 }
0x3cbb   :  { %v4623_v38 = vrot.slane %v4617_v61, 2  ;;  %v4676_v61 = vld [vmem:[#allocation4 + $0x1f0] sm:$0xff] }
0x3cbc   :  { %v4626_v27 = vadd.f32 %v4622_v21, %v9975_v63  ;;  %v8105_v63 = vpack.c.bf16 %v4665_v2, %v4663_v57  ;;  %v8117_v21 = vpack.c.bf16 %v4677_v10, %v4675_v58 }
0x3cbd   :  { %v4627_v18 = vadd.f32 %v4623_v38, %v9983_v62  ;;  %v8107_v62 = vpack.c.bf16 %v4664_v16, %v4662_v30  ;;  %v8119_v38 = vpack.c.bf16 %v4676_v61, %v4674_v48  ;;  %v4698_v16 = vld [vmem:[#allocation9 + $0x200] sm:$0xff] }
0x3cbe   :  { %v7373_v26 = vmul.f32 -1.442695, %v4626_v27  ;;  %8106 = vmatprep.subr.bf16.mxu0 %v8105_v63  ;;  %v4692_v27 = vld [vmem:[#allocation7 + $0x1e8] sm:$0xff]  ;;  %v10124_v13 = vpack.c.bf16 %v4700_v40, %v4698_v16 }
0x3cbf   :  { %8108 = vmatpush1.bf16.msra.mxu0 %v8107_v62  ;;  %v7374_v12 = vmul.f32 -1.442695, %v4627_v18  ;;  %v4705_v62 = vld [vmem:[#allocation9 + $0x238] sm:$0xff] }
0x3cc0   :  { %8839 = vpow2.f32 %v7373_v26  ;;  %8110 = vmatprep.subr.bf16.mxu0 %v8109_v51  ;;  %v4694_v26 = vld [vmem:[#allocation7 + $0x1f8] sm:$0xff]  ;;  %v10126_v43 = vpack.c.bf16 %v4705_v62, %v4703_v31  ;;  %v10136_v51 = vpack.c.bf16 %v4709_v52, %v4707_v36 }
0x3cc1   :  { %8841 = vtanh.f32 %v4627_v18  ;;  %v8133_v18 = vpack.c.bf16 %v4694_v26, %v4692_v27 }
0x3cc3   :  { %8112 = vmatpush1.bf16.msra.mxu0 %v8111_v4  ;;  %v4706_v4 = vld [vmem:[#allocation9 + $0x240] sm:$0xff] }
0x3cc4   :  { %8114 = vmatprep.subr.bf16.mxu0 %v8113_v9 }
0x3cc7   :  { %8116 = vmatpush1.bf16.msra.mxu0 %v8115_v46 }
0x3cc8   :  { %8118 = vmatprep.subr.bf16.mxu0 %v8117_v21 }
0x3cca   :  { %v8840_v42 = vpop.eup %8839 }
0x3ccb   :  { %v4631_v49 = vadd.f32 1.0, %v8840_v42  ;;  %v8842_v28 = vpop.eup %8841  ;;  %v4691_v42 = vld [vmem:[#allocation7 + $0x1e0] sm:$0xff]  ;;  %8120 = vmatpush1.bf16.msra.mxu0 %v8119_v38 }
0x3ccd   :  { %8843 = vrcp.f32 %v4631_v49  ;;  %v4693_v49 = vld [vmem:[#allocation7 + $0x1f0] sm:$0xff] }
0x3cce   :  { %8845 = vpow2.f32 %v7374_v12  ;;  %v4887_v12 = vpop.permute.xlu1 %4886 }
0x3cd7   :  { %v8844_v3 = vpop.eup %8843 }
0x3cd8   :  { %v4645_v19 = vmul.f32 %v8844_v3, %v8842_v28  ;;  %v4644_v1 = vmul.f32 %v8844_v3, %v4642_v15  ;;  %v8846_v22 = vpop.eup %8845  ;;  %v4699_v28 = vld [vmem:[#allocation9 + $0x208] sm:$0xff]  ;;  %v8135_v15 = vpack.c.bf16 %v4693_v49, %v4691_v42  ;;  %v4701_v3 = vld [vmem:[#allocation9 + $0x218] sm:$0xff] }
0x3cd9   :  { %v4638_v17 = vadd.f32 1.0, %v8846_v22  ;;  %v7375_v22 = vld [vmem:[%s10626_s5 + $0x8] sm:$0x3] }
0x3cda   :  { %4647 = vrot.lane.b32.xlu0 %v4645_v19, %s9161_s25  ;;  %v10115_v19 = vpack.c.bf16 %v4701_v3, %v4699_v28  ;;  %v4722_v54 = vrot.slane %v7375_v22, %v9354_v35 }
0x3cdb   :  { %8847 = vrcp.f32 %v4638_v17  ;;  %v4718_v17 = vrot.slane %v7375_v22, %v9349_v33 }
0x3cdc   :  { %8138 = vmatprep.subr.bf16.mxu0 %v10115_v19 }
0x3cde   :  { %4074 = vrot.lane.b32.xlu0 %v10028_v20, %s9161_s25  ;;  %v4685_v20 = vld [vmem:[#allocation7 + $0x1b0] sm:$0xff] }
0x3cdf   :  { %v8127_v45 = vpack.c.bf16 %v4685_v20, %v4683_v5  ;;  %v4711_v5 = vld [vmem:[#allocation9 + $0x268] sm:$0xff]  ;;  %v10142_v20 = vpack.c.bf16 %v4708_v56, %v4706_v4 }
0x3ce0   :  { %v10146_v50 = vpack.c.bf16 %v4713_v6, %v4711_v5 }
0x3ce1   :  { %8128 = vmatpush1.bf16.msra.mxu1 %v8127_v45  ;;  %v4712_v45 = vld [vmem:[#allocation9 + $0x270] sm:$0xff] }
0x3ce2   :  { %4424 = vrot.lane.b32.xlu0 %v10077_v44, %s9161_s25  ;;  %v4689_v44 = vld [vmem:[#allocation7 + $0x1d0] sm:$0xff]  ;;  %8130 = vmatprep.subr.bf16.mxu1 %v8129_v60  ;;  %v10153_v9 = vpack.c.bf16 %v4712_v45, %v4710_v8 }
0x3ce3   :  { %v8131_v34 = vpack.c.bf16 %v4689_v44, %v4687_v7 }
0x3ce5   :  { %8132 = vmatpush1.bf16.msra.mxu1 %v8131_v34  ;;  %v8848_v57 = vpop.eup %8847 }
0x3ce6   :  { %8134 = vmatprep.subr.bf16.mxu1 %v8133_v18 }
0x3ce9   :  { %8136 = vmatpush1.bf16.msra.mxu1 %v8135_v15 }
0x3cea   :  { %8154 = vmatprep.subr.bf16.mxu1 %v10115_v19 }
0x3d4c   :  { %v4648_v25 = vpop.permute.xlu0 %4647 }
0x3d4d   :  { %v4650_v55 = vadd.f32 %v4648_v25, %v4644_v1 }
0x3d4f   :  { %8849 = vtanh.f32 %v4650_v55 }
0x3d50   :  { %v4075_v29 = vpop.permute.xlu0 %4074 }
0x3d51   :  { %4077 = vst.msk [vmem:[#allocation3] sm:$0x30] %vm623_vm8, %v4075_v29 }
0x3d52   :  { %4078 = vst.msk [vmem:[#allocation3 + $0x6] sm:$0x30] %vm625_vm9, %v4075_v29 }
0x3d54   :  { %v4425_v1 = vpop.permute.xlu0 %4424 }
0x3d55   :  { %4427 = vst.msk [vmem:[#allocation3 + $0x8] sm:$0xc] %vm506_vm4, %v4425_v1 }
0x3d56   :  { %4428 = vst.msk [vmem:[#allocation3 + $0x2] sm:$0xc] %vm508_vm5, %v4425_v1 }
0x3d59   :  { %v8850_v2 = vpop.eup %8849 }
0x3d5a   :  { %v4652_v30 = vmul.f32 %v8850_v2, %v8848_v57 }
0x3d5c   :  { %4654 = vrot.lane.b32.xlu0 %v4652_v30, %s9161_s25 }
0x3dce   :  { %v4655_v63 = vpop.permute.xlu0 %4654 }
0x3dcf   :  { %4657 = vst.msk [vmem:[#allocation3 + $0x8] sm:$0xc0] %vm740_vm6, %v4655_v63 }
0x3dd0   :  { %4658 = vst.msk [vmem:[#allocation3 - $0x6] sm:$0xc0] %vm742_vm7, %v4655_v63 }
0x3dd6   :  { %v4660_v53 = vld [vmem:[#allocation3 + $0x8] sm:$0xff] }
0x3dd7   :  { %v4659_v23 = vld [vmem:[#allocation3] sm:$0xff] }
0x3dd8   :  { %7376 = vmatmul.mubr.msk.f32.vlgmr.msra.gmra.mrb[48].mxu0 %vm275_vm3, %v4659_v23  ;;  %7378 = vmatmul.mubr.msk.f32.vlgmr.msra.gmra.mrb[48].mxu1 %vm275_vm3, %v4659_v23  ;;  %v4985_v23 = vrot.slane %v9698_v39, 6 }
0x3dd9   :  { %8140 = vmatpush1.bf16.msra.mxu0 %v10124_v13  ;;  %4801 = vmatprep.mubr.f32.mxu0 %v9160_v0 }
0x3dda   :  { %4878 = vmatprep.mubr.f32.mxu1 %v9160_v0  ;;  %8142 = vmatprep.subr.bf16.mxu0 %v10126_v43 }
0x3ddb   :  { %8156 = vmatpush1.bf16.msra.mxu1 %v10124_v13 }
0x3ddc   :  { %7377 = vmatmul.mubr.msk.f32.gmra.mrb[50].mxu0 %vm275_vm3, %v4660_v53  ;;  %7379 = vmatmul.mubr.msk.f32.gmra.mrb[50].mxu1 %vm275_vm3, %v4660_v53 }
0x3ddd   :  { %8144 = vmatpush1.bf16.msra.mxu0 %v10132_v47  ;;  %4954 = vmatprep.mubr.f32.mxu0 %v9160_v0 }
0x3dde   :  { %8146 = vmatprep.subr.bf16.mxu0 %v10136_v51  ;;  %8158 = vmatprep.subr.bf16.mxu1 %v10126_v43 }
0x3ddf   :  { %8160 = vmatpush1.bf16.msra.mxu1 %v10132_v47  ;;  %5068 = vmatprep.mubr.f32.mxu1 %v9160_v0 }
0x3de0   :  { %8162 = vmatprep.subr.bf16.mxu1 %v10136_v51 }
0x3de1   :  { %8148 = vmatpush1.bf16.msra.mxu0 %v10142_v20 }
0x3de2   :  { %8150 = vmatprep.subr.bf16.mxu0 %v10146_v50 }
0x3de3   :  { %8164 = vmatpush1.bf16.msra.mxu1 %v10142_v20 }
0x3de4   :  { %8166 = vmatprep.subr.bf16.mxu1 %v10146_v50 }
0x3de5   :  { %8152 = vmatpush1.bf16.msra.mxu0 %v10153_v9 }
0x3de6   :  { %8170 = vmatprep.subr.bf16.mxu0 %v10115_v19 }
0x3de7   :  { %8168 = vmatpush1.bf16.msra.mxu1 %v10153_v9 }
0x3de8   :  { %7380 = vmatmul.mubr.msk.f32.vlgmr.msra.gmra.mrb[52].mxu0 %vm275_vm3, %v4887_v12  ;;  %8186 = vmatprep.subr.bf16.mxu1 %v10115_v19 }
0x3de9   :  { %8172 = vmatpush1.bf16.msra.mxu0 %v10124_v13  ;;  %5189 = vmatprep.mubr.f32.mxu0 %v9160_v0 }
0x3dea   :  { %8174 = vmatprep.subr.bf16.mxu0 %v10126_v43 }
0x3ded   :  { %8176 = vmatpush1.bf16.msra.mxu0 %v10132_v47 }
0x3dee   :  { %8178 = vmatprep.subr.bf16.mxu0 %v10136_v51 }
0x3df1   :  { %8180 = vmatpush1.bf16.msra.mxu0 %v10142_v20 }
0x3df2   :  { %8182 = vmatprep.subr.bf16.mxu0 %v10146_v50 }
0x3df5   :  { %8184 = vmatpush1.bf16.msra.mxu0 %v10153_v9 }
0x3df6   :  { %8202 = vmatprep.subr.bf16.mxu0 %v10115_v19 }
0x3eab   :  { %v4797_v25 = vpop.f32.mrb[48].mxu0  ;;  %v4874_v32 = vpop.f32.mrb[48].mxu1 }
0x3eac   :  { %v4799_v11 = vpop.f32.mrb[49].mxu0  ;;  %v4876_v55 = vpop.f32.mrb[49].mxu1  ;;  %v4798_v46 = vadd.f32 %v4797_v25, %v4718_v17  ;;  %v5428_v37 = vrot.slane %v4874_v32, 6  ;;  %v5540_v7 = vrot.slane %v4874_v32, 2 }
0x3ead   :  { %v4800_v44 = vadd.f32 %v4799_v11, %v4722_v54  ;;  %v5429_v58 = vrot.slane %v4876_v55, 6  ;;  %v5541_v27 = vrot.slane %v4876_v55, 2 }
0x3eaf   :  { %v4803_v60 = vpop.f32.mrb[50].mxu0  ;;  %v4880_v34 = vpop.f32.mrb[50].mxu1 }
0x3eb0   :  { %v4804_v10 = vadd.f32 %v4803_v60, %v4718_v17  ;;  %v4963_v48 = vrot.slane %v4880_v34, 6  ;;  %v5075_v29 = vrot.slane %v4880_v34, 2  ;;  %v4805_v21 = vpop.f32.mrb[51].mxu0  ;;  %v4882_v61 = vpop.f32.mrb[51].mxu1 }
0x3eb1   :  { %v4806_v26 = vadd.f32 %v4805_v21, %v4722_v54  ;;  %v4964_v38 = vrot.slane %v4882_v61, 6  ;;  %v5076_v18 = vrot.slane %v4882_v61, 2 }
0x3eb2   :  { %v10177_v42 = vadd.f32 %v5540_v7, %v4804_v10  ;;  %v10179_v49 = vadd.f32 %v5075_v29, %v4798_v46  ;;  %v10181_v28 = vadd.f32 %v4963_v48, %v4798_v46  ;;  %v10183_v15 = vadd.f32 %v5428_v37, %v4804_v10 }
0x3eb3   :  { %v10185_v3 = vadd.f32 %v5541_v27, %v4806_v26  ;;  %v10187_v1 = vadd.f32 %v5076_v18, %v4800_v44  ;;  %v10189_v57 = vadd.f32 %v4964_v38, %v4800_v44  ;;  %v10191_v2 = vadd.f32 %v5429_v58, %v4806_v26 }
0x3ebb   :  { %v4956_v30 = vpop.f32.mrb[52].mxu0 }
0x3ebc   :  { %v4969_v63 = vadd.f32 %v10181_v28, %v4956_v30  ;;  %v4958_v16 = vpop.f32.mrb[53].mxu0 }
0x3ebd   :  { %v4970_v31 = vadd.f32 %v10189_v57, %v4958_v16 }
0x3ebe   :  { %v7381_v40 = vmul.f32 -1.442695, %v4969_v63 }
0x3ebf   :  { %v7382_v56 = vmul.f32 -1.442695, %v4970_v31 }
0x3ec0   :  { %8851 = vpow2.f32 %v7381_v40 }
0x3ec1   :  { %8853 = vtanh.f32 %v4970_v31 }
0x3eca   :  { %v8852_v62 = vpop.eup %8851 }
0x3ecb   :  { %v4974_v24 = vadd.f32 1.0, %v8852_v62  ;;  %v8854_v14 = vpop.eup %8853 }
0x3ecd   :  { %8855 = vrcp.f32 %v4974_v24 }
0x3ece   :  { %8857 = vpow2.f32 %v7382_v56 }
0x3ed7   :  { %v8856_v36 = vpop.eup %8855 }
0x3ed8   :  { %v4988_v52 = vmul.f32 %v8856_v36, %v8854_v14  ;;  %v4987_v4 = vmul.f32 %v8856_v36, %v4985_v23  ;;  %v8858_v53 = vpop.eup %8857 }
0x3ed9   :  { %v4981_v5 = vadd.f32 1.0, %v8858_v53 }
0x3eda   :  { %4990 = vrot.lane.b32.xlu0 %v4988_v52, %s9161_s25 }
0x3edb   :  { %8859 = vrcp.f32 %v4981_v5 }
0x3ee5   :  { %v8860_v45 = vpop.eup %8859 }
0x3f4c   :  { %v4991_v6 = vpop.permute.xlu0 %4990 }
0x3f4d   :  { %v4993_v8 = vadd.f32 %v4991_v6, %v4987_v4 }
0x3f4f   :  { %8861 = vtanh.f32 %v4993_v8  ;;  %v5103_v60 = vrot.slane %v4993_v8, 6 }
0x3f59   :  { %v8862_v12 = vpop.eup %8861 }
0x3f5a   :  { %v4995_v22 = vmul.f32 %v8862_v12, %v8860_v45 }
0x3f5c   :  { %4997 = vrot.lane.b32.xlu1 %v4995_v22, %s9161_s25 }
0x3fce   :  { %v4998_v17 = vpop.permute.xlu1 %4997 }
0x3fcf   :  { %5000 = vst.msk [vmem:[#allocation2] sm:$0x3] %vm386_vm1, %v4998_v17  ;;  %7383 = vmatmul.mubr.msk.f32.vlgmr.msra.gmra.mrb[52].mxu1 %vm275_vm3, %v4998_v17 }
0x3fd0   :  { %5001 = vst.msk [vmem:[#allocation2 + $0xe] sm:$0x3] %vm388_vm2, %v4998_v17  ;;  %8188 = vmatpush1.bf16.msra.mxu1 %v10124_v13  ;;  %5304 = vmatprep.mubr.f32.mxu1 %v9160_v0 }
0x3fd1   :  { %8190 = vmatprep.subr.bf16.mxu1 %v10126_v43 }
0x3fd4   :  { %8192 = vmatpush1.bf16.msra.mxu1 %v10132_v47 }
0x3fd5   :  { %8194 = vmatprep.subr.bf16.mxu1 %v10136_v51 }
0x3fd8   :  { %8196 = vmatpush1.bf16.msra.mxu1 %v10142_v20 }
0x3fd9   :  { %8198 = vmatprep.subr.bf16.mxu1 %v10146_v50 }
0x3fdc   :  { %8200 = vmatpush1.bf16.msra.mxu1 %v10153_v9 }
0x3fdd   :  { %8218 = vmatprep.subr.bf16.mxu1 %v10115_v19 }
0x40a2   :  { %v5070_v39 = vpop.f32.mrb[52].mxu1 }
0x40a3   :  { %v5083_v25 = vrot.slane %v5070_v39, 6  ;;  %v5072_v32 = vpop.f32.mrb[53].mxu1 }
0x40a4   :  { %v5084_v55 = vrot.slane %v5072_v32, 6 }
0x40a5   :  { %v5087_v54 = vadd.f32 %v5083_v25, %v10179_v49 }
0x40a6   :  { %v5088_v46 = vadd.f32 %v5084_v55, %v10187_v1 }
0x40a7   :  { %v7384_v11 = vmul.f32 -1.442695, %v5087_v54 }
0x40a8   :  { %v7385_v48 = vmul.f32 -1.442695, %v5088_v46 }
0x40a9   :  { %8863 = vpow2.f32 %v7384_v11 }
0x40aa   :  { %8865 = vtanh.f32 %v5088_v46 }
0x40b3   :  { %v8864_v37 = vpop.eup %8863 }
0x40b4   :  { %v5092_v7 = vadd.f32 1.0, %v8864_v37  ;;  %v8866_v44 = vpop.eup %8865 }
0x40b6   :  { %8867 = vrcp.f32 %v5092_v7 }
0x40b7   :  { %8869 = vpow2.f32 %v7385_v48 }
0x40c0   :  { %v8868_v34 = vpop.eup %8867 }
0x40c1   :  { %v5106_v58 = vmul.f32 %v8868_v34, %v8866_v44  ;;  %v5105_v10 = vmul.f32 %v8868_v34, %v5103_v60  ;;  %v8870_v29 = vpop.eup %8869 }
0x40c2   :  { %v5099_v21 = vadd.f32 1.0, %v8870_v29 }
0x40c3   :  { %5108 = vrot.lane.b32.xlu0 %v5106_v58, %s9161_s25 }
0x40c4   :  { %8871 = vrcp.f32 %v5099_v21 }
0x40ce   :  { %v8872_v26 = vpop.eup %8871 }
0x4135   :  { %v5109_v61 = vpop.permute.xlu0 %5108 }
0x4136   :  { %v5111_v27 = vadd.f32 %v5109_v61, %v5105_v10 }
0x4138   :  { %8873 = vtanh.f32 %v5111_v27  ;;  %v5218_v56 = vrot.slane %v5111_v27, 6 }
0x4142   :  { %v8874_v38 = vpop.eup %8873 }
0x4143   :  { %v10213_v18 = vmul.f32 %v8874_v38, %v8872_v26 }
0x4145   :  { %v5120_v30 = vrot.slane %v10213_v18, 2 }
0x4147   :  { %5121 = vrot.lane.b32.xlu1 %v5120_v30, %s9161_s25 }
0x41b9   :  { %v5122_v63 = vpop.permute.xlu1 %5121 }
0x41ba   :  { %7386 = vmatmul.mubr.msk.f32.vlgmr.msra.gmra.mrb[54].mxu0 %vm275_vm3, %v5122_v63 }
0x41bb   :  { %8204 = vmatpush1.bf16.msra.mxu0 %v10124_v13  ;;  %5419 = vmatprep.mubr.f32.mxu0 %v9160_v0 }
0x41bc   :  { %8206 = vmatprep.subr.bf16.mxu0 %v10126_v43 }
0x41bf   :  { %8208 = vmatpush1.bf16.msra.mxu0 %v10132_v47 }
0x41c0   :  { %8210 = vmatprep.subr.bf16.mxu0 %v10136_v51 }
0x41c3   :  { %8212 = vmatpush1.bf16.msra.mxu0 %v10142_v20 }
0x41c4   :  { %8214 = vmatprep.subr.bf16.mxu0 %v10146_v50 }
0x41c7   :  { %8216 = vmatpush1.bf16.msra.mxu0 %v10153_v9 }
0x41c8   :  { %8234 = vmatprep.subr.bf16.mxu0 %v10115_v19 }
0x428d   :  { %v5191_v16 = vpop.f32.mrb[54].mxu0 }
0x428e   :  { %v5198_v40 = vrot.slane %v5191_v16, 4  ;;  %v5193_v31 = vpop.f32.mrb[55].mxu0 }
0x428f   :  { %v5199_v14 = vrot.slane %v5193_v31, 4 }
0x4290   :  { %v5202_v62 = vadd.f32 %v5198_v40, %v10181_v28 }
0x4291   :  { %v5203_v23 = vadd.f32 %v5199_v14, %v10189_v57 }
0x4292   :  { %v7387_v24 = vmul.f32 -1.442695, %v5202_v62 }
0x4293   :  { %v7388_v8 = vmul.f32 -1.442695, %v5203_v23 }
0x4294   :  { %8875 = vpow2.f32 %v7387_v24 }
0x4295   :  { %8877 = vtanh.f32 %v5203_v23 }
0x429e   :  { %v8876_v36 = vpop.eup %8875 }
0x429f   :  { %v5207_v52 = vadd.f32 1.0, %v8876_v36  ;;  %v8878_v4 = vpop.eup %8877 }
0x42a1   :  { %8879 = vrcp.f32 %v5207_v52 }
0x42a2   :  { %8881 = vpow2.f32 %v7388_v8 }
0x42ab   :  { %v8880_v53 = vpop.eup %8879 }
0x42ac   :  { %v5221_v5 = vmul.f32 %v8880_v53, %v8878_v4  ;;  %v5220_v6 = vmul.f32 %v8880_v53, %v5218_v56  ;;  %v8882_v45 = vpop.eup %8881 }
0x42ad   :  { %v5214_v28 = vadd.f32 1.0, %v8882_v45 }
0x42ae   :  { %5223 = vrot.lane.b32.xlu0 %v5221_v5, %s9161_s25 }
0x42af   :  { %8883 = vrcp.f32 %v5214_v28 }
0x42b9   :  { %v8884_v57 = vpop.eup %8883 }
0x4320   :  { %v5224_v12 = vpop.permute.xlu0 %5223 }
0x4321   :  { %v5226_v22 = vadd.f32 %v5224_v12, %v5220_v6 }
0x4323   :  { %8885 = vtanh.f32 %v5226_v22  ;;  %v5333_v10 = vrot.slane %v5226_v22, 6 }
0x432d   :  { %v8886_v17 = vpop.eup %8885 }
0x432e   :  { %v10230_v39 = vmul.f32 %v8886_v17, %v8884_v57 }
0x4330   :  { %v5235_v25 = vrot.slane %v10230_v39, 4 }
0x4332   :  { %5236 = vrot.lane.b32.xlu1 %v5235_v25, %s9161_s25 }
0x43a4   :  { %v5237_v32 = vpop.permute.xlu1 %5236 }
0x43a5   :  { %7389 = vmatmul.mubr.msk.f32.vlgmr.msra.gmra.mrb[54].mxu1 %vm275_vm3, %v5237_v32 }
0x43a6   :  { %8220 = vmatpush1.bf16.msra.mxu1 %v10124_v13  ;;  %5533 = vmatprep.mubr.f32.mxu1 %v9160_v0 }
0x43a7   :  { %8222 = vmatprep.subr.bf16.mxu1 %v10126_v43 }
0x43aa   :  { %8224 = vmatpush1.bf16.msra.mxu1 %v10132_v47 }
0x43ab   :  { %8226 = vmatprep.subr.bf16.mxu1 %v10136_v51 }
0x43ae   :  { %8228 = vmatpush1.bf16.msra.mxu1 %v10142_v20 }
0x43af   :  { %8230 = vmatprep.subr.bf16.mxu1 %v10146_v50 }
0x43b2   :  { %8232 = vmatpush1.bf16.msra.mxu1 %v10153_v9 }
0x43b3   :  { %8250 = vmatprep.subr.bf16.mxu1 %v10115_v19 }
0x4478   :  { %v5306_v54 = vpop.f32.mrb[54].mxu1 }
0x4479   :  { %v5313_v11 = vrot.slane %v5306_v54, 2  ;;  %v5308_v55 = vpop.f32.mrb[55].mxu1 }
0x447a   :  { %v5314_v7 = vrot.slane %v5308_v55, 2 }
0x447b   :  { %v5317_v46 = vadd.f32 %v5313_v11, %v10179_v49 }
0x447c   :  { %v5318_v44 = vadd.f32 %v5314_v7, %v10187_v1 }
0x447d   :  { %v7390_v37 = vmul.f32 -1.442695, %v5317_v46 }
0x447e   :  { %v7391_v19 = vmul.f32 -1.442695, %v5318_v44 }
0x447f   :  { %8887 = vpow2.f32 %v7390_v37 }
0x4480   :  { %8889 = vtanh.f32 %v5318_v44 }
0x4489   :  { %v8888_v60 = vpop.eup %8887 }
0x448a   :  { %v5322_v34 = vadd.f32 1.0, %v8888_v60  ;;  %v8890_v58 = vpop.eup %8889 }
0x448c   :  { %8891 = vrcp.f32 %v5322_v34 }
0x448d   :  { %8893 = vpow2.f32 %v7391_v19 }
0x4496   :  { %v8892_v48 = vpop.eup %8891 }
0x4497   :  { %v5336_v29 = vmul.f32 %v8892_v48, %v8890_v58  ;;  %v5335_v21 = vmul.f32 %v8892_v48, %v5333_v10  ;;  %v8894_v61 = vpop.eup %8893 }
0x4498   :  { %v5329_v49 = vadd.f32 1.0, %v8894_v61 }
0x4499   :  { %5338 = vrot.lane.b32.xlu0 %v5336_v29, %s9161_s25 }
0x449a   :  { %8895 = vrcp.f32 %v5329_v49 }
0x44a4   :  { %v8896_v1 = vpop.eup %8895 }
0x450b   :  { %v5339_v27 = vpop.permute.xlu0 %5338 }
0x450c   :  { %v5341_v26 = vadd.f32 %v5339_v27, %v5335_v21 }
0x450e   :  { %8897 = vtanh.f32 %v5341_v26  ;;  %v5450_v4 = vrot.slane %v5341_v26, 6 }
0x4518   :  { %v8898_v38 = vpop.eup %8897 }
0x4519   :  { %v10247_v30 = vmul.f32 %v8898_v38, %v8896_v1 }
0x451b   :  { %v5350_v63 = vrot.slane %v10247_v30, 6 }
0x451d   :  { %5351 = vrot.lane.b32.xlu1 %v5350_v63, %s9161_s25 }
0x458f   :  { %v5352_v16 = vpop.permute.xlu1 %5351 }
0x4590   :  { %7392 = vmatmul.mubr.msk.f32.vlgmr.msra.gmra.mrb[56].mxu0 %vm275_vm3, %v5352_v16 }
0x4591   :  { %8236 = vmatpush1.bf16.msra.mxu0 %v10124_v13  ;;  %5654 = vmatprep.mubr.f32.mxu0 %v9160_v0 }
0x4592   :  { %8238 = vmatprep.subr.bf16.mxu0 %v10126_v43 }
0x4595   :  { %8240 = vmatpush1.bf16.msra.mxu0 %v10132_v47 }
0x4596   :  { %8242 = vmatprep.subr.bf16.mxu0 %v10136_v51 }
0x4599   :  { %8244 = vmatpush1.bf16.msra.mxu0 %v10142_v20 }
0x459a   :  { %8246 = vmatprep.subr.bf16.mxu0 %v10146_v50 }
0x459d   :  { %8248 = vmatpush1.bf16.msra.mxu0 %v10153_v9 }
0x4663   :  { %v5421_v40 = vpop.f32.mrb[56].mxu0 }
0x4664   :  { %v5434_v31 = vadd.f32 %v10183_v15, %v5421_v40  ;;  %v5423_v62 = vpop.f32.mrb[57].mxu0 }
0x4665   :  { %v5435_v14 = vadd.f32 %v10191_v2, %v5423_v62 }
0x4666   :  { %v7393_v24 = vmul.f32 -1.442695, %v5434_v31 }
0x4667   :  { %v7394_v6 = vmul.f32 -1.442695, %v5435_v14 }
0x4668   :  { %8899 = vpow2.f32 %v7393_v24 }
0x4669   :  { %8901 = vtanh.f32 %v5435_v14 }
0x4672   :  { %v8900_v23 = vpop.eup %8899 }
0x4673   :  { %v5439_v36 = vadd.f32 1.0, %v8900_v23  ;;  %v8902_v52 = vpop.eup %8901 }
0x4675   :  { %8903 = vrcp.f32 %v5439_v36 }
0x4676   :  { %8905 = vpow2.f32 %v7394_v6 }
0x467f   :  { %v8904_v56 = vpop.eup %8903 }
0x4680   :  { %v5453_v53 = vmul.f32 %v8904_v56, %v8902_v52  ;;  %v5452_v5 = vmul.f32 %v8904_v56, %v5450_v4  ;;  %v8906_v8 = vpop.eup %8905 }
0x4681   :  { %v5446_v45 = vadd.f32 1.0, %v8906_v8 }
0x4682   :  { %5455 = vrot.lane.b32.xlu0 %v5453_v53, %s9161_s25 }
0x4683   :  { %8907 = vrcp.f32 %v5446_v45  ;;  %v6041_v45 = vrot.slane %v9916_v59, 6 }
0x468d   :  { %v8908_v22 = vpop.eup %8907 }
0x46f4   :  { %v5456_v28 = vpop.permute.xlu0 %5455 }
0x46f5   :  { %v5458_v12 = vadd.f32 %v5456_v28, %v5452_v5 }
0x46f7   :  { %8909 = vtanh.f32 %v5458_v12 }
0x4701   :  { %v8910_v57 = vpop.eup %8909 }
0x4702   :  { %v5460_v17 = vmul.f32 %v8910_v57, %v8908_v22 }
0x4704   :  { %5462 = vrot.lane.b32.xlu1 %v5460_v17, %s9161_s25 }
0x4776   :  { %v10264_v25 = vpop.permute.xlu1 %5462 }
0x4777   :  { %7395 = vmatmul.mubr.msk.f32.vlgmr.msra.gmra.mrb[56].mxu1 %vm275_vm3, %v10264_v25 }
0x4778   :  { %8252 = vmatpush1.bf16.msra.mxu1 %v10124_v13  ;;  %5769 = vmatprep.mubr.f32.mxu1 %v9160_v0 }
0x4779   :  { %8254 = vmatprep.subr.bf16.mxu1 %v10126_v43 }
0x477c   :  { %8256 = vmatpush1.bf16.msra.mxu1 %v10132_v47 }
0x477d   :  { %8258 = vmatprep.subr.bf16.mxu1 %v10136_v51 }
0x4780   :  { %8260 = vmatpush1.bf16.msra.mxu1 %v10142_v20  ;;  %v5568_v20 = vrot.slane %v5458_v12, 6 }
0x4781   :  { %8262 = vmatprep.subr.bf16.mxu1 %v10146_v50 }
0x4784   :  { %8264 = vmatpush1.bf16.msra.mxu1 %v10153_v9 }
0x484a   :  { %v5535_v32 = vpop.f32.mrb[56].mxu1 }
0x484b   :  { %v5548_v54 = vrot.slane %v5535_v32, 6  ;;  %v5537_v11 = vpop.f32.mrb[57].mxu1 }
0x484c   :  { %v5549_v46 = vrot.slane %v5537_v11, 6 }
0x484d   :  { %v5552_v55 = vadd.f32 %v5548_v54, %v10177_v42 }
0x484e   :  { %v5553_v43 = vadd.f32 %v5549_v46, %v10185_v3 }
0x484f   :  { %v7396_v13 = vmul.f32 -1.442695, %v5552_v55 }
0x4850   :  { %v7397_v9 = vmul.f32 -1.442695, %v5553_v43 }
0x4851   :  { %8911 = vpow2.f32 %v7396_v13 }
0x4852   :  { %8913 = vtanh.f32 %v5553_v43 }
0x485b   :  { %v8912_v37 = vpop.eup %8911 }
0x485c   :  { %v5557_v47 = vadd.f32 1.0, %v8912_v37  ;;  %v8914_v51 = vpop.eup %8913 }
0x485e   :  { %8915 = vrcp.f32 %v5557_v47 }
0x485f   :  { %8917 = vpow2.f32 %v7397_v9  ;;  %v5838_v9 = vld [vmem:[#allocation7 + $0x218] sm:$0xff] }
0x4868   :  { %v8916_v7 = vpop.eup %8915 }
0x4869   :  { %v5571_v50 = vmul.f32 %v8916_v7, %v8914_v51  ;;  %v5570_v44 = vmul.f32 %v8916_v7, %v5568_v20  ;;  %v8918_v60 = vpop.eup %8917  ;;  %v5819_v51 = vld [vmem:[#allocation4 + $0x208] sm:$0xff]  ;;  %v5821_v20 = vld [vmem:[#allocation4 + $0x218] sm:$0xff]  ;;  %v5818_v7 = vld [vmem:[#allocation4 + $0x200] sm:$0xff] }
0x486a   :  { %v5564_v34 = vadd.f32 1.0, %v8918_v60 }
0x486b   :  { %5573 = vrot.lane.b32.xlu0 %v5571_v50, %s9161_s25  ;;  %v5820_v50 = vld [vmem:[#allocation4 + $0x210] sm:$0xff] }
0x486c   :  { %8919 = vrcp.f32 %v5564_v34  ;;  %v5835_v34 = vld [vmem:[#allocation7 + $0x200] sm:$0xff] }
0x4876   :  { %v8920_v48 = vpop.eup %8919 }
0x48dd   :  { %v5574_v58 = vpop.permute.xlu0 %5573 }
0x48de   :  { %v5576_v10 = vadd.f32 %v5574_v58, %v5570_v44  ;;  %v5836_v44 = vld [vmem:[#allocation7 + $0x208] sm:$0xff]  ;;  %v5837_v58 = vld [vmem:[#allocation7 + $0x210] sm:$0xff] }
0x48df   :  { %v8281_v60 = vpack.c.bf16 %v5838_v9, %v5836_v44  ;;  %v5861_v44 = vld [vmem:[#allocation9 + $0x2b8] sm:$0xff] }
0x48e0   :  { %8921 = vtanh.f32 %v5576_v10  ;;  %v5683_v24 = vrot.slane %v5576_v10, 6  ;;  %v5823_v10 = vld [vmem:[#allocation4 + $0x228] sm:$0xff] }
0x48e1   :  { %8282 = vmatprep.subr.bf16.mxu1 %v8281_v60  ;;  %v5858_v60 = vld [vmem:[#allocation9 + $0x2a0] sm:$0xff] }
0x48ea   :  { %v8922_v29 = vpop.eup %8921 }
0x48eb   :  { %v10279_v21 = vmul.f32 %v8922_v29, %v8920_v48  ;;  %v8283_v48 = vpack.c.bf16 %v5837_v58, %v5835_v34  ;;  %v5825_v29 = vld [vmem:[#allocation4 + $0x238] sm:$0xff]  ;;  %v5860_v34 = vld [vmem:[#allocation9 + $0x2b0] sm:$0xff] }
0x48ed   :  { %v5585_v19 = vrot.slane %v10279_v21, 2 }
0x48ef   :  { %5586 = vrot.lane.b32.xlu1 %v5585_v19, %s9161_s25  ;;  %v5822_v19 = vld [vmem:[#allocation4 + $0x220] sm:$0xff] }
0x4961   :  { %v5587_v61 = vpop.permute.xlu1 %5586 }
0x4962   :  { %7398 = vmatmul.mubr.msk.f32.vlgmr.msra.gmra.mrb[58].mxu0 %vm275_vm3, %v5587_v61  ;;  %v5824_v61 = vld [vmem:[#allocation4 + $0x230] sm:$0xff] }
0x4963   :  { %5951 = vmatprep.mubr.f32.mxu0 %v9160_v0 }
0x4a35   :  { %v5656_v49 = vpop.f32.mrb[58].mxu0 }
0x4a36   :  { %v5663_v27 = vrot.slane %v5656_v49, 4  ;;  %v5658_v26 = vpop.f32.mrb[59].mxu0  ;;  %v8269_v49 = vpack.c.bf16 %v5825_v29, %v5823_v10  ;;  %v5863_v10 = vld [vmem:[#allocation9 + $0x2c8] sm:$0xff]  ;;  %v10334_v29 = vpack.c.bf16 %v5860_v34, %v5858_v60 }
0x4a37   :  { %v5664_v63 = vrot.slane %v5658_v26, 4  ;;  %v5840_v26 = vld [vmem:[#allocation7 + $0x228] sm:$0xff] }
0x4a38   :  { %v5667_v1 = vadd.f32 %v5663_v27, %v10183_v15  ;;  %v8271_v27 = vpack.c.bf16 %v5824_v61, %v5822_v19  ;;  %v5862_v61 = vld [vmem:[#allocation9 + $0x2c0] sm:$0xff] }
0x4a39   :  { %v5668_v16 = vadd.f32 %v5664_v63, %v10191_v2 }
0x4a3a   :  { %v7399_v38 = vmul.f32 -1.442695, %v5667_v1  ;;  %v5842_v1 = vld [vmem:[#allocation7 + $0x238] sm:$0xff] }
0x4a3b   :  { %v7400_v52 = vmul.f32 -1.442695, %v5668_v16  ;;  %v8285_v63 = vpack.c.bf16 %v5842_v1, %v5840_v26  ;;  %v5867_v26 = vld [vmem:[#allocation9 + $0x2e8] sm:$0xff]  ;;  %v5869_v1 = vld [vmem:[#allocation9 + $0x2f8] sm:$0xff] }
0x4a3c   :  { %8923 = vpow2.f32 %v7399_v38  ;;  %v5839_v38 = vld [vmem:[#allocation7 + $0x220] sm:$0xff] }
0x4a3d   :  { %8925 = vtanh.f32 %v5668_v16  ;;  %v5827_v16 = vld [vmem:[#allocation4 + $0x248] sm:$0xff] }
0x4a46   :  { %v8924_v40 = vpop.eup %8923 }
0x4a47   :  { %v5672_v31 = vadd.f32 1.0, %v8924_v40  ;;  %v8926_v62 = vpop.eup %8925  ;;  %v5829_v40 = vld [vmem:[#allocation4 + $0x258] sm:$0xff] }
0x4a49   :  { %8927 = vrcp.f32 %v5672_v31 }
0x4a4a   :  { %8929 = vpow2.f32 %v7400_v52  ;;  %v5826_v52 = vld [vmem:[#allocation4 + $0x240] sm:$0xff] }
0x4a53   :  { %v8928_v14 = vpop.eup %8927 }
0x4a54   :  { %v5686_v23 = vmul.f32 %v8928_v14, %v8926_v62  ;;  %v5685_v36 = vmul.f32 %v8928_v14, %v5683_v24  ;;  %v8930_v4 = vpop.eup %8929  ;;  %v8273_v62 = vpack.c.bf16 %v5829_v40, %v5827_v16  ;;  %v5868_v16 = vld [vmem:[#allocation9 + $0x2f0] sm:$0xff] }
0x4a55   :  { %v5679_v15 = vadd.f32 1.0, %v8930_v4  ;;  %v5828_v4 = vld [vmem:[#allocation4 + $0x250] sm:$0xff] }
0x4a56   :  { %5688 = vrot.lane.b32.xlu0 %v5686_v23, %s9161_s25 }
0x4a57   :  { %8931 = vrcp.f32 %v5679_v15  ;;  %v5844_v15 = vld [vmem:[#allocation7 + $0x248] sm:$0xff] }
0x4a61   :  { %v8932_v2 = vpop.eup %8931 }
0x4ac8   :  { %v5689_v56 = vpop.permute.xlu0 %5688 }
0x4ac9   :  { %v5691_v53 = vadd.f32 %v5689_v56, %v5685_v36 }
0x4acb   :  { %8933 = vtanh.f32 %v5691_v53  ;;  %v5798_v46 = vrot.slane %v5691_v53, 6  ;;  %v8275_v53 = vpack.c.bf16 %v5828_v4, %v5826_v52 }
0x4ad5   :  { %v8934_v5 = vpop.eup %8933 }
0x4ad6   :  { %v5693_v6 = vmul.f32 %v8934_v5, %v8932_v2  ;;  %v5846_v2 = vld [vmem:[#allocation7 + $0x258] sm:$0xff]  ;;  %v5843_v5 = vld [vmem:[#allocation7 + $0x240] sm:$0xff] }
0x4ad8   :  { %v5700_v8 = vrot.slane %v5693_v6, 4 }
0x4ada   :  { %5701 = vrot.lane.b32.xlu1 %v5700_v8, %s9161_s25 }
0x4ade   :  { %5115 = vrot.lane.b32.xlu1 %v10213_v18, %s9161_s25 }
0x4ae2   :  { %5345 = vrot.lane.b32.xlu1 %v10247_v30, %s9161_s25 }
0x4ae6   :  { %5695 = vrot.lane.b32.xlu1 %v5693_v6, %s9161_s25  ;;  %v8289_v6 = vpack.c.bf16 %v5846_v2, %v5844_v15 }
0x4aea   :  { %6042 = vrot.lane.b32.xlu1 %v6041_v45, %s9161_s25  ;;  %v5831_v45 = vld [vmem:[#allocation4 + $0x268] sm:$0xff] }
0x4b4c   :  { %v5702_v28 = vpop.permute.xlu1 %5701 }
0x4b4d   :  { %7401 = vmatmul.mubr.msk.f32.vlgmr.msra.gmra.mrb[58].mxu1 %vm275_vm3, %v5702_v28  ;;  %v5833_v28 = vld [vmem:[#allocation4 + $0x278] sm:$0xff] }
0x4b4e   :  { %6028 = vmatprep.mubr.f32.mxu1 %v9160_v0  ;;  %8284 = vmatpush1.bf16.msra.mxu1 %v8283_v48  ;;  %v5865_v48 = vld [vmem:[#allocation9 + $0x2d8] sm:$0xff] }
0x4b4f   :  { %8286 = vmatprep.subr.bf16.mxu1 %v8285_v63  ;;  %v10338_v19 = vpack.c.bf16 %v5865_v48, %v5863_v10  ;;  %v10348_v63 = vpack.c.bf16 %v5869_v1, %v5867_v26 }
0x4b50   :  { %v5116_v12 = vpop.permute.xlu1 %5115 }
0x4b51   :  { %5118 = vst.msk [vmem:[#allocation2] sm:$0xc] %vm506_vm4, %v5116_v12 }
0x4b52   :  { %5119 = vst.msk [vmem:[#allocation2 + $0xa] sm:$0xc] %vm508_vm5, %v5116_v12  ;;  %v5830_v12 = vld [vmem:[#allocation4 + $0x260] sm:$0xff] }
0x4b54   :  { %v5346_v18 = vpop.permute.xlu1 %5345 }
0x4b55   :  { %5348 = vst.msk [vmem:[#allocation2] sm:$0xc0] %vm740_vm6, %v5346_v18 }
0x4b56   :  { %5349 = vst.msk [vmem:[#allocation2 + $0x2] sm:$0xc0] %vm742_vm7, %v5346_v18 }
0x4b57   :  { %5465 = vst.msk [vmem:[#allocation2 + $0x8] sm:$0x3] %vm386_vm1, %v10264_v25 }
0x4b58   :  { %5466 = vst.msk [vmem:[#allocation2 + $0x6] sm:$0x3] %vm388_vm2, %v10264_v25  ;;  %v5696_v59 = vpop.permute.xlu1 %5695 }
0x4b59   :  { %5698 = vst.msk [vmem:[#allocation2 + $0x8] sm:$0x30] %vm623_vm8, %v5696_v59 }
0x4b5a   :  { %5699 = vst.msk [vmem:[#allocation2 - $0x2] sm:$0x30] %vm625_vm9, %v5696_v59  ;;  %v8277_v59 = vpack.c.bf16 %v5833_v28, %v5831_v45 }
0x4c20   :  { %v5771_v30 = vpop.f32.mrb[58].mxu1 }
0x4c21   :  { %v5778_v22 = vrot.slane %v5771_v30, 2  ;;  %v5773_v57 = vpop.f32.mrb[59].mxu1  ;;  %v5832_v30 = vld [vmem:[#allocation4 + $0x270] sm:$0xff] }
0x4c22   :  { %v5779_v54 = vrot.slane %v5773_v57, 2  ;;  %v5850_v57 = vld [vmem:[#allocation7 + $0x278] sm:$0xff] }
0x4c23   :  { %v5782_v17 = vadd.f32 %v5778_v22, %v10177_v42  ;;  %v8265_v42 = vpack.c.bf16 %v5821_v20, %v5819_v51  ;;  %v5848_v22 = vld [vmem:[#allocation7 + $0x268] sm:$0xff] }
0x4c24   :  { %v5783_v11 = vadd.f32 %v5779_v54, %v10185_v3  ;;  %v8267_v3 = vpack.c.bf16 %v5820_v50, %v5818_v7  ;;  %v5847_v54 = vld [vmem:[#allocation7 + $0x260] sm:$0xff]  ;;  %v5859_v50 = vld [vmem:[#allocation9 + $0x2a8] sm:$0xff] }
0x4c25   :  { %v7402_v32 = vmul.f32 -1.442695, %v5782_v17  ;;  %8266 = vmatprep.subr.bf16.mxu0 %v8265_v42  ;;  %v8279_v17 = vpack.c.bf16 %v5832_v30, %v5830_v12  ;;  %v5854_v7 = vld [vmem:[#allocation9 + $0x280] sm:$0xff]  ;;  %v5856_v42 = vld [vmem:[#allocation9 + $0x290] sm:$0xff] }
0x4c26   :  { %8268 = vmatpush1.bf16.msra.mxu0 %v8267_v3  ;;  %v7403_v24 = vmul.f32 -1.442695, %v5783_v11  ;;  %v10326_v9 = vpack.c.bf16 %v5856_v42, %v5854_v7  ;;  %v10328_v3 = vpack.c.bf16 %v5861_v44, %v5859_v50  ;;  %v6141_v50 = vrot.slane %v9905_v41, 6 }
0x4c27   :  { %8935 = vpow2.f32 %v7402_v32  ;;  %8270 = vmatprep.subr.bf16.mxu0 %v8269_v49  ;;  %v8293_v32 = vpack.c.bf16 %v5850_v57, %v5848_v22  ;;  %v5864_v49 = vld [vmem:[#allocation9 + $0x2d0] sm:$0xff] }
0x4c28   :  { %8937 = vtanh.f32 %v5783_v11  ;;  %v5849_v11 = vld [vmem:[#allocation7 + $0x270] sm:$0xff] }
0x4c2a   :  { %8272 = vmatpush1.bf16.msra.mxu0 %v8271_v27 }
0x4c2b   :  { %8274 = vmatprep.subr.bf16.mxu0 %v8273_v62  ;;  %v7404_v62 = vld [vmem:[%s10626_s5 + $0xa] sm:$0x3] }
0x4c2e   :  { %8276 = vmatpush1.bf16.msra.mxu0 %v8275_v53 }
0x4c2f   :  { %8278 = vmatprep.subr.bf16.mxu0 %v8277_v59 }
0x4c31   :  { %v8936_v55 = vpop.eup %8935 }
0x4c32   :  { %v5787_v13 = vadd.f32 1.0, %v8936_v55  ;;  %v8938_v25 = vpop.eup %8937  ;;  %v5855_v55 = vld [vmem:[#allocation9 + $0x288] sm:$0xff]  ;;  %8280 = vmatpush1.bf16.msra.mxu0 %v8279_v17 }
0x4c34   :  { %8939 = vrcp.f32 %v5787_v13  ;;  %v8295_v13 = vpack.c.bf16 %v5849_v11, %v5847_v54 }
0x4c35   :  { %8941 = vpow2.f32 %v7403_v24  ;;  %v5874_v24 = vrot.slane %v7404_v62, %v9349_v33 }
0x4c3e   :  { %v8940_v43 = vpop.eup %8939 }
0x4c3f   :  { %v5801_v37 = vmul.f32 %v8940_v43, %v8938_v25  ;;  %v5800_v47 = vmul.f32 %v8940_v43, %v5798_v46  ;;  %v8942_v14 = vpop.eup %8941  ;;  %v5857_v25 = vld [vmem:[#allocation9 + $0x298] sm:$0xff] }
0x4c40   :  { %v5794_v23 = vadd.f32 1.0, %v8942_v14  ;;  %v10317_v46 = vpack.c.bf16 %v5857_v25, %v5855_v55 }
0x4c41   :  { %5803 = vrot.lane.b32.xlu0 %v5801_v37, %s9161_s25 }
0x4c42   :  { %8943 = vrcp.f32 %v5794_v23  ;;  %8298 = vmatprep.subr.bf16.mxu0 %v10317_v46 }
0x4c45   :  { %5230 = vrot.lane.b32.xlu0 %v10230_v39, %s9161_s25  ;;  %v5841_v39 = vld [vmem:[#allocation7 + $0x230] sm:$0xff] }
0x4c46   :  { %v8287_v31 = vpack.c.bf16 %v5841_v39, %v5839_v38  ;;  %v10344_v38 = vpack.c.bf16 %v5864_v49, %v5862_v61  ;;  %v5866_v39 = vld [vmem:[#allocation9 + $0x2e0] sm:$0xff] }
0x4c47   :  { %v10355_v40 = vpack.c.bf16 %v5868_v16, %v5866_v39 }
0x4c48   :  { %8288 = vmatpush1.bf16.msra.mxu1 %v8287_v31  ;;  %v6043_v31 = vpop.permute.xlu1 %6042 }
0x4c49   :  { %5580 = vrot.lane.b32.xlu0 %v10279_v21, %s9161_s25  ;;  %v5845_v21 = vld [vmem:[#allocation7 + $0x250] sm:$0xff]  ;;  %8290 = vmatprep.subr.bf16.mxu1 %v8289_v6 }
0x4c4a   :  { %v8291_v8 = vpack.c.bf16 %v5845_v21, %v5843_v5 }
0x4c4c   :  { %8292 = vmatpush1.bf16.msra.mxu1 %v8291_v8  ;;  %v8944_v37 = vpop.eup %8943 }
0x4c4d   :  { %8294 = vmatprep.subr.bf16.mxu1 %v8293_v32 }
0x4c50   :  { %8296 = vmatpush1.bf16.msra.mxu1 %v8295_v13 }
0x4c51   :  { %8314 = vmatprep.subr.bf16.mxu1 %v10317_v46 }
0x4cb3   :  { %v5804_v36 = vpop.permute.xlu0 %5803 }
0x4cb4   :  { %v5806_v56 = vadd.f32 %v5804_v36, %v5800_v47  ;;  %v5878_v36 = vrot.slane %v7404_v62, %v9354_v35 }
0x4cb6   :  { %8945 = vtanh.f32 %v5806_v56 }
0x4cb7   :  { %v5231_v18 = vpop.permute.xlu0 %5230 }
0x4cb8   :  { %5233 = vst.msk [vmem:[#allocation2] sm:$0x30] %vm623_vm8, %v5231_v18 }
0x4cb9   :  { %5234 = vst.msk [vmem:[#allocation2 + $0x6] sm:$0x30] %vm625_vm9, %v5231_v18 }
0x4cbb   :  { %v5581_v43 = vpop.permute.xlu0 %5580 }
0x4cbc   :  { %5583 = vst.msk [vmem:[#allocation2 + $0x8] sm:$0xc] %vm506_vm4, %v5581_v43 }
0x4cbd   :  { %5584 = vst.msk [vmem:[#allocation2 + $0x2] sm:$0xc] %vm508_vm5, %v5581_v43 }
0x4cc0   :  { %v8946_v47 = vpop.eup %8945 }
0x4cc1   :  { %v5808_v51 = vmul.f32 %v8946_v47, %v8944_v37 }
0x4cc3   :  { %5810 = vrot.lane.b32.xlu0 %v5808_v51, %s9161_s25 }
0x4d35   :  { %v5811_v20 = vpop.permute.xlu0 %5810 }
0x4d36   :  { %5813 = vst.msk [vmem:[#allocation2 + $0x8] sm:$0xc0] %vm740_vm6, %v5811_v20 }
0x4d37   :  { %5814 = vst.msk [vmem:[#allocation2 - $0x6] sm:$0xc0] %vm742_vm7, %v5811_v20 }
0x4d3d   :  { %v5816_v27 = vld [vmem:[#allocation2 + $0x8] sm:$0xff] }
0x4d3e   :  { %v5815_v58 = vld [vmem:[#allocation2] sm:$0xff] }
0x4d3f   :  { %7405 = vmatmul.mubr.msk.f32.vlgmr.msra.gmra.mrb[60].mxu0 %vm275_vm3, %v5815_v58  ;;  %7407 = vmatmul.mubr.msk.f32.vlgmr.msra.gmra.mrb[60].mxu1 %vm275_vm3, %v5815_v58 }
0x4d40   :  { %8300 = vmatpush1.bf16.msra.mxu0 %v10326_v9  ;;  %5957 = vmatprep.mubr.f32.mxu0 %v9160_v0 }
0x4d41   :  { %6034 = vmatprep.mubr.f32.mxu1 %v9160_v0  ;;  %8302 = vmatprep.subr.bf16.mxu0 %v10328_v3 }
0x4d42   :  { %8316 = vmatpush1.bf16.msra.mxu1 %v10326_v9 }
0x4d43   :  { %7406 = vmatmul.mubr.msk.f32.gmra.mrb[62].mxu0 %vm275_vm3, %v5816_v27  ;;  %7408 = vmatmul.mubr.msk.f32.gmra.mrb[62].mxu1 %vm275_vm3, %v5816_v27 }
0x4d44   :  { %8304 = vmatpush1.bf16.msra.mxu0 %v10334_v29  ;;  %6110 = vmatprep.mubr.f32.mxu0 %v9160_v0 }
0x4d45   :  { %8306 = vmatprep.subr.bf16.mxu0 %v10338_v19  ;;  %8318 = vmatprep.subr.bf16.mxu1 %v10328_v3 }
0x4d46   :  { %8320 = vmatpush1.bf16.msra.mxu1 %v10334_v29  ;;  %6224 = vmatprep.mubr.f32.mxu1 %v9160_v0 }
0x4d47   :  { %8322 = vmatprep.subr.bf16.mxu1 %v10338_v19 }
0x4d48   :  { %8308 = vmatpush1.bf16.msra.mxu0 %v10344_v38 }
0x4d49   :  { %8310 = vmatprep.subr.bf16.mxu0 %v10348_v63 }
0x4d4a   :  { %8324 = vmatpush1.bf16.msra.mxu1 %v10344_v38 }
0x4d4b   :  { %8326 = vmatprep.subr.bf16.mxu1 %v10348_v63 }
0x4d4c   :  { %8312 = vmatpush1.bf16.msra.mxu0 %v10355_v40 }
0x4d4d   :  { %8330 = vmatprep.subr.bf16.mxu0 %v10317_v46 }
0x4d4e   :  { %8328 = vmatpush1.bf16.msra.mxu1 %v10355_v40 }
0x4d4f   :  { %7409 = vmatmul.mubr.msk.f32.vlgmr.msra.gmra.mrb[64].mxu0 %vm275_vm3, %v6043_v31  ;;  %8346 = vmatprep.subr.bf16.mxu1 %v10317_v46 }
0x4d50   :  { %8332 = vmatpush1.bf16.msra.mxu0 %v10326_v9  ;;  %6345 = vmatprep.mubr.f32.mxu0 %v9160_v0 }
0x4d51   :  { %8334 = vmatprep.subr.bf16.mxu0 %v10328_v3 }
0x4d54   :  { %8336 = vmatpush1.bf16.msra.mxu0 %v10334_v29 }
0x4d55   :  { %8338 = vmatprep.subr.bf16.mxu0 %v10338_v19 }
0x4d58   :  { %8340 = vmatpush1.bf16.msra.mxu0 %v10344_v38 }
0x4d59   :  { %8342 = vmatprep.subr.bf16.mxu0 %v10348_v63 }
0x4d5c   :  { %8344 = vmatpush1.bf16.msra.mxu0 %v10355_v40 }
0x4d5d   :  { %8362 = vmatprep.subr.bf16.mxu0 %v10317_v46 }
0x4e12   :  { %v5953_v14 = vpop.f32.mrb[60].mxu0  ;;  %v6030_v23 = vpop.f32.mrb[60].mxu1 }
0x4e13   :  { %v5955_v52 = vpop.f32.mrb[61].mxu0  ;;  %v6032_v4 = vpop.f32.mrb[61].mxu1  ;;  %v5954_v15 = vadd.f32 %v5953_v14, %v5874_v24  ;;  %v6584_v56 = vrot.slane %v6030_v23, 6  ;;  %v6696_v53 = vrot.slane %v6030_v23, 2 }
0x4e14   :  { %v5956_v2 = vadd.f32 %v5955_v52, %v5878_v36  ;;  %v6585_v6 = vrot.slane %v6032_v4, 6  ;;  %v6697_v59 = vrot.slane %v6032_v4, 2 }
0x4e16   :  { %v5959_v5 = vpop.f32.mrb[62].mxu0  ;;  %v6036_v21 = vpop.f32.mrb[62].mxu1 }
0x4e17   :  { %v5960_v8 = vadd.f32 %v5959_v5, %v5874_v24  ;;  %v6119_v45 = vrot.slane %v6036_v21, 6  ;;  %v6231_v28 = vrot.slane %v6036_v21, 2  ;;  %v5961_v12 = vpop.f32.mrb[63].mxu0  ;;  %v6038_v18 = vpop.f32.mrb[63].mxu1 }
0x4e18   :  { %v5962_v33 = vadd.f32 %v5961_v12, %v5878_v36  ;;  %v6120_v30 = vrot.slane %v6038_v18, 6  ;;  %v6232_v22 = vrot.slane %v6038_v18, 2 }
0x4e19   :  { %v10379_v57 = vadd.f32 %v6696_v53, %v5960_v8  ;;  %v10381_v35 = vadd.f32 %v6231_v28, %v5954_v15  ;;  %v10383_v17 = vadd.f32 %v6119_v45, %v5954_v15  ;;  %v10385_v32 = vadd.f32 %v6584_v56, %v5960_v8 }
0x4e1a   :  { %v10387_v54 = vadd.f32 %v6697_v59, %v5962_v33  ;;  %v10389_v11 = vadd.f32 %v6232_v22, %v5956_v2  ;;  %v10391_v55 = vadd.f32 %v6120_v30, %v5956_v2  ;;  %v10393_v13 = vadd.f32 %v6585_v6, %v5962_v33 }
0x4e22   :  { %v6112_v25 = vpop.f32.mrb[64].mxu0 }
0x4e23   :  { %v6125_v43 = vadd.f32 %v10383_v17, %v6112_v25  ;;  %v6114_v37 = vpop.f32.mrb[65].mxu0 }
0x4e24   :  { %v6126_v51 = vadd.f32 %v10391_v55, %v6114_v37 }
0x4e25   :  { %v7410_v47 = vmul.f32 -1.442695, %v6125_v43 }
0x4e26   :  { %v7411_v58 = vmul.f32 -1.442695, %v6126_v51 }
0x4e27   :  { %8947 = vpow2.f32 %v7410_v47 }
0x4e28   :  { %8949 = vtanh.f32 %v6126_v51 }
0x4e31   :  { %v8948_v20 = vpop.eup %8947 }
0x4e32   :  { %v6130_v7 = vadd.f32 1.0, %v8948_v20  ;;  %v8950_v42 = vpop.eup %8949 }
0x4e34   :  { %8951 = vrcp.f32 %v6130_v7 }
0x4e35   :  { %8953 = vpow2.f32 %v7411_v58 }
0x4e3e   :  { %v8952_v44 = vpop.eup %8951 }
0x4e3f   :  { %v6144_v60 = vmul.f32 %v8952_v44, %v8950_v42  ;;  %v6143_v34 = vmul.f32 %v8952_v44, %v6141_v50  ;;  %v8954_v10 = vpop.eup %8953 }
0x4e40   :  { %v6137_v48 = vadd.f32 1.0, %v8954_v10 }
0x4e41   :  { %6146 = vrot.lane.b32.xlu0 %v6144_v60, %s9161_s25 }
0x4e42   :  { %8955 = vrcp.f32 %v6137_v48 }
0x4e4c   :  { %v8956_v27 = vpop.eup %8955 }
0x4eb3   :  { %v6147_v61 = vpop.permute.xlu0 %6146 }
0x4eb4   :  { %v6149_v49 = vadd.f32 %v6147_v61, %v6143_v34 }
0x4eb6   :  { %8957 = vtanh.f32 %v6149_v49  ;;  %v6259_v15 = vrot.slane %v6149_v49, 6 }
0x4ec0   :  { %v8958_v26 = vpop.eup %8957 }
0x4ec1   :  { %v6151_v1 = vmul.f32 %v8958_v26, %v8956_v27 }
0x4ec3   :  { %6153 = vrot.lane.b32.xlu1 %v6151_v1, %s9161_s25 }
0x4f35   :  { %v6154_v39 = vpop.permute.xlu1 %6153 }
0x4f36   :  { %6156 = vst.msk [vmem:[#allocation3] sm:$0x3] %vm386_vm1, %v6154_v39  ;;  %7412 = vmatmul.mubr.msk.f32.vlgmr.msra.gmra.mrb[64].mxu1 %vm275_vm3, %v6154_v39 }
0x4f37   :  { %6157 = vst.msk [vmem:[#allocation3 + $0xe] sm:$0x3] %vm388_vm2, %v6154_v39  ;;  %8348 = vmatpush1.bf16.msra.mxu1 %v10326_v9  ;;  %6460 = vmatprep.mubr.f32.mxu1 %v9160_v0 }
0x4f38   :  { %8350 = vmatprep.subr.bf16.mxu1 %v10328_v3 }
0x4f3b   :  { %8352 = vmatpush1.bf16.msra.mxu1 %v10334_v29 }
0x4f3c   :  { %8354 = vmatprep.subr.bf16.mxu1 %v10338_v19 }
0x4f3f   :  { %8356 = vmatpush1.bf16.msra.mxu1 %v10344_v38 }
0x4f40   :  { %8358 = vmatprep.subr.bf16.mxu1 %v10348_v63 }
0x4f43   :  { %8360 = vmatpush1.bf16.msra.mxu1 %v10355_v40 }
0x4f44   :  { %8378 = vmatprep.subr.bf16.mxu1 %v10317_v46 }
0x5009   :  { %v6226_v41 = vpop.f32.mrb[64].mxu1 }
0x500a   :  { %v6239_v16 = vrot.slane %v6226_v41, 6  ;;  %v6228_v31 = vpop.f32.mrb[65].mxu1 }
0x500b   :  { %v6240_v14 = vrot.slane %v6228_v31, 6 }
0x500c   :  { %v6243_v62 = vadd.f32 %v6239_v16, %v10381_v35 }
0x500d   :  { %v6244_v23 = vadd.f32 %v6240_v14, %v10389_v11 }
0x500e   :  { %v7413_v24 = vmul.f32 -1.442695, %v6243_v62 }
0x500f   :  { %v7414_v5 = vmul.f32 -1.442695, %v6244_v23 }
0x5010   :  { %8959 = vpow2.f32 %v7413_v24 }
0x5011   :  { %8961 = vtanh.f32 %v6244_v23 }
0x501a   :  { %v8960_v36 = vpop.eup %8959 }
0x501b   :  { %v6248_v52 = vadd.f32 1.0, %v8960_v36  ;;  %v8962_v4 = vpop.eup %8961 }
0x501d   :  { %8963 = vrcp.f32 %v6248_v52 }
0x501e   :  { %8965 = vpow2.f32 %v7414_v5 }
0x5027   :  { %v8964_v56 = vpop.eup %8963 }
0x5028   :  { %v6262_v53 = vmul.f32 %v8964_v56, %v8962_v4  ;;  %v6261_v2 = vmul.f32 %v8964_v56, %v6259_v15  ;;  %v8966_v21 = vpop.eup %8965 }
0x5029   :  { %v6255_v6 = vadd.f32 1.0, %v8966_v21 }
0x502a   :  { %6264 = vrot.lane.b32.xlu0 %v6262_v53, %s9161_s25 }
0x502b   :  { %8967 = vrcp.f32 %v6255_v6 }
0x5035   :  { %v8968_v28 = vpop.eup %8967 }
0x509c   :  { %v6265_v8 = vpop.permute.xlu0 %6264 }
0x509d   :  { %v6267_v45 = vadd.f32 %v6265_v8, %v6261_v2 }
0x509f   :  { %8969 = vtanh.f32 %v6267_v45  ;;  %v6374_v50 = vrot.slane %v6267_v45, 6 }
0x50a9   :  { %v8970_v12 = vpop.eup %8969 }
0x50aa   :  { %v10415_v18 = vmul.f32 %v8970_v12, %v8968_v28 }
0x50ac   :  { %v6276_v59 = vrot.slane %v10415_v18, 2 }
0x50ae   :  { %6277 = vrot.lane.b32.xlu1 %v6276_v59, %s9161_s25 }
0x5120   :  { %v6278_v33 = vpop.permute.xlu1 %6277 }
0x5121   :  { %7415 = vmatmul.mubr.msk.f32.vlgmr.msra.gmra.mrb[66].mxu0 %vm275_vm3, %v6278_v33 }
0x5122   :  { %8364 = vmatpush1.bf16.msra.mxu0 %v10326_v9  ;;  %6575 = vmatprep.mubr.f32.mxu0 %v9160_v0 }
0x5123   :  { %8366 = vmatprep.subr.bf16.mxu0 %v10328_v3 }
0x5126   :  { %8368 = vmatpush1.bf16.msra.mxu0 %v10334_v29 }
0x5127   :  { %8370 = vmatprep.subr.bf16.mxu0 %v10338_v19 }
0x512a   :  { %8372 = vmatpush1.bf16.msra.mxu0 %v10344_v38 }
0x512b   :  { %8374 = vmatprep.subr.bf16.mxu0 %v10348_v63 }
0x512e   :  { %8376 = vmatpush1.bf16.msra.mxu0 %v10355_v40 }
0x512f   :  { %8394 = vmatprep.subr.bf16.mxu0 %v10317_v46 }
0x51f4   :  { %v6347_v30 = vpop.f32.mrb[66].mxu0 }
0x51f5   :  { %v6354_v22 = vrot.slane %v6347_v30, 4  ;;  %v6349_v25 = vpop.f32.mrb[67].mxu0 }
0x51f6   :  { %v6355_v47 = vrot.slane %v6349_v25, 4 }
0x51f7   :  { %v6358_v43 = vadd.f32 %v6354_v22, %v10383_v17 }
0x51f8   :  { %v6359_v51 = vadd.f32 %v6355_v47, %v10391_v55 }
0x51f9   :  { %v7416_v37 = vmul.f32 -1.442695, %v6358_v43 }
0x51fa   :  { %v7417_v58 = vmul.f32 -1.442695, %v6359_v51 }
0x51fb   :  { %8971 = vpow2.f32 %v7416_v37 }
0x51fc   :  { %8973 = vtanh.f32 %v6359_v51 }
0x5205   :  { %v8972_v20 = vpop.eup %8971 }
0x5206   :  { %v6363_v7 = vadd.f32 1.0, %v8972_v20  ;;  %v8974_v42 = vpop.eup %8973 }
0x5208   :  { %8975 = vrcp.f32 %v6363_v7 }
0x5209   :  { %8977 = vpow2.f32 %v7417_v58 }
0x5212   :  { %v8976_v44 = vpop.eup %8975 }
0x5213   :  { %v6377_v60 = vmul.f32 %v8976_v44, %v8974_v42  ;;  %v6376_v34 = vmul.f32 %v8976_v44, %v6374_v50  ;;  %v8978_v10 = vpop.eup %8977 }
0x5214   :  { %v6370_v17 = vadd.f32 1.0, %v8978_v10 }
0x5215   :  { %6379 = vrot.lane.b32.xlu0 %v6377_v60, %s9161_s25 }
0x5216   :  { %8979 = vrcp.f32 %v6370_v17 }
0x5220   :  { %v8980_v55 = vpop.eup %8979 }
0x5287   :  { %v6380_v48 = vpop.permute.xlu0 %6379 }
0x5288   :  { %v6382_v61 = vadd.f32 %v6380_v48, %v6376_v34 }
0x528a   :  { %8981 = vtanh.f32 %v6382_v61  ;;  %v6489_v4 = vrot.slane %v6382_v61, 6 }
0x5294   :  { %v8982_v49 = vpop.eup %8981 }
0x5295   :  { %v10432_v27 = vmul.f32 %v8982_v49, %v8980_v55 }
0x5297   :  { %v6391_v26 = vrot.slane %v10432_v27, 4 }
0x5299   :  { %6392 = vrot.lane.b32.xlu1 %v6391_v26, %s9161_s25 }
0x530b   :  { %v6393_v1 = vpop.permute.xlu1 %6392 }
0x530c   :  { %7418 = vmatmul.mubr.msk.f32.vlgmr.msra.gmra.mrb[66].mxu1 %vm275_vm3, %v6393_v1 }
0x530d   :  { %8380 = vmatpush1.bf16.msra.mxu1 %v10326_v9  ;;  %6689 = vmatprep.mubr.f32.mxu1 %v9160_v0 }
0x530e   :  { %8382 = vmatprep.subr.bf16.mxu1 %v10328_v3 }
0x5311   :  { %8384 = vmatpush1.bf16.msra.mxu1 %v10334_v29 }
0x5312   :  { %8386 = vmatprep.subr.bf16.mxu1 %v10338_v19 }
0x5315   :  { %8388 = vmatpush1.bf16.msra.mxu1 %v10344_v38 }
0x5316   :  { %8390 = vmatprep.subr.bf16.mxu1 %v10348_v63 }
0x5319   :  { %8392 = vmatpush1.bf16.msra.mxu1 %v10355_v40 }
0x531a   :  { %8410 = vmatprep.subr.bf16.mxu1 %v10317_v46 }
0x53df   :  { %v6462_v39 = vpop.f32.mrb[66].mxu1 }
0x53e0   :  { %v6469_v41 = vrot.slane %v6462_v39, 2  ;;  %v6464_v16 = vpop.f32.mrb[67].mxu1 }
0x53e1   :  { %v6470_v24 = vrot.slane %v6464_v16, 2 }
0x53e2   :  { %v6473_v31 = vadd.f32 %v6469_v41, %v10381_v35 }
0x53e3   :  { %v6474_v14 = vadd.f32 %v6470_v24, %v10389_v11 }
0x53e4   :  { %v7419_v62 = vmul.f32 -1.442695, %v6473_v31 }
0x53e5   :  { %v7420_v46 = vmul.f32 -1.442695, %v6474_v14 }
0x53e6   :  { %8983 = vpow2.f32 %v7419_v62 }
0x53e7   :  { %8985 = vtanh.f32 %v6474_v14 }
0x53f0   :  { %v8984_v23 = vpop.eup %8983 }
0x53f1   :  { %v6478_v36 = vadd.f32 1.0, %v8984_v23  ;;  %v8986_v52 = vpop.eup %8985 }
0x53f3   :  { %8987 = vrcp.f32 %v6478_v36 }
0x53f4   :  { %8989 = vpow2.f32 %v7420_v46 }
0x53fd   :  { %v8988_v15 = vpop.eup %8987 }
0x53fe   :  { %v6492_v56 = vmul.f32 %v8988_v15, %v8986_v52  ;;  %v6491_v53 = vmul.f32 %v8988_v15, %v6489_v4  ;;  %v8990_v2 = vpop.eup %8989 }
0x53ff   :  { %v6485_v35 = vadd.f32 1.0, %v8990_v2 }
0x5400   :  { %6494 = vrot.lane.b32.xlu0 %v6492_v56, %s9161_s25 }
0x5401   :  { %8991 = vrcp.f32 %v6485_v35 }
0x540b   :  { %v8992_v11 = vpop.eup %8991 }
0x5472   :  { %v6495_v5 = vpop.permute.xlu0 %6494 }
0x5473   :  { %v6497_v21 = vadd.f32 %v6495_v5, %v6491_v53 }
0x5475   :  { %8993 = vtanh.f32 %v6497_v21  ;;  %v6606_v47 = vrot.slane %v6497_v21, 6 }
0x547f   :  { %v8994_v6 = vpop.eup %8993 }
0x5480   :  { %v10449_v8 = vmul.f32 %v8994_v6, %v8992_v11 }
0x5482   :  { %v6506_v45 = vrot.slane %v10449_v8, 6 }
0x5484   :  { %6507 = vrot.lane.b32.xlu1 %v6506_v45, %s9161_s25 }
0x54f6   :  { %v6508_v28 = vpop.permute.xlu1 %6507 }
0x54f7   :  { %7421 = vmatmul.mubr.msk.f32.vlgmr.msra.gmra.mrb[68].mxu0 %vm275_vm3, %v6508_v28 }
0x54f8   :  { %8396 = vmatpush1.bf16.msra.mxu0 %v10326_v9  ;;  %6810 = vmatprep.mubr.f32.mxu0 %v9160_v0 }
0x54f9   :  { %8398 = vmatprep.subr.bf16.mxu0 %v10328_v3 }
0x54fc   :  { %8400 = vmatpush1.bf16.msra.mxu0 %v10334_v29 }
0x54fd   :  { %8402 = vmatprep.subr.bf16.mxu0 %v10338_v19 }
0x5500   :  { %8404 = vmatpush1.bf16.msra.mxu0 %v10344_v38 }
0x5501   :  { %8406 = vmatprep.subr.bf16.mxu0 %v10348_v63 }
0x5504   :  { %8408 = vmatpush1.bf16.msra.mxu0 %v10355_v40 }
0x55ca   :  { %v6577_v12 = vpop.f32.mrb[68].mxu0 }
0x55cb   :  { %v6590_v59 = vadd.f32 %v10385_v32, %v6577_v12  ;;  %v6579_v33 = vpop.f32.mrb[69].mxu0 }
0x55cc   :  { %v6591_v22 = vadd.f32 %v10393_v13, %v6579_v33 }
0x55cd   :  { %v7422_v30 = vmul.f32 -1.442695, %v6590_v59 }
0x55ce   :  { %v7423_v42 = vmul.f32 -1.442695, %v6591_v22 }
0x55cf   :  { %8995 = vpow2.f32 %v7422_v30 }
0x55d0   :  { %8997 = vtanh.f32 %v6591_v22 }
0x55d9   :  { %v8996_v25 = vpop.eup %8995 }
0x55da   :  { %v6595_v43 = vadd.f32 1.0, %v8996_v25  ;;  %v8998_v37 = vpop.eup %8997 }
0x55dc   :  { %8999 = vrcp.f32 %v6595_v43 }
0x55dd   :  { %9001 = vpow2.f32 %v7423_v42 }
0x55e6   :  { %v9000_v51 = vpop.eup %8999 }
0x55e7   :  { %v6609_v20 = vmul.f32 %v9000_v51, %v8998_v37  ;;  %v6608_v7 = vmul.f32 %v9000_v51, %v6606_v47  ;;  %v9002_v50 = vpop.eup %9001 }
0x55e8   :  { %v6602_v44 = vadd.f32 1.0, %v9002_v50 }
0x55e9   :  { %6611 = vrot.lane.b32.xlu0 %v6609_v20, %s9161_s25 }
0x55ea   :  { %9003 = vrcp.f32 %v6602_v44 }
0x55f4   :  { %v9004_v58 = vpop.eup %9003 }
0x565b   :  { %v6612_v60 = vpop.permute.xlu0 %6611 }
0x565c   :  { %v6614_v34 = vadd.f32 %v6612_v60, %v6608_v7 }
0x565e   :  { %9005 = vtanh.f32 %v6614_v34 }
0x5668   :  { %v9006_v10 = vpop.eup %9005 }
0x5669   :  { %v6616_v17 = vmul.f32 %v9006_v10, %v9004_v58 }
0x566b   :  { %6618 = vrot.lane.b32.xlu1 %v6616_v17, %s9161_s25 }
0x56dd   :  { %v10466_v48 = vpop.permute.xlu1 %6618 }
0x56de   :  { %7424 = vmatmul.mubr.msk.f32.vlgmr.msra.gmra.mrb[68].mxu1 %vm275_vm3, %v10466_v48 }
0x56df   :  { %8412 = vmatpush1.bf16.msra.mxu1 %v10326_v9  ;;  %6925 = vmatprep.mubr.f32.mxu1 %v9160_v0 }
0x56e0   :  { %8414 = vmatprep.subr.bf16.mxu1 %v10328_v3 }
0x56e3   :  { %8416 = vmatpush1.bf16.msra.mxu1 %v10334_v29 }
0x56e4   :  { %8418 = vmatprep.subr.bf16.mxu1 %v10338_v19 }
0x56e7   :  { %8420 = vmatpush1.bf16.msra.mxu1 %v10344_v38  ;;  %v6724_v38 = vrot.slane %v6614_v34, 6 }
0x56e8   :  { %8422 = vmatprep.subr.bf16.mxu1 %v10348_v63 }
0x56eb   :  { %8424 = vmatpush1.bf16.msra.mxu1 %v10355_v40 }
0x57b1   :  { %v6691_v61 = vpop.f32.mrb[68].mxu1 }
0x57b2   :  { %v6704_v55 = vrot.slane %v6691_v61, 6  ;;  %v6693_v49 = vpop.f32.mrb[69].mxu1 }
0x57b3   :  { %v6705_v0 = vrot.slane %v6693_v49, 6 }
0x57b4   :  { %v6708_v26 = vadd.f32 %v6704_v55, %v10379_v57 }
0x57b5   :  { %v6709_v3 = vadd.f32 %v6705_v0, %v10387_v54 }
0x57b6   :  { %v7425_v9 = vmul.f32 -1.442695, %v6708_v26 }
0x57b7   :  { %v7426_v40 = vmul.f32 -1.442695, %v6709_v3 }
0x57b8   :  { %9007 = vpow2.f32 %v7425_v9 }
0x57b9   :  { %9009 = vtanh.f32 %v6709_v3 }
0x57c2   :  { %v9008_v1 = vpop.eup %9007 }
0x57c3   :  { %v6713_v29 = vadd.f32 1.0, %v9008_v1  ;;  %v9010_v19 = vpop.eup %9009  ;;  %v7002_v1 = vld [vmem:[%s10628_s7] sm:$0xff] }
0x57c5   :  { %9011 = vrcp.f32 %v6713_v29  ;;  %v7003_v29 = vld [vmem:[%s10628_s7 + $0x8] sm:$0xff] }
0x57c6   :  { %9013 = vpow2.f32 %v7426_v40  ;;  %v7007_v40 = vld [vmem:[%s10628_s7 + $0x28] sm:$0xff] }
0x57cf   :  { %v9012_v39 = vpop.eup %9011 }
0x57d0   :  { %v6727_v63 = vmul.f32 %v9012_v39, %v9010_v19  ;;  %v6726_v41 = vmul.f32 %v9012_v39, %v6724_v38  ;;  %v9014_v16 = vpop.eup %9013  ;;  %v8425_v38 = vpack.c.bf16 %v7003_v29, %v7002_v1  ;;  %v7005_v39 = vld [vmem:[%s10628_s7 + $0x18] sm:$0xff] }
0x57d1   :  { %v6720_v31 = vadd.f32 1.0, %v9014_v16 }
0x57d2   :  { %6729 = vrot.lane.b32.xlu0 %v6727_v63, %s9161_s25  ;;  %8426 = vmatprep.subr.bf16.mxu0 %v8425_v38 }
0x57d3   :  { %9015 = vrcp.f32 %v6720_v31 }
0x57dd   :  { %v9016_v14 = vpop.eup %9015 }
0x5844   :  { %v6730_v62 = vpop.permute.xlu0 %6729 }
0x5845   :  { %v6732_v24 = vadd.f32 %v6730_v62, %v6726_v41  ;;  %v7006_v41 = vld [vmem:[%s10628_s7 + $0x20] sm:$0xff]  ;;  %v7008_v62 = vld [vmem:[%s10628_s7 + $0x30] sm:$0xff] }
0x5846   :  { %v8433_v31 = vpack.c.bf16 %v7007_v40, %v7006_v41 }
0x5847   :  { %9017 = vtanh.f32 %v6732_v24  ;;  %v6839_v45 = vrot.slane %v6732_v24, 6  ;;  %v7009_v24 = vld [vmem:[%s10628_s7 + $0x38] sm:$0xff] }
0x5851   :  { %v9018_v23 = vpop.eup %9017 }
0x5852   :  { %v10481_v36 = vmul.f32 %v9018_v23, %v9016_v14  ;;  %v8437_v23 = vpack.c.bf16 %v7009_v24, %v7008_v62 }
0x5854   :  { %v6741_v52 = vrot.slane %v10481_v36, 2 }
0x5856   :  { %6742 = vrot.lane.b32.xlu1 %v6741_v52, %s9161_s25 }
0x58c8   :  { %v6743_v4 = vpop.permute.xlu1 %6742 }
0x58c9   :  { %7427 = vmatmul.mubr.msk.f32.vlgmr.msra.gmra.mrb[70].mxu0 %vm275_vm3, %v6743_v4 }
0x58ca   :  { %8428 = vmatpush3.bf16.msra.mxu0 %v8425_v38 }
0x599c   :  { %v6812_v15 = vpop.f32.mrb[70].mxu0 }
0x599d   :  { %v6819_v56 = vrot.slane %v6812_v15, 4  ;;  %v6814_v53 = vpop.f32.mrb[71].mxu0 }
0x599e   :  { %v6820_v35 = vrot.slane %v6814_v53, 4 }
0x599f   :  { %v6823_v46 = vadd.f32 %v6819_v56, %v10385_v32 }
0x59a0   :  { %v6824_v5 = vadd.f32 %v6820_v35, %v10393_v13 }
0x59a1   :  { %v7428_v2 = vmul.f32 -1.442695, %v6823_v46 }
0x59a2   :  { %v7429_v33 = vmul.f32 -1.442695, %v6824_v5 }
0x59a3   :  { %9019 = vpow2.f32 %v7428_v2 }
0x59a4   :  { %9021 = vtanh.f32 %v6824_v5 }
0x59ad   :  { %v9020_v21 = vpop.eup %9019 }
0x59ae   :  { %v6828_v11 = vadd.f32 1.0, %v9020_v21  ;;  %v9022_v6 = vpop.eup %9021 }
0x59b0   :  { %9023 = vrcp.f32 %v6828_v11 }
0x59b1   :  { %9025 = vpow2.f32 %v7429_v33 }
0x59ba   :  { %v9024_v28 = vpop.eup %9023 }
0x59bb   :  { %v6842_v12 = vmul.f32 %v9024_v28, %v9022_v6  ;;  %v6841_v59 = vmul.f32 %v9024_v28, %v6839_v45  ;;  %v9026_v30 = vpop.eup %9025 }
0x59bc   :  { %v6835_v32 = vadd.f32 1.0, %v9026_v30 }
0x59bd   :  { %6844 = vrot.lane.b32.xlu0 %v6842_v12, %s9161_s25 }
0x59be   :  { %9027 = vrcp.f32 %v6835_v32 }
0x59c8   :  { %v9028_v13 = vpop.eup %9027 }
0x5a2f   :  { %v6845_v22 = vpop.permute.xlu0 %6844 }
0x5a30   :  { %v6847_v25 = vadd.f32 %v6845_v22, %v6841_v59 }
0x5a32   :  { %9029 = vtanh.f32 %v6847_v25  ;;  %v6954_v61 = vrot.slane %v6847_v25, 6 }
0x5a3c   :  { %v9030_v43 = vpop.eup %9029 }
0x5a3d   :  { %v6849_v37 = vmul.f32 %v9030_v43, %v9028_v13 }
0x5a3f   :  { %v6856_v47 = vrot.slane %v6849_v37, 4 }
0x5a41   :  { %6857 = vrot.lane.b32.xlu1 %v6856_v47, %s9161_s25 }
0x5a45   :  { %6271 = vrot.lane.b32.xlu1 %v10415_v18, %s9161_s25 }
0x5a49   :  { %6501 = vrot.lane.b32.xlu1 %v10449_v8, %s9161_s25 }
0x5a4d   :  { %6851 = vrot.lane.b32.xlu1 %v6849_v37, %s9161_s25 }
0x5ab3   :  { %v6858_v51 = vpop.permute.xlu1 %6857 }
0x5ab4   :  { %7430 = vmatmul.mubr.msk.f32.vlgmr.msra.gmra.mrb[70].mxu1 %vm275_vm3, %v6858_v51 }
0x5ab7   :  { %v6272_v20 = vpop.permute.xlu1 %6271 }
0x5ab8   :  { %6274 = vst.msk [vmem:[#allocation3] sm:$0xc] %vm506_vm4, %v6272_v20 }
0x5ab9   :  { %6275 = vst.msk [vmem:[#allocation3 + $0xa] sm:$0xc] %vm508_vm5, %v6272_v20 }
0x5abb   :  { %v6502_v7 = vpop.permute.xlu1 %6501 }
0x5abc   :  { %6504 = vst.msk [vmem:[#allocation3] sm:$0xc0] %vm740_vm6, %v6502_v7 }
0x5abd   :  { %6505 = vst.msk [vmem:[#allocation3 + $0x2] sm:$0xc0] %vm742_vm7, %v6502_v7 }
0x5abe   :  { %6621 = vst.msk [vmem:[#allocation3 + $0x8] sm:$0x3] %vm386_vm1, %v10466_v48  ;;  %vm7233_vm1 = vcmask 129030  }
0x5abf   :  { %6622 = vst.msk [vmem:[#allocation3 + $0x6] sm:$0x3] %vm388_vm2, %v10466_v48  ;;  %v6852_v18 = vpop.permute.xlu1 %6851  ;;  %vm7235_vm2 = vcmask 130055  }
0x5ac0   :  { %6854 = vst.msk [vmem:[#allocation3 + $0x8] sm:$0x30] %vm623_vm8, %v6852_v18 }
0x5ac1   :  { %6855 = vst.msk [vmem:[#allocation3 - $0x2] sm:$0x30] %vm625_vm9, %v6852_v18 }
0x5b87   :  { %v6927_v8 = vpop.f32.mrb[70].mxu1 }
0x5b88   :  { %v6934_v42 = vrot.slane %v6927_v8, 2  ;;  %v6929_v50 = vpop.f32.mrb[71].mxu1 }
0x5b89   :  { %v6935_v34 = vrot.slane %v6929_v50, 2 }
0x5b8a   :  { %v6938_v44 = vadd.f32 %v6934_v42, %v10379_v57 }
0x5b8b   :  { %v6939_v58 = vadd.f32 %v6935_v34, %v10387_v54 }
0x5b8c   :  { %v7431_v60 = vmul.f32 -1.442695, %v6938_v44  ;;  %v7100_v44 = vld [vmem:[%s10630_s9] sm:$0xff] }
0x5b8d   :  { %v7432_v57 = vmul.f32 -1.442695, %v6939_v58 }
0x5b8e   :  { %9031 = vpow2.f32 %v7431_v60  ;;  %v7101_v60 = vld [vmem:[%s10630_s9 + $0x8] sm:$0xff] }
0x5b8f   :  { %9033 = vtanh.f32 %v6939_v58  ;;  %v8441_v34 = vpack.c.bf16 %v7101_v60, %v7100_v44  ;;  %v7102_v58 = vld [vmem:[%s10630_s9 + $0x10] sm:$0xff] }
0x5b91   :  { %8442 = vmatprep.subr.bf16.mxu1 %v8441_v34 }
0x5b92   :  { %8444 = vmatpush3.bf16.msra.mxu1 %v8441_v34 }
0x5b98   :  { %v9032_v10 = vpop.eup %9031 }
0x5b99   :  { %v6943_v17 = vadd.f32 1.0, %v9032_v10  ;;  %v9034_v48 = vpop.eup %9033  ;;  %v7103_v10 = vld [vmem:[%s10630_s9 + $0x18] sm:$0xff] }
0x5b9b   :  { %9035 = vrcp.f32 %v6943_v17  ;;  %v8445_v17 = vpack.c.bf16 %v7103_v10, %v7102_v58 }
0x5b9c   :  { %9037 = vpow2.f32 %v7432_v57 }
0x5b9d   :  { %8446 = vmatprep.subr.bf16.mxu1 %v8445_v17 }
0x5b9e   :  { %8448 = vmatpush3.bf16.msra.mxu1 %v8445_v17 }
0x5ba5   :  { %v9036_v55 = vpop.eup %9035 }
0x5ba6   :  { %v6957_v49 = vmul.f32 %v9036_v55, %v9034_v48  ;;  %v6956_v26 = vmul.f32 %v9036_v55, %v6954_v61  ;;  %v9038_v54 = vpop.eup %9037  ;;  %v7104_v48 = vld [vmem:[%s10630_s9 + $0x20] sm:$0xff]  ;;  %v7105_v61 = vld [vmem:[%s10630_s9 + $0x28] sm:$0xff]  ;;  %v7106_v55 = vld [vmem:[%s10630_s9 + $0x30] sm:$0xff] }
0x5ba7   :  { %v6950_v9 = vadd.f32 1.0, %v9038_v54  ;;  %v7433_v54 = vld [vmem:[%s10629_s8] ss:$0 sm:$0xff]  ;;  %s9162_s8 = smov [#allocation10]  }
0x5ba8   :  { %6959 = vrot.lane.b32.xlu0 %v6957_v49, %s9161_s25  ;;  %v8449_v49 = vpack.c.bf16 %v7105_v61, %v7104_v48 }
0x5ba9   :  { %9039 = vrcp.f32 %v6950_v9 }
0x5baa   :  { %8450 = vmatprep.subr.bf16.mxu1 %v8449_v49 }
0x5bab   :  { %8452 = vmatpush3.bf16.msra.mxu1 %v8449_v49 }
0x5bac   :  { %6386 = vrot.lane.b32.xlu0 %v10432_v27, %s9161_s25  ;;  %v7004_v27 = vld [vmem:[%s10628_s7 + $0x10] sm:$0xff] }
0x5bad   :  { %v8429_v63 = vpack.c.bf16 %v7005_v39, %v7004_v27 }
0x5baf   :  { %8430 = vmatprep.subr.bf16.mxu0 %v8429_v63 }
0x5bb0   :  { %6736 = vrot.lane.b32.xlu0 %v10481_v36, %s9161_s25  ;;  %8432 = vmatpush3.bf16.msra.mxu0 %v8429_v63 }
0x5bb1   :  { %8434 = vmatprep.subr.bf16.mxu0 %v8433_v31 }
0x5bb3   :  { %v9040_v14 = vpop.eup %9039 }
0x5bb4   :  { %8436 = vmatpush3.bf16.msra.mxu0 %v8433_v31 }
0x5bb5   :  { %8438 = vmatprep.subr.bf16.mxu0 %v8437_v23 }
0x5bb8   :  { %8440 = vmatpush3.bf16.msra.mxu0 %v8437_v23 }
0x5c1a   :  { %v6960_v0 = vpop.permute.xlu0 %6959 }
0x5c1b   :  { %v6962_v3 = vadd.f32 %v6960_v0, %v6956_v26  ;;  %v7107_v26 = vld [vmem:[%s10630_s9 + $0x38] sm:$0xff] }
0x5c1c   :  { %v8453_v57 = vpack.c.bf16 %v7107_v26, %v7106_v55 }
0x5c1d   :  { %9041 = vtanh.f32 %v6962_v3 }
0x5c1e   :  { %v6387_v19 = vpop.permute.xlu0 %6386  ;;  %8454 = vmatprep.subr.bf16.mxu1 %v8453_v57 }
0x5c1f   :  { %6389 = vst.msk [vmem:[#allocation3] sm:$0x30] %vm623_vm8, %v6387_v19  ;;  %8456 = vmatpush3.bf16.msra.mxu1 %v8453_v57 }
0x5c20   :  { %6390 = vst.msk [vmem:[#allocation3 + $0x6] sm:$0x30] %vm625_vm9, %v6387_v19  ;;  %v7436_v19 = vld [vmem:[%s10631_s10] ss:$0 sm:$0xff]  ;;  %s7250_s10 = sshll.u32 %s9162_s8, 4  ;;  %s10586_s10 = int_to_ptr.vmem [resolvable:$true] %s7250_s10 }
0x5c21   :  { %s9127_s29 = scalar_lea.vmem %s10586_s10, 256  ;;  %p9132_p11 = scmp.lt.s32.totalorder %s10586_s10, %s10586_s10 }
0x5c22   :  { %v6737_v16 = vpop.permute.xlu0 %6736  ;;  %p9128_p10 = scmp.ne.s32.totalorder %s10586_s10, %s9127_s29  ;;  %p9133_p12 = scmp.lt.s32.totalorder %s9127_s29, %s9127_s29 }
0x5c23   :  { %6739 = vst.msk [vmem:[#allocation3 + $0x8] sm:$0xc] %vm506_vm4, %v6737_v16 }
0x5c24   :  { %6740 = vst.msk [vmem:[#allocation3 + $0x2] sm:$0xc] %vm508_vm5, %v6737_v16  ;;  %p9134_p13 = por %p9133_p12, %p9132_p11 }
0x5c26   :  { %p9135_p0 = pnand %p9134_p13, %p9128_p10 }
0x5c27   :  { %v9042_v36 = vpop.eup %9041 }
0x5c28   :  { %v6964_v52 = vmul.f32 %v9042_v36, %v9040_v14 }
0x5c2a   :  { %6966 = vrot.lane.b32.xlu0 %v6964_v52, %s9161_s25 }
0x5c9c   :  { %v6967_v4 = vpop.permute.xlu0 %6966 }
0x5c9d   :  { %6969 = vst.msk [vmem:[#allocation3 + $0x8] sm:$0xc0] %vm740_vm6, %v6967_v4 }
0x5c9e   :  { %6970 = vst.msk [vmem:[#allocation3 - $0x6] sm:$0xc0] %vm742_vm7, %v6967_v4 }
0x5ca4   :  { %v6972_v56 = vld [vmem:[#allocation3 + $0x8] sm:$0xff] }
0x5ca5   :  { %v6971_v15 = vld [vmem:[#allocation3] sm:$0xff]  ;;  %v6974_v46 = vsel %vm275_vm3, %v6972_v56, 0.0 }
0x5ca6   :  { %v6973_v53 = vsel %vm275_vm3, %v6971_v15, 0.0 }
0x5ca7   :  { %v6975_v2 = vadd.f32 %v6974_v46, %v6973_v53 }
0x5ca9   :  { %v6976_v35 = vrot.slane %v6975_v2, 4 }
0x5cab   :  { %v6977_v5 = vadd.f32 %v6976_v35, %v6975_v2 }
0x5cad   :  { %v6978_v21 = vrot.slane %v6977_v5, 2 }
0x5caf   :  { %v6979_v11 = vadd.f32 %v6978_v21, %v6977_v5 }
0x5cb1   :  { %v6980_v6 = vrot.slane %v6979_v11, 1 }
0x5cb3   :  { %v6981_v45 = vadd.f32 %v6980_v6, %v6979_v11 }
0x5cb5   :  { %v6983_v28 = vmul.f32 0.0625, %v6981_v45 }
0x5cb7   :  { %v6984_v12 = vsub.f32 %v6971_v15, %v6983_v28  ;;  %v6985_v59 = vsub.f32 %v6972_v56, %v6983_v28 }
0x5cb9   :  { %v6986_v33 = vmul.f32 %v6984_v12, %v6984_v12  ;;  %v6987_v30 = vmul.f32 %v6985_v59, %v6985_v59 }
0x5cbb   :  { %v6988_v32 = vsel %vm275_vm3, %v6986_v33, 0.0  ;;  %v6989_v22 = vsel %vm275_vm3, %v6987_v30, 0.0 }
0x5cbc   :  { %v6990_v25 = vadd.f32 %v6989_v22, %v6988_v32 }
0x5cbe   :  { %v6991_v13 = vrot.slane %v6990_v25, 4 }
0x5cc0   :  { %v6992_v43 = vadd.f32 %v6991_v13, %v6990_v25 }
0x5cc2   :  { %v6993_v37 = vrot.slane %v6992_v43, 2 }
0x5cc4   :  { %v6994_v47 = vadd.f32 %v6993_v37, %v6992_v43 }
0x5cc6   :  { %v6995_v51 = vrot.slane %v6994_v47, 1 }
0x5cc8   :  { %v6996_v20 = vadd.f32 %v6995_v51, %v6994_v47 }
0x5cca   :  { %v6997_v7 = vmul.f32 0.0625, %v6996_v20 }
0x5ccc   :  { %v6998_v18 = vadd.f32 1e-05, %v6997_v7 }
0x5cce   :  { %9043 = vrsqrt.f32 %v6998_v18 }
0x5cd8   :  { %v9044_v8 = vpop.eup %9043 }
0x5cd9   :  { %v7000_v42 = vmul.f32 %v9044_v8, %v6984_v12  ;;  %v7001_v50 = vmul.f32 %v9044_v8, %v6985_v59 }
0x5cdb   :  { %7475 = vmatprep.mubr.msk.f32.mxu0 %vm275_vm3, %v7000_v42 }
0x5cdc   :  { %7476 = vmatmul.mubr.msk.f32.vlgmr.msra.gmra.mrb[72].mxu0 %vm275_vm3, %v7001_v50 }
0x5daf   :  { %v7477_v9 = vpop.f32.mrb[72].mxu0 }
0x5db0   :  { %v7095_v0 = vadd.f32 %v7477_v9, %v7433_v54  ;;  %v7089_v3 = vpop.f32.mrb[73].mxu0 }
0x5db1   :  { %v7090_v1 = vadd.f32 %v7433_v54, %v7089_v3 }
0x5db3   :  { %9045 = vtanh.f32 %v7090_v1 }
0x5db4   :  { %9047 = vtanh.f32 %v7095_v0 }
0x5dbd   :  { %v9046_v29 = vpop.eup %9045 }
0x5dbe   :  { %v9048_v27 = vpop.eup %9047  ;;  %7494 = vmatprep.mubr.msk.f32.mxu1 %vm275_vm3, %v9046_v29 }
0x5dbf   :  { %7495 = vmatmul.mubr.msk.f32.vlgmr.msra.gmra.mrb[72].mxu1 %vm275_vm3, %v9048_v27 }
0x5e92   :  { %v7496_v38 = vpop.f32.mrb[72].mxu1 }
0x5e93   :  { %v7193_v39 = vadd.f32 %v7496_v38, %v7436_v19  ;;  %v7187_v63 = vpop.f32.mrb[73].mxu1 }
0x5e94   :  { %v7188_v41 = vadd.f32 %v7436_v19, %v7187_v63 }
0x5e95   :  { %9049 = vtanh.f32 %v7193_v39 }
0x5e96   :  { %9051 = vtanh.f32 %v7188_v41 }
0x5e9f   :  { %v9050_v40 = vpop.eup %9049 }
0x5ea0   :  { %v9052_v16 = vpop.eup %9051  ;;  %v7202_v31 = vsel %vm7198_vm10, %v9050_v40, -inf }
0x5ea1   :  { %7203 = vmax.xlane.f32.xlu0 %v7202_v31  ;;  %v7199_v62 = vsel %vm7198_vm10, %v9052_v16, -inf }
0x5ea2   :  { %7200 = vmax.xlane.f32.xlu1 %v7199_v62 }
0x5f2e   :  { %v7204_v24 = vpop.xlane.xlu0 %7203 }
0x5f2f   :  { %v7206_v14 = vsub.f32 %v9050_v40, %v7204_v24  ;;  %v7201_v23 = vpop.xlane.xlu1 %7200 }
0x5f30   :  { %v7205_v36 = vsub.f32 %v9052_v16, %v7201_v23 }
0x5f31   :  { %v7209_v52 = vmul.f32 1.442695, %v7206_v14 }
0x5f32   :  { %v7207_v4 = vmul.f32 1.442695, %v7205_v36 }
0x5f33   :  { %9053 = vpow2.f32 %v7209_v52 }
0x5f34   :  { %9055 = vpow2.f32 %v7207_v4 }
0x5f3d   :  { %v9054_v15 = vpop.eup %9053 }
0x5f3e   :  { %v9056_v56 = vpop.eup %9055  ;;  %v7214_v53 = vsel %vm7198_vm10, %v9054_v15, 0.0 }
0x5f3f   :  { %7215 = vadd.xlane.f32.xlu1 %v7214_v53  ;;  %v7211_v46 = vsel %vm7198_vm10, %v9056_v56, 0.0 }
0x5f40   :  { %7212 = vadd.xlane.f32.xlu0 %v7211_v46 }
0x5fcc   :  { %v7216_v2 = vpop.xlane.xlu1 %7215 }
0x5fcd   :  { %9057 = vrcp.f32 %v7216_v2  ;;  %v7213_v35 = vpop.xlane.xlu0 %7212 }
0x5fce   :  { %9059 = vrcp.f32 %v7213_v35 }
0x5fd7   :  { %v9058_v5 = vpop.eup %9057 }
0x5fd8   :  { %v9060_v21 = vpop.eup %9059  ;;  %v7220_v11 = vmul.f32 %v9058_v5, %v9054_v15 }
0x5fd9   :  { %v7218_v6 = vmul.f32 %v9060_v21, %v9056_v56 }
0x5fda   :  { %7237 = vst.msk [vmem:[#allocation10 + $0x4] sm:$0x1] %vm7221_vm11, %v7220_v11 }
0x5fdb   :  { %7238 = vst.msk [vmem:[#allocation10 + $0xb] sm:$0x2] %vm7223_vm12, %v7220_v11  ;;  %7224 = vst.msk [vmem:[#allocation10 + $0x7] sm:$0x2] %vm7223_vm12, %v7218_v6 }
0x5fdc   :  { %7239 = vst.msk [vmem:[#allocation10 + $0x3] sm:$0x4] %vm7225_vm13, %v7220_v11  ;;  %7226 = vst.msk [vmem:[#allocation10 - $0x1] sm:$0x4] %vm7225_vm13, %v7218_v6 }
0x5fdd   :  { %7240 = vst.msk [vmem:[#allocation10 + $0xa] sm:$0x8] %vm7227_vm14, %v7220_v11  ;;  %7228 = vst.msk [vmem:[#allocation10 + $0x6] sm:$0x8] %vm7227_vm14, %v7218_v6 }
0x5fde   :  { %7241 = vst.msk [vmem:[#allocation10 + $0x2] sm:$0x10] %vm7229_vm15, %v7220_v11  ;;  %7230 = vst.msk [vmem:[#allocation10 - $0x2] sm:$0x10] %vm7229_vm15, %v7218_v6 }
0x5fdf   :  { %7242 = vst.msk [vmem:[#allocation10 + $0x9] sm:$0x20] %vm7231_vm0, %v7220_v11  ;;  %7232 = vst.msk [vmem:[#allocation10 + $0x5] sm:$0x20] %vm7231_vm0, %v7218_v6 }
0x5fe0   :  { %7243 = vst.msk [vmem:[#allocation10 + $0x1] sm:$0x40] %vm7233_vm1, %v7220_v11  ;;  %7234 = vst.msk [vmem:[#allocation10 - $0x3] sm:$0x40] %vm7233_vm1, %v7218_v6 }
0x5fe1   :  { %7244 = vst.msk [vmem:[#allocation10 + $0x8] sm:$0x80] %vm7235_vm2, %v7220_v11  ;;  %7236 = vst.msk [vmem:[#allocation10 + $0x4] sm:$0x80] %vm7235_vm2, %v7218_v6 }
0x5fe2   :  { %7222 = vst.msk [vmem:[#allocation10] sm:$0x1] %vm7221_vm11, %v7218_v6 }
0x5fe3   :  { %9138 = shalt.err (!%p9135_p0)
}
0x5fe4   :  { %s9139_s1 = scalar_lea.hbm %s10632_s11, 256 }
0x5fe5   :  { %p9140_p1 = scmp.ne.s32.totalorder %s10632_s11, %s9139_s1  ;;  %p9143_p2 = scmp.lt.u32.totalorder %s9139_s1, %s10632_s11 }
0x5fe7   :  { %p9145_p3 = pnand %p9143_p2, %p9140_p1 }
0x5fe9   :  { %9148 = shalt.err (!%p9145_p3)
}
0x5fea   :  { %s9163_s7 = smov 128   ;;  %s9164_s25 = smov 8  }
0x5feb   :  { %7256 = dma.vmem_to_hbm [thread:$0]  %s10586_s10, 256, %s10632_s11, [#allocation6], %s9163_s7, %s9163_s7, %s9164_s25  }
0x5fec   :  { %9153 = dma.done.wait [#allocation6], 256  }
0x5fed   :  { %9154 = vsyncadd [#allocation6], 4294967040 }
0x5fee   :  { %7260 = vsyncpa [#allocation5], 1 }
0x5fef   :  { %7261 = vsyncpa [#allocation8], 1 }
0x5ff0   :  { %7262 = vsyncpa [#allocation6], 1 }

</bundles_post_ra>
